<compile_context>
chip_gen: v7x
topology: tpu7x:2x2x1
jax: 0.10.0
libtpu: 0.0.40
codegen_flags: <defaults>
</compile_context>

<pallas_src>
import jax
import jax.numpy as jnp
import numpy as np
from jax.experimental import pallas as pl
from jax.experimental.pallas import tpu as pltpu

EPS = 1e-5
INV_SQRT2 = 0.7071067811865475


def _fused_kernel(x1_ref, x2_ref, gamma_ref, beta_ref,
                  w1_ref, b1_ref, w2_ref, b2_ref,
                  out_ref, xn_ref):
    k = pl.program_id(1)  # hidden-dim (reduction) axis, innermost

    # First hidden block for this token block: compute LayerNorm(x1+x2) once into a
    # bf16 scratch (reused across all k) and seed the resident f32 output accumulator
    # with b2 (folds the second bias into the init -> no full-width add at the end).
    @pl.when(k == 0)
    def _init():
        x = x1_ref[...] + x2_ref[...]                          # (TB, C) f32
        mean = jnp.mean(x, axis=-1, keepdims=True)
        xc = x - mean
        var = jnp.mean(xc * xc, axis=-1, keepdims=True)        # biased var (torch)
        xn = xc * jax.lax.rsqrt(var + EPS)
        xn = xn * gamma_ref[...] + beta_ref[...]               # affine, computed once
        xn_ref[...] = xn.astype(xn_ref.dtype)                  # bf16 for the MXU
        out_ref[...] = jnp.broadcast_to(b2_ref[...], out_ref.shape).astype(out_ref.dtype)

    # Partial first matmul over this block_dh-wide hidden slice (bf16 operands, f32 acc).
    h = jnp.dot(xn_ref[...], w1_ref[...],
                preferred_element_type=jnp.float32) + b1_ref[...]

    # Exact GELU (approximate='none'), f32 on the VPU.
    h = 0.5 * h * (1.0 + jax.lax.erf(h * jnp.float32(INV_SQRT2)))

    # Dropout(p=0.0) -> identity.

    # Partial second matmul, accumulated into the resident f32 output block.
    out_ref[...] += jnp.dot(h.astype(jnp.bfloat16), w2_ref[...],
                            preferred_element_type=jnp.float32)


def fused_forward(x134, x148, gamma, beta, w1, b1, w2, b2,
                  *, block_dh=768, num_token_blocks=1):
    """x134, x148: (B, H, W, C) float32.  Returns (B, H, W, C) float32.

    num_token_blocks=1 (default): no token padding, single 196-row block per k step
    (best for 1-TC v5e/v6e).  num_token_blocks=2: tokens padded to a multiple of 16 and
    split across the 'parallel' grid axis (worth benchmarking on v7x's 2 TensorCores).
    block_dh in {384, 768, 1536}: hidden-dim tile; 768 keeps weight-DMA double-buffered
    while minimizing per-grid-step overhead.
    """
    B, H, W, C = x134.shape
    T = B * H * W
    Dh = w1.shape[1]
    assert Dh % block_dh == 0
    K = Dh // block_dh

    x1 = x134.reshape(T, C).astype(jnp.float32)
    x2 = x148.reshape(T, C).astype(jnp.float32)

    if num_token_blocks == 1:
        Tp = T                              # full-extent token block: no pad needed
    else:
        align = 8 * num_token_blocks        # each token block must be sublane-aligned
        Tp = ((T + align - 1) // align) * align
        x1 = jnp.pad(x1, ((0, Tp - T), (0, 0)))
        x2 = jnp.pad(x2, ((0, Tp - T), (0, 0)))
    TB = Tp // num_token_blocks

    gamma2 = gamma.reshape(1, C).astype(jnp.float32)
    beta2 = beta.reshape(1, C).astype(jnp.float32)
    b1_2 = b1.reshape(1, Dh).astype(jnp.float32)
    b2_2 = b2.reshape(1, C).astype(jnp.float32)

    # Stream weights as bf16 (halves dominant weight DMA; MXU-native, f32 accumulation).
    # w1 re-laid-out to (K, C, block_dh) so each k-tile is a contiguous HBM slab.
    # In a real model the weights would be stored in this layout/dtype already.
    w1_bf = w1.astype(jnp.bfloat16).reshape(C, K, block_dh).transpose(1, 0, 2)
    w2_bf = w2.astype(jnp.bfloat16)         # (Dh, C): per-k row slabs are contiguous

    grid = (num_token_blocks, K)            # reduction axis last

    out = pl.pallas_call(
        _fused_kernel,
        out_shape=jax.ShapeDtypeStruct((Tp, C), jnp.float32),
        grid=grid,
        in_specs=[
            pl.BlockSpec((TB, C), lambda i, k: (i, 0)),              # x1 (resident per i)
            pl.BlockSpec((TB, C), lambda i, k: (i, 0)),              # x2
            pl.BlockSpec((1, C), lambda i, k: (0, 0)),               # gamma
            pl.BlockSpec((1, C), lambda i, k: (0, 0)),               # beta
            pl.BlockSpec((None, C, block_dh), lambda i, k: (k, 0, 0)),  # w1 tile (contig)
            pl.BlockSpec((1, block_dh), lambda i, k: (0, k)),        # b1 tile
            pl.BlockSpec((block_dh, C), lambda i, k: (k, 0)),        # w2 tile (contig)
            pl.BlockSpec((1, C), lambda i, k: (0, 0)),               # b2
        ],
        out_specs=pl.BlockSpec((TB, C), lambda i, k: (i, 0)),        # resident accumulator
        scratch_shapes=[pltpu.VMEM((TB, C), jnp.bfloat16)],          # LayerNorm'd acts
        compiler_params=pltpu.CompilerParams(
            dimension_semantics=("parallel", "arbitrary")),
    )(x1, x2, gamma2, beta2, w1_bf, b1_2, w2_bf, b2_2)

    if Tp != T:
        out = out[:T]
    return out.reshape(B, H, W, C)


# ---------------- references for the self-test ----------------

def _reference_exact(x134, x148, gamma, beta, w1, b1, w2, b2):
    """Pure-f32 reference matching the PyTorch module."""
    x = x134 + x148
    mean = jnp.mean(x, axis=-1, keepdims=True)
    var = jnp.mean((x - mean) ** 2, axis=-1, keepdims=True)
    xn = (x - mean) * jax.lax.rsqrt(var + EPS) * gamma + beta
    h = xn @ w1 + b1
    h = 0.5 * h * (1.0 + jax.lax.erf(h * INV_SQRT2))
    return h @ w2 + b2


def _reference_matched(x1, x2, gamma2, beta2, w1, b1_2, w2, b2_2):
    """Same mixed precision as the kernel (bf16 matmul operands, f32 accum)."""
    x = x1 + x2
    mean = jnp.mean(x, axis=-1, keepdims=True)
    xc = x - mean
    var = jnp.mean(xc * xc, axis=-1, keepdims=True)
    xn = xc * jax.lax.rsqrt(var + EPS) * gamma2 + beta2
    h = jnp.dot(xn.astype(jnp.bfloat16), w1.astype(jnp.bfloat16),
                preferred_element_type=jnp.float32) + b1_2
    h = 0.5 * h * (1.0 + jax.lax.erf(h * jnp.float32(INV_SQRT2)))
    return jnp.dot(h.astype(jnp.bfloat16), w2.astype(jnp.bfloat16),
                   preferred_element_type=jnp.float32) + b2_2


if __name__ == "__main__":
    key = jax.random.PRNGKey(0)
    ks = jax.random.split(key, 8)

    B, H, W, C, Dh = 1, 14, 14, 384, 1536

    x134 = jax.random.normal(ks[0], (B, H, W, C), dtype=jnp.float32)
    x148 = jax.random.normal(ks[1], (B, H, W, C), dtype=jnp.float32)

    gamma = 1.0 + 0.1 * jax.random.normal(ks[6], (C,), dtype=jnp.float32)
    beta = 0.05 * jax.random.normal(ks[7], (C,), dtype=jnp.float32)
    w1 = jax.random.normal(ks[2], (C, Dh), dtype=jnp.float32) * (1.0 / np.sqrt(C))
    b1 = jax.random.normal(ks[3], (Dh,), dtype=jnp.float32) * 0.01
    w2 = jax.random.normal(ks[4], (Dh, C), dtype=jnp.float32) * (1.0 / np.sqrt(Dh))
    b2 = jax.random.normal(ks[5], (C,), dtype=jnp.float32) * 0.01

    y = fused_forward(x134, x148, gamma, beta, w1, b1, w2, b2)
    jax.block_until_ready(y)

    # Tight check against a reference using the same mixed precision as the kernel.
    T = B * H * W
    y_matched = _reference_matched(
        x134.reshape(T, C), x148.reshape(T, C),
        gamma.reshape(1, C), beta.reshape(1, C),
        w1, b1.reshape(1, Dh), w2, b2.reshape(1, C)).reshape(B, H, W, C)
    np.testing.assert_allclose(np.asarray(y), np.asarray(y_matched),
                               rtol=5e-3, atol=5e-3)

    # Loose check against the exact f32 module semantics (bf16 matmul operands
    # introduce ~1e-3-level error, anticipated and accepted in the perf review).
    y_exact = _reference_exact(x134, x148, gamma, beta, w1, b1, w2, b2)
    np.testing.assert_allclose(np.asarray(y), np.asarray(y_exact),
                               rtol=5e-2, atol=5e-2)

    print("KERNEL_OK")
</pallas_src>

<mosaic_0001>
module attributes {stable_mosaic.version = 11 : i64} {
  func.func @_fused_kernel(%arg0: i32, %arg1: i32, %arg2: memref<196x384xf32, #tpu.memory_space<vmem>>, %arg3: memref<196x384xf32, #tpu.memory_space<vmem>>, %arg4: memref<1x384xf32, #tpu.memory_space<vmem>>, %arg5: memref<1x384xf32, #tpu.memory_space<vmem>>, %arg6: memref<1x384x768xbf16, #tpu.memory_space<vmem>>, %arg7: memref<1x768xf32, #tpu.memory_space<vmem>>, %arg8: memref<768x384xbf16, #tpu.memory_space<vmem>>, %arg9: memref<1x384xf32, #tpu.memory_space<vmem>>, %arg10: memref<196x384xf32, #tpu.memory_space<vmem>>, %arg11: memref<196x384xbf16, #tpu.memory_space<vmem>>) attributes {dimension_semantics = [#tpu.dimension_semantics<parallel>, #tpu.dimension_semantics<arbitrary>], iteration_bounds = array<i64: 1, 2>, scalar_prefetch = 0 : i64, scratch_operands = 1 : i64, tpu.core_type = #tpu.core_type<tc>, window_params = [{transform_indices = @transform_0, window_bounds = array<i64: 196, 384>}, {transform_indices = @transform_1, window_bounds = array<i64: 196, 384>}, {pipeline_mode = #tpu.pipeline_mode<synchronous>, transform_indices = @transform_2, window_bounds = array<i64: 1, 384>}, {pipeline_mode = #tpu.pipeline_mode<synchronous>, transform_indices = @transform_3, window_bounds = array<i64: 1, 384>}, {transform_indices = @transform_4, window_bounds = array<i64: 1, 384, 768>}, {transform_indices = @transform_5, window_bounds = array<i64: 1, 768>}, {transform_indices = @transform_6, window_bounds = array<i64: 768, 384>}, {pipeline_mode = #tpu.pipeline_mode<synchronous>, transform_indices = @transform_7, window_bounds = array<i64: 1, 384>}, {transform_indices = @transform_8, window_bounds = array<i64: 196, 384>}]} {
    %c0_i32 = arith.constant 0 : i32
    %0 = arith.cmpi eq, %arg1, %c0_i32 : i32
    %1 = arith.extui %0 : i1 to i32
    %c0_i32_0 = arith.constant 0 : i32
    %2 = arith.cmpi ne, %1, %c0_i32_0 : i32
    scf.if %2 {
      %c0_17 = arith.constant 0 : index
      %c0_18 = arith.constant 0 : index
      %24 = vector.load %arg2[%c0_17, %c0_18] : memref<196x384xf32, #tpu.memory_space<vmem>>, vector<196x384xf32>
      %c0_19 = arith.constant 0 : index
      %c0_20 = arith.constant 0 : index
      %25 = vector.load %arg3[%c0_19, %c0_20] : memref<196x384xf32, #tpu.memory_space<vmem>>, vector<196x384xf32>
      %26 = arith.addf %24, %25 : vector<196x384xf32>
      %cst_21 = arith.constant dense<0.000000e+00> : vector<196xf32>
      %27 = vector.multi_reduction <add>, %26, %cst_21 [1] : vector<196x384xf32> to vector<196xf32>
      %28 = vector.shape_cast %27 : vector<196xf32> to vector<196x1xf32>
      %cst_22 = arith.constant 3.840000e+02 : f32
      %29 = vector.broadcast %cst_22 : f32 to vector<196x1xf32>
      %30 = arith.divf %28, %29 : vector<196x1xf32>
      %31 = vector.broadcast %30 : vector<196x1xf32> to vector<196x384xf32>
      %32 = arith.subf %26, %31 : vector<196x384xf32>
      %33 = arith.mulf %32, %32 : vector<196x384xf32>
      %cst_23 = arith.constant dense<0.000000e+00> : vector<196xf32>
      %34 = vector.multi_reduction <add>, %33, %cst_23 [1] : vector<196x384xf32> to vector<196xf32>
      %35 = vector.shape_cast %34 : vector<196xf32> to vector<196x1xf32>
      %cst_24 = arith.constant 3.840000e+02 : f32
      %36 = vector.broadcast %cst_24 : f32 to vector<196x1xf32>
      %37 = arith.divf %35, %36 : vector<196x1xf32>
      %cst_25 = arith.constant 9.99999974E-6 : f32
      %38 = vector.broadcast %cst_25 : f32 to vector<196x1xf32>
      %39 = arith.addf %37, %38 : vector<196x1xf32>
      %40 = math.rsqrt %39 : vector<196x1xf32>
      %41 = vector.broadcast %40 : vector<196x1xf32> to vector<196x384xf32>
      %42 = arith.mulf %32, %41 : vector<196x384xf32>
      %c0_26 = arith.constant 0 : index
      %c0_27 = arith.constant 0 : index
      %43 = vector.load %arg4[%c0_26, %c0_27] : memref<1x384xf32, #tpu.memory_space<vmem>>, vector<1x384xf32>
      %44 = vector.broadcast %43 : vector<1x384xf32> to vector<196x384xf32>
      %45 = arith.mulf %42, %44 : vector<196x384xf32>
      %c0_28 = arith.constant 0 : index
      %c0_29 = arith.constant 0 : index
      %46 = vector.load %arg5[%c0_28, %c0_29] : memref<1x384xf32, #tpu.memory_space<vmem>>, vector<1x384xf32>
      %47 = vector.broadcast %46 : vector<1x384xf32> to vector<196x384xf32>
      %48 = arith.addf %45, %47 : vector<196x384xf32>
      %49 = arith.truncf %48 : vector<196x384xf32> to vector<196x384xbf16>
      %c0_30 = arith.constant 0 : index
      %c0_31 = arith.constant 0 : index
      %50 = vector.load %arg11[%c0_30, %c0_31] : memref<196x384xbf16, #tpu.memory_space<vmem>>, vector<196x384xbf16>
      tpu.vector_store %arg11[%c0_30, %c0_31], %49 {strides = array<i32>} : memref<196x384xbf16, #tpu.memory_space<vmem>>, vector<196x384xbf16>,
      %c0_32 = arith.constant 0 : index
      %c0_33 = arith.constant 0 : index
      %51 = vector.load %arg9[%c0_32, %c0_33] : memref<1x384xf32, #tpu.memory_space<vmem>>, vector<1x384xf32>
      %52 = vector.shape_cast %51 : vector<1x384xf32> to vector<1x384xf32>
      %53 = vector.broadcast %52 : vector<1x384xf32> to vector<196x384xf32>
      %c0_34 = arith.constant 0 : index
      %c0_35 = arith.constant 0 : index
      %54 = vector.load %arg10[%c0_34, %c0_35] : memref<196x384xf32, #tpu.memory_space<vmem>>, vector<196x384xf32>
      tpu.vector_store %arg10[%c0_34, %c0_35], %53 {strides = array<i32>} : memref<196x384xf32, #tpu.memory_space<vmem>>, vector<196x384xf32>,
    } else {
    }
    %c0 = arith.constant 0 : index
    %c0_1 = arith.constant 0 : index
    %3 = vector.load %arg11[%c0, %c0_1] : memref<196x384xbf16, #tpu.memory_space<vmem>>, vector<196x384xbf16>
    %c0_2 = arith.constant 0 : index
    %c0_3 = arith.constant 0 : index
    %c0_4 = arith.constant 0 : index
    %4 = vector.load %arg6[%c0_2, %c0_3, %c0_4] : memref<1x384x768xbf16, #tpu.memory_space<vmem>>, vector<1x384x768xbf16>
    %5 = vector.shape_cast %4 : vector<1x384x768xbf16> to vector<384x768xbf16>
    %cst = arith.constant dense<0.000000e+00> : vector<196x768xf32>
    %6 = tpu.matmul %3, %5, %cst {dimension_numbers = #tpu.dot_dimension_numbers<[1], [0], [0], [1], [0, 0, 1, 1], [], []>} : vector<196x384xbf16>, vector<384x768xbf16>, vector<196x768xf32> -> vector<196x768xf32>
    %c0_5 = arith.constant 0 : index
    %c0_6 = arith.constant 0 : index
    %7 = vector.load %arg7[%c0_5, %c0_6] : memref<1x768xf32, #tpu.memory_space<vmem>>, vector<1x768xf32>
    %8 = vector.broadcast %7 : vector<1x768xf32> to vector<196x768xf32>
    %9 = arith.addf %6, %8 : vector<196x768xf32>
    %cst_7 = arith.constant 5.000000e-01 : f32
    %10 = vector.broadcast %cst_7 : f32 to vector<196x768xf32>
    %11 = arith.mulf %10, %9 : vector<196x768xf32>
    %cst_8 = arith.constant 0.707106769 : f32
    %12 = vector.broadcast %cst_8 : f32 to vector<196x768xf32>
    %13 = arith.mulf %9, %12 : vector<196x768xf32>
    %14 = math.erf %13 : vector<196x768xf32>
    %cst_9 = arith.constant 1.000000e+00 : f32
    %15 = vector.broadcast %cst_9 : f32 to vector<196x768xf32>
    %16 = arith.addf %15, %14 : vector<196x768xf32>
    %17 = arith.mulf %11, %16 : vector<196x768xf32>
    %c0_10 = arith.constant 0 : index
    %c0_11 = arith.constant 0 : index
    %18 = vector.load %arg10[%c0_10, %c0_11] : memref<196x384xf32, #tpu.memory_space<vmem>>, vector<196x384xf32>
    %19 = arith.truncf %17 : vector<196x768xf32> to vector<196x768xbf16>
    %c0_12 = arith.constant 0 : index
    %c0_13 = arith.constant 0 : index
    %20 = vector.load %arg8[%c0_12, %c0_13] : memref<768x384xbf16, #tpu.memory_space<vmem>>, vector<768x384xbf16>
    %cst_14 = arith.constant dense<0.000000e+00> : vector<196x384xf32>
    %21 = tpu.matmul %19, %20, %cst_14 {dimension_numbers = #tpu.dot_dimension_numbers<[1], [0], [0], [1], [0, 0, 1, 1], [], []>} : vector<196x768xbf16>, vector<768x384xbf16>, vector<196x384xf32> -> vector<196x384xf32>
    %22 = arith.addf %18, %21 : vector<196x384xf32>
    %c0_15 = arith.constant 0 : index
    %c0_16 = arith.constant 0 : index
    %23 = vector.load %arg10[%c0_15, %c0_16] : memref<196x384xf32, #tpu.memory_space<vmem>>, vector<196x384xf32>
    tpu.vector_store %arg10[%c0_15, %c0_16], %22 {strides = array<i32>} : memref<196x384xf32, #tpu.memory_space<vmem>>, vector<196x384xf32>,
    return
  }
  func.func @transform_0(%arg0: i32, %arg1: i32) -> (i32, i32) {
    %c0_i32 = arith.constant 0 : i32
    %c0_i32_0 = arith.constant 0 : i32
    return %arg0, %c0_i32 : i32, i32
  }
  func.func @transform_1(%arg0: i32, %arg1: i32) -> (i32, i32) {
    %c0_i32 = arith.constant 0 : i32
    %c0_i32_0 = arith.constant 0 : i32
    return %arg0, %c0_i32 : i32, i32
  }
  func.func @transform_2(%arg0: i32, %arg1: i32) -> (i32, i32) {
    %c0_i32 = arith.constant 0 : i32
    %c0_i32_0 = arith.constant 0 : i32
    %c0_i32_1 = arith.constant 0 : i32
    return %c0_i32, %c0_i32_0 : i32, i32
  }
  func.func @transform_3(%arg0: i32, %arg1: i32) -> (i32, i32) {
    %c0_i32 = arith.constant 0 : i32
    %c0_i32_0 = arith.constant 0 : i32
    %c0_i32_1 = arith.constant 0 : i32
    return %c0_i32, %c0_i32_0 : i32, i32
  }
  func.func @transform_4(%arg0: i32, %arg1: i32) -> (i32, i32, i32) {
    %c0_i32 = arith.constant 0 : i32
    %c0_i32_0 = arith.constant 0 : i32
    %c0_i32_1 = arith.constant 0 : i32
    return %arg1, %c0_i32, %c0_i32_0 : i32, i32, i32
  }
  func.func @transform_5(%arg0: i32, %arg1: i32) -> (i32, i32) {
    %c0_i32 = arith.constant 0 : i32
    %c0_i32_0 = arith.constant 0 : i32
    return %c0_i32, %arg1 : i32, i32
  }
  func.func @transform_6(%arg0: i32, %arg1: i32) -> (i32, i32) {
    %c0_i32 = arith.constant 0 : i32
    %c0_i32_0 = arith.constant 0 : i32
    return %arg1, %c0_i32 : i32, i32
  }
  func.func @transform_7(%arg0: i32, %arg1: i32) -> (i32, i32) {
    %c0_i32 = arith.constant 0 : i32
    %c0_i32_0 = arith.constant 0 : i32
    %c0_i32_1 = arith.constant 0 : i32
    return %c0_i32, %c0_i32_0 : i32, i32
  }
  func.func @transform_8(%arg0: i32, %arg1: i32) -> (i32, i32) {
    %c0_i32 = arith.constant 0 : i32
    %c0_i32_0 = arith.constant 0 : i32
    return %arg0, %c0_i32 : i32, i32
  }
}

</mosaic_0001>

<bundles_post_ra>
// kernel: tpu_custom_call.1
= control target key start
LH: loop header
LB: loop body
LE: loop exit
PB: predicated region body
PF: predicated region fallthrough
CT: control target
= control target key end

     0   :  { %s12879_s0 = inlined_call_operand.hbm [shape: f32[196,384], index: 0, kind: input, shape index: {}]   ;;  %s12880_s1 = inlined_call_operand.hbm [shape: f32[196,384], index: 1, kind: input, shape index: {}]   ;;  %s12881_s2 = inlined_call_operand.hbm [shape: f32[1,384], index: 2, kind: input, shape index: {}]   ;;  %s12882_s3 = inlined_call_operand.hbm [shape: f32[1,384], index: 3, kind: input, shape index: {}]   ;;  %s12883_s4 = inlined_call_operand.hbm [shape: bf16[2,384,768], index: 4, kind: input, shape index: {}]   ;;  %s12884_s5 = inlined_call_operand.hbm [shape: f32[1,1536], index: 5, kind: input, shape index: {}]   ;;  %s12885_s6 = inlined_call_operand.hbm [shape: bf16[1536,384], index: 6, kind: input, shape index: {}]   ;;  %s12886_s7 = inlined_call_operand.hbm [shape: f32[1,384], index: 7, kind: input, shape index: {}]   ;;  %s12887_s8 = inlined_call_operand.hbm [shape: f32[196,384], index: 8, kind: output, shape index: {}]  }
   0x1   :  { %12987 = sst [smem:[#allocation127_spill]] %s12879_s0 }
   0x2   :  { %12988 = sst [smem:[#allocation128_spill]] %s12880_s1 }
   0x3   :  { %12989 = sst [smem:[#allocation129_spill]] %s12883_s4 }
   0x4   :  { %12990 = sst [smem:[#allocation130_spill]] %s12887_s8 }
   0x5   :  { %13 = vsyncpa [#allocation4], 0 }
   0x6   :  { %14 = vsyncpa [#allocation7], 0 }
   0x7   :  { %15 = vsyncpa [#allocation10], 0 }
   0x8   :  { %16 = vsyncpa [#allocation5], 0  ;;  %s9503_s27 = smov 0   ;;  %s9505_s28 = smov 0  }
   0x9   :  { %s9507_s29 = smov 0   ;;  %s9509_s30 = smov 0  }
   0xa   :  { %s9511_s9 = smov 0   ;;  %s9513_s10 = smov 0  }
   0xb LB: > { %12991 = sst [smem:[#allocation22_spill]] %s9424_s28  ;;  %s9532_s11 = sadd.s32 4294967295, %s9440_s10   ;;  %s9440_s10 = sphi %s9513_s10, %s22_s10   ;;  %s9436_s9 = sphi %s9511_s9, %s13283_s9   ;;  %s9432_s30 = sphi %s9509_s30, %s13282_s30   ;;  %s9428_s29 = sphi %s9507_s29, %s13281_s29   ;;  %s9424_s28 = sphi %s9505_s28, %s13280_s28   ;;  %s9420_s27 = sphi %s9503_s27, %s13277_s27  }
   0xc   : > { %12992 = sst [smem:[#allocation23_spill]] %s9432_s30  ;;  %p148_p0 = scmp.ne.s32.totalorder %s9424_s28, %s9420_s27 }
   0xd   : > { %12993 = sst [smem:[#allocation24_spill]] %s9440_s10  ;;  %p12888_p1 = scmp.eq.s32.totalorder %s9532_s11, 0 }
   0xe   : > { %p7016_p2 = scmp.ge.s32.totalorder %s9440_s10, 1  ;;  %p258_p3 = scmp.lt.s32.totalorder %s9440_s10, 3 }
   0xf   : > { %p9540_p4 = por %p12888_p1, %p148_p0  ;;  %s9442_s14 = smov [#allocation3]  }
  0x10   : > { %p9544_p5 = pnand %p7016_p2, %p258_p3  ;;  %s274_s15 = sshll.u32 %s9442_s14, 4  ;;  %s275_s15 = int_to_ptr.vmem [resolvable:$true] %s274_s15 }
  0x11   : > { %s12994_s12 = scalar_select %p9540_p4, 1, 0 }
  0x12   : > { %s12996_s13 = scalar_select %p9544_p5, 1, 0 }
  0x13   : > { %12995 = sst [smem:[#allocation25_spill]] %s12994_s12  ;;  %p8186_p6 = pneg %p9544_p5 }
  0x14   : > { %s9443_s17 = smov [#allocation6]   ;;  %s12998_s0 = sld [smem:[#allocation127_spill]] }
  0x15   : > { %p9552_p7 = pnand %p8186_p6, %p12888_p1  ;;  %s291_s18 = sshll.u32 %s9443_s17, 4  ;;  %s9556_s18 = int_to_ptr.vmem [resolvable:$true] %s291_s18 }
  0x17   : > { %s12997_s16 = scalar_select %p9552_p7, 1, 0 }
  0x18   : > { %p9566_p9 = pneg %p9552_p7 }
  0x1a   : > { %s9114_s21 = scalar_lea.hbm %s12998_s0, 9600 }
  0x1b   : > { %p9115_p8 = scmp.ne.s32.totalorder %s12998_s0, %s9114_s21  ;;  %p9121_p12 = scmp.lt.u32.totalorder %s9114_s21, %s12998_s0 }
  0x1c   : > { %s12999_s24 = scalar_select %p9566_p9, 1, 0 }
  0x1d   : > { %p9117_p10 = pnand %p9566_p9, %p9115_p8 }
  0x1f   : > { %p9118_p11 = pneg %p9117_p10 }
  0x21   : > { %p9123_p13 = pnand %p9121_p12, %p9118_p11 }
  0x23   : > { %9126 = shalt.err (!%p9123_p13)
}
  0x24   : > { %s9127_s27 = scalar_lea.vmem %s275_s15, 9600  ;;  %p9135_p6 = scmp.lt.s32.totalorder %s275_s15, %s275_s15 }
  0x25   : > { %p9128_p0 = scmp.ne.s32.totalorder %s275_s15, %s9127_s27  ;;  %p9136_p1 = scmp.lt.s32.totalorder %s9127_s27, %s9127_s27 }
  0x27   : > { %p9130_p2 = pnand %p9128_p0, %p9566_p9  ;;  %p9137_p4 = por %p9136_p1, %p9135_p6 }
  0x29   : > { %p9131_p3 = pneg %p9130_p2 }
  0x2b   : > { %p9138_p5 = pnand %p9137_p4, %p9131_p3 }
  0x2d   : > { %9141 = shalt.err (!%p9138_p5)
}
  0x2e   : > { %s12892_s14 = smov 384   ;;  %s12893_s17 = smov 24  }
  0x2f   : > { %8189 = dma.hbm_to_vmem [thread:$0]  (!%p9552_p7), %s12998_s0, 9600, %s275_s15, [#allocation4], %s12892_s14, %s12892_s14, %s12893_s17  }
  0x30   : > { %s13000_s1 = sld [smem:[#allocation128_spill]] }
  0x36   : > { %s9142_s23 = scalar_lea.hbm %s13000_s1, 9600 }
  0x37   : > { %p9143_p1 = scmp.ne.s32.totalorder %s13000_s1, %s9142_s23  ;;  %p9149_p8 = scmp.lt.u32.totalorder %s9142_s23, %s13000_s1 }
  0x39   : > { %p9145_p4 = pnand %p9143_p1, %p9566_p9 }
  0x3b   : > { %p9146_p5 = pneg %p9145_p4 }
  0x3d   : > { %p9151_p10 = pnand %p9149_p8, %p9146_p5 }
  0x3f   : > { %9154 = shalt.err (!%p9151_p10)
}
  0x40   : > { %s9155_s15 = scalar_lea.vmem %s9556_s18, 9600  ;;  %p9163_p0 = scmp.lt.s32.totalorder %s9556_s18, %s9556_s18 }
  0x41   : > { %p9156_p11 = scmp.ne.s32.totalorder %s9556_s18, %s9155_s15  ;;  %p9164_p2 = scmp.lt.s32.totalorder %s9155_s15, %s9155_s15 }
  0x43   : > { %p9158_p12 = pnand %p9156_p11, %p9566_p9  ;;  %p9165_p3 = por %p9164_p2, %p9163_p0 }
  0x45   : > { %p9159_p13 = pneg %p9158_p12 }
  0x47   : > { %p9166_p6 = pnand %p9165_p3, %p9159_p13 }
  0x49   : > { %9169 = shalt.err (!%p9166_p6)
}
  0x4a   : > { %8192 = dma.hbm_to_vmem [thread:$0]  (!%p9552_p7), %s13000_s1, 9600, %s9556_s18, [#allocation7], %s12892_s14, %s12892_s14, %s12893_s17  }
  0x4b   : > { %s31_s20 = sadd.s32 1, %s9436_s9  ;;  %s135_s21 = sadd.s32 1, %s9428_s29 }
  0x4c   : > { %p32_p1 = scmp.ge.s32.totalorder %s31_s20, 2  ;;  %p142_p4 = scmp.ne.s32.totalorder %s9428_s29, %s9424_s28 }
  0x4d   : > { %p143_p5 = scmp.eq.s32.totalorder %s9440_s10, 0  ;;  %p8217_p8 = scmp.lt.s32.totalorder %s9440_s10, 2 }
  0x4e   : > { %s13285_s20 = smov (%p32_p1, %s31_s20), 0  ;;  %s338_s22 = sand.u32 1, %s9440_s10  }
  0x4f   : > { %13001 = sst [smem:[#allocation26_spill]] %s13285_s20  ;;  %p144_p10 = por %p143_p5, %p142_p4 }
  0x50   : > { %s132_s23 = ssub.s32 %s9436_s9, %s13285_s20  ;;  %s12894_s25 = sand.u32 1, %s9428_s29  }
  0x51   : > { %p133_p11 = scmp.eq.s32.totalorder %s132_s23, 0  ;;  %s9625_s26 = smul.u32 1152, %s12894_s25 }
  0x52   : > { %p9627_p12 = pnand %p8217_p8, %p144_p10  ;;  %s12895_s15 = smul.u32 18432, %s9436_s9 }
  0x53   : > { %s9632_s27 = scalar_select %p133_p11, %s9428_s29, %s135_s21  }
  0x54   : > { %s13002_s18 = scalar_select %p9627_p12, 1, 0 }
  0x55   : > { %13003 = sst [smem:[#allocation27_spill]] %s9632_s27  ;;  %s342_s8 = scalar_lea.vmem [#allocation11], %s9625_s26 }
  0x56   : > { %s349_s19 = sshll.u32 %s342_s8, 4  ;;  %s13004_s4 = sld [smem:[#allocation129_spill]]  ;;  %s9643_s19 = int_to_ptr.vmem [resolvable:$true] %s349_s19 }
  0x57   : > { %s9645_s25 = scalar_lea.sflag [#allocation4], %s338_s22  ;;  %p9651_p0 = pneg %p9627_p12 }
  0x59   : > { %s13005_s21 = scalar_select %p9651_p0, 1, 0 }
  0x5c   : > { %s9641_s23 = scalar_lea.hbm %s13004_s4, %s12895_s15  ;;  %s9175_s8 = scalar_lea.hbm %s13004_s4, 36864 }
  0x5d   : > { %s9170_s0 = scalar_lea.hbm %s9641_s23, 18432  ;;  %p9176_p6 = scmp.lt.u32.totalorder %s9641_s23, %s13004_s4 }
  0x5e   : > { %p9171_p13 = scmp.ne.s32.totalorder %s9641_s23, %s9170_s0  ;;  %p9177_p1 = scmp.lt.u32.totalorder %s9175_s8, %s9170_s0 }
  0x5f   : > { %p9179_p5 = scmp.lt.u32.totalorder %s9170_s0, %s9641_s23 }
  0x60   : > { %p9173_p2 = pnand %p9651_p0, %p9171_p13  ;;  %p9178_p4 = por %p9177_p1, %p9176_p6 }
  0x62   : > { %p9174_p3 = pneg %p9173_p2  ;;  %p9180_p8 = por %p9179_p5, %p9178_p4 }
  0x64   : > { %p9181_p10 = pnand %p9180_p8, %p9174_p3 }
  0x66   : > { %9184 = shalt.err (!%p9181_p10)
}
  0x67   : > { %s9185_s22 = scalar_lea.vmem %s9643_s19, 18432  ;;  %s9446_s14 = smov [#allocation11]  }
  0x68   : > { %p9186_p11 = scmp.ne.s32.totalorder %s9643_s19, %s9185_s22  ;;  %s9190_s17 = sshll.u32 %s9446_s14, 4  ;;  %s9191_s17 = int_to_ptr.vmem [resolvable:$false] %s9190_s17 }
  0x69   : > { %s9192_s1 = scalar_lea.vmem %s9191_s17, 36864  ;;  %p9193_p7 = scmp.lt.s32.totalorder %s9643_s19, %s9191_s17 }
  0x6a   : > { %p9188_p13 = pnand %p9186_p11, %p9651_p0  ;;  %p9194_p9 = scmp.lt.s32.totalorder %s9192_s1, %s9185_s22 }
  0x6c   : > { %p9189_p2 = pneg %p9188_p13  ;;  %p9195_p6 = por %p9194_p9, %p9193_p7 }
  0x6e   : > { %p9196_p1 = pnand %p9195_p6, %p9189_p2 }
  0x70   : > { %9199 = shalt.err (!%p9196_p1)
}
  0x71   : > { %s13006_s0 = smov 24   ;;  %s13007_s15 = smov 384  }
  0x72   : > { %8205 = dma.hbm_to_vmem [thread:$0]  (!%p9627_p12), %s9641_s23, 18432, %s9643_s19, %s9645_s25, %s13007_s15, %s13007_s15, %s13006_s0  }
  0x73   : > { %s13008_s8 = sand.u32 1, %s9428_s29   ;;  %s9447_s4 = smov [#allocation8]  }
  0x74   : > { %s8151_s14 = smul.u32 6, %s13008_s8  ;;  %s305_s17 = sshll.u32 %s9447_s4, 4  ;;  %s306_s17 = int_to_ptr.vmem [resolvable:$true] %s305_s17 }
  0x75   : > { %s7414_s22 = smul.u32 96, %s9436_s9  ;;  %s9200_s27 = scalar_lea.hbm %s12881_s2, 48 }
  0x76   : > { %p9201_p7 = scmp.ne.s32.totalorder %s12881_s2, %s9200_s27  ;;  %p13009_p9 = scmp.ne.s32.totalorder %s12999_s24, 0 }
  0x77   : > { %p9207_p5 = scmp.lt.u32.totalorder %s9200_s27, %s12881_s2 }
  0x78   : > { %p9203_p3 = pnand %p9201_p7, %p13009_p9 }
  0x7a   : > { %p9204_p4 = pneg %p9203_p3 }
  0x7c   : > { %p9209_p8 = pnand %p9207_p5, %p9204_p4 }
  0x7e   : > { %9212 = shalt.err (!%p9209_p8)
}
  0x7f   : > { %s9213_s4 = scalar_lea.vmem %s306_s17, 48  ;;  %s9220_s20 = scalar_lea.vmem %s306_s17, 64 }
  0x80   : > { %p9214_p10 = scmp.ne.s32.totalorder %s306_s17, %s9213_s4  ;;  %p9221_p2 = scmp.lt.s32.totalorder %s306_s17, %s306_s17 }
  0x81   : > { %p9222_p6 = scmp.lt.s32.totalorder %s9220_s20, %s9213_s4 }
  0x82   : > { %p9216_p11 = pnand %p9214_p10, %p13009_p9 }
  0x83   : > { %p9223_p1 = por %p9222_p6, %p9221_p2 }
  0x84   : > { %p9217_p13 = pneg %p9216_p11 }
  0x86   : > { %p9224_p12 = pnand %p9223_p1, %p9217_p13 }
  0x88   : > { %9227 = shalt.err (!%p9224_p12)
}
  0x89   : > { %p13010_p7 = scmp.ne.s32.totalorder %s12997_s16, 0  ;;  %s9702_s27 = scalar_lea.hbm %s12884_s5, %s7414_s22 }
  0x8a   : > { %s363_s19 = scalar_lea.vmem [#allocation12], %s8151_s14  ;;  %s9228_s0 = scalar_lea.hbm %s9702_s27, 96 }
  0x8b   : > { %8195 = dma.hbm_to_vmem [thread:$0]  (!%p13010_p7), %s12881_s2, 48, %s306_s17, [#allocation7]  }
  0x8c   : > { %s371_s23 = sshll.u32 %s363_s19, 4  ;;  %p9229_p12 = scmp.ne.s32.totalorder %s9702_s27, %s9228_s0  ;;  %s372_s23 = int_to_ptr.vmem [resolvable:$true] %s371_s23 }
  0x8d   : > { %s9233_s17 = scalar_lea.hbm %s12884_s5, 192  ;;  %p9234_p5 = scmp.lt.u32.totalorder %s9702_s27, %s12884_s5 }
  0x8e   : > { %p9231_p3 = pnand %p9229_p12, %p9651_p0  ;;  %p9235_p8 = scmp.lt.u32.totalorder %s9233_s17, %s9228_s0 }
  0x8f   : > { %p9237_p11 = scmp.lt.u32.totalorder %s9228_s0, %s9702_s27 }
  0x90   : > { %p9232_p4 = pneg %p9231_p3  ;;  %p9236_p10 = por %p9235_p8, %p9234_p5 }
  0x92   : > { %p9238_p13 = por %p9237_p11, %p9236_p10 }
  0x94   : > { %p9239_p2 = pnand %p9238_p13, %p9232_p4 }
  0x96   : > { %9242 = shalt.err (!%p9239_p2)
}
  0x97   : > { %s9243_s14 = scalar_lea.vmem %s372_s23, 96  ;;  %s9448_s22 = smov [#allocation12]  }
  0x98   : > { %p9244_p6 = scmp.ne.s32.totalorder %s372_s23, %s9243_s14  ;;  %s9248_s20 = sshll.u32 %s9448_s22, 4  ;;  %s9249_s20 = int_to_ptr.vmem [resolvable:$false] %s9248_s20 }
  0x99   : > { %s9250_s30 = scalar_lea.vmem %s9249_s20, 192  ;;  %p9251_p3 = scmp.lt.s32.totalorder %s372_s23, %s9249_s20 }
  0x9a   : > { %p9246_p1 = pnand %p9244_p6, %p9651_p0  ;;  %p9252_p7 = scmp.lt.s32.totalorder %s9250_s30, %s9243_s14 }
  0x9c   : > { %p9247_p12 = pneg %p9246_p1  ;;  %p9253_p9 = por %p9252_p7, %p9251_p3 }
  0x9e   : > { %p9254_p5 = pnand %p9253_p9, %p9247_p12 }
  0xa0   : > { %9257 = shalt.err (!%p9254_p5)
}
  0xa1   : > { %p13011_p8 = scmp.ne.s32.totalorder %s13002_s18, 0  ;;  %s9449_s10 = smov [#allocation9]  }
  0xa2   : > { %s316_s28 = sshll.u32 %s9449_s10, 4  ;;  %s9450_s12 = smov [#allocation14]   ;;  %s317_s28 = int_to_ptr.vmem [resolvable:$true] %s316_s28 }
  0xa3   : > { %8208 = dma.hbm_to_vmem [thread:$0]  (!%p13011_p8), %s9702_s27, 96, %s372_s23, %s9645_s25  }
  0xa4   : > { %s327_s19 = sshll.u32 %s9450_s12, 4  ;;  %s9258_s8 = scalar_lea.hbm %s12882_s3, 48  ;;  %s328_s19 = int_to_ptr.vmem [resolvable:$true] %s327_s19 }
  0xa5   : > { %p9259_p9 = scmp.ne.s32.totalorder %s12882_s3, %s9258_s8  ;;  %p13012_p7 = scmp.ne.s32.totalorder %s12999_s24, 0 }
  0xa6   : > { %p9265_p11 = scmp.lt.u32.totalorder %s9258_s8, %s12882_s3 }
  0xa7   : > { %p9261_p4 = pnand %p9259_p9, %p13012_p7 }
  0xa9   : > { %p9262_p10 = pneg %p9261_p4 }
  0xab   : > { %p9267_p13 = pnand %p9265_p11, %p9262_p10 }
  0xad   : > { %9270 = shalt.err (!%p9267_p13)
}
  0xae   : > { %s9271_s27 = scalar_lea.vmem %s317_s28, 48  ;;  %s9278_s23 = scalar_lea.vmem %s317_s28, 64 }
  0xaf   : > { %p9272_p2 = scmp.ne.s32.totalorder %s317_s28, %s9271_s27  ;;  %p9279_p12 = scmp.lt.s32.totalorder %s317_s28, %s317_s28 }
  0xb0   : > { %p9280_p3 = scmp.lt.s32.totalorder %s9278_s23, %s9271_s27 }
  0xb1   : > { %p9274_p6 = pnand %p9272_p2, %p13012_p7 }
  0xb2   : > { %p9281_p5 = por %p9280_p3, %p9279_p12 }
  0xb3   : > { %p9275_p1 = pneg %p9274_p6 }
  0xb5   : > { %p9282_p8 = pnand %p9281_p5, %p9275_p1 }
  0xb7   : > { %9285 = shalt.err (!%p9282_p8)
}
  0xb8   : > { %p13013_p9 = scmp.ne.s32.totalorder %s12997_s16, 0  ;;  %s9286_s12 = scalar_lea.hbm %s12886_s7, 48 }
  0xb9   : > { %p9287_p4 = scmp.ne.s32.totalorder %s12886_s7, %s9286_s12  ;;  %p9293_p8 = scmp.lt.u32.totalorder %s9286_s12, %s12886_s7 }
  0xba   : > { %8198 = dma.hbm_to_vmem [thread:$0]  (!%p13013_p9), %s12882_s3, 48, %s317_s28, [#allocation10]  }
  0xbb   : > { %p9289_p10 = pnand %p9287_p4, %p13012_p7 }
  0xbd   : > { %p9290_p11 = pneg %p9289_p10 }
  0xbf   : > { %p9295_p13 = pnand %p9293_p8, %p9290_p11 }
  0xc1   : > { %9298 = shalt.err (!%p9295_p13)
}
  0xc2   : > { %s9299_s1 = scalar_lea.vmem %s328_s19, 48  ;;  %s9306_s28 = scalar_lea.vmem %s328_s19, 64 }
  0xc3   : > { %p9300_p2 = scmp.ne.s32.totalorder %s328_s19, %s9299_s1  ;;  %p9307_p12 = scmp.lt.s32.totalorder %s328_s19, %s328_s19 }
  0xc4   : > { %p9308_p3 = scmp.lt.s32.totalorder %s9306_s28, %s9299_s1 }
  0xc5   : > { %p9302_p6 = pnand %p9300_p2, %p13012_p7 }
  0xc6   : > { %p9309_p5 = por %p9308_p3, %p9307_p12 }
  0xc7   : > { %p9303_p1 = pneg %p9302_p6 }
  0xc9   : > { %p9310_p0 = pnand %p9309_p5, %p9303_p1 }
  0xcb   : > { %9313 = shalt.err (!%p9310_p0)
}
  0xcc   : > { %8201 = dma.hbm_to_vmem [thread:$0]  (!%p13013_p9), %s12886_s7, 48, %s328_s19, [#allocation7]  }
  0xcd   : > { %s13014_s27 = smul.u32 18432, %s9436_s9  ;;  %s382_s20 = scalar_lea.vmem [#allocation13], %s9625_s26 }
  0xce   : > { %s390_s30 = sshll.u32 %s382_s20, 4  ;;  %p13015_p7 = scmp.ne.s32.totalorder %s13005_s21, 0  ;;  %s9766_s30 = int_to_ptr.vmem [resolvable:$true] %s390_s30 }
  0xcf   : > { %s9763_s22 = scalar_lea.hbm %s12885_s6, %s13014_s27  ;;  %s9319_s12 = scalar_lea.hbm %s12885_s6, 36864 }
  0xd0   : > { %s9314_s16 = scalar_lea.hbm %s9763_s22, 18432  ;;  %p9320_p9 = scmp.lt.u32.totalorder %s9763_s22, %s12885_s6 }
  0xd1   : > { %p9315_p0 = scmp.ne.s32.totalorder %s9763_s22, %s9314_s16  ;;  %p9321_p11 = scmp.lt.u32.totalorder %s9319_s12, %s9314_s16 }
  0xd2   : > { %p9323_p13 = scmp.lt.u32.totalorder %s9314_s16, %s9763_s22 }
  0xd3   : > { %p9317_p4 = pnand %p9315_p0, %p13015_p7  ;;  %p9322_p8 = por %p9321_p11, %p9320_p9 }
  0xd5   : > { %p9318_p10 = pneg %p9317_p4  ;;  %p9324_p2 = por %p9323_p13, %p9322_p8 }
  0xd7   : > { %p9325_p6 = pnand %p9324_p2, %p9318_p10 }
  0xd9   : > { %9328 = shalt.err (!%p9325_p6)
}
  0xda   : > { %s9329_s26 = scalar_lea.vmem %s9766_s30, 18432  ;;  %s9451_s8 = smov [#allocation13]  }
  0xdb   : > { %p9330_p1 = scmp.ne.s32.totalorder %s9766_s30, %s9329_s26  ;;  %s9334_s17 = sshll.u32 %s9451_s8, 4  ;;  %s9335_s17 = int_to_ptr.vmem [resolvable:$false] %s9334_s17 }
  0xdc   : > { %s9336_s1 = scalar_lea.vmem %s9335_s17, 36864  ;;  %p9337_p5 = scmp.lt.s32.totalorder %s9766_s30, %s9335_s17 }
  0xdd   : > { %p9332_p12 = pnand %p9330_p1, %p13015_p7  ;;  %p9338_p0 = scmp.lt.s32.totalorder %s9336_s1, %s9329_s26 }
  0xdf   : > { %p9333_p3 = pneg %p9332_p12  ;;  %p9339_p4 = por %p9338_p0, %p9337_p5 }
  0xe1   : > { %p9340_p9 = pnand %p9339_p4, %p9333_p3 }
  0xe3   : > { %9343 = shalt.err (!%p9340_p9)
}
  0xe4   : > { %s9452_s28 = smov 192   ;;  %s9453_s4 = smov 12  }
  0xe5   : > { %p13016_p10 = scmp.ne.s32.totalorder %s13002_s18, 0  ;;  %p13017_p7 = scmp.ne.s32.totalorder %s12996_s13, 0 }
  0xe7   : > { %8211 = dma.hbm_to_vmem [thread:$0]  (!%p13016_p10), %s9763_s22, 18432, %s9766_s30, %s9645_s25, %s9452_s28, %s9452_s28, %s9453_s4  }
  0xe8   : > { %402 = sbr.rel (%p13017_p7) target bundleno = 1806 (0x70e), region = 52 }
  0xef   : > { %p13018_p11 = scmp.eq.s32.totalorder %s9532_s11, 0 }
  0xf1   : > { %9395 = dma.done.wait (%p13018_p11), [#allocation4], 9600   ;;  %p13019_p8 = pmov %p13018_p11 }
  0xf3   : > { %9397 = vsyncadd (%p13019_p8), [#allocation4], 4294957696  ;;  %p13020_p13 = pmov %p13019_p8 }
  0xf4   : > { %p13021_p2 = pmov %p13019_p8 }
  0xf5   : > { %9399 = dma.done.wait (%p13020_p13), [#allocation7], 9648  }
  0xf6   : > { %9401 = vsyncadd (%p13021_p2), [#allocation7], 4294957648  ;;  %p13022_p6 = pmov %p13021_p2 }
  0xf7   : > { %p13023_p1 = pmov %p13021_p2 }
  0xf8   : > { %9403 = dma.done.wait (%p13022_p6), [#allocation10], 48  }
  0xf9   : > { %9405 = vsyncadd (%p13023_p1), [#allocation10], 4294967248  ;;  %s13024_s13 = sld [smem:[#allocation22_spill]]  ;;  %s13025_s25 = sld [smem:[#allocation25_spill]] }
  0xfa   : > { %s420_s18 = sand.u32 1, %s9532_s11  }
  0xfb   : > { %s421_s27 = scalar_lea.sflag [#allocation4], %s420_s18 }
  0xff   : > { %s422_s21 = sand.u32 1, %s13024_s13   ;;  %p13026_p12 = scmp.ne.s32.totalorder %s13025_s25, 0 }
 0x100   : > { %s8154_s14 = smul.u32 1152, %s422_s21 }
 0x102   : > { %s9806_s23 = scalar_lea.vmem [#allocation11], %s8154_s14 }
 0x103   : > { %9407 = dma.done.wait (%p13026_p12), %s421_s27, 36960  }
 0x104   : > { %9409 = vsyncadd (%p13026_p12), %s421_s27, 4294930336  ;;  %s9812_s24 = smul.u32 6, %s422_s21  ;;  %s9815_s20 = scalar_lea.vmem [#allocation13], %s8154_s14 }
 0x105   : > { %p13027_p3 = pmov %p13023_p1 }
 0x106   : > { %s433_s22 = scalar_lea.vmem [#allocation12], %s9812_s24 }
 0x107   : > { %9411 = dma.done.wait (%p13027_p3), [#allocation7], 48   ;;  %p13028_p5 = pmov %p13023_p1 }
 0x108   : > { %s13029_s30 = sld [smem:[#allocation23_spill]] }
 0x109   : > { %9413 = vsyncadd (%p13028_p5), [#allocation7], 4294967248 }
 0x10e   : > { %p7032_p0 = scmp.ne.s32.totalorder %s13029_s30, 0 }
 0x110   : > { %493 = sbr.rel (%p7032_p0) target bundleno = 695 (0x2b7), region = 88 }
 0x117   : > { %v497_v0 = vld [vmem:[#allocation3 + $0x18] sm:$0xff]  ;;  %v498_v1 = vld [vmem:[#allocation3 + $0x20] sm:$0xff]  ;;  %v499_v2 = vld [vmem:[#allocation3 + $0x28] sm:$0xff]  ;;  %vm815_vm0 = vcmask 1043456  }
 0x118   : > { %v572_v3 = vld [vmem:[#allocation6 + $0x18] sm:$0xff]  ;;  %v573_v4 = vld [vmem:[#allocation6 + $0x20] sm:$0xff]  ;;  %v574_v5 = vld [vmem:[#allocation6 + $0x28] sm:$0xff] }
 0x119   : > { %v9822_v6 = vadd.f32 %v572_v3, %v497_v0  ;;  %v9824_v7 = vadd.f32 %v573_v4, %v498_v1  ;;  %v9826_v8 = vadd.f32 %v574_v5, %v499_v2  ;;  %v494_v9 = vld [vmem:[#allocation3] sm:$0xff]  ;;  %v495_v10 = vld [vmem:[#allocation3 + $0x8] sm:$0xff]  ;;  %v496_v11 = vld [vmem:[#allocation3 + $0x10] sm:$0xff] }
 0x11a   : > { %v569_v12 = vld [vmem:[#allocation6] sm:$0xff]  ;;  %v570_v13 = vld [vmem:[#allocation6 + $0x8] sm:$0xff]  ;;  %v571_v14 = vld [vmem:[#allocation6 + $0x10] sm:$0xff] }
 0x11b   : > { %v723_v15 = vadd.f32 %v9824_v7, %v9822_v6  ;;  %v9830_v16 = vadd.f32 %v569_v12, %v494_v9  ;;  %v9832_v17 = vadd.f32 %v570_v13, %v495_v10  ;;  %v9834_v18 = vadd.f32 %v571_v14, %v496_v11  ;;  %v500_v19 = vld [vmem:[#allocation3 + $0x30] sm:$0xff]  ;;  %v501_v20 = vld [vmem:[#allocation3 + $0x38] sm:$0xff]  ;;  %v502_v21 = vld [vmem:[#allocation3 + $0x40] sm:$0xff] }
 0x11c   : > { %v575_v22 = vld [vmem:[#allocation6 + $0x30] sm:$0xff]  ;;  %v576_v23 = vld [vmem:[#allocation6 + $0x38] sm:$0xff]  ;;  %v577_v24 = vld [vmem:[#allocation6 + $0x40] sm:$0xff] }
 0x11d   : > { %v724_v25 = vadd.f32 %v723_v15, %v9826_v8  ;;  %v719_v26 = vadd.f32 %v9832_v17, %v9830_v16  ;;  %v9839_v27 = vadd.f32 %v575_v22, %v500_v19  ;;  %v9841_v28 = vadd.f32 %v576_v23, %v501_v20  ;;  %v503_v29 = vld [vmem:[#allocation3 + $0x48] sm:$0xff]  ;;  %v504_v30 = vld [vmem:[#allocation3 + $0x50] sm:$0xff]  ;;  %v505_v31 = vld [vmem:[#allocation3 + $0x58] sm:$0xff] }
 0x11e   : > { %v9843_v32 = vadd.f32 %v577_v24, %v502_v21  ;;  %v578_v33 = vld [vmem:[#allocation6 + $0x48] sm:$0xff]  ;;  %v579_v34 = vld [vmem:[#allocation6 + $0x50] sm:$0xff]  ;;  %v580_v35 = vld [vmem:[#allocation6 + $0x58] sm:$0xff] }
 0x11f   : > { %725 = vadd.xlane.f32.xlu1 %v724_v25  ;;  %v720_v36 = vadd.f32 %v719_v26, %v9834_v18  ;;  %v727_v37 = vadd.f32 %v9841_v28, %v9839_v27  ;;  %v9848_v38 = vadd.f32 %v578_v33, %v503_v29  ;;  %v9850_v39 = vadd.f32 %v579_v34, %v504_v30  ;;  %v506_v40 = vld [vmem:[#allocation3 + $0x60] sm:$0xff]  ;;  %v507_v41 = vld [vmem:[#allocation3 + $0x68] sm:$0xff]  ;;  %v508_v42 = vld [vmem:[#allocation3 + $0x70] sm:$0xff] }
 0x120   : > { %v9852_v43 = vadd.f32 %v580_v35, %v505_v31  ;;  %v581_v44 = vld [vmem:[#allocation6 + $0x60] sm:$0xff]  ;;  %v582_v45 = vld [vmem:[#allocation6 + $0x68] sm:$0xff]  ;;  %v583_v46 = vld [vmem:[#allocation6 + $0x70] sm:$0xff] }
 0x121   : > { %721 = vadd.xlane.f32.xlu0 %v720_v36  ;;  %v728_v47 = vadd.f32 %v727_v37, %v9843_v32  ;;  %v731_v48 = vadd.f32 %v9850_v39, %v9848_v38  ;;  %v9857_v49 = vadd.f32 %v581_v44, %v506_v40  ;;  %v9859_v50 = vadd.f32 %v582_v45, %v507_v41  ;;  %v566_v51 = vld [vmem:[#allocation3 + $0x240] sm:$0xf]  ;;  %v567_v52 = vld [vmem:[#allocation3 + $0x248] sm:$0xf]  ;;  %v568_v53 = vld [vmem:[#allocation3 + $0x250] sm:$0xf] }
 0x122   : > { %v9861_v54 = vadd.f32 %v583_v46, %v508_v42  ;;  %v641_v55 = vld [vmem:[#allocation6 + $0x240] sm:$0xf]  ;;  %v642_v56 = vld [vmem:[#allocation6 + $0x248] sm:$0xf]  ;;  %v643_v57 = vld [vmem:[#allocation6 + $0x250] sm:$0xf] }
 0x123   : > { %729 = vadd.xlane.f32.xlu1 %v728_v47  ;;  %v732_v58 = vadd.f32 %v731_v48, %v9852_v43  ;;  %v735_v59 = vadd.f32 %v9859_v50, %v9857_v49  ;;  %v9866_v60 = vadd.f32 %v641_v55, %v566_v51  ;;  %v9868_v61 = vadd.f32 %v642_v56, %v567_v52  ;;  %v512_v62 = vld [vmem:[#allocation3 + $0x90] sm:$0xff]  ;;  %v513_v63 = vld [vmem:[#allocation3 + $0x98] sm:$0xff]  ;;  %v514_v0 = vld [vmem:[#allocation3 + $0xa0] sm:$0xff] }
 0x124   : > { %v9870_v1 = vadd.f32 %v643_v57, %v568_v53  ;;  %v587_v2 = vld [vmem:[#allocation6 + $0x90] sm:$0xff]  ;;  %v588_v3 = vld [vmem:[#allocation6 + $0x98] sm:$0xff]  ;;  %v589_v4 = vld [vmem:[#allocation6 + $0xa0] sm:$0xff] }
 0x125   : > { %733 = vadd.xlane.f32.xlu0 %v732_v58  ;;  %v736_v5 = vadd.f32 %v735_v59, %v9861_v54  ;;  %v816_v9 = vsel %vm815_vm0, %v9866_v60, 0.0  ;;  %v817_v10 = vsel %vm815_vm0, %v9868_v61, 0.0  ;;  %v9877_v11 = vadd.f32 %v587_v2, %v512_v62  ;;  %v509_v12 = vld [vmem:[#allocation3 + $0x78] sm:$0xff]  ;;  %v510_v13 = vld [vmem:[#allocation3 + $0x80] sm:$0xff]  ;;  %v511_v14 = vld [vmem:[#allocation3 + $0x88] sm:$0xff] }
 0x126   : > { %13030 = vst [vmem:[#allocation28_spill] sm:$0xff] %v9870_v1  ;;  %v818_v15 = vadd.f32 %v817_v10, %v816_v9  ;;  %v819_v19 = vsel %vm815_vm0, %v9870_v1, 0.0  ;;  %v9881_v20 = vadd.f32 %v588_v3, %v513_v63  ;;  %v9883_v21 = vadd.f32 %v589_v4, %v514_v0  ;;  %v584_v22 = vld [vmem:[#allocation6 + $0x78] sm:$0xff]  ;;  %v585_v23 = vld [vmem:[#allocation6 + $0x80] sm:$0xff]  ;;  %v586_v24 = vld [vmem:[#allocation6 + $0x88] sm:$0xff] }
 0x127   : > { %737 = vadd.xlane.f32.xlu1 %v736_v5  ;;  %v9885_v25 = vadd.f32 %v584_v22, %v509_v12  ;;  %v9887_v26 = vadd.f32 %v585_v23, %v510_v13  ;;  %v9889_v29 = vadd.f32 %v586_v24, %v511_v14  ;;  %v518_v30 = vld [vmem:[#allocation3 + $0xc0] sm:$0xff]  ;;  %v519_v31 = vld [vmem:[#allocation3 + $0xc8] sm:$0xff]  ;;  %v520_v33 = vld [vmem:[#allocation3 + $0xd0] sm:$0xff] }
 0x128   : > { %v820_v34 = vadd.f32 %v819_v19, %v818_v15  ;;  %v743_v35 = vadd.f32 %v9881_v20, %v9877_v11  ;;  %v593_v36 = vld [vmem:[#allocation6 + $0xc0] sm:$0xff]  ;;  %v594_v37 = vld [vmem:[#allocation6 + $0xc8] sm:$0xff]  ;;  %v595_v40 = vld [vmem:[#allocation6 + $0xd0] sm:$0xff] }
 0x129   : > { %v739_v41 = vadd.f32 %v9887_v26, %v9885_v25  ;;  %v9895_v42 = vadd.f32 %v593_v36, %v518_v30  ;;  %v9897_v44 = vadd.f32 %v594_v37, %v519_v31  ;;  %v9899_v45 = vadd.f32 %v595_v40, %v520_v33  ;;  %v515_v46 = vld [vmem:[#allocation3 + $0xa8] sm:$0xff]  ;;  %v516_v47 = vld [vmem:[#allocation3 + $0xb0] sm:$0xff]  ;;  %v517_v48 = vld [vmem:[#allocation3 + $0xb8] sm:$0xff] }
 0x12a   : > { %821 = vadd.xlane.f32.xlu0 %v820_v34  ;;  %v744_v51 = vadd.f32 %v743_v35, %v9883_v21  ;;  %v590_v52 = vld [vmem:[#allocation6 + $0xa8] sm:$0xff]  ;;  %v591_v53 = vld [vmem:[#allocation6 + $0xb0] sm:$0xff]  ;;  %v592_v55 = vld [vmem:[#allocation6 + $0xb8] sm:$0xff] }
 0x12b   : > { %v740_v56 = vadd.f32 %v739_v41, %v9889_v29  ;;  %v751_v57 = vadd.f32 %v9897_v44, %v9895_v42  ;;  %v9905_v58 = vadd.f32 %v590_v52, %v515_v46  ;;  %v9907_v59 = vadd.f32 %v591_v53, %v516_v47  ;;  %v524_v62 = vld [vmem:[#allocation3 + $0xf0] sm:$0xff]  ;;  %v525_v63 = vld [vmem:[#allocation3 + $0xf8] sm:$0xff]  ;;  %v526_v0 = vld [vmem:[#allocation3 + $0x100] sm:$0xff] }
 0x12c   : > { %745 = vadd.xlane.f32.xlu1 %v744_v51  ;;  %v9909_v2 = vadd.f32 %v592_v55, %v517_v48  ;;  %v599_v3 = vld [vmem:[#allocation6 + $0xf0] sm:$0xff]  ;;  %v600_v4 = vld [vmem:[#allocation6 + $0xf8] sm:$0xff]  ;;  %v601_v5 = vld [vmem:[#allocation6 + $0x100] sm:$0xff] }
 0x12d   : > { %v752_v9 = vadd.f32 %v751_v57, %v9899_v45  ;;  %v747_v10 = vadd.f32 %v9907_v59, %v9905_v58  ;;  %v9914_v12 = vadd.f32 %v599_v3, %v524_v62  ;;  %v9916_v13 = vadd.f32 %v600_v4, %v525_v63  ;;  %v521_v14 = vld [vmem:[#allocation3 + $0xd8] sm:$0xff]  ;;  %v522_v15 = vld [vmem:[#allocation3 + $0xe0] sm:$0xff]  ;;  %v523_v19 = vld [vmem:[#allocation3 + $0xe8] sm:$0xff] }
 0x12e   : > { %741 = vadd.xlane.f32.xlu0 %v740_v56  ;;  %v9918_v22 = vadd.f32 %v601_v5, %v526_v0  ;;  %v596_v23 = vld [vmem:[#allocation6 + $0xd8] sm:$0xff]  ;;  %v597_v24 = vld [vmem:[#allocation6 + $0xe0] sm:$0xff]  ;;  %v598_v30 = vld [vmem:[#allocation6 + $0xe8] sm:$0xff] }
 0x12f   : > { %v748_v31 = vadd.f32 %v747_v10, %v9909_v2  ;;  %v759_v33 = vadd.f32 %v9916_v13, %v9914_v12  ;;  %v9923_v34 = vadd.f32 %v596_v23, %v521_v14  ;;  %v9925_v35 = vadd.f32 %v597_v24, %v522_v15  ;;  %v530_v36 = vld [vmem:[#allocation3 + $0x120] sm:$0xff]  ;;  %v531_v37 = vld [vmem:[#allocation3 + $0x128] sm:$0xff]  ;;  %v532_v40 = vld [vmem:[#allocation3 + $0x130] sm:$0xff] }
 0x130   : > { %753 = vadd.xlane.f32.xlu1 %v752_v9  ;;  %v9927_v41 = vadd.f32 %v598_v30, %v523_v19  ;;  %v605_v46 = vld [vmem:[#allocation6 + $0x120] sm:$0xff]  ;;  %v606_v47 = vld [vmem:[#allocation6 + $0x128] sm:$0xff]  ;;  %v607_v48 = vld [vmem:[#allocation6 + $0x130] sm:$0xff] }
 0x131   : > { %v760_v51 = vadd.f32 %v759_v33, %v9918_v22  ;;  %v755_v52 = vadd.f32 %v9925_v35, %v9923_v34  ;;  %v9932_v53 = vadd.f32 %v605_v46, %v530_v36  ;;  %v9934_v55 = vadd.f32 %v606_v47, %v531_v37  ;;  %v527_v56 = vld [vmem:[#allocation3 + $0x108] sm:$0xff]  ;;  %v528_v57 = vld [vmem:[#allocation3 + $0x110] sm:$0xff]  ;;  %v529_v62 = vld [vmem:[#allocation3 + $0x118] sm:$0xff] }
 0x132   : > { %749 = vadd.xlane.f32.xlu0 %v748_v31  ;;  %v9936_v63 = vadd.f32 %v607_v48, %v532_v40  ;;  %v602_v0 = vld [vmem:[#allocation6 + $0x108] sm:$0xff]  ;;  %v603_v3 = vld [vmem:[#allocation6 + $0x110] sm:$0xff]  ;;  %v604_v4 = vld [vmem:[#allocation6 + $0x118] sm:$0xff] }
 0x133   : > { %v756_v5 = vadd.f32 %v755_v52, %v9927_v41  ;;  %v767_v9 = vadd.f32 %v9934_v55, %v9932_v53  ;;  %v9941_v10 = vadd.f32 %v602_v0, %v527_v56  ;;  %v9943_v14 = vadd.f32 %v603_v3, %v528_v57  ;;  %v536_v15 = vld [vmem:[#allocation3 + $0x150] sm:$0xff]  ;;  %v537_v19 = vld [vmem:[#allocation3 + $0x158] sm:$0xff]  ;;  %v538_v23 = vld [vmem:[#allocation3 + $0x160] sm:$0xff] }
 0x134   : > { %761 = vadd.xlane.f32.xlu1 %v760_v51  ;;  %v9945_v24 = vadd.f32 %v604_v4, %v529_v62  ;;  %v611_v30 = vld [vmem:[#allocation6 + $0x150] sm:$0xff]  ;;  %v612_v31 = vld [vmem:[#allocation6 + $0x158] sm:$0xff]  ;;  %v613_v33 = vld [vmem:[#allocation6 + $0x160] sm:$0xff] }
 0x135   : > { %v768_v36 = vadd.f32 %v767_v9, %v9936_v63  ;;  %v763_v37 = vadd.f32 %v9943_v14, %v9941_v10  ;;  %v9950_v40 = vadd.f32 %v611_v30, %v536_v15  ;;  %v9952_v46 = vadd.f32 %v612_v31, %v537_v19  ;;  %v533_v47 = vld [vmem:[#allocation3 + $0x138] sm:$0xff]  ;;  %v534_v48 = vld [vmem:[#allocation3 + $0x140] sm:$0xff]  ;;  %v535_v52 = vld [vmem:[#allocation3 + $0x148] sm:$0xff] }
 0x136   : > { %13031 = vst [vmem:[#allocation29_spill] sm:$0xff] %v9945_v24  ;;  %757 = vadd.xlane.f32.xlu0 %v756_v5  ;;  %v9954_v56 = vadd.f32 %v613_v33, %v538_v23  ;;  %v608_v51 = vld [vmem:[#allocation6 + $0x138] sm:$0xff]  ;;  %v609_v57 = vld [vmem:[#allocation6 + $0x140] sm:$0xff]  ;;  %v610_v62 = vld [vmem:[#allocation6 + $0x148] sm:$0xff] }
 0x137   : > { %13032 = vst [vmem:[#allocation30_spill] sm:$0xff] %v9950_v40  ;;  %13033 = vst [vmem:[#allocation31_spill] sm:$0xff] %v9952_v46  ;;  %v764_v0 = vadd.f32 %v763_v37, %v9945_v24  ;;  %v775_v3 = vadd.f32 %v9952_v46, %v9950_v40  ;;  %v9959_v4 = vadd.f32 %v608_v51, %v533_v47  ;;  %v542_v15 = vld [vmem:[#allocation3 + $0x180] sm:$0xff]  ;;  %v543_v19 = vld [vmem:[#allocation3 + $0x188] sm:$0xff] }
 0x138   : > { %13034 = vst [vmem:[#allocation32_spill] sm:$0xff] %v9954_v56  ;;  %v9961_v9 = vadd.f32 %v609_v57, %v534_v48  ;;  %v544_v30 = vld [vmem:[#allocation3 + $0x190] sm:$0xff]  ;;  %769 = vadd.xlane.f32.xlu1 %v768_v36  ;;  %v9963_v31 = vadd.f32 %v610_v62, %v535_v52  ;;  %v617_v5 = vld [vmem:[#allocation6 + $0x180] sm:$0xff]  ;;  %v618_v23 = vld [vmem:[#allocation6 + $0x188] sm:$0xff] }
 0x139   : > { %13035 = vst [vmem:[#allocation33_spill] sm:$0xff] %v9959_v4  ;;  %v619_v33 = vld [vmem:[#allocation6 + $0x190] sm:$0xff]  ;;  %v776_v1 = vadd.f32 %v775_v3, %v9954_v56  ;;  %v9968_v24 = vadd.f32 %v617_v5, %v542_v15  ;;  %v9970_v47 = vadd.f32 %v618_v23, %v543_v19  ;;  %v540_v51 = vld [vmem:[#allocation3 + $0x170] sm:$0xff]  ;;  %v541_v57 = vld [vmem:[#allocation3 + $0x178] sm:$0xff] }
 0x13a   : > { %13036 = vst [vmem:[#allocation34_spill] sm:$0xff] %v9961_v9  ;;  %13037 = vst [vmem:[#allocation35_spill] sm:$0xff] %v9963_v31  ;;  %v771_v37 = vadd.f32 %v9961_v9, %v9959_v4  ;;  %v539_v48 = vld [vmem:[#allocation3 + $0x168] sm:$0xff]  ;;  %765 = vadd.xlane.f32.xlu0 %v764_v0  ;;  %v9972_v46 = vadd.f32 %v619_v33, %v544_v30  ;;  %v614_v36 = vld [vmem:[#allocation6 + $0x168] sm:$0xff] }
 0x13b   : > { %13038 = vst [vmem:[#allocation36_spill] sm:$0xff] %v9968_v24  ;;  %13039 = vst [vmem:[#allocation37_spill] sm:$0xff] %v9970_v47  ;;  %v615_v52 = vld [vmem:[#allocation6 + $0x170] sm:$0xff]  ;;  %v616_v62 = vld [vmem:[#allocation6 + $0x178] sm:$0xff]  ;;  %v783_v3 = vadd.f32 %v9970_v47, %v9968_v24  ;;  %v9977_v56 = vadd.f32 %v614_v36, %v539_v48 }
 0x13c   : > { %13040 = vst [vmem:[#allocation38_spill] sm:$0xff] %v9972_v46  ;;  %v772_v40 = vadd.f32 %v771_v37, %v9963_v31  ;;  %v9979_v15 = vadd.f32 %v615_v52, %v540_v51  ;;  %v548_v19 = vld [vmem:[#allocation3 + $0x1b0] sm:$0xff]  ;;  %v549_v5 = vld [vmem:[#allocation3 + $0x1b8] sm:$0xff]  ;;  %v550_v23 = vld [vmem:[#allocation3 + $0x1c0] sm:$0xff]  ;;  %777 = vadd.xlane.f32.xlu1 %v776_v1  ;;  %v9981_v9 = vadd.f32 %v616_v62, %v541_v57 }
 0x13d   : > { %13041 = vst [vmem:[#allocation39_spill] sm:$0xff] %v9977_v56  ;;  %v623_v0 = vld [vmem:[#allocation6 + $0x1b0] sm:$0xff]  ;;  %v624_v30 = vld [vmem:[#allocation6 + $0x1b8] sm:$0xff]  ;;  %v625_v33 = vld [vmem:[#allocation6 + $0x1c0] sm:$0xff]  ;;  %v784_v4 = vadd.f32 %v783_v3, %v9972_v46 }
 0x13e   : > { %13042 = vst [vmem:[#allocation40_spill] sm:$0xff] %v9979_v15  ;;  %13043 = vst [vmem:[#allocation41_spill] sm:$0xff] %v9981_v9  ;;  %v779_v37 = vadd.f32 %v9979_v15, %v9977_v56  ;;  %v9986_v31 = vadd.f32 %v623_v0, %v548_v19  ;;  %v9988_v48 = vadd.f32 %v624_v30, %v549_v5  ;;  %v545_v51 = vld [vmem:[#allocation3 + $0x198] sm:$0xff]  ;;  %v546_v36 = vld [vmem:[#allocation3 + $0x1a0] sm:$0xff]  ;;  %773 = vadd.xlane.f32.xlu0 %v772_v40 }
 0x13f   : > { %v547_v52 = vld [vmem:[#allocation3 + $0x1a8] sm:$0xff]  ;;  %v9990_v47 = vadd.f32 %v625_v33, %v550_v23  ;;  %v620_v1 = vld [vmem:[#allocation6 + $0x198] sm:$0xff]  ;;  %v621_v57 = vld [vmem:[#allocation6 + $0x1a0] sm:$0xff] }
 0x140   : > { %13044 = vst [vmem:[#allocation42_spill] sm:$0xff] %v9986_v31  ;;  %13045 = vst [vmem:[#allocation43_spill] sm:$0xff] %v9988_v48  ;;  %v622_v62 = vld [vmem:[#allocation6 + $0x1a8] sm:$0xff]  ;;  %v780_v24 = vadd.f32 %v779_v37, %v9981_v9  ;;  %v791_v3 = vadd.f32 %v9988_v48, %v9986_v31  ;;  %v9995_v46 = vadd.f32 %v620_v1, %v545_v51  ;;  %v555_v0 = vld [vmem:[#allocation3 + $0x1e8] sm:$0xff]  ;;  %785 = vadd.xlane.f32.xlu1 %v784_v4 }
 0x141   : > { %13046 = vst [vmem:[#allocation44_spill] sm:$0xff] %v9990_v47  ;;  %v9997_v19 = vadd.f32 %v621_v57, %v546_v36  ;;  %v554_v5 = vld [vmem:[#allocation3 + $0x1e0] sm:$0xff]  ;;  %v556_v30 = vld [vmem:[#allocation3 + $0x1f0] sm:$0xff]  ;;  %v9999_v15 = vadd.f32 %v622_v62, %v547_v52  ;;  %v629_v40 = vld [vmem:[#allocation6 + $0x1e0] sm:$0xff] }
 0x142   : > { %13047 = vst [vmem:[#allocation45_spill] sm:$0xff] %v9995_v46  ;;  %v630_v23 = vld [vmem:[#allocation6 + $0x1e8] sm:$0xff]  ;;  %v631_v33 = vld [vmem:[#allocation6 + $0x1f0] sm:$0xff]  ;;  %v792_v56 = vadd.f32 %v791_v3, %v9990_v47  ;;  %v10004_v9 = vadd.f32 %v629_v40, %v554_v5  ;;  %v552_v1 = vld [vmem:[#allocation3 + $0x1d0] sm:$0xff]  ;;  %781 = vadd.xlane.f32.xlu0 %v780_v24 }
 0x143   : > { %13048 = vst [vmem:[#allocation46_spill] sm:$0xff] %v9997_v19  ;;  %13049 = vst [vmem:[#allocation47_spill] sm:$0xff] %v9999_v15  ;;  %v787_v37 = vadd.f32 %v9997_v19, %v9995_v46  ;;  %v10006_v51 = vadd.f32 %v630_v23, %v555_v0  ;;  %v551_v36 = vld [vmem:[#allocation3 + $0x1c8] sm:$0xff]  ;;  %v553_v57 = vld [vmem:[#allocation3 + $0x1d8] sm:$0xff]  ;;  %v10008_v48 = vadd.f32 %v631_v33, %v556_v30 }
 0x144   : > { %13050 = vst [vmem:[#allocation48_spill] sm:$0xff] %v10004_v9  ;;  %v626_v4 = vld [vmem:[#allocation6 + $0x1c8] sm:$0xff]  ;;  %v627_v52 = vld [vmem:[#allocation6 + $0x1d0] sm:$0xff]  ;;  %v628_v62 = vld [vmem:[#allocation6 + $0x1d8] sm:$0xff]  ;;  %793 = vadd.xlane.f32.xlu1 %v792_v56 }
 0x145   : > { %13051 = vst [vmem:[#allocation49_spill] sm:$0xff] %v10006_v51  ;;  %13052 = vst [vmem:[#allocation50_spill] sm:$0xff] %v10008_v48  ;;  %v788_v31 = vadd.f32 %v787_v37, %v9999_v15  ;;  %v799_v3 = vadd.f32 %v10006_v51, %v10004_v9  ;;  %v10013_v47 = vadd.f32 %v626_v4, %v551_v36  ;;  %v560_v0 = vld [vmem:[#allocation3 + $0x210] sm:$0xff]  ;;  %v561_v40 = vld [vmem:[#allocation3 + $0x218] sm:$0xff] }
 0x146   : > { %v10015_v5 = vadd.f32 %v627_v52, %v552_v1  ;;  %v562_v23 = vld [vmem:[#allocation3 + $0x220] sm:$0xff]  ;;  %v10017_v19 = vadd.f32 %v628_v62, %v553_v57  ;;  %v635_v24 = vld [vmem:[#allocation6 + $0x210] sm:$0xff]  ;;  %v636_v30 = vld [vmem:[#allocation6 + $0x218] sm:$0xff] }
 0x147   : > { %13053 = vst [vmem:[#allocation51_spill] sm:$0xff] %v10013_v47  ;;  %v637_v33 = vld [vmem:[#allocation6 + $0x220] sm:$0xff]  ;;  %v800_v46 = vadd.f32 %v799_v3, %v10008_v48  ;;  %v10022_v15 = vadd.f32 %v635_v24, %v560_v0  ;;  %v10024_v36 = vadd.f32 %v636_v30, %v561_v40  ;;  %v558_v4 = vld [vmem:[#allocation3 + $0x200] sm:$0xff]  ;;  %v559_v52 = vld [vmem:[#allocation3 + $0x208] sm:$0xff]  ;;  %789 = vadd.xlane.f32.xlu0 %v788_v31 }
 0x148   : > { %13054 = vst [vmem:[#allocation52_spill] sm:$0xff] %v10015_v5  ;;  %13055 = vst [vmem:[#allocation53_spill] sm:$0xff] %v10017_v19  ;;  %v795_v37 = vadd.f32 %v10015_v5, %v10013_v47  ;;  %v557_v1 = vld [vmem:[#allocation3 + $0x1f8] sm:$0xff]  ;;  %v10026_v51 = vadd.f32 %v637_v33, %v562_v23  ;;  %v632_v56 = vld [vmem:[#allocation6 + $0x1f8] sm:$0xff] }
 0x149   : > { %v633_v57 = vld [vmem:[#allocation6 + $0x200] sm:$0xff]  ;;  %v634_v62 = vld [vmem:[#allocation6 + $0x208] sm:$0xff]  ;;  %v807_v3 = vadd.f32 %v10024_v36, %v10022_v15  ;;  %v10031_v48 = vadd.f32 %v632_v56, %v557_v1  ;;  %v563_v40 = vld [vmem:[#allocation3 + $0x228] sm:$0xff]  ;;  %801 = vadd.xlane.f32.xlu1 %v800_v46 }
 0x14a   : > { %v796_v9 = vadd.f32 %v795_v37, %v10017_v19  ;;  %v10033_v0 = vadd.f32 %v633_v57, %v558_v4  ;;  %v564_v24 = vld [vmem:[#allocation3 + $0x230] sm:$0xff]  ;;  %v565_v30 = vld [vmem:[#allocation3 + $0x238] sm:$0xff]  ;;  %v10035_v5 = vadd.f32 %v634_v62, %v559_v52  ;;  %v638_v31 = vld [vmem:[#allocation6 + $0x228] sm:$0xff]  ;;  %v1254_v57 = vlaneseq }
 0x14b   : > { %v639_v23 = vld [vmem:[#allocation6 + $0x230] sm:$0xff]  ;;  %v640_v33 = vld [vmem:[#allocation6 + $0x238] sm:$0xff]  ;;  %v808_v47 = vadd.f32 %v807_v3, %v10026_v51  ;;  %v10040_v19 = vadd.f32 %v638_v31, %v563_v40  ;;  %v1739_v3 = vld [vmem:[#allocation14] sm:$0x7] }
 0x14c   : > { %v803_v37 = vadd.f32 %v10033_v0, %v10031_v48  ;;  %v10042_v1 = vadd.f32 %v639_v23, %v564_v24  ;;  %797 = vadd.xlane.f32.xlu0 %v796_v9  ;;  %v10044_v4 = vadd.f32 %v640_v33, %v565_v30  ;;  %v1255_v62 = vshrl.u32 %v1254_v57, 7 }
 0x14d   : > { %809 = vadd.xlane.f32.xlu1 %v808_v47 }
 0x14e   : > { %v804_v56 = vadd.f32 %v803_v37, %v10035_v5  ;;  %v811_v46 = vadd.f32 %v10042_v1, %v10040_v19  ;;  %v10050_v40 = vsub.s32 0, %v1255_v62  ;;  %v10052_v24 = vsub.s32 1, %v1255_v62 }
 0x14f   : > { %v10054_v9 = vsub.s32 2, %v1255_v62 }
 0x150   : > { %805 = vadd.xlane.f32.xlu0 %v804_v56  ;;  %v812_v52 = vadd.f32 %v811_v46, %v10044_v4  ;;  %v1744_v30 = vrot.slane %v1739_v3, %v10050_v40  ;;  %v1748_v31 = vrot.slane %v1739_v3, %v10052_v24 }
 0x151   : > { %v10059_v23 = vrot.slane %v1739_v3, %v10054_v9 }
 0x152   : > { %1756 = vst [vmem:[#allocation15] sm:$0xff] %v1744_v30  ;;  %1757 = vst [vmem:[#allocation15 + $0x8] sm:$0xff] %v1748_v31 }
 0x153   : > { %1759 = vst [vmem:[#allocation15 + $0x18] sm:$0xff] %v1744_v30  ;;  %1760 = vst [vmem:[#allocation15 + $0x20] sm:$0xff] %v1748_v31 }
 0x154   : > { %813 = vadd.xlane.f32.xlu0 %v812_v52  ;;  %1762 = vst [vmem:[#allocation15 + $0x30] sm:$0xff] %v1744_v30  ;;  %1763 = vst [vmem:[#allocation15 + $0x38] sm:$0xff] %v1748_v31 }
 0x155   : > { %1765 = vst [vmem:[#allocation15 + $0x48] sm:$0xff] %v1744_v30  ;;  %1766 = vst [vmem:[#allocation15 + $0x50] sm:$0xff] %v1748_v31 }
 0x156   : > { %1768 = vst [vmem:[#allocation15 + $0x60] sm:$0xff] %v1744_v30  ;;  %1769 = vst [vmem:[#allocation15 + $0x68] sm:$0xff] %v1748_v31 }
 0x157   : > { %1771 = vst [vmem:[#allocation15 + $0x78] sm:$0xff] %v1744_v30  ;;  %1772 = vst [vmem:[#allocation15 + $0x80] sm:$0xff] %v1748_v31 }
 0x158   : > { %1774 = vst [vmem:[#allocation15 + $0x90] sm:$0xff] %v1744_v30  ;;  %1775 = vst [vmem:[#allocation15 + $0x98] sm:$0xff] %v1748_v31 }
 0x159   : > { %1777 = vst [vmem:[#allocation15 + $0xa8] sm:$0xff] %v1744_v30  ;;  %1778 = vst [vmem:[#allocation15 + $0xb0] sm:$0xff] %v1748_v31 }
 0x15a   : > { %1780 = vst [vmem:[#allocation15 + $0xc0] sm:$0xff] %v1744_v30  ;;  %1781 = vst [vmem:[#allocation15 + $0xc8] sm:$0xff] %v1748_v31 }
 0x15b   : > { %1783 = vst [vmem:[#allocation15 + $0xd8] sm:$0xff] %v1744_v30  ;;  %1784 = vst [vmem:[#allocation15 + $0xe0] sm:$0xff] %v1748_v31 }
 0x15c   : > { %1786 = vst [vmem:[#allocation15 + $0xf0] sm:$0xff] %v1744_v30  ;;  %1787 = vst [vmem:[#allocation15 + $0xf8] sm:$0xff] %v1748_v31 }
 0x15d   : > { %1789 = vst [vmem:[#allocation15 + $0x108] sm:$0xff] %v1744_v30  ;;  %1790 = vst [vmem:[#allocation15 + $0x110] sm:$0xff] %v1748_v31 }
 0x15e   : > { %1792 = vst [vmem:[#allocation15 + $0x120] sm:$0xff] %v1744_v30  ;;  %1793 = vst [vmem:[#allocation15 + $0x128] sm:$0xff] %v1748_v31 }
 0x15f   : > { %1795 = vst [vmem:[#allocation15 + $0x138] sm:$0xff] %v1744_v30  ;;  %1796 = vst [vmem:[#allocation15 + $0x140] sm:$0xff] %v1748_v31 }
 0x160   : > { %1798 = vst [vmem:[#allocation15 + $0x150] sm:$0xff] %v1744_v30  ;;  %1799 = vst [vmem:[#allocation15 + $0x158] sm:$0xff] %v1748_v31 }
 0x161   : > { %1801 = vst [vmem:[#allocation15 + $0x168] sm:$0xff] %v1744_v30  ;;  %1802 = vst [vmem:[#allocation15 + $0x170] sm:$0xff] %v1748_v31 }
 0x162   : > { %1804 = vst [vmem:[#allocation15 + $0x180] sm:$0xff] %v1744_v30  ;;  %1805 = vst [vmem:[#allocation15 + $0x188] sm:$0xff] %v1748_v31 }
 0x163   : > { %1807 = vst [vmem:[#allocation15 + $0x198] sm:$0xff] %v1744_v30  ;;  %1808 = vst [vmem:[#allocation15 + $0x1a0] sm:$0xff] %v1748_v31 }
 0x164   : > { %1810 = vst [vmem:[#allocation15 + $0x1b0] sm:$0xff] %v1744_v30  ;;  %1811 = vst [vmem:[#allocation15 + $0x1b8] sm:$0xff] %v1748_v31 }
 0x165   : > { %1813 = vst [vmem:[#allocation15 + $0x1c8] sm:$0xff] %v1744_v30  ;;  %1814 = vst [vmem:[#allocation15 + $0x1d0] sm:$0xff] %v1748_v31 }
 0x166   : > { %1816 = vst [vmem:[#allocation15 + $0x1e0] sm:$0xff] %v1744_v30  ;;  %1817 = vst [vmem:[#allocation15 + $0x1e8] sm:$0xff] %v1748_v31 }
 0x167   : > { %1819 = vst [vmem:[#allocation15 + $0x1f8] sm:$0xff] %v1744_v30  ;;  %1820 = vst [vmem:[#allocation15 + $0x200] sm:$0xff] %v1748_v31 }
 0x168   : > { %1822 = vst [vmem:[#allocation15 + $0x210] sm:$0xff] %v1744_v30  ;;  %1823 = vst [vmem:[#allocation15 + $0x218] sm:$0xff] %v1748_v31 }
 0x169   : > { %1825 = vst [vmem:[#allocation15 + $0x228] sm:$0xff] %v1744_v30  ;;  %1826 = vst [vmem:[#allocation15 + $0x230] sm:$0xff] %v1748_v31 }
 0x16a   : > { %1828 = vst [vmem:[#allocation15 + $0x240] sm:$0xf] %v1744_v30  ;;  %1829 = vst [vmem:[#allocation15 + $0x248] sm:$0xf] %v1748_v31 }
 0x16b   : > { %1758 = vst [vmem:[#allocation15 + $0x10] sm:$0xff] %v10059_v23  ;;  %1761 = vst [vmem:[#allocation15 + $0x28] sm:$0xff] %v10059_v23 }
 0x16c   : > { %1764 = vst [vmem:[#allocation15 + $0x40] sm:$0xff] %v10059_v23  ;;  %1767 = vst [vmem:[#allocation15 + $0x58] sm:$0xff] %v10059_v23 }
 0x16d   : > { %1770 = vst [vmem:[#allocation15 + $0x70] sm:$0xff] %v10059_v23  ;;  %1773 = vst [vmem:[#allocation15 + $0x88] sm:$0xff] %v10059_v23 }
 0x16e   : > { %1776 = vst [vmem:[#allocation15 + $0xa0] sm:$0xff] %v10059_v23  ;;  %1779 = vst [vmem:[#allocation15 + $0xb8] sm:$0xff] %v10059_v23 }
 0x16f   : > { %1782 = vst [vmem:[#allocation15 + $0xd0] sm:$0xff] %v10059_v23  ;;  %1785 = vst [vmem:[#allocation15 + $0xe8] sm:$0xff] %v10059_v23 }
 0x170   : > { %1788 = vst [vmem:[#allocation15 + $0x100] sm:$0xff] %v10059_v23  ;;  %1791 = vst [vmem:[#allocation15 + $0x118] sm:$0xff] %v10059_v23 }
 0x171   : > { %1794 = vst [vmem:[#allocation15 + $0x130] sm:$0xff] %v10059_v23  ;;  %1797 = vst [vmem:[#allocation15 + $0x148] sm:$0xff] %v10059_v23 }
 0x172   : > { %1800 = vst [vmem:[#allocation15 + $0x160] sm:$0xff] %v10059_v23  ;;  %1803 = vst [vmem:[#allocation15 + $0x178] sm:$0xff] %v10059_v23 }
 0x173   : > { %1806 = vst [vmem:[#allocation15 + $0x190] sm:$0xff] %v10059_v23  ;;  %1809 = vst [vmem:[#allocation15 + $0x1a8] sm:$0xff] %v10059_v23 }
 0x174   : > { %1812 = vst [vmem:[#allocation15 + $0x1c0] sm:$0xff] %v10059_v23  ;;  %1815 = vst [vmem:[#allocation15 + $0x1d8] sm:$0xff] %v10059_v23 }
 0x175   : > { %1818 = vst [vmem:[#allocation15 + $0x1f0] sm:$0xff] %v10059_v23  ;;  %1821 = vst [vmem:[#allocation15 + $0x208] sm:$0xff] %v10059_v23 }
 0x176   : > { %1824 = vst [vmem:[#allocation15 + $0x220] sm:$0xff] %v10059_v23  ;;  %1827 = vst [vmem:[#allocation15 + $0x238] sm:$0xff] %v10059_v23 }
 0x177   : > { %1830 = vst [vmem:[#allocation15 + $0x250] sm:$0xf] %v10059_v23 }
 0x1ac   : > { %v726_v47 = vpop.xlane.xlu1 %725 }
 0x1ad   : > { %v825_v33 = vmul.f32 0.0026041667, %v726_v47 }
 0x1ae   : > { %v722_v37 = vpop.xlane.xlu0 %721 }
 0x1af   : > { %v10087_v56 = vsub.f32 %v9822_v6, %v825_v33  ;;  %v10090_v46 = vsub.f32 %v9824_v7, %v825_v33  ;;  %v10093_v52 = vsub.f32 %v9826_v8, %v825_v33  ;;  %v824_v57 = vmul.f32 0.0026041667, %v722_v37 }
 0x1b0   : > { %v730_v62 = vpop.xlane.xlu1 %729 }
 0x1b1   : > { %13056 = vst [vmem:[#allocation54_spill] sm:$0xff] %v10090_v46  ;;  %13057 = vst [vmem:[#allocation55_spill] sm:$0xff] %v10093_v52  ;;  %v10096_v3 = vsub.f32 %v9830_v16, %v824_v57  ;;  %v10099_v30 = vsub.f32 %v9832_v17, %v824_v57  ;;  %v10102_v31 = vsub.f32 %v9834_v18, %v824_v57  ;;  %v826_v23 = vmul.f32 0.0026041667, %v730_v62 }
 0x1b2   : > { %v734_v6 = vpop.xlane.xlu0 %733  ;;  %v927_v7 = vmul.f32 %v10087_v56, %v10087_v56  ;;  %v928_v8 = vmul.f32 %v10090_v46, %v10090_v46  ;;  %v929_v47 = vmul.f32 %v10093_v52, %v10093_v52 }
 0x1b3   : > { %13058 = vst [vmem:[#allocation56_spill] sm:$0xff] %v10099_v30  ;;  %13059 = vst [vmem:[#allocation57_spill] sm:$0xff] %v10102_v31  ;;  %v10111_v16 = vsub.f32 %v9839_v27, %v826_v23  ;;  %v10114_v17 = vsub.f32 %v9841_v28, %v826_v23  ;;  %v10117_v18 = vsub.f32 %v9843_v32, %v826_v23  ;;  %v827_v33 = vmul.f32 0.0026041667, %v734_v6 }
 0x1b4   : > { %v738_v37 = vpop.xlane.xlu1 %737  ;;  %v1003_v57 = vadd.f32 %v928_v8, %v927_v7  ;;  %v924_v62 = vmul.f32 %v10096_v3, %v10096_v3  ;;  %v925_v46 = vmul.f32 %v10099_v30, %v10099_v30  ;;  %v926_v52 = vmul.f32 %v10102_v31, %v10102_v31 }
 0x1b5   : > { %v10126_v27 = vsub.f32 %v9848_v38, %v827_v33  ;;  %v10129_v28 = vsub.f32 %v9850_v39, %v827_v33  ;;  %v10132_v32 = vsub.f32 %v9852_v43, %v827_v33  ;;  %v828_v23 = vmul.f32 0.0026041667, %v738_v37 }
 0x1b6   : > { %v1004_v6 = vadd.f32 %v1003_v57, %v929_v47  ;;  %v999_v7 = vadd.f32 %v925_v46, %v924_v62  ;;  %v930_v8 = vmul.f32 %v10111_v16, %v10111_v16  ;;  %v931_v30 = vmul.f32 %v10114_v17, %v10114_v17 }
 0x1b7   : > { %13060 = vst [vmem:[#allocation58_spill] sm:$0xff] %v10126_v27  ;;  %13061 = vst [vmem:[#allocation59_spill] sm:$0xff] %v10129_v28  ;;  %v10139_v31 = vsub.f32 %v9857_v49, %v828_v23  ;;  %v10142_v38 = vsub.f32 %v9859_v50, %v828_v23  ;;  %v10145_v39 = vsub.f32 %v9861_v54, %v828_v23  ;;  %v822_v43 = vpop.xlane.xlu0 %821 }
 0x1b8   : > { %13062 = vst [vmem:[#allocation60_spill] sm:$0xff] %v10132_v32  ;;  %v10147_v33 = vmul.f32 0.0026041667, %v822_v43  ;;  %1005 = vadd.xlane.f32.xlu0 %v1004_v6  ;;  %v1000_v46 = vadd.f32 %v999_v7, %v926_v52  ;;  %v1007_v47 = vadd.f32 %v931_v30, %v930_v8  ;;  %v933_v37 = vmul.f32 %v10126_v27, %v10126_v27 }
 0x1b9   : > { %13063 = vst [vmem:[#allocation61_spill] sm:$0xff] %v10139_v31  ;;  %13064 = vst [vmem:[#allocation62_spill] sm:$0xff] %v10142_v38  ;;  %v746_v57 = vpop.xlane.xlu1 %745  ;;  %v932_v49 = vmul.f32 %v10117_v18, %v10117_v18  ;;  %v934_v50 = vmul.f32 %v10129_v28, %v10129_v28  ;;  %v936_v54 = vmul.f32 %v10139_v31, %v10139_v31 }
 0x1ba   : > { %v937_v62 = vmul.f32 %v10142_v38, %v10142_v38  ;;  %v10161_v52 = vsub.f32 %v9866_v60, %v10147_v33  ;;  %v10165_v30 = vsub.f32 %v9868_v61, %v10147_v33  ;;  %1001 = vadd.xlane.f32.xlu1 %v1000_v46  ;;  %v830_v23 = vmul.f32 0.0026041667, %v746_v57 }
 0x1bb   : > { %v935_v6 = vmul.f32 %v10132_v32, %v10132_v32  ;;  %v742_v7 = vpop.xlane.xlu0 %741  ;;  %v1008_v8 = vadd.f32 %v1007_v47, %v932_v49  ;;  %v1011_v43 = vadd.f32 %v934_v50, %v933_v37  ;;  %v938_v31 = vmul.f32 %v10145_v39, %v10145_v39 }
 0x1bc   : > { %13065 = vst [vmem:[#allocation63_spill] sm:$0xff] %v10161_v52  ;;  %13066 = vst [vmem:[#allocation64_spill] sm:$0xff] %v10165_v30  ;;  %v1015_v38 = vadd.f32 %v937_v62, %v936_v54  ;;  %v10172_v28 = vsub.f32 %v9877_v11, %v830_v23  ;;  %v10175_v60 = vsub.f32 %v9881_v20, %v830_v23  ;;  %v829_v46 = vmul.f32 0.0026041667, %v742_v7 }
 0x1bd   : > { %v10178_v61 = vsub.f32 %v9883_v21, %v830_v23  ;;  %v1012_v57 = vadd.f32 %v1011_v43, %v935_v6  ;;  %v754_v27 = vpop.xlane.xlu1 %753 }
 0x1be   : > { %v1016_v32 = vadd.f32 %v1015_v38, %v938_v31  ;;  %v10181_v47 = vsub.f32 %v9885_v25, %v829_v46  ;;  %v10184_v37 = vsub.f32 %v9887_v26, %v829_v46  ;;  %v10187_v49 = vsub.f32 %v9889_v29, %v829_v46  ;;  %1009 = vadd.xlane.f32.xlu1 %v1008_v8 }
 0x1bf   : > { %v832_v11 = vmul.f32 0.0026041667, %v754_v27  ;;  %1013 = vadd.xlane.f32.xlu0 %v1012_v57  ;;  %v750_v20 = vpop.xlane.xlu0 %749  ;;  %v942_v21 = vmul.f32 %v10172_v28, %v10172_v28  ;;  %v943_v50 = vmul.f32 %v10175_v60, %v10175_v60  ;;  %v10195_v25 = vmul.f32 %v10161_v52, %v10161_v52  ;;  %v13083_v52 = vld [vmem:[#allocation31_spill] sm:$0xff] }
 0x1c0   : > { %v10199_v26 = vmul.f32 %v10165_v30, %v10165_v30  ;;  %v831_v27 = vmul.f32 0.0026041667, %v750_v20  ;;  %v944_v38 = vmul.f32 %v10178_v61, %v10178_v61  ;;  %v939_v6 = vmul.f32 %v10181_v47, %v10181_v47  ;;  %v13081_v30 = vld [vmem:[#allocation30_spill] sm:$0xff] }
 0x1c1   : > { %v10202_v29 = vsub.f32 %v9895_v42, %v832_v11  ;;  %v10205_v31 = vsub.f32 %v9897_v44, %v832_v11  ;;  %v10210_v54 = vsub.f32 %v9899_v45, %v832_v11  ;;  %v762_v62 = vpop.xlane.xlu1 %761  ;;  %v1023_v23 = vadd.f32 %v943_v50, %v942_v21 }
 0x1c2   : > { %v940_v7 = vmul.f32 %v10184_v37, %v10184_v37  ;;  %v10217_v42 = vsub.f32 %v9905_v58, %v831_v27  ;;  %v10220_v44 = vsub.f32 %v9907_v59, %v831_v27  ;;  %1017 = vadd.xlane.f32.xlu1 %v1016_v32  ;;  %v834_v8 = vmul.f32 0.0026041667, %v762_v62 }
 0x1c3   : > { %v941_v45 = vmul.f32 %v10187_v49, %v10187_v49  ;;  %v758_v43 = vpop.xlane.xlu0 %757  ;;  %v1024_v46 = vadd.f32 %v1023_v23, %v944_v38  ;;  %v948_v11 = vmul.f32 %v10202_v29, %v10202_v29  ;;  %v949_v20 = vmul.f32 %v10205_v31, %v10205_v31 }
 0x1c4   : > { %v1019_v57 = vadd.f32 %v940_v7, %v939_v6  ;;  %v10229_v58 = vsub.f32 %v9909_v2, %v831_v27  ;;  %v10232_v59 = vsub.f32 %v9914_v12, %v834_v8  ;;  %v10235_v32 = vsub.f32 %v9916_v13, %v834_v8 }
 0x1c5   : > { %v833_v21 = vmul.f32 0.0026041667, %v758_v43  ;;  %v770_v62 = vpop.xlane.xlu1 %769  ;;  %v950_v38 = vmul.f32 %v10210_v54, %v10210_v54  ;;  %v1031_v23 = vadd.f32 %v949_v20, %v948_v11  ;;  %v945_v6 = vmul.f32 %v10217_v42, %v10217_v42 }
 0x1c6   : > { %13067 = vst [vmem:[#allocation65_spill] sm:$0xff] %v10229_v58  ;;  %13068 = vst [vmem:[#allocation66_spill] sm:$0xff] %v10232_v59  ;;  %v1020_v50 = vadd.f32 %v1019_v57, %v941_v45  ;;  %v10242_v7 = vsub.f32 %v9918_v22, %v834_v8  ;;  %1025 = vadd.xlane.f32.xlu1 %v1024_v46  ;;  %v836_v13 = vmul.f32 0.0026041667, %v770_v62 }
 0x1c7   : > { %13069 = vst [vmem:[#allocation67_spill] sm:$0xff] %v10235_v32  ;;  %v10245_v2 = vsub.f32 %v9923_v34, %v833_v21  ;;  %v10248_v12 = vsub.f32 %v9925_v35, %v833_v21  ;;  %v10251_v27 = vsub.f32 %v9927_v41, %v833_v21  ;;  %v766_v45 = vpop.xlane.xlu0 %765  ;;  %v1032_v43 = vadd.f32 %v1031_v23, %v950_v38  ;;  %v13079_v38 = vld [vmem:[#allocation29_spill] sm:$0xff] }
 0x1c8   : > { %13070 = vst [vmem:[#allocation68_spill] sm:$0xff] %v10242_v7  ;;  %1021 = vadd.xlane.f32.xlu0 %v1020_v50  ;;  %v946_v57 = vmul.f32 %v10220_v44, %v10220_v44  ;;  %v954_v22 = vmul.f32 %v10232_v59, %v10232_v59  ;;  %v10258_v34 = vsub.f32 %v9932_v53, %v836_v13  ;;  %v835_v8 = vmul.f32 0.0026041667, %v766_v45 }
 0x1c9   : > { %13071 = vst [vmem:[#allocation69_spill] sm:$0xff] %v10245_v2  ;;  %13072 = vst [vmem:[#allocation70_spill] sm:$0xff] %v10248_v12  ;;  %v10261_v35 = vsub.f32 %v9934_v55, %v836_v13  ;;  %v947_v41 = vmul.f32 %v10229_v58, %v10229_v58  ;;  %v10266_v46 = vsub.f32 %v9936_v63, %v836_v13  ;;  %v778_v20 = vpop.xlane.xlu1 %777 }
 0x1ca   : > { %13073 = vst [vmem:[#allocation71_spill] sm:$0xff] %v10251_v27  ;;  %13074 = vst [vmem:[#allocation72_spill] sm:$0xff] %v10258_v34  ;;  %v1027_v11 = vadd.f32 %v946_v57, %v945_v6  ;;  %v955_v21 = vmul.f32 %v10235_v32, %v10235_v32  ;;  %v951_v50 = vmul.f32 %v10245_v2, %v10245_v2  ;;  %1033 = vadd.xlane.f32.xlu1 %v1032_v43 }
 0x1cb   : > { %13075 = vst [vmem:[#allocation73_spill] sm:$0xff] %v10261_v35  ;;  %13076 = vst [vmem:[#allocation74_spill] sm:$0xff] %v10266_v46  ;;  %v10273_v53 = vsub.f32 %v9941_v10, %v835_v8  ;;  %v10276_v55 = vsub.f32 %v9943_v14, %v835_v8  ;;  %v838_v62 = vmul.f32 0.0026041667, %v778_v20  ;;  %v956_v63 = vmul.f32 %v10242_v7, %v10242_v7  ;;  %v774_v13 = vpop.xlane.xlu0 %773 }
 0x1cc   : > { %v10281_v23 = vsub.f32 %v13079_v38, %v835_v8  ;;  %v1028_v6 = vadd.f32 %v1027_v11, %v947_v41  ;;  %v1039_v45 = vadd.f32 %v955_v21, %v954_v22  ;;  %v952_v57 = vmul.f32 %v10248_v12, %v10248_v12  ;;  %v13085_v11 = vld [vmem:[#allocation32_spill] sm:$0xff]  ;;  %v13087_v21 = vld [vmem:[#allocation33_spill] sm:$0xff] }
 0x1cd   : > { %13077 = vst [vmem:[#allocation75_spill] sm:$0xff] %v10273_v53  ;;  %13078 = vst [vmem:[#allocation76_spill] sm:$0xff] %v10276_v55  ;;  %v10286_v10 = vsub.f32 %v13081_v30, %v838_v62  ;;  %v10289_v14 = vsub.f32 %v13083_v52, %v838_v62  ;;  %v837_v43 = vmul.f32 0.0026041667, %v774_v13  ;;  %v953_v20 = vmul.f32 %v10251_v27, %v10251_v27  ;;  %v786_v38 = vpop.xlane.xlu1 %785  ;;  %v13089_v13 = vld [vmem:[#allocation34_spill] sm:$0xff] }
 0x1ce   : > { %13080 = vst [vmem:[#allocation29_spill] sm:$0xff] %v10281_v23  ;;  %1029 = vadd.xlane.f32.xlu0 %v1028_v6  ;;  %v1040_v2 = vadd.f32 %v1039_v45, %v956_v63  ;;  %v1035_v8 = vadd.f32 %v952_v57, %v951_v50  ;;  %v960_v22 = vmul.f32 %v10258_v34, %v10258_v34  ;;  %v840_v27 = vmul.f32 0.0026041667, %v786_v38  ;;  %v13094_v34 = vld [vmem:[#allocation37_spill] sm:$0xff] }
 0x1cf   : > { %13082 = vst [vmem:[#allocation30_spill] sm:$0xff] %v10286_v10  ;;  %13084 = vst [vmem:[#allocation31_spill] sm:$0xff] %v10289_v14  ;;  %v961_v41 = vmul.f32 %v10261_v35, %v10261_v35  ;;  %v10298_v30 = vsub.f32 %v13085_v11, %v838_v62  ;;  %v10301_v52 = vsub.f32 %v13087_v21, %v837_v43  ;;  %v782_v50 = vpop.xlane.xlu0 %781  ;;  %v13091_v35 = vld [vmem:[#allocation35_spill] sm:$0xff]  ;;  %v13092_v11 = vld [vmem:[#allocation36_spill] sm:$0xff] }
 0x1d0   : > { %v10304_v12 = vsub.f32 %v13089_v13, %v837_v43  ;;  %1041 = vadd.xlane.f32.xlu1 %v1040_v2  ;;  %v1036_v63 = vadd.f32 %v1035_v8, %v953_v20  ;;  %v962_v6 = vmul.f32 %v10266_v46, %v10266_v46  ;;  %v957_v57 = vmul.f32 %v10273_v53, %v10273_v53  ;;  %v13096_v2 = vld [vmem:[#allocation38_spill] sm:$0xff] }
 0x1d1   : > { %13086 = vst [vmem:[#allocation32_spill] sm:$0xff] %v10298_v30  ;;  %13088 = vst [vmem:[#allocation33_spill] sm:$0xff] %v10301_v52  ;;  %v1047_v45 = vadd.f32 %v961_v41, %v960_v22  ;;  %v10311_v62 = vsub.f32 %v13091_v35, %v837_v43  ;;  %v10314_v21 = vsub.f32 %v13092_v11, %v840_v27  ;;  %v839_v38 = vmul.f32 0.0026041667, %v782_v50  ;;  %v794_v41 = vpop.xlane.xlu1 %793  ;;  %v13097_v43 = vld [vmem:[#allocation39_spill] sm:$0xff]  ;;  %v13099_v11 = vld [vmem:[#allocation40_spill] sm:$0xff] }
 0x1d2   : > { %13090 = vst [vmem:[#allocation34_spill] sm:$0xff] %v10304_v12  ;;  %v10317_v13 = vsub.f32 %v13094_v34, %v840_v27  ;;  %1037 = vadd.xlane.f32.xlu0 %v1036_v63  ;;  %v10320_v20 = vsub.f32 %v13096_v2, %v840_v27  ;;  %v958_v22 = vmul.f32 %v10276_v55, %v10276_v55  ;;  %v842_v63 = vmul.f32 0.0026041667, %v794_v41  ;;  %v13100_v27 = vld [vmem:[#allocation41_spill] sm:$0xff] }
 0x1d3   : > { %13093 = vst [vmem:[#allocation35_spill] sm:$0xff] %v10314_v21  ;;  %v1048_v8 = vadd.f32 %v1047_v45, %v962_v6  ;;  %v966_v35 = vmul.f32 %v10286_v10, %v10286_v10  ;;  %v10327_v53 = vsub.f32 %v13097_v43, %v839_v38  ;;  %v10330_v46 = vsub.f32 %v13099_v11, %v839_v38  ;;  %v13101_v10 = vld [vmem:[#allocation42_spill] sm:$0xff]  ;;  %v13102_v11 = vld [vmem:[#allocation43_spill] sm:$0xff] }
 0x1d4   : > { %13095 = vst [vmem:[#allocation36_spill] sm:$0xff] %v10317_v13  ;;  %v959_v34 = vmul.f32 %v10281_v23, %v10281_v23  ;;  %v10335_v50 = vsub.f32 %v13100_v27, %v839_v38  ;;  %v1043_v6 = vadd.f32 %v958_v22, %v957_v57  ;;  %v790_v45 = vpop.xlane.xlu0 %789  ;;  %v967_v2 = vmul.f32 %v10289_v14, %v10289_v14 }
 0x1d5   : > { %13098 = vst [vmem:[#allocation37_spill] sm:$0xff] %v10327_v53  ;;  %1049 = vadd.xlane.f32.xlu1 %v1048_v8  ;;  %v963_v43 = vmul.f32 %v10301_v52, %v10301_v52  ;;  %v10342_v55 = vsub.f32 %v13101_v10, %v842_v63  ;;  %v10345_v7 = vsub.f32 %v13102_v11, %v842_v63  ;;  %v841_v23 = vmul.f32 0.0026041667, %v790_v45  ;;  %v13103_v8 = vld [vmem:[#allocation44_spill] sm:$0xff]  ;;  %v13104_v52 = vld [vmem:[#allocation45_spill] sm:$0xff]  ;;  %v13105_v10 = vld [vmem:[#allocation46_spill] sm:$0xff] }
 0x1d6   : > { %v968_v38 = vmul.f32 %v10298_v30, %v10298_v30  ;;  %v1044_v41 = vadd.f32 %v1043_v6, %v959_v34  ;;  %v10350_v57 = vsub.f32 %v13103_v8, %v842_v63  ;;  %v1055_v22 = vadd.f32 %v967_v2, %v966_v35  ;;  %v802_v14 = vpop.xlane.xlu1 %801  ;;  %v13106_v8 = vld [vmem:[#allocation47_spill] sm:$0xff]  ;;  %v13108_v30 = vld [vmem:[#allocation49_spill] sm:$0xff] }
 0x1d7   : > { %v964_v27 = vmul.f32 %v10304_v12, %v10304_v12  ;;  %v10355_v32 = vsub.f32 %v13104_v52, %v841_v23  ;;  %v10358_v59 = vsub.f32 %v13105_v10, %v841_v23  ;;  %v965_v45 = vmul.f32 %v10311_v62, %v10311_v62  ;;  %v13107_v12 = vld [vmem:[#allocation48_spill] sm:$0xff] }
 0x1d8   : > { %v844_v11 = vmul.f32 0.0026041667, %v802_v14  ;;  %1045 = vadd.xlane.f32.xlu0 %v1044_v41  ;;  %v1056_v34 = vadd.f32 %v1055_v22, %v968_v38  ;;  %v972_v35 = vmul.f32 %v10314_v21, %v10314_v21  ;;  %v973_v2 = vmul.f32 %v10317_v13, %v10317_v13  ;;  %v13110_v13 = vld [vmem:[#allocation50_spill] sm:$0xff]  ;;  %v13113_v21 = vld [vmem:[#allocation52_spill] sm:$0xff] }
 0x1d9   : > { %v1051_v6 = vadd.f32 %v964_v27, %v963_v43  ;;  %v798_v63 = vpop.xlane.xlu0 %797  ;;  %v10367_v52 = vsub.f32 %v13106_v8, %v841_v23  ;;  %v974_v43 = vmul.f32 %v10320_v20, %v10320_v20  ;;  %v969_v22 = vmul.f32 %v10327_v53, %v10327_v53  ;;  %v13111_v8 = vld [vmem:[#allocation51_spill] sm:$0xff] }
 0x1da   : > { %v10370_v10 = vsub.f32 %v13107_v12, %v844_v11  ;;  %v10373_v58 = vsub.f32 %v13108_v30, %v844_v11  ;;  %v843_v14 = vmul.f32 0.0026041667, %v798_v63  ;;  %1057 = vadd.xlane.f32.xlu1 %v1056_v34  ;;  %v1063_v41 = vadd.f32 %v973_v2, %v972_v35  ;;  %v810_v27 = vpop.xlane.xlu1 %809  ;;  %v13115_v34 = vld [vmem:[#allocation53_spill] sm:$0xff] }
 0x1db   : > { %v1052_v38 = vadd.f32 %v1051_v6, %v965_v45  ;;  %v10380_v23 = vsub.f32 %v13110_v13, %v844_v11  ;;  %v970_v45 = vmul.f32 %v10330_v46, %v10330_v46  ;;  %v846_v35 = vmul.f32 0.0026041667, %v810_v27 }
 0x1dc   : > { %13109 = vst [vmem:[#allocation38_spill] sm:$0xff] %v10373_v58  ;;  %v10383_v12 = vsub.f32 %v13111_v8, %v843_v14  ;;  %v10386_v30 = vsub.f32 %v13113_v21, %v843_v14  ;;  %v10391_v6 = vsub.f32 %v13115_v34, %v843_v14  ;;  %v1064_v63 = vadd.f32 %v1063_v41, %v974_v43 }
 0x1dd   : > { %1053 = vadd.xlane.f32.xlu0 %v1052_v38  ;;  %v806_v2 = vpop.xlane.xlu0 %805  ;;  %v978_v13 = vmul.f32 %v10342_v55, %v10342_v55  ;;  %v971_v11 = vmul.f32 %v10335_v50, %v10335_v50  ;;  %v1059_v8 = vadd.f32 %v970_v45, %v969_v22  ;;  %v979_v21 = vmul.f32 %v10345_v7, %v10345_v7 }
 0x1de   : > { %13112 = vst [vmem:[#allocation39_spill] sm:$0xff] %v10383_v12  ;;  %13114 = vst [vmem:[#allocation40_spill] sm:$0xff] %v10386_v30  ;;  %v845_v53 = vmul.f32 0.0026041667, %v806_v2  ;;  %1065 = vadd.xlane.f32.xlu1 %v1064_v63  ;;  %v10400_v38 = vsub.f32 %v10022_v15, %v846_v35  ;;  %v10403_v14 = vsub.f32 %v10024_v36, %v846_v35 }
 0x1df   : > { %v980_v43 = vmul.f32 %v10350_v57, %v10350_v57  ;;  %v975_v41 = vmul.f32 %v10355_v32, %v10355_v32  ;;  %v1060_v27 = vadd.f32 %v1059_v8, %v971_v11  ;;  %v10410_v22 = vsub.f32 %v10026_v51, %v846_v35 }
 0x1e0   : > { %v10413_v45 = vsub.f32 %v10031_v48, %v845_v53  ;;  %v10416_v34 = vsub.f32 %v10033_v0, %v845_v53  ;;  %v10419_v15 = vsub.f32 %v10035_v5, %v845_v53  ;;  %v1071_v36 = vadd.f32 %v979_v21, %v978_v13 }
 0x1e1   : > { %v976_v63 = vmul.f32 %v10358_v59, %v10358_v59  ;;  %v814_v2 = vpop.xlane.xlu0 %813  ;;  %v984_v11 = vmul.f32 %v10370_v10, %v10370_v10  ;;  %1061 = vadd.xlane.f32.xlu0 %v1060_v27  ;;  %v977_v51 = vmul.f32 %v10367_v52, %v10367_v52  ;;  %v985_v0 = vmul.f32 %v10373_v58, %v10373_v58 }
 0x1e2   : > { %v847_v48 = vmul.f32 0.0026041667, %v814_v2  ;;  %v981_v5 = vmul.f32 %v10383_v12, %v10383_v12  ;;  %v1072_v53 = vadd.f32 %v1071_v36, %v980_v43  ;;  %v986_v13 = vmul.f32 %v10380_v23, %v10380_v23 }
 0x1e3   : > { %v1067_v35 = vadd.f32 %v976_v63, %v975_v41  ;;  %v982_v8 = vmul.f32 %v10386_v30, %v10386_v30  ;;  %v1079_v2 = vadd.f32 %v985_v0, %v984_v11  ;;  %v983_v58 = vmul.f32 %v10391_v6, %v10391_v6  ;;  %v13118_v63 = vld [vmem:[#allocation28_spill] sm:$0xff] }
 0x1e4   : > { %v10436_v21 = vsub.f32 %v10040_v19, %v847_v48  ;;  %v10439_v27 = vsub.f32 %v10042_v1, %v847_v48  ;;  %1073 = vadd.xlane.f32.xlu1 %v1072_v53  ;;  %v990_v41 = vmul.f32 %v10400_v38, %v10400_v38  ;;  %v991_v36 = vmul.f32 %v10403_v14, %v10403_v14 }
 0x1e5   : > { %v1068_v12 = vadd.f32 %v1067_v35, %v977_v51  ;;  %v1075_v43 = vadd.f32 %v982_v8, %v981_v5  ;;  %v10449_v19 = vsub.f32 %v13118_v63, %v10147_v33  ;;  %v1080_v30 = vadd.f32 %v1079_v2, %v986_v13 }
 0x1e6   : > { %13116 = vst [vmem:[#allocation41_spill] sm:$0xff] %v10436_v21  ;;  %13117 = vst [vmem:[#allocation42_spill] sm:$0xff] %v10439_v27  ;;  %v987_v1 = vmul.f32 %v10413_v45, %v10413_v45  ;;  %v988_v11 = vmul.f32 %v10416_v34, %v10416_v34  ;;  %v992_v0 = vmul.f32 %v10410_v22, %v10410_v22  ;;  %v1095_v35 = vsel %vm815_vm0, %v10195_v25, 0.0 }
 0x1e7   : > { %13119 = vst [vmem:[#allocation43_spill] sm:$0xff] %v10449_v19  ;;  %1069 = vadd.xlane.f32.xlu0 %v1068_v12  ;;  %v1076_v51 = vadd.f32 %v1075_v43, %v983_v58  ;;  %v1087_v5 = vadd.f32 %v991_v36, %v990_v41  ;;  %v1096_v33 = vsel %vm815_vm0, %v10199_v26, 0.0  ;;  %v993_v13 = vmul.f32 %v10436_v21, %v10436_v21  ;;  %v13125_v21 = vld [vmem:[#allocation58_spill] sm:$0xff] }
 0x1e8   : > { %v1083_v53 = vadd.f32 %v988_v11, %v987_v1  ;;  %v10464_v8 = vsub.f32 %v10044_v4, %v847_v48  ;;  %1081 = vadd.xlane.f32.xlu1 %v1080_v30  ;;  %v989_v58 = vmul.f32 %v10419_v15, %v10419_v15  ;;  %v994_v2 = vmul.f32 %v10439_v27, %v10439_v27 }
 0x1e9   : > { %v1088_v12 = vadd.f32 %v1087_v5, %v992_v0  ;;  %v998_v25 = vmul.f32 %v10449_v19, %v10449_v19  ;;  %v1097_v26 = vadd.f32 %v1096_v33, %v1095_v35 }
 0x1ea   : > { %13120 = vst [vmem:[#allocation44_spill] sm:$0xff] %v10464_v8  ;;  %v1084_v43 = vadd.f32 %v1083_v53, %v989_v58  ;;  %v1091_v41 = vadd.f32 %v994_v2, %v993_v13  ;;  %v995_v4 = vmul.f32 %v10464_v8, %v10464_v8 }
 0x1eb   : > { %1077 = vadd.xlane.f32.xlu0 %v1076_v51  ;;  %v1098_v30 = vsel %vm815_vm0, %v998_v25, 0.0  ;;  %v1252_v25 = vld [vmem:[#allocation8] sm:$0x7] }
 0x1ec   : > { %1089 = vadd.xlane.f32.xlu1 %v1088_v12  ;;  %v1099_v48 = vadd.f32 %v1098_v30, %v1097_v26  ;;  %v1092_v36 = vadd.f32 %v1091_v41, %v995_v4  ;;  %v1344_v26 = vld [vmem:[#allocation9] sm:$0x7]  ;;  %v10476_v4 = vrot.slane %v1252_v25, %v10050_v40  ;;  %v10479_v30 = vrot.slane %v1252_v25, %v10052_v24 }
 0x1ef   : > { %1085 = vadd.xlane.f32.xlu0 %v1084_v43 }
 0x1f0   : > { %1100 = vadd.xlane.f32.xlu1 %v1099_v48 }
 0x1f3   : > { %1093 = vadd.xlane.f32.xlu0 %v1092_v36 }
 0x245   : > { %v1006_v63 = vpop.xlane.xlu0 %1005 }
 0x246   : > { %v1103_v1 = vmul.f32 0.0026041667, %v1006_v63  ;;  %v10482_v63 = vrot.slane %v1252_v25, %v10054_v9 }
 0x247   : > { %v1002_v11 = vpop.xlane.xlu1 %1001 }
 0x248   : > { %v1102_v0 = vmul.f32 0.0026041667, %v1002_v11  ;;  %v1128_v5 = vadd.f32 1e-05, %v1103_v1  ;;  %v10485_v1 = vrot.slane %v1344_v26, %v10050_v40 }
 0x24a   : > { %v1127_v51 = vadd.f32 1e-05, %v1102_v0  ;;  %8287 = vrsqrt.f32 %v1128_v5 }
 0x24b   : > { %v1010_v53 = vpop.xlane.xlu1 %1009 }
 0x24c   : > { %8289 = vrsqrt.f32 %v1127_v51  ;;  %v1104_v35 = vmul.f32 0.0026041667, %v1010_v53  ;;  %v1014_v33 = vpop.xlane.xlu0 %1013  ;;  %v13121_v51 = vld [vmem:[#allocation54_spill] sm:$0xff] }
 0x24d   : > { %v1105_v13 = vmul.f32 0.0026041667, %v1014_v33 }
 0x24e   : > { %v1129_v12 = vadd.f32 1e-05, %v1104_v35  ;;  %v13122_v35 = vld [vmem:[#allocation55_spill] sm:$0xff] }
 0x24f   : > { %v1130_v58 = vadd.f32 1e-05, %v1105_v13  ;;  %v1018_v2 = vpop.xlane.xlu1 %1017 }
 0x250   : > { %8291 = vrsqrt.f32 %v1129_v12  ;;  %v1106_v43 = vmul.f32 0.0026041667, %v1018_v2  ;;  %v10494_v2 = vrot.slane %v1344_v26, %v10054_v9 }
 0x251   : > { %8293 = vrsqrt.f32 %v1130_v58  ;;  %v10491_v58 = vrot.slane %v1344_v26, %v10052_v24 }
 0x252   : > { %v1131_v41 = vadd.f32 1e-05, %v1106_v43  ;;  %v13123_v43 = vld [vmem:[#allocation56_spill] sm:$0xff] }
 0x253   : > { %v1026_v48 = vpop.xlane.xlu1 %1025 }
 0x254   : > { %v8288_v36 = vpop.eup %8287  ;;  %8295 = vrsqrt.f32 %v1131_v41  ;;  %v1108_v11 = vmul.f32 0.0026041667, %v1026_v48  ;;  %v13124_v48 = vld [vmem:[#allocation57_spill] sm:$0xff] }
 0x255   : > { %v1022_v0 = vpop.xlane.xlu0 %1021  ;;  %v1180_v5 = vmul.f32 %v8288_v36, %v10087_v56  ;;  %v1181_v53 = vmul.f32 %v8288_v36, %v13121_v51  ;;  %v1182_v33 = vmul.f32 %v8288_v36, %v13122_v35 }
 0x256   : > { %v1107_v13 = vmul.f32 0.0026041667, %v1022_v0  ;;  %v8290_v12 = vpop.eup %8289  ;;  %v1133_v25 = vadd.f32 1e-05, %v1108_v11 }
 0x257   : > { %v1177_v40 = vmul.f32 %v8290_v12, %v10096_v3  ;;  %v1178_v41 = vmul.f32 %v8290_v12, %v13123_v43  ;;  %v1179_v8 = vmul.f32 %v8290_v12, %v13124_v48  ;;  %v1272_v56 = vmul.f32 %v10476_v4, %v1180_v5  ;;  %v1034_v51 = vpop.xlane.xlu1 %1033 }
 0x258   : > { %v1273_v36 = vmul.f32 %v10479_v30, %v1181_v53  ;;  %v1274_v0 = vmul.f32 %v10482_v63, %v1182_v33  ;;  %8297 = vrsqrt.f32 %v1133_v25  ;;  %v1132_v24 = vadd.f32 1e-05, %v1107_v13 }
 0x259   : > { %v1269_v35 = vmul.f32 %v10476_v4, %v1177_v40  ;;  %v1270_v9 = vmul.f32 %v10479_v30, %v1178_v41  ;;  %v1271_v26 = vmul.f32 %v10482_v63, %v1179_v8  ;;  %v1364_v3 = vadd.f32 %v10485_v1, %v1272_v56 }
 0x25a   : > { %v8292_v11 = vpop.eup %8291  ;;  %v1365_v12 = vadd.f32 %v10491_v58, %v1273_v36  ;;  %v1366_v5 = vadd.f32 %v10494_v2, %v1274_v0  ;;  %8299 = vrsqrt.f32 %v1132_v24  ;;  %v10508_v43 = vmul.f32 0.0026041667, %v1034_v51 }
 0x25b   : > { %v10510_v53 = vpop.xlane.xlu0 %1029  ;;  %v8294_v33 = vpop.eup %8293  ;;  %v1361_v13 = vadd.f32 %v10485_v1, %v1269_v35  ;;  %v1362_v25 = vadd.f32 %v10491_v58, %v1270_v9  ;;  %v1363_v40 = vadd.f32 %v10494_v2, %v1271_v26  ;;  %v1183_v8 = vmul.f32 %v8292_v11, %v10111_v16  ;;  %v13126_v26 = vld [vmem:[#allocation59_spill] sm:$0xff] }
 0x25c   : > { %v7417_v41 = vpack.c.bf16 %v1365_v12, %v1364_v3  ;;  %v7418_v48 = vpack.c.bf16 %v1366_v5, %v1366_v5  ;;  %v1184_v56 = vmul.f32 %v8292_v11, %v10114_v17  ;;  %v1185_v36 = vmul.f32 %v8292_v11, %v10117_v18  ;;  %v13127_v17 = vld [vmem:[#allocation60_spill] sm:$0xff] }
 0x25d   : > { %v10518_v0 = vpop.xlane.xlu1 %1041  ;;  %v7415_v51 = vpack.c.bf16 %v1362_v25, %v1361_v13  ;;  %v7416_v24 = vpack.c.bf16 %v1363_v40, %v1363_v40  ;;  %v1275_v27 = vmul.f32 %v10476_v4, %v1183_v8  ;;  %v1186_v35 = vmul.f32 %v8294_v33, %v13125_v21  ;;  %v13128_v21 = vld [vmem:[#allocation61_spill] sm:$0xff]  ;;  %v13129_v25 = vld [vmem:[#allocation62_spill] sm:$0xff] }
 0x25e   : > { %v8296_v19 = vpop.eup %8295  ;;  %1691 = vst [vmem:[#allocation2 + $0xc] sm:$0xff] %v7417_v41  ;;  %1692 = vst [vmem:[#allocation2 + $0x14] sm:$0xf] %v7418_v48  ;;  %v1276_v9 = vmul.f32 %v10479_v30, %v1184_v56  ;;  %v1277_v16 = vmul.f32 %v10482_v63, %v1185_v36  ;;  %v1187_v3 = vmul.f32 %v8294_v33, %v13126_v26 }
 0x25f   : > { %v1188_v12 = vmul.f32 %v8294_v33, %v13127_v17  ;;  %v10526_v18 = vpop.xlane.xlu0 %1037  ;;  %1689 = vst [vmem:[#allocation2] sm:$0xff] %v7415_v51  ;;  %1690 = vst [vmem:[#allocation2 + $0x8] sm:$0xf] %v7416_v24  ;;  %v1367_v11 = vadd.f32 %v10485_v1, %v1275_v27  ;;  %v1278_v5 = vmul.f32 %v10476_v4, %v1186_v35 }
 0x260   : > { %v1189_v13 = vmul.f32 %v8296_v19, %v13128_v21  ;;  %v1190_v40 = vmul.f32 %v8296_v19, %v13129_v25  ;;  %v1368_v8 = vadd.f32 %v10491_v58, %v1276_v9  ;;  %v1369_v41 = vadd.f32 %v10494_v2, %v1277_v16 }
 0x261   : > { %v1279_v48 = vmul.f32 %v10479_v30, %v1187_v3  ;;  %v1280_v33 = vmul.f32 %v10482_v63, %v1188_v12  ;;  %v1370_v36 = vadd.f32 %v10485_v1, %v1278_v5  ;;  %v1191_v51 = vmul.f32 %v8296_v19, %v10145_v39 }
 0x262   : > { %v1050_v56 = vpop.xlane.xlu1 %1049  ;;  %v1281_v27 = vmul.f32 %v10476_v4, %v1189_v13  ;;  %v1282_v24 = vmul.f32 %v10479_v30, %v1190_v40  ;;  %v8298_v35 = vpop.eup %8297  ;;  %v7419_v26 = vpack.c.bf16 %v1368_v8, %v1367_v11  ;;  %v7420_v17 = vpack.c.bf16 %v1369_v41, %v1369_v41 }
 0x263   : > { %v1371_v9 = vadd.f32 %v10491_v58, %v1279_v48  ;;  %v1372_v16 = vadd.f32 %v10494_v2, %v1280_v33  ;;  %v1283_v3 = vmul.f32 %v10482_v63, %v1191_v51  ;;  %v1195_v5 = vmul.f32 %v8298_v35, %v10172_v28 }
 0x264   : > { %v1373_v12 = vadd.f32 %v10485_v1, %v1281_v27  ;;  %v1374_v21 = vadd.f32 %v10491_v58, %v1282_v24  ;;  %v8300_v39 = vpop.eup %8299  ;;  %1693 = vst [vmem:[#allocation2 + $0x18] sm:$0xff] %v7419_v26  ;;  %1694 = vst [vmem:[#allocation2 + $0x20] sm:$0xf] %v7420_v17  ;;  %v1196_v11 = vmul.f32 %v8298_v35, %v10175_v60  ;;  %v1135_v26 = vadd.f32 1e-05, %v10508_v43 }
 0x265   : > { %v7421_v19 = vpack.c.bf16 %v1371_v9, %v1370_v36  ;;  %v7422_v13 = vpack.c.bf16 %v1372_v16, %v1372_v16  ;;  %v1197_v25 = vmul.f32 %v8298_v35, %v10178_v61  ;;  %v1046_v40 = vpop.xlane.xlu0 %1045  ;;  %v1375_v8 = vadd.f32 %v10494_v2, %v1283_v3 }
 0x266   : > { %v7423_v41 = vpack.c.bf16 %v1374_v21, %v1373_v12  ;;  %v1287_v48 = vmul.f32 %v10476_v4, %v1195_v5  ;;  %v1192_v33 = vmul.f32 %v8300_v39, %v10181_v47  ;;  %v1288_v28 = vmul.f32 %v10479_v30, %v1196_v11 }
 0x267   : > { %1695 = vst [vmem:[#allocation2 + $0x24] sm:$0xff] %v7421_v19  ;;  %1696 = vst [vmem:[#allocation2 + $0x2c] sm:$0xf] %v7422_v13  ;;  %v1289_v51 = vmul.f32 %v10482_v63, %v1197_v25  ;;  %v1193_v36 = vmul.f32 %v8300_v39, %v10184_v37  ;;  %v1194_v60 = vmul.f32 %v8300_v39, %v10187_v49  ;;  %v1058_v27 = vpop.xlane.xlu1 %1057  ;;  %8301 = vrsqrt.f32 %v1135_v26 }
 0x268   : > { %v7424_v61 = vpack.c.bf16 %v1375_v8, %v1375_v8  ;;  %1697 = vst [vmem:[#allocation2 + $0x30] sm:$0xff] %v7423_v41  ;;  %v1379_v24 = vadd.f32 %v10485_v1, %v1287_v48  ;;  %v1284_v35 = vmul.f32 %v10476_v4, %v1192_v33  ;;  %v1380_v47 = vadd.f32 %v10491_v58, %v1288_v28 }
 0x269   : > { %v1381_v17 = vadd.f32 %v10494_v2, %v1289_v51  ;;  %v1285_v9 = vmul.f32 %v10479_v30, %v1193_v36  ;;  %v1286_v16 = vmul.f32 %v10482_v63, %v1194_v60  ;;  %v1109_v3 = vmul.f32 0.0026041667, %v10510_v53 }
 0x26a   : > { %v1054_v37 = vpop.xlane.xlu0 %1053  ;;  %1698 = vst [vmem:[#allocation2 + $0x38] sm:$0xf] %v7424_v61  ;;  %v1376_v49 = vadd.f32 %v10485_v1, %v1284_v35  ;;  %v1112_v12 = vmul.f32 0.0026041667, %v10518_v0  ;;  %v7427_v21 = vpack.c.bf16 %v1380_v47, %v1379_v24  ;;  %v1111_v25 = vmul.f32 0.0026041667, %v10526_v18 }
 0x26b   : > { %v7428_v5 = vpack.c.bf16 %v1381_v17, %v1381_v17  ;;  %v1377_v43 = vadd.f32 %v10491_v58, %v1285_v9  ;;  %v1378_v39 = vadd.f32 %v10494_v2, %v1286_v16  ;;  %v1066_v19 = vpop.xlane.xlu1 %1065  ;;  %v1134_v13 = vadd.f32 1e-05, %v1109_v3 }
 0x26c   : > { %v1137_v11 = vadd.f32 1e-05, %v1112_v12  ;;  %1701 = vst [vmem:[#allocation2 + $0x48] sm:$0xff] %v7427_v21  ;;  %v1114_v48 = vmul.f32 0.0026041667, %v1050_v56 }
 0x26d   : > { %1702 = vst [vmem:[#allocation2 + $0x50] sm:$0xf] %v7428_v5  ;;  %v7425_v8 = vpack.c.bf16 %v1377_v43, %v1376_v49  ;;  %v7426_v41 = vpack.c.bf16 %v1378_v39, %v1378_v39  ;;  %v1113_v33 = vmul.f32 0.0026041667, %v1046_v40  ;;  %8303 = vrsqrt.f32 %v1134_v13 }
 0x26e   : > { %v1136_v53 = vadd.f32 1e-05, %v1111_v25  ;;  %v1116_v0 = vmul.f32 0.0026041667, %v1058_v27  ;;  %v1115_v28 = vmul.f32 0.0026041667, %v1054_v37  ;;  %v1062_v51 = vpop.xlane.xlu0 %1061  ;;  %8305 = vrsqrt.f32 %v1137_v11 }
 0x26f   : > { %1699 = vst [vmem:[#allocation2 + $0x3c] sm:$0xff] %v7425_v8  ;;  %1700 = vst [vmem:[#allocation2 + $0x44] sm:$0xf] %v7426_v41  ;;  %v1139_v36 = vadd.f32 1e-05, %v1114_v48 }
 0x270   : > { %v1138_v60 = vadd.f32 1e-05, %v1113_v33  ;;  %v1118_v61 = vmul.f32 0.0026041667, %v1066_v19  ;;  %8307 = vrsqrt.f32 %v1136_v53  ;;  %v1141_v24 = vadd.f32 1e-05, %v1116_v0 }
 0x271   : > { %v1140_v18 = vadd.f32 1e-05, %v1115_v28  ;;  %v1117_v35 = vmul.f32 0.0026041667, %v1062_v51  ;;  %8309 = vrsqrt.f32 %v1139_v36  ;;  %v1074_v47 = vpop.xlane.xlu1 %1073  ;;  %v8302_v17 = vpop.eup %8301  ;;  %v13130_v0 = vld [vmem:[#allocation65_spill] sm:$0xff]  ;;  %v13131_v51 = vld [vmem:[#allocation66_spill] sm:$0xff] }
 0x272   : > { %v1143_v26 = vadd.f32 1e-05, %v1118_v61  ;;  %8311 = vrsqrt.f32 %v1138_v60  ;;  %v1120_v40 = vmul.f32 0.0026041667, %v1074_v47  ;;  %v1201_v37 = vmul.f32 %v8302_v17, %v10202_v29  ;;  %v13132_v60 = vld [vmem:[#allocation67_spill] sm:$0xff]  ;;  %v13133_v47 = vld [vmem:[#allocation68_spill] sm:$0xff] }
 0x273   : > { %v1142_v56 = vadd.f32 1e-05, %v1117_v35  ;;  %8313 = vrsqrt.f32 %v1141_v24  ;;  %v1202_v49 = vmul.f32 %v8302_v17, %v10205_v31  ;;  %v1203_v3 = vmul.f32 %v8302_v17, %v10210_v54 }
 0x274   : > { %v1070_v27 = vpop.xlane.xlu0 %1069  ;;  %8315 = vrsqrt.f32 %v1140_v18  ;;  %v1145_v9 = vadd.f32 1e-05, %v1120_v40  ;;  %v1293_v43 = vmul.f32 %v10476_v4, %v1201_v37 }
 0x275   : > { %v1119_v16 = vmul.f32 0.0026041667, %v1070_v27  ;;  %8317 = vrsqrt.f32 %v1143_v26  ;;  %v1082_v12 = vpop.xlane.xlu1 %1081  ;;  %v1294_v39 = vmul.f32 %v10479_v30, %v1202_v49  ;;  %v1295_v19 = vmul.f32 %v10482_v63, %v1203_v3  ;;  %v13134_v49 = vld [vmem:[#allocation69_spill] sm:$0xff] }
 0x276   : > { %8319 = vrsqrt.f32 %v1142_v56  ;;  %v1122_v5 = vmul.f32 0.0026041667, %v1082_v12  ;;  %v1385_v25 = vadd.f32 %v10485_v1, %v1293_v43  ;;  %v13135_v12 = vld [vmem:[#allocation70_spill] sm:$0xff] }
 0x277   : > { %v1144_v21 = vadd.f32 1e-05, %v1119_v16  ;;  %8321 = vrsqrt.f32 %v1145_v9  ;;  %v8304_v11 = vpop.eup %8303  ;;  %v1386_v8 = vadd.f32 %v10491_v58, %v1294_v39  ;;  %v1387_v41 = vadd.f32 %v10494_v2, %v1295_v19 }
 0x278   : > { %v1078_v13 = vpop.xlane.xlu0 %1077  ;;  %v10574_v29 = vadd.f32 1e-05, %v1122_v5  ;;  %v8306_v54 = vpop.eup %8305  ;;  %v1198_v48 = vmul.f32 %v8304_v11, %v10217_v42  ;;  %v1199_v53 = vmul.f32 %v8304_v11, %v10220_v44  ;;  %v1200_v28 = vmul.f32 %v8304_v11, %v13130_v0 }
 0x279   : > { %8323 = vrsqrt.f32 %v1144_v21  ;;  %v10576_v31 = vmul.f32 0.0026041667, %v1078_v13  ;;  %v1207_v36 = vmul.f32 %v8306_v54, %v13131_v51  ;;  %v1208_v61 = vmul.f32 %v8306_v54, %v13132_v60 }
 0x27a   : > { %v8308_v33 = vpop.eup %8307  ;;  %v7431_v18 = vpack.c.bf16 %v1386_v8, %v1385_v25  ;;  %v7432_v35 = vpack.c.bf16 %v1387_v41, %v1387_v41  ;;  %v1290_v26 = vmul.f32 %v10476_v4, %v1198_v48  ;;  %v1209_v56 = vmul.f32 %v8306_v54, %v13133_v47  ;;  %v13136_v25 = vld [vmem:[#allocation71_spill] sm:$0xff] }
 0x27b   : > { %v8310_v24 = vpop.eup %8309  ;;  %v1291_v27 = vmul.f32 %v10479_v30, %v1199_v53  ;;  %v1292_v42 = vmul.f32 %v10482_v63, %v1200_v28  ;;  %v1299_v44 = vmul.f32 %v10476_v4, %v1207_v36  ;;  %v1300_v17 = vmul.f32 %v10479_v30, %v1208_v61  ;;  %v13137_v36 = vld [vmem:[#allocation72_spill] sm:$0xff] }
 0x27c   : > { %v8312_v40 = vpop.eup %8311  ;;  %1705 = vst [vmem:[#allocation2 + $0x60] sm:$0xff] %v7431_v18  ;;  %1706 = vst [vmem:[#allocation2 + $0x68] sm:$0xf] %v7432_v35  ;;  %v1382_v16 = vadd.f32 %v10485_v1, %v1290_v26  ;;  %v1301_v37 = vmul.f32 %v10482_v63, %v1209_v56  ;;  %v1204_v3 = vmul.f32 %v8308_v33, %v13134_v49  ;;  %v13138_v56 = vld [vmem:[#allocation73_spill] sm:$0xff]  ;;  %8325 = vrsqrt.f32 %v10574_v29 }
 0x27d   : > { %v8314_v9 = vpop.eup %8313  ;;  %v1205_v21 = vmul.f32 %v8308_v33, %v13135_v12  ;;  %v1383_v43 = vadd.f32 %v10491_v58, %v1291_v27  ;;  %v1384_v39 = vadd.f32 %v10494_v2, %v1292_v42  ;;  %v1391_v19 = vadd.f32 %v10485_v1, %v1299_v44  ;;  %v13139_v42 = vld [vmem:[#allocation74_spill] sm:$0xff]  ;;  %v13141_v12 = vld [vmem:[#allocation76_spill] sm:$0xff] }
 0x27e   : > { %v10596_v5 = vpop.eup %8315  ;;  %v1392_v13 = vadd.f32 %v10491_v58, %v1300_v17  ;;  %v1393_v54 = vadd.f32 %v10494_v2, %v1301_v37  ;;  %v1206_v8 = vmul.f32 %v8308_v33, %v13136_v25  ;;  %v1296_v41 = vmul.f32 %v10476_v4, %v1204_v3 }
 0x27f   : > { %v10602_v11 = vpop.eup %8317  ;;  %v1297_v48 = vmul.f32 %v10479_v30, %v1205_v21  ;;  %v7429_v0 = vpack.c.bf16 %v1383_v43, %v1382_v16  ;;  %v7430_v28 = vpack.c.bf16 %v1384_v39, %v1384_v39  ;;  %v1213_v60 = vmul.f32 %v8310_v24, %v13137_v36  ;;  %v13140_v16 = vld [vmem:[#allocation75_spill] sm:$0xff]  ;;  %v13142_v43 = vld [vmem:[#allocation29_spill] sm:$0xff] }
 0x280   : > { %v10608_v53 = vpop.eup %8319  ;;  %v7435_v51 = vpack.c.bf16 %v1392_v13, %v1391_v19  ;;  %v7436_v18 = vpack.c.bf16 %v1393_v54, %v1393_v54  ;;  %v1298_v35 = vmul.f32 %v10482_v63, %v1206_v8  ;;  %v1388_v26 = vadd.f32 %v10485_v1, %v1296_v41  ;;  %v13144_v36 = vld [vmem:[#allocation31_spill] sm:$0xff] }
 0x281   : > { %v10611_v61 = vpop.eup %8321  ;;  %v1389_v33 = vadd.f32 %v10491_v58, %v1297_v48  ;;  %1703 = vst [vmem:[#allocation2 + $0x54] sm:$0xff] %v7429_v0  ;;  %1704 = vst [vmem:[#allocation2 + $0x5c] sm:$0xf] %v7430_v28  ;;  %v1214_v27 = vmul.f32 %v8310_v24, %v13138_v56  ;;  %v1215_v44 = vmul.f32 %v8310_v24, %v13139_v42  ;;  %v13143_v48 = vld [vmem:[#allocation30_spill] sm:$0xff] }
 0x282   : > { %1709 = vst [vmem:[#allocation2 + $0x78] sm:$0xff] %v7435_v51  ;;  %v1305_v17 = vmul.f32 %v10476_v4, %v1213_v60  ;;  %v1210_v37 = vmul.f32 %v8312_v40, %v13140_v16  ;;  %1710 = vst [vmem:[#allocation2 + $0x80] sm:$0xf] %v7436_v18  ;;  %v1390_v49 = vadd.f32 %v10494_v2, %v1298_v35 }
 0x283   : > { %v10616_v47 = vpop.eup %8323  ;;  %v7433_v3 = vpack.c.bf16 %v1389_v33, %v1388_v26  ;;  %v1211_v21 = vmul.f32 %v8312_v40, %v13141_v12  ;;  %v1212_v39 = vmul.f32 %v8312_v40, %v13142_v43  ;;  %v1306_v19 = vmul.f32 %v10479_v30, %v1214_v27  ;;  %v13145_v26 = vld [vmem:[#allocation32_spill] sm:$0xff] }
 0x284   : > { %v1307_v13 = vmul.f32 %v10482_v63, %v1215_v44  ;;  %v1397_v54 = vadd.f32 %v10485_v1, %v1305_v17  ;;  %v1302_v24 = vmul.f32 %v10476_v4, %v1210_v37  ;;  %v7434_v25 = vpack.c.bf16 %v1390_v49, %v1390_v49  ;;  %v13146_v17 = vld [vmem:[#allocation33_spill] sm:$0xff] }
 0x285   : > { %1707 = vst [vmem:[#allocation2 + $0x6c] sm:$0xff] %v7433_v3  ;;  %v1303_v8 = vmul.f32 %v10479_v30, %v1211_v21  ;;  %v1304_v41 = vmul.f32 %v10482_v63, %v1212_v39  ;;  %v1219_v0 = vmul.f32 %v8314_v9, %v13143_v48  ;;  %v1398_v28 = vadd.f32 %v10491_v58, %v1306_v19 }
 0x286   : > { %v1399_v40 = vadd.f32 %v10494_v2, %v1307_v13  ;;  %v1394_v51 = vadd.f32 %v10485_v1, %v1302_v24  ;;  %v1220_v60 = vmul.f32 %v8314_v9, %v13144_v36  ;;  %1708 = vst [vmem:[#allocation2 + $0x74] sm:$0xf] %v7434_v25  ;;  %v1221_v33 = vmul.f32 %v8314_v9, %v13145_v26  ;;  %v13147_v9 = vld [vmem:[#allocation34_spill] sm:$0xff]  ;;  %v13149_v25 = vld [vmem:[#allocation36_spill] sm:$0xff] }
 0x287   : > { %v1395_v18 = vadd.f32 %v10491_v58, %v1303_v8  ;;  %v1396_v35 = vadd.f32 %v10494_v2, %v1304_v41  ;;  %v1311_v56 = vmul.f32 %v10476_v4, %v1219_v0  ;;  %v7439_v27 = vpack.c.bf16 %v1398_v28, %v1397_v54  ;;  %v13148_v54 = vld [vmem:[#allocation35_spill] sm:$0xff] }
 0x288   : > { %v7440_v42 = vpack.c.bf16 %v1399_v40, %v1399_v40  ;;  %v1312_v44 = vmul.f32 %v10479_v30, %v1220_v60  ;;  %v1216_v16 = vmul.f32 %v10596_v5, %v13146_v17  ;;  %v1313_v3 = vmul.f32 %v10482_v63, %v1221_v33 }
 0x289   : > { %v7437_v37 = vpack.c.bf16 %v1395_v18, %v1394_v51  ;;  %v7438_v49 = vpack.c.bf16 %v1396_v35, %v1396_v35  ;;  %v1403_v12 = vadd.f32 %v10485_v1, %v1311_v56  ;;  %1713 = vst [vmem:[#allocation2 + $0x90] sm:$0xff] %v7439_v27  ;;  %v1217_v43 = vmul.f32 %v10596_v5, %v13147_v9 }
 0x28a   : > { %1714 = vst [vmem:[#allocation2 + $0x98] sm:$0xf] %v7440_v42  ;;  %v1404_v21 = vadd.f32 %v10491_v58, %v1312_v44  ;;  %v1218_v39 = vmul.f32 %v10596_v5, %v10311_v62  ;;  %v1308_v19 = vmul.f32 %v10476_v4, %v1216_v16  ;;  %v1405_v13 = vadd.f32 %v10494_v2, %v1313_v3 }
 0x28b   : > { %1711 = vst [vmem:[#allocation2 + $0x84] sm:$0xff] %v7437_v37  ;;  %1712 = vst [vmem:[#allocation2 + $0x8c] sm:$0xf] %v7438_v49  ;;  %v1225_v24 = vmul.f32 %v10602_v11, %v13148_v54  ;;  %v1226_v8 = vmul.f32 %v10602_v11, %v13149_v25  ;;  %v1227_v41 = vmul.f32 %v10602_v11, %v10320_v20  ;;  %v13150_v20 = vld [vmem:[#allocation37_spill] sm:$0xff]  ;;  %v1090_v37 = vpop.xlane.xlu1 %1089 }
 0x28c   : > { %v7443_v48 = vpack.c.bf16 %v1404_v21, %v1403_v12  ;;  %v1309_v0 = vmul.f32 %v10479_v30, %v1217_v43  ;;  %v1310_v62 = vmul.f32 %v10482_v63, %v1218_v39  ;;  %v1400_v5 = vadd.f32 %v10485_v1, %v1308_v19  ;;  %v1086_v21 = vpop.xlane.xlu0 %1085 }
 0x28d   : > { %v7444_v28 = vpack.c.bf16 %v1405_v13, %v1405_v13  ;;  %v1317_v40 = vmul.f32 %v10476_v4, %v1225_v24  ;;  %v1318_v51 = vmul.f32 %v10479_v30, %v1226_v8  ;;  %v1319_v36 = vmul.f32 %v10482_v63, %v1227_v41 }
 0x28e   : > { %1717 = vst [vmem:[#allocation2 + $0xa8] sm:$0xff] %v7443_v48  ;;  %v1401_v60 = vadd.f32 %v10491_v58, %v1309_v0  ;;  %v1402_v18 = vadd.f32 %v10494_v2, %v1310_v62  ;;  %v1222_v11 = vmul.f32 %v10608_v53, %v13150_v20  ;;  %v1223_v35 = vmul.f32 %v10608_v53, %v10330_v46 }
 0x28f   : > { %1718 = vst [vmem:[#allocation2 + $0xb0] sm:$0xf] %v7444_v28  ;;  %v1409_v26 = vadd.f32 %v10485_v1, %v1317_v40  ;;  %v1410_v33 = vadd.f32 %v10491_v58, %v1318_v51  ;;  %v1411_v56 = vadd.f32 %v10494_v2, %v1319_v36  ;;  %v1224_v27 = vmul.f32 %v10608_v53, %v10335_v50  ;;  %v1101_v0 = vpop.xlane.xlu1 %1100 }
 0x290   : > { %v7441_v42 = vpack.c.bf16 %v1401_v60, %v1400_v5  ;;  %v7442_v44 = vpack.c.bf16 %v1402_v18, %v1402_v18  ;;  %v1314_v17 = vmul.f32 %v10476_v4, %v1222_v11  ;;  %v1315_v16 = vmul.f32 %v10479_v30, %v1223_v35  ;;  %v1094_v28 = vpop.xlane.xlu0 %1093 }
 0x291   : > { %v7447_v49 = vpack.c.bf16 %v1410_v33, %v1409_v26  ;;  %v7448_v3 = vpack.c.bf16 %v1411_v56, %v1411_v56  ;;  %v1316_v46 = vmul.f32 %v10482_v63, %v1224_v27  ;;  %v1231_v12 = vmul.f32 %v10611_v61, %v10342_v55  ;;  %v8326_v56 = vpop.eup %8325 }
 0x292   : > { %1715 = vst [vmem:[#allocation2 + $0x9c] sm:$0xff] %v7441_v42  ;;  %1716 = vst [vmem:[#allocation2 + $0xa4] sm:$0xf] %v7442_v44  ;;  %v1406_v9 = vadd.f32 %v10485_v1, %v1314_v17  ;;  %v1407_v50 = vadd.f32 %v10491_v58, %v1315_v16  ;;  %v1232_v53 = vmul.f32 %v10611_v61, %v10345_v7  ;;  %v1146_v62 = vadd.f32 1e-05, %v10576_v31  ;;  %v13151_v42 = vld [vmem:[#allocation38_spill] sm:$0xff] }
 0x293   : > { %v1233_v43 = vmul.f32 %v10611_v61, %v10350_v57  ;;  %1721 = vst [vmem:[#allocation2 + $0xc0] sm:$0xff] %v7447_v49  ;;  %1722 = vst [vmem:[#allocation2 + $0xc8] sm:$0xf] %v7448_v3  ;;  %v1408_v39 = vadd.f32 %v10494_v2, %v1316_v46  ;;  %v1323_v19 = vmul.f32 %v10476_v4, %v1231_v12  ;;  %v1124_v5 = vmul.f32 0.0026041667, %v1090_v37  ;;  %v13152_v46 = vld [vmem:[#allocation39_spill] sm:$0xff] }
 0x294   : > { %v1228_v55 = vmul.f32 %v10616_v47, %v10355_v32  ;;  %v1229_v13 = vmul.f32 %v10616_v47, %v10358_v59  ;;  %v7445_v54 = vpack.c.bf16 %v1407_v50, %v1406_v9  ;;  %v1324_v24 = vmul.f32 %v10479_v30, %v1232_v53 }
 0x295   : > { %v1325_v7 = vmul.f32 %v10482_v63, %v1233_v43  ;;  %v1230_v57 = vmul.f32 %v10616_v47, %v10367_v52  ;;  %v7446_v61 = vpack.c.bf16 %v1408_v39, %v1408_v39  ;;  %v1415_v25 = vadd.f32 %v10485_v1, %v1323_v19 }
 0x296   : > { %v1320_v8 = vmul.f32 %v10476_v4, %v1228_v55  ;;  %v1321_v41 = vmul.f32 %v10479_v30, %v1229_v13  ;;  %1719 = vst [vmem:[#allocation2 + $0xb4] sm:$0xff] %v7445_v54  ;;  %v1416_v32 = vadd.f32 %v10491_v58, %v1324_v24  ;;  %v1123_v60 = vmul.f32 0.0026041667, %v1086_v21  ;;  %v13153_v21 = vld [vmem:[#allocation40_spill] sm:$0xff] }
 0x297   : > { %v1417_v59 = vadd.f32 %v10494_v2, %v1325_v7  ;;  %v1322_v48 = vmul.f32 %v10482_v63, %v1230_v57  ;;  %1720 = vst [vmem:[#allocation2 + $0xbc] sm:$0xf] %v7446_v61  ;;  %8327 = vrsqrt.f32 %v1146_v62  ;;  %v1149_v20 = vadd.f32 1e-05, %v1124_v5 }
 0x298   : > { %v1412_v52 = vadd.f32 %v10485_v1, %v1320_v8  ;;  %v1413_v47 = vadd.f32 %v10491_v58, %v1321_v41  ;;  %v7451_v40 = vpack.c.bf16 %v1416_v32, %v1415_v25  ;;  %v1126_v11 = vmul.f32 0.0026041667, %v1101_v0 }
 0x299   : > { %v7452_v51 = vpack.c.bf16 %v1417_v59, %v1417_v59  ;;  %v1414_v36 = vadd.f32 %v10494_v2, %v1322_v48  ;;  %v1148_v35 = vadd.f32 1e-05, %v1123_v60  ;;  %v1125_v26 = vmul.f32 0.0026041667, %v1094_v28  ;;  %v13155_v60 = vld [vmem:[#allocation64_spill] sm:$0xff] }
 0x29a   : > { %v7449_v18 = vpack.c.bf16 %v1413_v47, %v1412_v52  ;;  %1725 = vst [vmem:[#allocation2 + $0xd8] sm:$0xff] %v7451_v40  ;;  %8329 = vrsqrt.f32 %v1149_v20  ;;  %v1151_v33 = vadd.f32 1e-05, %v1126_v11  ;;  %v1237_v27 = vmul.f32 %v8326_v56, %v10370_v10  ;;  %v13156_v20 = vld [vmem:[#allocation43_spill] sm:$0xff] }
 0x29b   : > { %1726 = vst [vmem:[#allocation2 + $0xe0] sm:$0xf] %v7452_v51  ;;  %v7450_v29 = vpack.c.bf16 %v1414_v36, %v1414_v36  ;;  %8331 = vrsqrt.f32 %v1148_v35  ;;  %v1150_v31 = vadd.f32 1e-05, %v1125_v26  ;;  %v1238_v44 = vmul.f32 %v8326_v56, %v13151_v42 }
 0x29c   : > { %1723 = vst [vmem:[#allocation2 + $0xcc] sm:$0xff] %v7449_v18  ;;  %8333 = vrsqrt.f32 %v1151_v33  ;;  %v1239_v17 = vmul.f32 %v8326_v56, %v10380_v23  ;;  %v1329_v37 = vmul.f32 %v10476_v4, %v1237_v27 }
 0x29d   : > { %1724 = vst [vmem:[#allocation2 + $0xd4] sm:$0xf] %v7450_v29  ;;  %8335 = vrsqrt.f32 %v1150_v31  ;;  %v1330_v49 = vmul.f32 %v10479_v30, %v1238_v44  ;;  %v13157_v44 = vld [vmem:[#allocation41_spill] sm:$0xff] }
 0x29e   : > { %v1331_v3 = vmul.f32 %v10482_v63, %v1239_v17  ;;  %v1421_v10 = vadd.f32 %v10485_v1, %v1329_v37 }
 0x29f   : > { %v1422_v43 = vadd.f32 %v10491_v58, %v1330_v49  ;;  %v13159_v49 = vld [vmem:[#allocation44_spill] sm:$0xff] }
 0x2a0   : > { %v1423_v23 = vadd.f32 %v10494_v2, %v1331_v3 }
 0x2a1   : > { %v8328_v16 = vpop.eup %8327  ;;  %v7455_v24 = vpack.c.bf16 %v1422_v43, %v1421_v10 }
 0x2a2   : > { %v1234_v12 = vmul.f32 %v8328_v16, %v13152_v46  ;;  %v1235_v9 = vmul.f32 %v8328_v16, %v13153_v21  ;;  %v1236_v50 = vmul.f32 %v8328_v16, %v10391_v6  ;;  %v7456_v7 = vpack.c.bf16 %v1423_v23, %v1423_v23  ;;  %v13158_v16 = vld [vmem:[#allocation42_spill] sm:$0xff] }
 0x2a3   : > { %1729 = vst [vmem:[#allocation2 + $0xf0] sm:$0xff] %v7455_v24 }
 0x2a4   : > { %v8330_v53 = vpop.eup %8329  ;;  %v1326_v19 = vmul.f32 %v10476_v4, %v1234_v12  ;;  %v1327_v55 = vmul.f32 %v10479_v30, %v1235_v9  ;;  %v1328_v13 = vmul.f32 %v10482_v63, %v1236_v50  ;;  %1730 = vst [vmem:[#allocation2 + $0xf8] sm:$0xf] %v7456_v7 }
 0x2a5   : > { %v8332_v39 = vpop.eup %8331  ;;  %v1243_v54 = vmul.f32 %v8330_v53, %v10400_v38  ;;  %v1244_v6 = vmul.f32 %v8330_v53, %v10403_v14  ;;  %v1245_v57 = vmul.f32 %v8330_v53, %v10410_v22 }
 0x2a6   : > { %v1418_v61 = vadd.f32 %v10485_v1, %v1326_v19  ;;  %v1419_v25 = vadd.f32 %v10491_v58, %v1327_v55  ;;  %v1420_v8 = vadd.f32 %v10494_v2, %v1328_v13  ;;  %v8334_v32 = vpop.eup %8333  ;;  %v1240_v48 = vmul.f32 %v8332_v39, %v10413_v45 }
 0x2a7   : > { %v1335_v41 = vmul.f32 %v10476_v4, %v1243_v54  ;;  %v1336_v59 = vmul.f32 %v10479_v30, %v1244_v6  ;;  %v1337_v38 = vmul.f32 %v10482_v63, %v1245_v57  ;;  %v1241_v14 = vmul.f32 %v8332_v39, %v10416_v34  ;;  %v8336_v51 = vpop.eup %8335  ;;  %v13154_v34 = vld [vmem:[#allocation63_spill] sm:$0xff] }
 0x2a8   : > { %v7453_v22 = vpack.c.bf16 %v1419_v25, %v1418_v61  ;;  %v7454_v0 = vpack.c.bf16 %v1420_v8, %v1420_v8  ;;  %v1242_v47 = vmul.f32 %v8332_v39, %v10419_v15  ;;  %v1332_v28 = vmul.f32 %v10476_v4, %v1240_v48 }
 0x2a9   : > { %v1427_v52 = vadd.f32 %v10485_v1, %v1335_v41  ;;  %v1428_v62 = vadd.f32 %v10491_v58, %v1336_v59  ;;  %v1429_v5 = vadd.f32 %v10494_v2, %v1337_v38  ;;  %v1333_v40 = vmul.f32 %v10479_v30, %v1241_v14 }
 0x2aa   : > { %1727 = vst [vmem:[#allocation2 + $0xe4] sm:$0xff] %v7453_v22  ;;  %1728 = vst [vmem:[#allocation2 + $0xec] sm:$0xf] %v7454_v0  ;;  %v1334_v45 = vmul.f32 %v10482_v63, %v1242_v47  ;;  %v1249_v36 = vmul.f32 %v8334_v32, %v13154_v34  ;;  %v1250_v18 = vmul.f32 %v8334_v32, %v13155_v60 }
 0x2ab   : > { %v1251_v11 = vmul.f32 %v8334_v32, %v13156_v20  ;;  %v7459_v15 = vpack.c.bf16 %v1428_v62, %v1427_v52  ;;  %v7460_v29 = vpack.c.bf16 %v1429_v5, %v1429_v5  ;;  %v1424_v35 = vadd.f32 %v10485_v1, %v1332_v28 }
 0x2ac   : > { %v1425_v26 = vadd.f32 %v10491_v58, %v1333_v40  ;;  %v1426_v33 = vadd.f32 %v10494_v2, %v1334_v45  ;;  %v1341_v31 = vmul.f32 %v10476_v4, %v1249_v36  ;;  %v1342_v56 = vmul.f32 %v10479_v30, %v1250_v18 }
 0x2ad   : > { %v1343_v27 = vmul.f32 %v10482_v63, %v1251_v11  ;;  %1733 = vst [vmem:[#allocation2 + $0x108] sm:$0xff] %v7459_v15  ;;  %1734 = vst [vmem:[#allocation2 + $0x110] sm:$0xf] %v7460_v29  ;;  %v1246_v17 = vmul.f32 %v8336_v51, %v13157_v44  ;;  %v1247_v37 = vmul.f32 %v8336_v51, %v13158_v16 }
 0x2ae   : > { %v7457_v42 = vpack.c.bf16 %v1425_v26, %v1424_v35  ;;  %v1248_v3 = vmul.f32 %v8336_v51, %v13159_v49  ;;  %v7458_v46 = vpack.c.bf16 %v1426_v33, %v1426_v33  ;;  %v1433_v12 = vadd.f32 %v10485_v1, %v1341_v31 }
 0x2af   : > { %v1434_v21 = vadd.f32 %v10491_v58, %v1342_v56  ;;  %v1435_v9 = vadd.f32 %v10494_v2, %v1343_v27  ;;  %v1338_v50 = vmul.f32 %v10476_v4, %v1246_v17  ;;  %v1339_v53 = vmul.f32 %v10479_v30, %v1247_v37 }
 0x2b0   : > { %1731 = vst [vmem:[#allocation2 + $0xfc] sm:$0xff] %v7457_v42  ;;  %v1340_v10 = vmul.f32 %v10482_v63, %v1248_v3  ;;  %1732 = vst [vmem:[#allocation2 + $0x104] sm:$0xf] %v7458_v46 }
 0x2b1   : > { %v7463_v43 = vpack.c.bf16 %v1434_v21, %v1433_v12  ;;  %v7464_v23 = vpack.c.bf16 %v1435_v9, %v1435_v9  ;;  %v1430_v39 = vadd.f32 %v10485_v1, %v1338_v50  ;;  %v1431_v19 = vadd.f32 %v10491_v58, %v1339_v53 }
 0x2b2   : > { %v1432_v55 = vadd.f32 %v10494_v2, %v1340_v10 }
 0x2b3   : > { %1737 = vst [vmem:[#allocation2 + $0x120] sm:$0x33] %v7463_v43  ;;  %1738 = vst [vmem:[#allocation2 + $0x128] sm:$0x3] %v7464_v23  ;;  %v7461_v13 = vpack.c.bf16 %v1431_v19, %v1430_v39 }
 0x2b4   : > { %v7462_v54 = vpack.c.bf16 %v1432_v55, %v1432_v55 }
 0x2b5   : > { %1735 = vst [vmem:[#allocation2 + $0x114] sm:$0xff] %v7461_v13 }
 0x2b6   : > { %1736 = vst [vmem:[#allocation2 + $0x11c] sm:$0xf] %v7462_v54 }
 0x2b7 PF: > { %v8337_v4 = vld [vmem:[%s9806_s23 + $0x4] ss:$24 sps:$4 sm:$0xff]   ;;  %v8341_v63 = vld [vmem:[%s9806_s23] ss:$24 sps:$4 sm:$0xff]   ;;  %v8343_v58 = vld [vmem:[%s9806_s23 + $0x34] ss:$24 sps:$4 sm:$0xff]  }
 0x2b8   : > { %v8339_v30 = vld [vmem:[%s9806_s23 + $0xc] ss:$24 sps:$4 sm:$0xff]   ;;  %2980 = vmatprep.subr.bf16.mxu0 %v8337_v4  ;;  %v8342_v1 = vld [vmem:[%s9806_s23 + $0x8] ss:$24 sps:$4 sm:$0xff]   ;;  %v8345_v2 = vld [vmem:[%s9806_s23 + $0x3c] ss:$24 sps:$4 sm:$0xff]  }
 0x2b9   : > { %3302 = vmatprep.subr.bf16.mxu1 %v8339_v30  ;;  %2981 = vmatpush1.bf16.msra.mxu0 %v8341_v63  ;;  %v8347_v24 = vld [vmem:[%s9806_s23 + $0x30] ss:$24 sps:$4 sm:$0xff]   ;;  %v8349_v6 = vld [vmem:[%s9806_s23 + $0x64] ss:$24 sps:$4 sm:$0xff]   ;;  %v8353_v61 = vld [vmem:[%s9806_s23 + $0x60] ss:$24 sps:$4 sm:$0xff]  }
 0x2ba   : > { %3303 = vmatpush1.bf16.msra.mxu1 %v8342_v1  ;;  %2982 = vmatprep.subr.bf16.mxu0 %v8343_v58  ;;  %v8348_v7 = vld [vmem:[%s9806_s23 + $0x38] ss:$24 sps:$4 sm:$0xff]   ;;  %v8351_v57 = vld [vmem:[%s9806_s23 + $0x6c] ss:$24 sps:$4 sm:$0xff]   ;;  %v8354_v25 = vld [vmem:[%s9806_s23 + $0x68] ss:$24 sps:$4 sm:$0xff]  }
 0x2bb   : > { %3304 = vmatprep.subr.bf16.mxu1 %v8345_v2  ;;  %v8355_v8 = vld [vmem:[%s9806_s23 + $0x94] ss:$24 sps:$4 sm:$0xff]   ;;  %v8359_v32 = vld [vmem:[%s9806_s23 + $0x90] ss:$24 sps:$4 sm:$0xff]   ;;  %v8361_v38 = vld [vmem:[%s9806_s23 + $0xc4] ss:$24 sps:$4 sm:$0xff]  }
 0x2bc   : > { %v8357_v41 = vld [vmem:[%s9806_s23 + $0x9c] ss:$24 sps:$4 sm:$0xff]   ;;  %v8360_v59 = vld [vmem:[%s9806_s23 + $0x98] ss:$24 sps:$4 sm:$0xff]   ;;  %v8363_v48 = vld [vmem:[%s9806_s23 + $0xcc] ss:$24 sps:$4 sm:$0xff]  }
 0x2bd   : > { %2983 = vmatpush1.bf16.msra.mxu0 %v8347_v24  ;;  %v8365_v14 = vld [vmem:[%s9806_s23 + $0xc0] ss:$24 sps:$4 sm:$0xff]   ;;  %v8367_v0 = vld [vmem:[%s9806_s23 + $0xf4] ss:$24 sps:$4 sm:$0xff]   ;;  %v8371_v47 = vld [vmem:[%s9806_s23 + $0xf0] ss:$24 sps:$4 sm:$0xff]  }
 0x2be   : > { %3305 = vmatpush1.bf16.msra.mxu1 %v8348_v7  ;;  %2984 = vmatprep.subr.bf16.mxu0 %v8349_v6  ;;  %v8366_v22 = vld [vmem:[%s9806_s23 + $0xc8] ss:$24 sps:$4 sm:$0xff]   ;;  %v8369_v52 = vld [vmem:[%s9806_s23 + $0xfc] ss:$24 sps:$4 sm:$0xff]   ;;  %v8372_v62 = vld [vmem:[%s9806_s23 + $0xf8] ss:$24 sps:$4 sm:$0xff]  }
 0x2bf   : > { %3306 = vmatprep.subr.bf16.mxu1 %v8351_v57  ;;  %v8373_v5 = vld [vmem:[%s9806_s23 + $0x124] ss:$24 sps:$4 sm:$0xff]   ;;  %v8377_v40 = vld [vmem:[%s9806_s23 + $0x120] ss:$24 sps:$4 sm:$0xff]   ;;  %v8379_v45 = vld [vmem:[%s9806_s23 + $0x154] ss:$24 sps:$4 sm:$0xff]  }
 0x2c0   : > { %v8375_v28 = vld [vmem:[%s9806_s23 + $0x12c] ss:$24 sps:$4 sm:$0xff]   ;;  %v8378_v51 = vld [vmem:[%s9806_s23 + $0x128] ss:$24 sps:$4 sm:$0xff]   ;;  %v8381_v34 = vld [vmem:[%s9806_s23 + $0x15c] ss:$24 sps:$4 sm:$0xff]  }
 0x2c1   : > { %2985 = vmatpush1.bf16.msra.mxu0 %v8353_v61  ;;  %v8383_v36 = vld [vmem:[%s9806_s23 + $0x150] ss:$24 sps:$4 sm:$0xff]   ;;  %v8385_v18 = vld [vmem:[%s9806_s23 + $0x184] ss:$24 sps:$4 sm:$0xff]   ;;  %v8389_v11 = vld [vmem:[%s9806_s23 + $0x180] ss:$24 sps:$4 sm:$0xff]  }
 0x2c2   : > { %3307 = vmatpush1.bf16.msra.mxu1 %v8354_v25  ;;  %2986 = vmatprep.subr.bf16.mxu0 %v8355_v8  ;;  %v8384_v60 = vld [vmem:[%s9806_s23 + $0x158] ss:$24 sps:$4 sm:$0xff]   ;;  %v8387_v20 = vld [vmem:[%s9806_s23 + $0x18c] ss:$24 sps:$4 sm:$0xff]   ;;  %v8390_v15 = vld [vmem:[%s9806_s23 + $0x188] ss:$24 sps:$4 sm:$0xff]  }
 0x2c3   : > { %3308 = vmatprep.subr.bf16.mxu1 %v8357_v41  ;;  %v8391_v29 = vld [vmem:[%s9806_s23 + $0x1b4] ss:$24 sps:$4 sm:$0xff]   ;;  %v8395_v26 = vld [vmem:[%s9806_s23 + $0x1b0] ss:$24 sps:$4 sm:$0xff]   ;;  %v8397_v31 = vld [vmem:[%s9806_s23 + $0x1e4] ss:$24 sps:$4 sm:$0xff]  }
 0x2c4   : > { %v8393_v35 = vld [vmem:[%s9806_s23 + $0x1bc] ss:$24 sps:$4 sm:$0xff]   ;;  %v8396_v33 = vld [vmem:[%s9806_s23 + $0x1b8] ss:$24 sps:$4 sm:$0xff]   ;;  %v8399_v56 = vld [vmem:[%s9806_s23 + $0x1ec] ss:$24 sps:$4 sm:$0xff]  }
 0x2c5   : > { %2987 = vmatpush1.bf16.msra.mxu0 %v8359_v32  ;;  %v8401_v27 = vld [vmem:[%s9806_s23 + $0x1e0] ss:$24 sps:$4 sm:$0xff]   ;;  %v8403_v44 = vld [vmem:[%s9806_s23 + $0x214] ss:$24 sps:$4 sm:$0xff]   ;;  %v8407_v16 = vld [vmem:[%s9806_s23 + $0x210] ss:$24 sps:$4 sm:$0xff]  }
 0x2c6   : > { %3309 = vmatpush1.bf16.msra.mxu1 %v8360_v59  ;;  %2988 = vmatprep.subr.bf16.mxu0 %v8361_v38  ;;  %v8402_v42 = vld [vmem:[%s9806_s23 + $0x1e8] ss:$24 sps:$4 sm:$0xff]   ;;  %v8405_v17 = vld [vmem:[%s9806_s23 + $0x21c] ss:$24 sps:$4 sm:$0xff]   ;;  %v8408_v37 = vld [vmem:[%s9806_s23 + $0x218] ss:$24 sps:$4 sm:$0xff]  }
 0x2c7   : > { %3310 = vmatprep.subr.bf16.mxu1 %v8363_v48  ;;  %v8433_v49 = vld [vmem:[#allocation2 + $0x4] ss:$12 sps:$4 sm:$0xff]   ;;  %v8409_v3 = vld [vmem:[%s9806_s23 + $0x244] ss:$24 sps:$4 sm:$0xff]   ;;  %v8419_v53 = vld [vmem:[%s9806_s23 + $0x270] ss:$24 sps:$4 sm:$0xff]  }
 0x2c8   : > { %v8411_v46 = vld [vmem:[%s9806_s23 + $0x24c] ss:$24 sps:$4 sm:$0xff]   ;;  %3012 = vmatprep.mubr.bf16.mxu0 %v8433_v49  ;;  %3334 = vmatprep.mubr.bf16.mxu1 %v8433_v49  ;;  %v8413_v12 = vld [vmem:[%s9806_s23 + $0x240] ss:$24 sps:$4 sm:$0xff]   ;;  %v8417_v50 = vld [vmem:[%s9806_s23 + $0x27c] ss:$24 sps:$4 sm:$0xff]  }
 0x2c9   : > { %2989 = vmatpush1.bf16.msra.mxu0 %v8365_v14  ;;  %v8414_v21 = vld [vmem:[%s9806_s23 + $0x248] ss:$24 sps:$4 sm:$0xff]   ;;  %v8415_v9 = vld [vmem:[%s9806_s23 + $0x274] ss:$24 sps:$4 sm:$0xff]   ;;  %v8420_v10 = vld [vmem:[%s9806_s23 + $0x278] ss:$24 sps:$4 sm:$0xff]  }
 0x2ca   : > { %3311 = vmatpush1.bf16.msra.mxu1 %v8366_v22  ;;  %2990 = vmatprep.subr.bf16.mxu0 %v8367_v0  ;;  %v8421_v43 = vld [vmem:[%s9806_s23 + $0x2a4] ss:$24 sps:$4 sm:$0xff]   ;;  %v8425_v39 = vld [vmem:[%s9806_s23 + $0x2a0] ss:$24 sps:$4 sm:$0xff]   ;;  %v8427_v55 = vld [vmem:[%s9806_s23 + $0x2d4] ss:$24 sps:$4 sm:$0xff]  }
 0x2cb   : > { %3312 = vmatprep.subr.bf16.mxu1 %v8369_v52  ;;  %v8423_v23 = vld [vmem:[%s9806_s23 + $0x2ac] ss:$24 sps:$4 sm:$0xff]   ;;  %v8426_v19 = vld [vmem:[%s9806_s23 + $0x2a8] ss:$24 sps:$4 sm:$0xff]   ;;  %v8429_v13 = vld [vmem:[%s9806_s23 + $0x2dc] ss:$24 sps:$4 sm:$0xff]  }
 0x2cc   : > { %v8431_v54 = vld [vmem:[%s9806_s23 + $0x2d0] ss:$24 sps:$4 sm:$0xff]   ;;  %v8438_v30 = vld [vmem:[%s9806_s23 + $0x304] ss:$24 sps:$4 sm:$0xff]   ;;  %v8436_v1 = vld [vmem:[%s9806_s23 + $0x300] ss:$24 sps:$4 sm:$0xff]  }
 0x2cd   : > { %2991 = vmatpush1.bf16.msra.mxu0 %v8371_v47  ;;  %v8432_v4 = vld [vmem:[%s9806_s23 + $0x2d8] ss:$24 sps:$4 sm:$0xff]   ;;  %v8435_v63 = vld [vmem:[#allocation2] ss:$12 sps:$4 sm:$0xff]   ;;  %v8444_v2 = vld [vmem:[%s9806_s23 + $0x334] ss:$24 sps:$4 sm:$0xff]  }
 0x2ce   : > { %3313 = vmatpush1.bf16.msra.mxu1 %v8372_v62  ;;  %2992 = vmatprep.subr.bf16.mxu0 %v8373_v5  ;;  %v8439_v58 = vld [vmem:[#allocation2 + $0x1c] ss:$12 sps:$4 sm:$0xff]   ;;  %v8442_v7 = vld [vmem:[%s9806_s23 + $0x330] ss:$24 sps:$4 sm:$0xff]   ;;  %v8486_v57 = vld [vmem:[%s9806_s23 + $0x33c] ss:$24 sps:$4 sm:$0xff]  }
 0x2cf   : > { %3314 = vmatprep.subr.bf16.mxu1 %v8375_v28  ;;  %v8483_v24 = vld [vmem:[%s9806_s23 + $0x30c] ss:$24 sps:$4 sm:$0xff]   ;;  %v8481_v6 = vld [vmem:[%s9806_s23 + $0x308] ss:$24 sps:$4 sm:$0xff]   ;;  %v8445_v8 = vld [vmem:[#allocation2 + $0x34] ss:$12 sps:$4 sm:$0xff]  }
 0x2d0   : > { %v8453_v61 = vld [vmem:[%s9806_s23 + $0x364] ss:$24 sps:$4 sm:$0xff]   ;;  %v8441_v25 = vld [vmem:[#allocation2 + $0x18] ss:$12 sps:$4 sm:$0xff]   ;;  %v8484_v32 = vld [vmem:[%s9806_s23 + $0x338] ss:$24 sps:$4 sm:$0xff]  }
 0x2d1   : > { %2993 = vmatpush1.bf16.msra.mxu0 %v8377_v40  ;;  %v8451_v41 = vld [vmem:[%s9806_s23 + $0x360] ss:$24 sps:$4 sm:$0xff]   ;;  %v8461_v59 = vld [vmem:[%s9806_s23 + $0x394] ss:$24 sps:$4 sm:$0xff]   ;;  %v8459_v14 = vld [vmem:[%s9806_s23 + $0x390] ss:$24 sps:$4 sm:$0xff]  }
 0x2d2   : > { %3315 = vmatpush1.bf16.msra.mxu1 %v8378_v51  ;;  %2994 = vmatprep.subr.bf16.mxu0 %v8379_v45  ;;  %v8495_v38 = vld [vmem:[%s9806_s23 + $0x36c] ss:$24 sps:$4 sm:$0xff]   ;;  %v8493_v22 = vld [vmem:[%s9806_s23 + $0x368] ss:$24 sps:$4 sm:$0xff]   ;;  %v8498_v52 = vld [vmem:[%s9806_s23 + $0x39c] ss:$24 sps:$4 sm:$0xff]  }
 0x2d3   : > { %3316 = vmatprep.subr.bf16.mxu1 %v8381_v34  ;;  %v8447_v48 = vld [vmem:[#allocation2 + $0x30] ss:$12 sps:$4 sm:$0xff]   ;;  %v8468_v0 = vld [vmem:[%s9806_s23 + $0x3c4] ss:$24 sps:$4 sm:$0xff]   ;;  %v8448_v47 = vld [vmem:[#allocation2 + $0x4c] ss:$12 sps:$4 sm:$0xff]  }
 0x2d4   : > { %v8466_v62 = vld [vmem:[%s9806_s23 + $0x3c0] ss:$24 sps:$4 sm:$0xff]   ;;  %v8477_v28 = vld [vmem:[%s9806_s23 + $0x3f4] ss:$24 sps:$4 sm:$0xff]   ;;  %v8475_v51 = vld [vmem:[%s9806_s23 + $0x3f0] ss:$24 sps:$4 sm:$0xff]  }
 0x2d5   : > { %2995 = vmatpush1.bf16.msra.mxu0 %v8383_v36  ;;  %v8496_v5 = vld [vmem:[%s9806_s23 + $0x398] ss:$24 sps:$4 sm:$0xff]   ;;  %v8504_v40 = vld [vmem:[%s9806_s23 + $0x3cc] ss:$24 sps:$4 sm:$0xff]   ;;  %v8502_v34 = vld [vmem:[%s9806_s23 + $0x3c8] ss:$24 sps:$4 sm:$0xff]  }
 0x2d6   : > { %3317 = vmatpush1.bf16.msra.mxu1 %v8384_v60  ;;  %2996 = vmatprep.subr.bf16.mxu0 %v8385_v18  ;;  %v8489_v45 = vld [vmem:[%s9806_s23 + $0x424] ss:$24 sps:$4 sm:$0xff]   ;;  %v8454_v18 = vld [vmem:[#allocation2 + $0x64] ss:$12 sps:$4 sm:$0xff]   ;;  %s9455_s16 = smov [#allocation15]   ;;  %p8224_p4 = scmp.eq.s32.totalorder %s9532_s11, 1 }
 0x2d7   : > { %3318 = vmatprep.subr.bf16.mxu1 %v8387_v20  ;;  %v8510_v36 = vld [vmem:[%s9806_s23 + $0x3fc] ss:$24 sps:$4 sm:$0xff]   ;;  %v8450_v60 = vld [vmem:[#allocation2 + $0x48] ss:$12 sps:$4 sm:$0xff]   ;;  %v8487_v20 = vld [vmem:[%s9806_s23 + $0x420] ss:$24 sps:$4 sm:$0xff]  }
 0x2d8   : > { %v10870_v49 = vld [vmem:[#allocation2 + $0xa8] ss:$12 sps:$4 sm:$0xff]   ;;  %s6860_s19 = sshll.u32 %s9455_s16, 4  ;;  %s6861_s19 = int_to_ptr.vmem [resolvable:$true] %s6860_s19 }
 0x2d9   : > { %2997 = vmatpush1.bf16.msra.mxu0 %v8389_v11  ;;  %v8508_v11 = vld [vmem:[%s9806_s23 + $0x3f8] ss:$24 sps:$4 sm:$0xff]   ;;  %s9344_s10 = scalar_lea.vmem %s6861_s19, 9600  ;;  %p9351_p11 = scmp.lt.s32.totalorder %s6861_s19, %s6861_s19 }
 0x2da   : > { %3319 = vmatpush1.bf16.msra.mxu1 %v8390_v15  ;;  %2998 = vmatprep.subr.bf16.mxu0 %v8391_v29  ;;  %v8507_v15 = vld [vmem:[%s9806_s23 + $0x454] ss:$24 sps:$4 sm:$0xff]   ;;  %p9345_p9 = scmp.ne.s32.totalorder %s6861_s19, %s9344_s10  ;;  %p9352_p8 = scmp.lt.s32.totalorder %s9344_s10, %s9344_s10 }
 0x2db   : > { %3320 = vmatprep.subr.bf16.mxu1 %v8393_v35  ;;  %v8515_v29 = vld [vmem:[%s9806_s23 + $0x42c] ss:$24 sps:$4 sm:$0xff]   ;;  %v8505_v35 = vld [vmem:[%s9806_s23 + $0x450] ss:$24 sps:$4 sm:$0xff]  }
 0x2dc   : > { %p9346_p10 = pnand %p9345_p9, %p8224_p4  ;;  %p9353_p13 = por %p9352_p8, %p9351_p11 }
 0x2dd   : > { %2999 = vmatpush1.bf16.msra.mxu0 %v8395_v26  ;;  %v8513_v26 = vld [vmem:[%s9806_s23 + $0x428] ss:$24 sps:$4 sm:$0xff]  }
 0x2de   : > { %3321 = vmatpush1.bf16.msra.mxu1 %v8396_v33  ;;  %3000 = vmatprep.subr.bf16.mxu0 %v8397_v31  ;;  %v8518_v33 = vld [vmem:[%s9806_s23 + $0x45c] ss:$24 sps:$4 sm:$0xff]   ;;  %p9347_p7 = pneg %p9346_p10 }
 0x2df   : > { %3322 = vmatprep.subr.bf16.mxu1 %v8399_v56  ;;  %v8522_v31 = vld [vmem:[%s9806_s23 + $0x14] ss:$24 sps:$4 sm:$0xff]   ;;  %v8456_v56 = vld [vmem:[#allocation2 + $0x60] ss:$12 sps:$4 sm:$0xff]  }
 0x2e0   : > { %p9354_p2 = pnand %p9353_p13, %p9347_p7 }
 0x2e1   : > { %3001 = vmatpush1.bf16.msra.mxu0 %v8401_v27  ;;  %v8457_v27 = vld [vmem:[#allocation2 + $0x7c] ss:$12 sps:$4 sm:$0xff]  }
 0x2e2   : > { %3323 = vmatpush1.bf16.msra.mxu1 %v8402_v42  ;;  %3002 = vmatprep.subr.bf16.mxu0 %v8403_v44  ;;  %v8516_v42 = vld [vmem:[%s9806_s23 + $0x458] ss:$24 sps:$4 sm:$0xff]   ;;  %v8462_v44 = vld [vmem:[#allocation2 + $0x78] ss:$12 sps:$4 sm:$0xff]  }
 0x2e3   : > { %3324 = vmatprep.subr.bf16.mxu1 %v8405_v17  ;;  %v10858_v17 = vld [vmem:[#allocation2 + $0x94] ss:$12 sps:$4 sm:$0xff]  }
 0x2e5   : > { %3003 = vmatpush1.bf16.msra.mxu0 %v8407_v16  ;;  %v10862_v16 = vld [vmem:[#allocation2 + $0x90] ss:$12 sps:$4 sm:$0xff]  }
 0x2e6   : > { %3325 = vmatpush1.bf16.msra.mxu1 %v8408_v37  ;;  %3004 = vmatprep.subr.bf16.mxu0 %v8409_v3  ;;  %v10864_v37 = vld [vmem:[#allocation2 + $0xac] ss:$12 sps:$4 sm:$0xff]   ;;  %v10872_v3 = vld [vmem:[#allocation2 + $0xc4] ss:$12 sps:$4 sm:$0xff]  }
 0x2e7   : > { %3326 = vmatprep.subr.bf16.mxu1 %v8411_v46  ;;  %v10878_v46 = vld [vmem:[#allocation2 + $0xc0] ss:$12 sps:$4 sm:$0xff]  }
 0x2e9   : > { %3005 = vmatpush1.bf16.msra.mxu0 %v8413_v12  ;;  %v10880_v12 = vld [vmem:[#allocation2 + $0xdc] ss:$12 sps:$4 sm:$0xff]  }
 0x2ea   : > { %3327 = vmatpush1.bf16.msra.mxu1 %v8414_v21  ;;  %3006 = vmatprep.subr.bf16.mxu0 %v8415_v9  ;;  %v10886_v21 = vld [vmem:[#allocation2 + $0xd8] ss:$12 sps:$4 sm:$0xff]   ;;  %v10888_v9 = vld [vmem:[#allocation2 + $0xf4] ss:$12 sps:$4 sm:$0xff]  }
 0x2eb   : > { %3328 = vmatprep.subr.bf16.mxu1 %v8417_v50  ;;  %v10894_v50 = vld [vmem:[#allocation2 + $0xf0] ss:$12 sps:$4 sm:$0xff]  }
 0x2ed   : > { %3007 = vmatpush1.bf16.msra.mxu0 %v8419_v53  ;;  %v10896_v53 = vld [vmem:[#allocation2 + $0x10c] ss:$12 sps:$4 sm:$0xff]  }
 0x2ee   : > { %3329 = vmatpush1.bf16.msra.mxu1 %v8420_v10  ;;  %3008 = vmatprep.subr.bf16.mxu0 %v8421_v43  ;;  %v1879_v10 = vld [vmem:[#allocation2 + $0x120] sm:$0x33]  ;;  %v10902_v43 = vld [vmem:[#allocation2 + $0x108] ss:$12 sps:$4 sm:$0xff]  }
 0x2ef   : > { %3330 = vmatprep.subr.bf16.mxu1 %v8423_v23  ;;  %v10904_v23 = vcombine.high %v1879_v10, %v1879_v10 }
 0x2f1   : > { %3009 = vmatpush1.bf16.msra.mxu0 %v8425_v39  ;;  %v10910_v39 = vcombine.low %v1879_v10, %v1879_v10  ;;  %v8621_v10 = vld [vmem:[%s9815_s20 + $0xac] ss:$12 sps:$4 sm:$0xff]  }
 0x2f2   : > { %3331 = vmatpush1.bf16.msra.mxu1 %v8426_v19  ;;  %3010 = vmatprep.subr.bf16.mxu0 %v8427_v55  ;;  %v12975_v19 = vmov 0   ;;  %v10916_v55 = vld [vmem:[#allocation2 + $0x8] ss:$12 sps:$4 sm:$0xff]  }
 0x2f3   : > { %3332 = vmatprep.subr.bf16.mxu1 %v8429_v13  ;;  %v8520_v13 = vld [vmem:[%s9806_s23 + $0x10] ss:$24 sps:$4 sm:$0xff]  }
 0x2f5   : > { %3011 = vmatpush1.bf16.msra.mxu0 %v8431_v54  ;;  %v8525_v54 = vld [vmem:[%s9806_s23 + $0x44] ss:$24 sps:$4 sm:$0xff]  }
 0x2f6   : > { %3333 = vmatpush1.bf16.msra.mxu1 %v8432_v4  ;;  %3141 = vmatprep.subr.bf16.mxu0 %v8438_v30  ;;  %v8523_v4 = vld [vmem:[%s9806_s23 + $0x40] ss:$24 sps:$4 sm:$0xff]   ;;  %v8529_v30 = vld [vmem:[%s9806_s23 + $0x74] ss:$24 sps:$4 sm:$0xff]  }
 0x2f7   : > { %3463 = vmatprep.subr.bf16.mxu1 %v8483_v24  ;;  %v8533_v24 = vld [vmem:[%s9806_s23 + $0xa4] ss:$24 sps:$4 sm:$0xff]  }
 0x2f8   : > { %3013 = vmatmul.mubr.bf16.vlgmr.msra.gmra.mrb[0].mxu0 %v8435_v63 }
 0x2f9   : > { %3335 = vmatmul.mubr.bf16.vlgmr.msra.gmra.mrb[0].mxu1 %v8435_v63  ;;  %3142 = vmatpush1.bf16.msra.mxu0 %v8436_v1  ;;  %v8589_v63 = vld [vmem:[%s9815_s20] ss:$12 sps:$4 sm:$0xff]   ;;  %v8591_v1 = vld [vmem:[%s9815_s20 + $0x4] ss:$12 sps:$4 sm:$0xff]  }
 0x2fa   : > { %3022 = vmatprep.mubr.bf16.mxu0 %v8439_v58  ;;  %3344 = vmatprep.mubr.bf16.mxu1 %v8439_v58  ;;  %v10928_v58 = vld [vmem:[#allocation2 + $0x20] ss:$12 sps:$4 sm:$0xff]  }
 0x2fb   : > { %3143 = vmatprep.subr.bf16.mxu0 %v8444_v2  ;;  %3464 = vmatpush1.bf16.msra.mxu1 %v8481_v6  ;;  %v8527_v2 = vld [vmem:[%s9806_s23 + $0x70] ss:$24 sps:$4 sm:$0xff]  }
 0x2fc   : > { %3465 = vmatprep.subr.bf16.mxu1 %v8486_v57  ;;  %v8594_v6 = vld [vmem:[%s9815_s20 + $0x1c] ss:$12 sps:$4 sm:$0xff]   ;;  %v8531_v57 = vld [vmem:[%s9806_s23 + $0xa0] ss:$24 sps:$4 sm:$0xff]  }
 0x2fd   : > { %3144 = vmatpush1.bf16.msra.mxu0 %v8442_v7  ;;  %v8592_v7 = vld [vmem:[%s9815_s20 + $0x18] ss:$12 sps:$4 sm:$0xff]  }
 0x2fe   : > { %3145 = vmatprep.subr.bf16.mxu0 %v8453_v61  ;;  %v8537_v61 = vld [vmem:[%s9806_s23 + $0xd4] ss:$24 sps:$4 sm:$0xff]  }
 0x2ff   : > { %3466 = vmatpush1.bf16.msra.mxu1 %v8484_v32  ;;  %v8598_v32 = vld [vmem:[%s9815_s20 + $0x30] ss:$12 sps:$4 sm:$0xff]  }
 0x300   : > { %3023 = vmatmul.mubr.bf16.gmra.mrb[4].mxu0 %v8441_v25  ;;  %3467 = vmatprep.subr.bf16.mxu1 %v8495_v38  ;;  %v8539_v38 = vld [vmem:[%s9806_s23 + $0x100] ss:$24 sps:$4 sm:$0xff]  }
 0x301   : > { %3345 = vmatmul.mubr.bf16.gmra.mrb[4].mxu1 %v8441_v25  ;;  %3032 = vmatprep.mubr.bf16.mxu0 %v8445_v8  ;;  %v10940_v25 = vld [vmem:[#allocation2 + $0x38] ss:$12 sps:$4 sm:$0xff]  }
 0x302   : > { %3354 = vmatprep.mubr.bf16.mxu1 %v8445_v8  ;;  %3146 = vmatpush1.bf16.msra.mxu0 %v8451_v41  ;;  %v8535_v8 = vld [vmem:[%s9806_s23 + $0xd0] ss:$24 sps:$4 sm:$0xff]   ;;  %v8541_v41 = vld [vmem:[%s9806_s23 + $0x104] ss:$24 sps:$4 sm:$0xff]  }
 0x303   : > { %3147 = vmatprep.subr.bf16.mxu0 %v8461_v59  ;;  %3468 = vmatpush1.bf16.msra.mxu1 %v8493_v22  ;;  %v8600_v59 = vld [vmem:[%s9815_s20 + $0x34] ss:$12 sps:$4 sm:$0xff]   ;;  %v8542_v22 = vld [vmem:[%s9806_s23 + $0x130] ss:$24 sps:$4 sm:$0xff]  }
 0x304   : > { %3469 = vmatprep.subr.bf16.mxu1 %v8498_v52  ;;  %v8601_v52 = vld [vmem:[%s9815_s20 + $0x48] ss:$12 sps:$4 sm:$0xff]  }
 0x306   : > { %3148 = vmatpush1.bf16.msra.mxu0 %v8459_v14  ;;  %v10952_v14 = vld [vmem:[#allocation2 + $0x50] ss:$12 sps:$4 sm:$0xff]  }
 0x307   : > { %3149 = vmatprep.subr.bf16.mxu0 %v8468_v0  ;;  %3470 = vmatpush1.bf16.msra.mxu1 %v8496_v5  ;;  %v8548_v0 = vld [vmem:[%s9806_s23 + $0x164] ss:$24 sps:$4 sm:$0xff]   ;;  %v8546_v5 = vld [vmem:[%s9806_s23 + $0x160] ss:$24 sps:$4 sm:$0xff]  }
 0x308   : > { %3033 = vmatmul.mubr.bf16.gmra.mrb[8].mxu0 %v8447_v48  ;;  %3471 = vmatprep.subr.bf16.mxu1 %v8504_v40  ;;  %v8607_v40 = vld [vmem:[%s9815_s20 + $0x60] ss:$12 sps:$4 sm:$0xff]  }
 0x309   : > { %3355 = vmatmul.mubr.bf16.gmra.mrb[8].mxu1 %v8447_v48  ;;  %3042 = vmatprep.mubr.bf16.mxu0 %v8448_v47  ;;  %v8544_v48 = vld [vmem:[%s9806_s23 + $0x134] ss:$24 sps:$4 sm:$0xff]  }
 0x30a   : > { %3364 = vmatprep.mubr.bf16.mxu1 %v8448_v47  ;;  %3150 = vmatpush1.bf16.msra.mxu0 %v8466_v62  ;;  %v8603_v47 = vld [vmem:[%s9815_s20 + $0x4c] ss:$12 sps:$4 sm:$0xff]   ;;  %v8609_v62 = vld [vmem:[%s9815_s20 + $0x64] ss:$12 sps:$4 sm:$0xff]  }
 0x30b   : > { %3151 = vmatprep.subr.bf16.mxu0 %v8477_v28  ;;  %3472 = vmatpush1.bf16.msra.mxu1 %v8502_v34  ;;  %v8552_v28 = vld [vmem:[%s9806_s23 + $0x194] ss:$24 sps:$4 sm:$0xff]   ;;  %v8556_v34 = vld [vmem:[%s9806_s23 + $0x1c4] ss:$24 sps:$4 sm:$0xff]  }
 0x30c   : > { %3473 = vmatprep.subr.bf16.mxu1 %v8510_v36  ;;  %v8610_v36 = vld [vmem:[%s9815_s20 + $0x78] ss:$12 sps:$4 sm:$0xff]  }
 0x30e   : > { %3152 = vmatpush1.bf16.msra.mxu0 %v8475_v51  ;;  %v10966_v51 = vld [vmem:[#allocation2 + $0x68] ss:$12 sps:$4 sm:$0xff]  }
 0x30f   : > { %3153 = vmatprep.subr.bf16.mxu0 %v8489_v45  ;;  %3474 = vmatpush1.bf16.msra.mxu1 %v8508_v11  ;;  %v8550_v45 = vld [vmem:[%s9806_s23 + $0x190] ss:$24 sps:$4 sm:$0xff]  }
 0x310   : > { %3043 = vmatmul.mubr.bf16.gmra.mrb[12].mxu0 %v8450_v60  ;;  %3475 = vmatprep.subr.bf16.mxu1 %v8515_v29  ;;  %v10978_v11 = vld [vmem:[#allocation2 + $0x80] ss:$12 sps:$4 sm:$0xff]  }
 0x311   : > { %3365 = vmatmul.mubr.bf16.gmra.mrb[12].mxu1 %v8450_v60  ;;  %3052 = vmatprep.mubr.bf16.mxu0 %v8454_v18  ;;  %v8612_v60 = vld [vmem:[%s9815_s20 + $0x7c] ss:$12 sps:$4 sm:$0xff]   ;;  %v8564_v29 = vld [vmem:[%s9806_s23 + $0x224] ss:$24 sps:$4 sm:$0xff]  }
 0x312   : > { %3374 = vmatprep.mubr.bf16.mxu1 %v8454_v18  ;;  %3154 = vmatpush1.bf16.msra.mxu0 %v8487_v20  ;;  %v8554_v18 = vld [vmem:[%s9806_s23 + $0x1c0] ss:$24 sps:$4 sm:$0xff]   ;;  %v8560_v20 = vld [vmem:[%s9806_s23 + $0x1f4] ss:$24 sps:$4 sm:$0xff]  }
 0x313   : > { %3155 = vmatprep.subr.bf16.mxu0 %v8507_v15  ;;  %3476 = vmatpush1.bf16.msra.mxu1 %v8513_v26  ;;  %v8558_v15 = vld [vmem:[%s9806_s23 + $0x1f0] ss:$24 sps:$4 sm:$0xff]   ;;  %v8618_v26 = vld [vmem:[%s9815_s20 + $0x94] ss:$12 sps:$4 sm:$0xff]  }
 0x314   : > { %3477 = vmatprep.subr.bf16.mxu1 %v8518_v33  ;;  %v8562_v33 = vld [vmem:[%s9806_s23 + $0x220] ss:$24 sps:$4 sm:$0xff]  }
 0x316   : > { %3156 = vmatpush1.bf16.msra.mxu0 %v8505_v35  ;;  %v8616_v35 = vld [vmem:[%s9815_s20 + $0x90] ss:$12 sps:$4 sm:$0xff]  }
 0x317   : > { %3624 = vmatprep.subr.bf16.mxu0 %v8522_v31  ;;  %3478 = vmatpush1.bf16.msra.mxu1 %v8516_v42  ;;  %v8567_v31 = vld [vmem:[%s9806_s23 + $0x254] ss:$24 sps:$4 sm:$0xff]   ;;  %v8571_v42 = vld [vmem:[%s9806_s23 + $0x284] ss:$24 sps:$4 sm:$0xff]  }
 0x318   : > { %3053 = vmatmul.mubr.bf16.gmra.mrb[16].mxu0 %v8456_v56  ;;  %5809 = vmatprep.subr.bf16.mxu1 %v8591_v1  ;;  %v8625_v1 = vld [vmem:[%s9815_s20 + $0xc0] ss:$12 sps:$4 sm:$0xff]  }
 0x319   : > { %3375 = vmatmul.mubr.bf16.gmra.mrb[16].mxu1 %v8456_v56  ;;  %3062 = vmatprep.mubr.bf16.mxu0 %v8457_v27  ;;  %v10990_v56 = vld [vmem:[#allocation2 + $0x98] ss:$12 sps:$4 sm:$0xff]  }
 0x31a   : > { %3384 = vmatprep.mubr.bf16.mxu1 %v8457_v27  ;;  %v8565_v27 = vld [vmem:[%s9806_s23 + $0x250] ss:$24 sps:$4 sm:$0xff]  }
 0x320   : > { %3063 = vmatmul.mubr.bf16.gmra.mrb[20].mxu0 %v8462_v44 }
 0x321   : > { %3385 = vmatmul.mubr.bf16.gmra.mrb[20].mxu1 %v8462_v44  ;;  %3072 = vmatprep.mubr.bf16.mxu0 %v10858_v17  ;;  %v8619_v44 = vld [vmem:[%s9815_s20 + $0xa8] ss:$12 sps:$4 sm:$0xff]  }
 0x322   : > { %3394 = vmatprep.mubr.bf16.mxu1 %v10858_v17 }
 0x328   : > { %3073 = vmatmul.mubr.bf16.gmra.mrb[24].mxu0 %v10862_v16 }
 0x329   : > { %3395 = vmatmul.mubr.bf16.gmra.mrb[24].mxu1 %v10862_v16  ;;  %3082 = vmatprep.mubr.bf16.mxu0 %v10864_v37 }
 0x32a   : > { %3404 = vmatprep.mubr.bf16.mxu1 %v10864_v37 }
 0x330   : > { %3083 = vmatmul.mubr.bf16.gmra.mrb[28].mxu0 %v10870_v49 }
 0x331   : > { %3405 = vmatmul.mubr.bf16.gmra.mrb[28].mxu1 %v10870_v49  ;;  %3092 = vmatprep.mubr.bf16.mxu0 %v10872_v3 }
 0x332   : > { %3414 = vmatprep.mubr.bf16.mxu1 %v10872_v3 }
 0x338   : > { %3093 = vmatmul.mubr.bf16.gmra.mrb[32].mxu0 %v10878_v46 }
 0x339   : > { %3415 = vmatmul.mubr.bf16.gmra.mrb[32].mxu1 %v10878_v46  ;;  %3102 = vmatprep.mubr.bf16.mxu0 %v10880_v12 }
 0x33a   : > { %3424 = vmatprep.mubr.bf16.mxu1 %v10880_v12 }
 0x340   : > { %3103 = vmatmul.mubr.bf16.gmra.mrb[36].mxu0 %v10886_v21 }
 0x341   : > { %3425 = vmatmul.mubr.bf16.gmra.mrb[36].mxu1 %v10886_v21  ;;  %3112 = vmatprep.mubr.bf16.mxu0 %v10888_v9 }
 0x342   : > { %3434 = vmatprep.mubr.bf16.mxu1 %v10888_v9 }
 0x348   : > { %3113 = vmatmul.mubr.bf16.gmra.mrb[40].mxu0 %v10894_v50 }
 0x349   : > { %3435 = vmatmul.mubr.bf16.gmra.mrb[40].mxu1 %v10894_v50  ;;  %3122 = vmatprep.mubr.bf16.mxu0 %v10896_v53 }
 0x34a   : > { %3444 = vmatprep.mubr.bf16.mxu1 %v10896_v53 }
 0x350   : > { %3123 = vmatmul.mubr.bf16.gmra.mrb[44].mxu0 %v10902_v43 }
 0x351   : > { %3445 = vmatmul.mubr.bf16.gmra.mrb[44].mxu1 %v10902_v43  ;;  %3132 = vmatprep.mubr.bf16.mxu0 %v10904_v23 }
 0x352   : > { %3454 = vmatprep.mubr.bf16.mxu1 %v10904_v23 }
 0x358   : > { %3133 = vmatmul.mubr.bf16.gmra.mrb[48].mxu0 %v10910_v39 }
 0x359   : > { %3455 = vmatmul.mubr.bf16.gmra.mrb[48].mxu1 %v10910_v39  ;;  %3173 = vmatprep.mubr.bf16.mxu0 %v12975_v19 }
 0x35a   : > { %3495 = vmatprep.mubr.bf16.mxu1 %v12975_v19 }
 0x360   : > { %3174 = vmatmul.mubr.bf16.vlgmr.msra.gmra.mrb[0].mxu0 %v10916_v55 }
 0x361   : > { %3496 = vmatmul.mubr.bf16.vlgmr.msra.gmra.mrb[0].mxu1 %v10916_v55  ;;  %3625 = vmatpush1.bf16.msra.mxu0 %v8520_v13  ;;  %v8569_v13 = vld [vmem:[%s9806_s23 + $0x280] ss:$24 sps:$4 sm:$0xff]  }
 0x362   : > { %3183 = vmatprep.mubr.bf16.mxu0 %v12975_v19  ;;  %3505 = vmatprep.mubr.bf16.mxu1 %v12975_v19 }
 0x363   : > { %3626 = vmatprep.subr.bf16.mxu0 %v8525_v54  ;;  %5810 = vmatpush1.bf16.msra.mxu1 %v8589_v63  ;;  %v8575_v54 = vld [vmem:[%s9806_s23 + $0x2b4] ss:$24 sps:$4 sm:$0xff]   ;;  %v8579_v63 = vld [vmem:[%s9806_s23 + $0x2e4] ss:$24 sps:$4 sm:$0xff]  }
 0x364   : > { %5811 = vmatprep.subr.bf16.mxu1 %v8594_v6  ;;  %v8557_v6 = vld [vmem:[#allocation2 + $0xc8] ss:$12 sps:$4 sm:$0xff]  }
 0x365   : > { %3627 = vmatpush1.bf16.msra.mxu0 %v8523_v4  ;;  %v11002_v4 = vld [vmem:[#allocation2 + $0xb0] ss:$12 sps:$4 sm:$0xff]  }
 0x366   : > { %3628 = vmatprep.subr.bf16.mxu0 %v8529_v30  ;;  %v8573_v30 = vld [vmem:[%s9806_s23 + $0x2b0] ss:$24 sps:$4 sm:$0xff]  }
 0x367   : > { %5812 = vmatpush1.bf16.msra.mxu1 %v8592_v7  ;;  %v8582_v7 = vld [vmem:[%s9806_s23 + $0x314] ss:$24 sps:$4 sm:$0xff]  }
 0x368   : > { %3184 = vmatmul.mubr.bf16.gmra.mrb[4].mxu0 %v10928_v58  ;;  %5813 = vmatprep.subr.bf16.mxu1 %v8600_v59  ;;  %v8637_v59 = vld [vmem:[%s9815_s20 + $0x108] ss:$12 sps:$4 sm:$0xff]  }
 0x369   : > { %3506 = vmatmul.mubr.bf16.gmra.mrb[4].mxu1 %v10928_v58  ;;  %3629 = vmatpush1.bf16.msra.mxu0 %v8527_v2  ;;  %v8627_v2 = vld [vmem:[%s9815_s20 + $0xc4] ss:$12 sps:$4 sm:$0xff]  }
 0x36a   : > { %3193 = vmatprep.mubr.bf16.mxu0 %v12975_v19  ;;  %3515 = vmatprep.mubr.bf16.mxu1 %v12975_v19 }
 0x36b   : > { %3630 = vmatprep.subr.bf16.mxu0 %v8533_v24  ;;  %5814 = vmatpush1.bf16.msra.mxu1 %v8598_v32  ;;  %v8577_v24 = vld [vmem:[%s9806_s23 + $0x2e0] ss:$24 sps:$4 sm:$0xff]   ;;  %v8561_v32 = vld [vmem:[#allocation2 + $0xe0] ss:$12 sps:$4 sm:$0xff]  }
 0x36c   : > { %5815 = vmatprep.subr.bf16.mxu1 %v8603_v47  ;;  %v8640_v47 = vld [vmem:[%s9815_s20 + $0x120] ss:$12 sps:$4 sm:$0xff]  }
 0x36d   : > { %3631 = vmatpush1.bf16.msra.mxu0 %v8531_v57  ;;  %v8628_v57 = vld [vmem:[%s9815_s20 + $0xd8] ss:$12 sps:$4 sm:$0xff]  }
 0x36e   : > { %3632 = vmatprep.subr.bf16.mxu0 %v8537_v61  ;;  %v8630_v61 = vld [vmem:[%s9815_s20 + $0xdc] ss:$12 sps:$4 sm:$0xff]  }
 0x36f   : > { %5816 = vmatpush1.bf16.msra.mxu1 %v8601_v52  ;;  %v8642_v52 = vld [vmem:[%s9815_s20 + $0x124] ss:$12 sps:$4 sm:$0xff]  }
 0x370   : > { %3194 = vmatmul.mubr.bf16.gmra.mrb[8].mxu0 %v10940_v25  ;;  %5817 = vmatprep.subr.bf16.mxu1 %v8609_v62  ;;  %v9096_v62 = vld [vmem:[#allocation2 + $0x4] ss:$12 sps:$4 sm:$0xff]  }
 0x371   : > { %3516 = vmatmul.mubr.bf16.gmra.mrb[8].mxu1 %v10940_v25  ;;  %3203 = vmatprep.mubr.bf16.mxu0 %v12975_v19 }
 0x372   : > { %3525 = vmatprep.mubr.bf16.mxu1 %v12975_v19  ;;  %3633 = vmatpush1.bf16.msra.mxu0 %v8535_v8  ;;  %v8636_v8 = vld [vmem:[%s9815_s20 + $0xf4] ss:$12 sps:$4 sm:$0xff]  }
 0x373   : > { %3634 = vmatprep.subr.bf16.mxu0 %v8541_v41  ;;  %5818 = vmatpush1.bf16.msra.mxu1 %v8607_v40  ;;  %v8634_v41 = vld [vmem:[%s9815_s20 + $0xf0] ss:$12 sps:$4 sm:$0xff]  }
 0x374   : > { %5819 = vmatprep.subr.bf16.mxu1 %v8612_v60  ;;  %v8580_v40 = vld [vmem:[%s9806_s23 + $0x310] ss:$24 sps:$4 sm:$0xff]   ;;  %v8583_v60 = vld [vmem:[%s9806_s23 + $0x340] ss:$24 sps:$4 sm:$0xff]  }
 0x376   : > { %3635 = vmatpush1.bf16.msra.mxu0 %v8539_v38  ;;  %v8639_v38 = vld [vmem:[%s9815_s20 + $0x10c] ss:$12 sps:$4 sm:$0xff]  }
 0x377   : > { %3636 = vmatprep.subr.bf16.mxu0 %v8544_v48  ;;  %5820 = vmatpush1.bf16.msra.mxu1 %v8610_v36  ;;  %v8568_v48 = vld [vmem:[#allocation2 + $0xf8] ss:$12 sps:$4 sm:$0xff]   ;;  %v9098_v36 = vld [vmem:[#allocation2 + $0x1c] ss:$12 sps:$4 sm:$0xff]  }
 0x378   : > { %3204 = vmatmul.mubr.bf16.gmra.mrb[12].mxu0 %v10952_v14  ;;  %5821 = vmatprep.subr.bf16.mxu1 %v8618_v26  ;;  %v9099_v26 = vld [vmem:[#allocation2 + $0x18] ss:$12 sps:$4 sm:$0xff]  }
 0x379   : > { %3526 = vmatmul.mubr.bf16.gmra.mrb[12].mxu1 %v10952_v14  ;;  %3213 = vmatprep.mubr.bf16.mxu0 %v12975_v19 }
 0x37a   : > { %3535 = vmatprep.mubr.bf16.mxu1 %v12975_v19  ;;  %3637 = vmatpush1.bf16.msra.mxu0 %v8542_v22  ;;  %v8572_v22 = vld [vmem:[#allocation2 + $0x110] ss:$12 sps:$4 sm:$0xff]  }
 0x37b   : > { %3638 = vmatprep.subr.bf16.mxu0 %v8548_v0  ;;  %5822 = vmatpush1.bf16.msra.mxu1 %v8616_v35  ;;  %v8576_v0 = vld [vmem:[#allocation2 + $0x128] ss:$0 sps:$4 sm:$0x33]  }
 0x37c   : > { %5823 = vmatprep.subr.bf16.mxu1 %v8621_v10  ;;  %v8597_v35 = vld [vmem:[%s9806_s23 + $0x3a4] ss:$24 sps:$4 sm:$0xff]   ;;  %v8649_v10 = vld [vmem:[%s9815_s20 + $0x168] ss:$12 sps:$4 sm:$0xff]  }
 0x37e   : > { %3639 = vmatpush1.bf16.msra.mxu0 %v8546_v5  ;;  %v8645_v5 = vld [vmem:[%s9815_s20 + $0x13c] ss:$12 sps:$4 sm:$0xff]  }
 0x37f   : > { %3640 = vmatprep.subr.bf16.mxu0 %v8552_v28  ;;  %5824 = vmatpush1.bf16.msra.mxu1 %v8619_v44  ;;  %v8643_v28 = vld [vmem:[%s9815_s20 + $0x138] ss:$12 sps:$4 sm:$0xff]  }
 0x380   : > { %3214 = vmatmul.mubr.bf16.gmra.mrb[16].mxu0 %v10966_v51  ;;  %5825 = vmatprep.subr.bf16.mxu1 %v8627_v2  ;;  %v8604_v44 = vld [vmem:[%s9806_s23 + $0x3d0] ss:$24 sps:$4 sm:$0xff]  }
 0x381   : > { %3536 = vmatmul.mubr.bf16.gmra.mrb[16].mxu1 %v10966_v51  ;;  %3223 = vmatprep.mubr.bf16.mxu0 %v12975_v19  ;;  %v8622_v2 = vld [vmem:[%s9806_s23 + $0x430] ss:$24 sps:$4 sm:$0xff]  }
 0x382   : > { %3545 = vmatprep.mubr.bf16.mxu1 %v12975_v19  ;;  %3641 = vmatpush1.bf16.msra.mxu0 %v8550_v45  ;;  %v8585_v45 = vld [vmem:[%s9806_s23 + $0x344] ss:$24 sps:$4 sm:$0xff]  }
 0x383   : > { %3642 = vmatprep.subr.bf16.mxu0 %v8556_v34  ;;  %5826 = vmatpush1.bf16.msra.mxu1 %v8625_v1  ;;  %v9097_v34 = vld [vmem:[#allocation2] ss:$12 sps:$4 sm:$0xff]   ;;  %v8624_v1 = vld [vmem:[%s9806_s23 + $0x434] ss:$24 sps:$4 sm:$0xff]  }
 0x384   : > { %5827 = vmatprep.subr.bf16.mxu1 %v8630_v61  ;;  %v9105_v61 = vld [vmem:[#allocation2 + $0x60] ss:$12 sps:$4 sm:$0xff]  }
 0x386   : > { %3643 = vmatpush1.bf16.msra.mxu0 %v8554_v18  ;;  %v8648_v18 = vld [vmem:[%s9815_s20 + $0x154] ss:$12 sps:$4 sm:$0xff]  }
 0x387   : > { %3644 = vmatprep.subr.bf16.mxu0 %v8560_v20  ;;  %5828 = vmatpush1.bf16.msra.mxu1 %v8628_v57  ;;  %v8588_v20 = vld [vmem:[%s9806_s23 + $0x374] ss:$24 sps:$4 sm:$0xff]   ;;  %v8631_v57 = vld [vmem:[%s9806_s23 + $0x460] ss:$24 sps:$4 sm:$0xff]  }
 0x388   : > { %3224 = vmatmul.mubr.bf16.gmra.mrb[20].mxu0 %v10978_v11  ;;  %5829 = vmatprep.subr.bf16.mxu1 %v8636_v8  ;;  %v9106_v8 = vld [vmem:[#allocation2 + $0x7c] ss:$12 sps:$4 sm:$0xff]  }
 0x389   : > { %3546 = vmatmul.mubr.bf16.gmra.mrb[20].mxu1 %v10978_v11  ;;  %3233 = vmatprep.mubr.bf16.mxu0 %v12975_v19 }
 0x38a   : > { %3555 = vmatprep.mubr.bf16.mxu1 %v12975_v19  ;;  %3645 = vmatpush1.bf16.msra.mxu0 %v8558_v15  ;;  %v8646_v15 = vld [vmem:[%s9815_s20 + $0x150] ss:$12 sps:$4 sm:$0xff]  }
 0x38b   : > { %3646 = vmatprep.subr.bf16.mxu0 %v8564_v29  ;;  %5830 = vmatpush1.bf16.msra.mxu1 %v8634_v41  ;;  %v8586_v29 = vld [vmem:[%s9806_s23 + $0x370] ss:$24 sps:$4 sm:$0xff]  }
 0x38c   : > { %5831 = vmatprep.subr.bf16.mxu1 %v8639_v38  ;;  %v8654_v41 = vld [vmem:[%s9815_s20 + $0x184] ss:$12 sps:$4 sm:$0xff]  }
 0x38d   : > { %v8680_v38 = vld [vmem:[%s9815_s20 + $0xf8] ss:$12 sps:$4 sm:$0xff]  }
 0x38e   : > { %3647 = vmatpush1.bf16.msra.mxu0 %v8562_v33  ;;  %v9100_v33 = vld [vmem:[#allocation2 + $0x34] ss:$12 sps:$4 sm:$0xff]  }
 0x38f   : > { %3648 = vmatprep.subr.bf16.mxu0 %v8567_v31  ;;  %5832 = vmatpush1.bf16.msra.mxu1 %v8637_v59  ;;  %v8595_v31 = vld [vmem:[%s9806_s23 + $0x3a0] ss:$24 sps:$4 sm:$0xff]  }
 0x390   : > { %3234 = vmatmul.mubr.bf16.gmra.mrb[24].mxu0 %v10990_v56  ;;  %5833 = vmatprep.subr.bf16.mxu1 %v8642_v52 }
 0x391   : > { %3556 = vmatmul.mubr.bf16.gmra.mrb[24].mxu1 %v10990_v56  ;;  %3243 = vmatprep.mubr.bf16.mxu0 %v12975_v19 }
 0x392   : > { %3565 = vmatprep.mubr.bf16.mxu1 %v12975_v19  ;;  %3649 = vmatpush1.bf16.msra.mxu0 %v8565_v27  ;;  %v8606_v27 = vld [vmem:[%s9806_s23 + $0x3d4] ss:$24 sps:$4 sm:$0xff]  }
 0x393   : > { %3650 = vmatprep.subr.bf16.mxu0 %v8571_v42  ;;  %5834 = vmatpush1.bf16.msra.mxu1 %v8640_v47  ;;  %v8651_v42 = vld [vmem:[%s9815_s20 + $0x16c] ss:$12 sps:$4 sm:$0xff]  }
 0x394   : > { %5835 = vmatprep.subr.bf16.mxu1 %v8645_v5 }
 0x396   : > { %3651 = vmatpush1.bf16.msra.mxu0 %v8569_v13  ;;  %v8615_v13 = vld [vmem:[%s9806_s23 + $0x404] ss:$24 sps:$4 sm:$0xff]  }
 0x397   : > { %3652 = vmatprep.subr.bf16.mxu0 %v8575_v54  ;;  %5836 = vmatpush1.bf16.msra.mxu1 %v8643_v28  ;;  %v9101_v54 = vld [vmem:[#allocation2 + $0x30] ss:$12 sps:$4 sm:$0xff]  }
 0x398   : > { %3244 = vmatmul.mubr.bf16.gmra.mrb[28].mxu0 %v11002_v4  ;;  %5837 = vmatprep.subr.bf16.mxu1 %v8648_v18 }
 0x399   : > { %3566 = vmatmul.mubr.bf16.gmra.mrb[28].mxu1 %v11002_v4  ;;  %3253 = vmatprep.mubr.bf16.mxu0 %v12975_v19 }
 0x39a   : > { %3575 = vmatprep.mubr.bf16.mxu1 %v12975_v19  ;;  %3653 = vmatpush1.bf16.msra.mxu0 %v8573_v30  ;;  %v9102_v30 = vld [vmem:[#allocation2 + $0x4c] ss:$12 sps:$4 sm:$0xff]  }
 0x39b   : > { %3654 = vmatprep.subr.bf16.mxu0 %v8579_v63  ;;  %5838 = vmatpush1.bf16.msra.mxu1 %v8646_v15  ;;  %v8613_v63 = vld [vmem:[%s9806_s23 + $0x400] ss:$24 sps:$4 sm:$0xff]  }
 0x39c   : > { %5839 = vmatprep.subr.bf16.mxu1 %v8651_v42 }
 0x39e   : > { %3655 = vmatpush1.bf16.msra.mxu0 %v8577_v24  ;;  %v8633_v24 = vld [vmem:[%s9806_s23 + $0x464] ss:$24 sps:$4 sm:$0xff]  }
 0x39f   : > { %3785 = vmatprep.subr.bf16.mxu0 %v8582_v7  ;;  %5840 = vmatpush1.bf16.msra.mxu1 %v8649_v10  ;;  %v9103_v7 = vld [vmem:[#allocation2 + $0x48] ss:$12 sps:$4 sm:$0xff]  }
 0x3a0   : > { %3254 = vmatmul.mubr.bf16.gmra.mrb[32].mxu0 %v8557_v6  ;;  %5970 = vmatprep.subr.bf16.mxu1 %v8654_v41 }
 0x3a1   : > { %3576 = vmatmul.mubr.bf16.gmra.mrb[32].mxu1 %v8557_v6  ;;  %3263 = vmatprep.mubr.bf16.mxu0 %v12975_v19  ;;  %v9104_v6 = vld [vmem:[#allocation2 + $0x64] ss:$12 sps:$4 sm:$0xff]  }
 0x3a2   : > { %3585 = vmatprep.mubr.bf16.mxu1 %v12975_v19 }
 0x3a8   : > { %3264 = vmatmul.mubr.bf16.gmra.mrb[36].mxu0 %v8561_v32 }
 0x3a9   : > { %3586 = vmatmul.mubr.bf16.gmra.mrb[36].mxu1 %v8561_v32  ;;  %3273 = vmatprep.mubr.bf16.mxu0 %v12975_v19  ;;  %v9107_v32 = vld [vmem:[#allocation2 + $0x78] ss:$12 sps:$4 sm:$0xff]  }
 0x3aa   : > { %3595 = vmatprep.mubr.bf16.mxu1 %v12975_v19 }
 0x3b0   : > { %3274 = vmatmul.mubr.bf16.gmra.mrb[40].mxu0 %v8568_v48 }
 0x3b1   : > { %3596 = vmatmul.mubr.bf16.gmra.mrb[40].mxu1 %v8568_v48  ;;  %3283 = vmatprep.mubr.bf16.mxu0 %v12975_v19 }
 0x3b2   : > { %3605 = vmatprep.mubr.bf16.mxu1 %v12975_v19 }
 0x3b8   : > { %3284 = vmatmul.mubr.bf16.gmra.mrb[44].mxu0 %v8572_v22 }
 0x3b9   : > { %3606 = vmatmul.mubr.bf16.gmra.mrb[44].mxu1 %v8572_v22  ;;  %3293 = vmatprep.mubr.bf16.mxu0 %v12975_v19 }
 0x3ba   : > { %3615 = vmatprep.mubr.bf16.mxu1 %v12975_v19 }
 0x3c0   : > { %3294 = vmatmul.mubr.bf16.gmra.mrb[48].mxu0 %v8576_v0 }
 0x3c1   : > { %3616 = vmatmul.mubr.bf16.gmra.mrb[48].mxu1 %v8576_v0  ;;  %3656 = vmatprep.mubr.bf16.mxu0 %v9096_v62 }
 0x3c8   : > { %3657 = vmatmul.mubr.bf16.vlgmr.msra.gmra.mrb[52].mxu0 %v9097_v34 }
 0x3c9   : > { %3786 = vmatpush1.bf16.msra.mxu0 %v8580_v40  ;;  %3666 = vmatprep.mubr.bf16.mxu0 %v9098_v36  ;;  %v8684_v40 = vld [vmem:[%s9815_s20 + $0x38] ss:$12 sps:$4 sm:$0xff]  }
 0x3ca   : > { %3787 = vmatprep.subr.bf16.mxu0 %v8585_v45 }
 0x3cd   : > { %3788 = vmatpush1.bf16.msra.mxu0 %v8583_v60  ;;  %v8685_v60 = vld [vmem:[%s9815_s20 + $0x110] ss:$12 sps:$4 sm:$0xff]  }
 0x3ce   : > { %3789 = vmatprep.subr.bf16.mxu0 %v8588_v20 }
 0x3d0   : > { %3667 = vmatmul.mubr.bf16.gmra.mrb[56].mxu0 %v9099_v26 }
 0x3d1   : > { %3676 = vmatprep.mubr.bf16.mxu0 %v9100_v33  ;;  %3790 = vmatpush1.bf16.msra.mxu0 %v8586_v29 }
 0x3d2   : > { %3791 = vmatprep.subr.bf16.mxu0 %v8597_v35 }
 0x3d5   : > { %3792 = vmatpush1.bf16.msra.mxu0 %v8595_v31  ;;  %v8686_v31 = vld [vmem:[%s9815_s20 + $0x50] ss:$12 sps:$4 sm:$0xff]  }
 0x3d6   : > { %3793 = vmatprep.subr.bf16.mxu0 %v8606_v27 }
 0x3d8   : > { %3677 = vmatmul.mubr.bf16.gmra.mrb[60].mxu0 %v9101_v54 }
 0x3d9   : > { %3686 = vmatprep.mubr.bf16.mxu0 %v9102_v30  ;;  %3794 = vmatpush1.bf16.msra.mxu0 %v8604_v44  ;;  %v8690_v44 = vld [vmem:[%s9815_s20 + $0x128] ss:$12 sps:$4 sm:$0xff]  }
 0x3da   : > { %3795 = vmatprep.subr.bf16.mxu0 %v8615_v13 }
 0x3dd   : > { %3796 = vmatpush1.bf16.msra.mxu0 %v8613_v63 }
 0x3de   : > { %3797 = vmatprep.subr.bf16.mxu0 %v8624_v1 }
 0x3e0   : > { %3687 = vmatmul.mubr.bf16.gmra.mrb[64].mxu0 %v9103_v7 }
 0x3e1   : > { %3696 = vmatprep.mubr.bf16.mxu0 %v9104_v6  ;;  %3798 = vmatpush1.bf16.msra.mxu0 %v8622_v2 }
 0x3e2   : > { %3799 = vmatprep.subr.bf16.mxu0 %v8633_v24 }
 0x3e5   : > { %3800 = vmatpush1.bf16.msra.mxu0 %v8631_v57  ;;  %v8691_v57 = vld [vmem:[%s9815_s20 + $0x68] ss:$12 sps:$4 sm:$0xff]  }
 0x3e8   : > { %3697 = vmatmul.mubr.bf16.gmra.mrb[68].mxu0 %v9105_v61 }
 0x3e9   : > { %3706 = vmatprep.mubr.bf16.mxu0 %v9106_v8 }
 0x3f0   : > { %3707 = vmatmul.mubr.bf16.gmra.mrb[72].mxu0 %v9107_v32 }
 0x3f1   : > { %3716 = vmatprep.mubr.bf16.mxu0 %v10858_v17  ;;  %v8673_v17 = vld [vmem:[%s9815_s20 + $0xc8] ss:$12 sps:$4 sm:$0xff]  }
 0x3f2   : > { %7465 = vmatprep.subr.bf16.mxu0 %v8673_v17 }
 0x3f8   : > { %3717 = vmatmul.mubr.bf16.gmra.mrb[76].mxu0 %v10862_v16  ;;  %v2027_v16 = vlaneseq }
 0x3f9   : > { %3726 = vmatprep.mubr.bf16.mxu0 %v10864_v37 }
 0x3fa   : > { %v11067_v37 = vshrl.u32 %v2027_v16, 7 }
 0x3fc   : > { %13160 = vst [vmem:[#allocation77_spill] sm:$0xff] %v11067_v37 }
 0x400   : > { %3727 = vmatmul.mubr.bf16.gmra.mrb[80].mxu0 %v10870_v49  ;;  %v2029_v49 = vsub.s32 0, %v11067_v37 }
 0x401   : > { %3736 = vmatprep.mubr.bf16.mxu0 %v10872_v3  ;;  %v2037_v3 = vsub.s32 2, %v11067_v37 }
 0x408   : > { %3737 = vmatmul.mubr.bf16.gmra.mrb[84].mxu0 %v10878_v46  ;;  %v2025_v46 = vld [vmem:[%s433_s22] sm:$0x3f] }
 0x409   : > { %3746 = vmatprep.mubr.bf16.mxu0 %v10880_v12  ;;  %v2033_v12 = vsub.s32 1, %v11067_v37 }
 0x410   : > { %3747 = vmatmul.mubr.bf16.gmra.mrb[88].mxu0 %v10886_v21  ;;  %v8674_v21 = vld [vmem:[%s9815_s20 + $0x8] ss:$12 sps:$4 sm:$0xff]  }
 0x411   : > { %3756 = vmatprep.mubr.bf16.mxu0 %v10888_v9  ;;  %v2041_v9 = vsub.s32 3, %v11067_v37 }
 0x413   : > { %v11087_v59 = vrot.slane %v2025_v46, %v2041_v9 }
 0x418   : > { %3757 = vmatmul.mubr.bf16.gmra.mrb[92].mxu0 %v10894_v50  ;;  %v8678_v50 = vld [vmem:[%s9815_s20 + $0xe0] ss:$12 sps:$4 sm:$0xff]  }
 0x419   : > { %3766 = vmatprep.mubr.bf16.mxu0 %v10896_v53  ;;  %v11079_v53 = vrot.slane %v2025_v46, %v2029_v49 }
 0x420   : > { %3767 = vmatmul.mubr.bf16.gmra.mrb[96].mxu0 %v10902_v43  ;;  %v11081_v43 = vrot.slane %v2025_v46, %v2037_v3 }
 0x421   : > { %3776 = vmatprep.mubr.bf16.mxu0 %v10904_v23  ;;  %v11083_v23 = vrot.slane %v2025_v46, %v2033_v12 }
 0x428   : > { %3777 = vmatmul.mubr.bf16.gmra.mrb[100].mxu0 %v10910_v39  ;;  %v8679_v39 = vld [vmem:[%s9815_s20 + $0x20] ss:$12 sps:$4 sm:$0xff]  }
 0x429   : > { %3817 = vmatprep.mubr.bf16.mxu0 %v12975_v19 }
 0x430   : > { %3818 = vmatmul.mubr.bf16.vlgmr.msra.gmra.mrb[52].mxu0 %v10916_v55 }
 0x431   : > { %3827 = vmatprep.mubr.bf16.mxu0 %v12975_v19  ;;  %7466 = vmatpush3.bf16.msra.mxu0 %v8674_v21 }
 0x432   : > { %7467 = vmatprep.subr.bf16.mxu0 %v8678_v50 }
 0x433   : > { %v3175_v48 = vpop.f32.mrb[0].mxu0 }
 0x434   : > { %v3497_v22 = vpop.f32.mrb[0].mxu1  ;;  %v7747_v55 = vadd.f32 %v3175_v48, %v11079_v53  ;;  %v3177_v52 = vpop.f32.mrb[1].mxu0  ;;  %v8692_v48 = vld [vmem:[%s9815_s20 + $0x140] ss:$12 sps:$4 sm:$0xff]  }
 0x435   : > { %v7797_v0 = vadd.f32 %v3497_v22, %v11081_v43  ;;  %v3499_v47 = vpop.f32.mrb[1].mxu1  ;;  %v7748_v62 = vadd.f32 %v3177_v52, %v11083_v23  ;;  %v3179_v5 = vpop.f32.mrb[2].mxu0  ;;  %7468 = vmatpush3.bf16.msra.mxu0 %v8679_v39 }
 0x436   : > { %v3501_v28 = vpop.f32.mrb[2].mxu1  ;;  %v4096_v45 = vmul.f32 0.70710677, %v7747_v55  ;;  %v7798_v36 = vadd.f32 %v3499_v47, %v11087_v59  ;;  %7469 = vmatprep.subr.bf16.mxu0 %v8680_v38  ;;  %v7749_v20 = vadd.f32 %v3179_v5, %v11079_v53  ;;  %v3181_v29 = vpop.f32.mrb[3].mxu0  ;;  %v3946_v17 = vmul.f32 0.5, %v7747_v55 }
 0x437   : > { %v4098_v34 = vmul.f32 0.70710677, %v7797_v0  ;;  %v4097_v18 = vmul.f32 0.70710677, %v7748_v62  ;;  %v7799_v15 = vadd.f32 %v3501_v28, %v11081_v43  ;;  %v3503_v35 = vpop.f32.mrb[3].mxu1  ;;  %v7750_v26 = vadd.f32 %v3181_v29, %v11083_v23 }
 0x438   : > { %8796 = verf.f32 %v4096_v45  ;;  %3828 = vmatmul.mubr.bf16.gmra.mrb[56].mxu0 %v10928_v58  ;;  %v7800_v33 = vadd.f32 %v3503_v35, %v11087_v59  ;;  %v4099_v27 = vmul.f32 0.70710677, %v7798_v36  ;;  %v4102_v42 = vmul.f32 0.70710677, %v7749_v20 }
 0x439   : > { %8798 = verf.f32 %v4098_v34  ;;  %3837 = vmatprep.mubr.bf16.mxu0 %v12975_v19  ;;  %7470 = vmatpush3.bf16.msra.mxu0 %v8684_v40  ;;  %v4104_v10 = vmul.f32 0.70710677, %v7799_v15  ;;  %v4103_v13 = vmul.f32 0.70710677, %v7750_v26  ;;  %v3948_v16 = vmul.f32 0.5, %v7797_v0 }
 0x43a   : > { %7471 = vmatprep.subr.bf16.mxu0 %v8685_v60  ;;  %8800 = verf.f32 %v4097_v18  ;;  %v4105_v1 = vmul.f32 0.70710677, %v7800_v33  ;;  %v11109_v46 = vmul.f32 0.5, %v7748_v62  ;;  %v11111_v12 = vmul.f32 0.5, %v7798_v36 }
 0x43b   : > { %v3185_v54 = vpop.f32.mrb[4].mxu0  ;;  %8802 = verf.f32 %v4102_v42  ;;  %v3952_v21 = vmul.f32 0.5, %v7749_v20  ;;  %v3954_v50 = vmul.f32 0.5, %v7799_v15  ;;  %v11117_v55 = vmul.f32 0.5, %v7750_v26 }
 0x43c   : > { %v7751_v58 = vadd.f32 %v3185_v54, %v11079_v53  ;;  %v3507_v30 = vpop.f32.mrb[4].mxu1  ;;  %v3187_v63 = vpop.f32.mrb[5].mxu0  ;;  %8804 = verf.f32 %v4104_v10  ;;  %v11119_v0 = vmul.f32 0.5, %v7800_v33 }
 0x43d   : > { %v7801_v2 = vadd.f32 %v3507_v30, %v11081_v43  ;;  %v7752_v24 = vadd.f32 %v3187_v63, %v11083_v23  ;;  %v3509_v7 = vpop.f32.mrb[5].mxu1  ;;  %v3189_v6 = vpop.f32.mrb[6].mxu0  ;;  %7472 = vmatpush3.bf16.msra.mxu0 %v8686_v31  ;;  %8806 = verf.f32 %v4099_v27  ;;  %v8697_v30 = vld [vmem:[%s9815_s20 + $0x158] ss:$12 sps:$4 sm:$0xff]  }
 0x43e   : > { %v4108_v61 = vmul.f32 0.70710677, %v7751_v58  ;;  %v7802_v8 = vadd.f32 %v3509_v7, %v11087_v59  ;;  %v3511_v41 = vpop.f32.mrb[6].mxu1  ;;  %v3191_v32 = vpop.f32.mrb[7].mxu0  ;;  %7473 = vmatprep.subr.bf16.mxu0 %v8690_v44  ;;  %8808 = verf.f32 %v4103_v13  ;;  %v7753_v38 = vadd.f32 %v3189_v6, %v11079_v53  ;;  %v8693_v44 = vld [vmem:[%s9815_s20 + $0x80] ss:$12 sps:$4 sm:$0xff]  }
 0x43f   : > { %v4110_v49 = vmul.f32 0.70710677, %v7801_v2  ;;  %v3513_v3 = vpop.f32.mrb[7].mxu1  ;;  %v4109_v9 = vmul.f32 0.70710677, %v7752_v24  ;;  %8810 = verf.f32 %v4105_v1  ;;  %v7803_v52 = vadd.f32 %v3511_v41, %v11081_v43 }
 0x440   : > { %3838 = vmatmul.mubr.bf16.gmra.mrb[60].mxu0 %v10940_v25  ;;  %v4111_v39 = vmul.f32 0.70710677, %v7802_v8  ;;  %8812 = verf.f32 %v4108_v61  ;;  %v11122_v62 = vmul.f32 0.5, %v7751_v58  ;;  %v11124_v25 = vmul.f32 0.5, %v7801_v2  ;;  %v8698_v41 = vld [vmem:[%s9815_s20 + $0x98] ss:$12 sps:$4 sm:$0xff]  }
 0x441   : > { %3847 = vmatprep.mubr.bf16.mxu0 %v12975_v19  ;;  %7474 = vmatpush3.bf16.msra.mxu0 %v8691_v57  ;;  %8814 = verf.f32 %v4110_v49  ;;  %v7754_v5 = vadd.f32 %v3191_v32, %v11083_v23  ;;  %v11127_v34 = vmul.f32 0.5, %v7752_v24  ;;  %v4114_v36 = vmul.f32 0.70710677, %v7753_v38 }
 0x442   : > { %v8797_v22 = vpop.eup %8796  ;;  %7475 = vmatprep.subr.bf16.mxu0 %v8692_v48  ;;  %8816 = verf.f32 %v4109_v9  ;;  %v11129_v15 = vmul.f32 0.5, %v7802_v8  ;;  %v7804_v29 = vadd.f32 %v3513_v3, %v11087_v59  ;;  %v4116_v31 = vmul.f32 0.70710677, %v7803_v52  ;;  %v8699_v48 = vld [vmem:[%s9815_s20 + $0x170] ss:$12 sps:$4 sm:$0xff]  }
 0x443   : > { %v8799_v47 = vpop.eup %8798  ;;  %v3195_v28 = vpop.f32.mrb[8].mxu0  ;;  %v4396_v45 = vadd.f32 1.0, %v8797_v22  ;;  %8818 = verf.f32 %v4111_v39  ;;  %v4115_v54 = vmul.f32 0.70710677, %v7754_v5 }
 0x444   : > { %v3517_v40 = vpop.f32.mrb[8].mxu1  ;;  %v3197_v60 = vpop.f32.mrb[9].mxu0  ;;  %v4398_v20 = vadd.f32 1.0, %v8799_v47  ;;  %8820 = verf.f32 %v4114_v36  ;;  %v7755_v24 = vadd.f32 %v3195_v28, %v11079_v53  ;;  %v4117_v8 = vmul.f32 0.70710677, %v7804_v29 }
 0x445   : > { %v8801_v18 = vpop.eup %8800  ;;  %v3519_v35 = vpop.f32.mrb[9].mxu1  ;;  %v4546_v1 = vmul.f32 %v4396_v45, %v3946_v17  ;;  %7476 = vmatpush3.bf16.msra.mxu0 %v8693_v44  ;;  %8822 = verf.f32 %v4116_v31  ;;  %v7805_v17 = vadd.f32 %v3517_v40, %v11081_v43  ;;  %v11157_v40 = vmul.f32 0.5, %v7803_v52  ;;  %v8703_v52 = vld [vmem:[%s9815_s20 + $0xb0] ss:$12 sps:$4 sm:$0xff]  }
 0x446   : > { %v11132_v26 = vpop.f32.mrb[10].mxu0  ;;  %v8803_v33 = vpop.eup %8802  ;;  %v4548_v6 = vmul.f32 %v4398_v20, %v3948_v16  ;;  %v4397_v57 = vadd.f32 1.0, %v8801_v18  ;;  %v4120_v49 = vmul.f32 0.70710677, %v7755_v24  ;;  %7477 = vmatprep.subr.bf16.mxu0 %v8697_v30  ;;  %8824 = verf.f32 %v4115_v54 }
 0x447   : > { %v11134_v27 = vpop.f32.mrb[10].mxu1  ;;  %v11136_v42 = vpop.f32.mrb[11].mxu0  ;;  %v4402_v13 = vadd.f32 1.0, %v8803_v33  ;;  %v7756_v16 = vadd.f32 %v3197_v60, %v11083_v23  ;;  %v11166_v60 = vmul.f32 0.5, %v7754_v5  ;;  %v11168_v20 = vmul.f32 0.5, %v7804_v29 }
 0x448   : > { %v8805_v10 = vpop.eup %8804  ;;  %v11139_v58 = vpop.f32.mrb[11].mxu1  ;;  %3848 = vmatmul.mubr.bf16.gmra.mrb[64].mxu0 %v10952_v14  ;;  %v11149_v14 = vmul.f32 0.5, %v7753_v38  ;;  %v11164_v18 = vmul.f32 %v4397_v57, %v11109_v46  ;;  %8826 = verf.f32 %v4117_v8  ;;  %v7806_v54 = vadd.f32 %v3519_v35, %v11087_v59 }
 0x449   : > { %v8807_v63 = vpop.eup %8806  ;;  %v4404_v2 = vadd.f32 1.0, %v8805_v10  ;;  %v4552_v61 = vmul.f32 %v4402_v13, %v3952_v21  ;;  %3857 = vmatprep.mubr.bf16.mxu0 %v12975_v19  ;;  %7478 = vmatpush3.bf16.msra.mxu0 %v8698_v41  ;;  %8828 = verf.f32 %v4120_v49  ;;  %v4122_v13 = vmul.f32 0.70710677, %v7805_v17 }
 0x44a   : > { %v8809_v7 = vpop.eup %8808  ;;  %7479 = vmatprep.subr.bf16.mxu0 %v8699_v48  ;;  %v11188_v57 = vmul.f32 0.5, %v7755_v24  ;;  %v11191_v8 = vmul.f32 0.5, %v7805_v17  ;;  %v4123_v41 = vmul.f32 0.70710677, %v7806_v54  ;;  %v7808_v49 = vadd.f32 %v11139_v58, %v11087_v59 }
 0x44b   : > { %v4554_v32 = vmul.f32 %v4404_v2, %v3954_v50  ;;  %v8811_v3 = vpop.eup %8810  ;;  %v11147_v9 = vpack.c.bf16 %v4552_v61, %v4546_v1  ;;  %v3205_v21 = vpop.f32.mrb[12].mxu0  ;;  %v4399_v50 = vadd.f32 1.0, %v8807_v63  ;;  %v4403_v28 = vadd.f32 1.0, %v8809_v7 }
 0x44c   : > { %v11152_v39 = vpop.f32.mrb[12].mxu1  ;;  %v8813_v22 = vpop.eup %8812  ;;  %v4405_v10 = vadd.f32 1.0, %v8811_v3  ;;  %v4121_v63 = vmul.f32 0.70710677, %v7756_v16  ;;  %v7757_v1 = vadd.f32 %v11132_v26, %v11079_v53  ;;  %v7807_v2 = vadd.f32 %v11134_v27, %v11081_v43 }
 0x44d   : > { %13161 = vst [vmem:[#allocation78_spill] sm:$0xff] %v11147_v9  ;;  %v11155_v47 = vpack.c.bf16 %v4554_v32, %v4548_v6  ;;  %v11159_v45 = vpop.f32.mrb[13].mxu0  ;;  %v11161_v36 = vpop.f32.mrb[13].mxu1  ;;  %v4408_v29 = vadd.f32 1.0, %v8813_v22  ;;  %v11185_v7 = vmul.f32 %v4399_v50, %v11111_v12  ;;  %v4553_v6 = vmul.f32 %v4403_v28, %v11117_v55  ;;  %7480 = vmatpush3.bf16.msra.mxu0 %v8703_v52 }
 0x44e   : > { %v8815_v38 = vpop.eup %8814  ;;  %v11170_v33 = vpop.f32.mrb[14].mxu0  ;;  %v4126_v32 = vmul.f32 0.70710677, %v7757_v1  ;;  %v11195_v27 = vmul.f32 %v4405_v10, %v11119_v0  ;;  %8830 = verf.f32 %v4122_v13  ;;  %v4128_v55 = vmul.f32 0.70710677, %v7807_v2 }
 0x44f   : > { %13162 = vst [vmem:[#allocation79_spill] sm:$0xff] %v11155_v47  ;;  %v11172_v31 = vpop.f32.mrb[14].mxu1  ;;  %v8817_v44 = vpop.eup %8816  ;;  %13163 = vst [vmem:[#allocation80_spill] sm:$0xff] %v11185_v7  ;;  %v4410_v35 = vadd.f32 1.0, %v8815_v38  ;;  %v11198_v24 = vmul.f32 %v4408_v29, %v11122_v62  ;;  %8832 = verf.f32 %v4121_v63  ;;  %v11211_v22 = vmul.f32 0.5, %v7756_v16 }
 0x450   : > { %v11176_v30 = vpop.f32.mrb[15].mxu0  ;;  %v11178_v46 = vpop.f32.mrb[15].mxu1  ;;  %3858 = vmatmul.mubr.bf16.gmra.mrb[68].mxu0 %v10966_v51  ;;  %v4409_v61 = vadd.f32 1.0, %v8817_v44  ;;  %13164 = vst [vmem:[#allocation81_spill] sm:$0xff] %v11195_v27  ;;  %v7758_v51 = vadd.f32 %v11136_v42, %v11083_v23  ;;  %8834 = verf.f32 %v4123_v41  ;;  %v11214_v62 = vadd.f32 %v3205_v21, %v11079_v53 }
 0x451   : > { %v8819_v5 = vpop.eup %8818  ;;  %3867 = vmatprep.mubr.bf16.mxu0 %v12975_v19  ;;  %v11209_v0 = vmul.f32 %v4410_v35, %v11124_v25  ;;  %8836 = verf.f32 %v4126_v32  ;;  %v11230_v21 = vmul.f32 0.5, %v7806_v54  ;;  %v4129_v10 = vmul.f32 0.70710677, %v7808_v49 }
 0x452   : > { %v8821_v26 = vpop.eup %8820  ;;  %v4411_v12 = vadd.f32 1.0, %v8819_v5  ;;  %v11221_v58 = vmul.f32 %v4409_v61, %v11127_v34  ;;  %v4127_v52 = vmul.f32 0.70710677, %v7758_v51  ;;  %8838 = verf.f32 %v4128_v55 }
 0x453   : > { %v11204_v17 = vpop.f32.mrb[16].mxu0  ;;  %v8823_v48 = vpop.eup %8822  ;;  %13165 = vst [vmem:[#allocation82_spill] sm:$0xff] %v11209_v0  ;;  %v4414_v38 = vadd.f32 1.0, %v8821_v26  ;;  %v4132_v29 = vmul.f32 0.70710677, %v11214_v62  ;;  %v7809_v63 = vadd.f32 %v11152_v39, %v11081_v43  ;;  %v7760_v35 = vadd.f32 %v11159_v45, %v11083_v23 }
 0x454   : > { %v11206_v3 = vpop.f32.mrb[16].mxu1  ;;  %v11216_v50 = vpop.f32.mrb[17].mxu0  ;;  %v11228_v16 = vmul.f32 %v4411_v12, %v11129_v15  ;;  %v4416_v34 = vadd.f32 1.0, %v8823_v48  ;;  %v11243_v41 = vadd.f32 %v11161_v36, %v11087_v59  ;;  %v11246_v32 = vpack.c.bf16 %v4553_v6, %v11164_v18  ;;  %v8652_v39 = vld [vmem:[%s9815_s20 + $0x180] ss:$12 sps:$4 sm:$0xff]  }
 0x455   : > { %v11218_v42 = vpop.f32.mrb[17].mxu1  ;;  %v8825_v28 = vpop.eup %8824  ;;  %v11250_v26 = vadd.f32 %v11170_v33, %v11079_v53  ;;  %v11255_v45 = vmul.f32 %v4414_v38, %v11149_v14  ;;  %v11257_v12 = vmul.f32 0.5, %v7757_v1  ;;  %8840 = verf.f32 %v4127_v52  ;;  %v8657_v36 = vld [vmem:[%s9815_s20 + $0x19c] ss:$12 sps:$4 sm:$0xff]   ;;  %v8655_v33 = vld [vmem:[%s9815_s20 + $0x198] ss:$12 sps:$4 sm:$0xff]  }
 0x456   : > { %v11223_v44 = vpop.f32.mrb[18].mxu0  ;;  %v11225_v25 = vpop.f32.mrb[18].mxu1  ;;  %13166 = vst [vmem:[#allocation83_spill] sm:$0xff] %v11228_v16  ;;  %v4415_v54 = vadd.f32 1.0, %v8825_v28  ;;  %13167 = vst [vmem:[#allocation84_spill] sm:$0xff] %v11246_v32  ;;  %v11261_v18 = vmul.f32 0.5, %v7807_v2  ;;  %8842 = verf.f32 %v4129_v10  ;;  %5841 = vmatprep.mubr.bf16.mxu1 %v11246_v32 }
 0x457   : > { %v11232_v13 = vpop.f32.mrb[19].mxu0  ;;  %v8827_v5 = vpop.eup %8826  ;;  %v4134_v55 = vmul.f32 0.70710677, %v7809_v63  ;;  %v4133_v6 = vmul.f32 0.70710677, %v7760_v35  ;;  %8844 = verf.f32 %v4132_v29  ;;  %5842 = vmatmul.mubr.bf16.vlgmr.msra.gmra.mrb[52].mxu1 %v11147_v9  ;;  %v11277_v10 = vmul.f32 0.5, %v7758_v51 }
 0x458   : > { %v11239_v15 = vpop.f32.mrb[19].mxu1  ;;  %v8829_v61 = vpop.eup %8828  ;;  %3868 = vmatmul.mubr.bf16.gmra.mrb[72].mxu0 %v10978_v11  ;;  %v4417_v48 = vadd.f32 1.0, %v8827_v5  ;;  %v11266_v11 = vmul.f32 %v4416_v34, %v11157_v40  ;;  %v4135_v1 = vmul.f32 0.70710677, %v11243_v41  ;;  %v11275_v52 = vmul.f32 %v4415_v54, %v11166_v60  ;;  %5971 = vmatpush1.bf16.msra.mxu1 %v8652_v39  ;;  %v8660_v54 = vld [vmem:[%s9815_s20 + $0x1b4] ss:$12 sps:$4 sm:$0xff]  }
 0x459   : > { %3877 = vmatprep.mubr.bf16.mxu0 %v12975_v19  ;;  %v4420_v14 = vadd.f32 1.0, %v8829_v61  ;;  %v8831_v2 = vpop.eup %8830  ;;  %v4138_v40 = vmul.f32 0.70710677, %v11250_v26  ;;  %v7811_v5 = vadd.f32 %v11172_v31, %v11081_v43  ;;  %v11286_v19 = vmul.f32 0.5, %v7808_v49  ;;  %5972 = vmatprep.subr.bf16.mxu1 %v8657_v36 }
 0x45a   : > { %13168 = vst [vmem:[#allocation85_spill] sm:$0xff] %v11266_v11  ;;  %v8833_v61 = vpop.eup %8832  ;;  %8846 = verf.f32 %v4134_v55  ;;  %v7762_v60 = vadd.f32 %v11176_v30, %v11083_v23  ;;  %v7812_v51 = vadd.f32 %v11178_v46, %v11087_v59  ;;  %v11298_v47 = vmul.f32 %v4417_v48, %v11168_v20 }
 0x45b   : > { %v11270_v28 = vpop.f32.mrb[20].mxu0  ;;  %v8835_v39 = vpop.eup %8834  ;;  %v11301_v49 = vmul.f32 0.5, %v11214_v62  ;;  %8848 = verf.f32 %v4133_v6  ;;  %v4140_v55 = vmul.f32 0.70710677, %v7811_v5  ;;  %v11308_v36 = vmul.f32 %v4420_v14, %v11188_v57  ;;  %v8658_v6 = vld [vmem:[%s9815_s20 + $0x1b0] ss:$12 sps:$4 sm:$0xff]  }
 0x45c   : > { %v11272_v38 = vpop.f32.mrb[20].mxu1  ;;  %v11282_v34 = vpop.f32.mrb[21].mxu0  ;;  %13169 = vst [vmem:[#allocation86_spill] sm:$0xff] %v11298_v47  ;;  %v11310_v0 = vmul.f32 0.5, %v7809_v63  ;;  %8850 = verf.f32 %v4135_v1  ;;  %v4139_v20 = vmul.f32 0.70710677, %v7762_v60  ;;  %5973 = vmatpush1.bf16.msra.mxu1 %v8655_v33  ;;  %v7763_v57 = vadd.f32 %v11204_v17, %v11079_v53 }
 0x45d   : > { %v11284_v29 = vpop.f32.mrb[21].mxu1  ;;  %v11293_v37 = vpop.f32.mrb[22].mxu0  ;;  %v4422_v47 = vadd.f32 1.0, %v8831_v2  ;;  %v4421_v62 = vadd.f32 1.0, %v8833_v61  ;;  %v11312_v16 = vmul.f32 0.5, %v7760_v35  ;;  %8852 = verf.f32 %v4138_v40  ;;  %5974 = vmatprep.subr.bf16.mxu1 %v8660_v54 }
 0x45e   : > { %v11295_v31 = vpop.f32.mrb[22].mxu1  ;;  %v11303_v30 = vpop.f32.mrb[23].mxu0  ;;  %8854 = verf.f32 %v4140_v55  ;;  %v4141_v27 = vmul.f32 0.70710677, %v7812_v51  ;;  %v7813_v63 = vadd.f32 %v11206_v3, %v11081_v43  ;;  %v8663_v14 = vld [vmem:[%s9815_s20 + $0x1cc] ss:$12 sps:$4 sm:$0xff]  }
 0x45f   : > { %v11305_v11 = vpop.f32.mrb[23].mxu1  ;;  %v8837_v46 = vpop.eup %8836  ;;  %v13170_v1 = vmov 0   ;;  %v4423_v35 = vadd.f32 1.0, %v8835_v39  ;;  %v11323_v2 = vmul.f32 0.5, %v11243_v41  ;;  %8856 = verf.f32 %v4139_v20  ;;  %v8661_v33 = vld [vmem:[%s9815_s20 + $0x1c8] ss:$12 sps:$4 sm:$0xff]  }
 0x460   : > { %v8839_v48 = vpop.eup %8838  ;;  %3878 = vmatmul.mubr.bf16.gmra.mrb[76].mxu0 %v10990_v56  ;;  %v7764_v56 = vadd.f32 %v11216_v50, %v11083_v23  ;;  %v4426_v61 = vadd.f32 1.0, %v8837_v46  ;;  %v11329_v55 = vmul.f32 0.5, %v11250_v26  ;;  %v4144_v3 = vmul.f32 0.70710677, %v7763_v57  ;;  %5975 = vmatpush1.bf16.msra.mxu1 %v8658_v6  ;;  %v8666_v26 = vld [vmem:[%s9815_s20 + $0x1e4] ss:$12 sps:$4 sm:$0xff]  }
 0x461   : > { %3887 = vmatprep.mubr.bf16.mxu0 %v13170_v1  ;;  %v8841_v40 = vpop.eup %8840  ;;  %v4428_v17 = vadd.f32 1.0, %v8839_v48  ;;  %v11334_v39 = vmul.f32 %v4422_v47, %v11191_v8  ;;  %v11337_v41 = vmul.f32 %v4421_v62, %v11211_v22  ;;  %v11339_v20 = vmul.f32 0.5, %v7811_v5  ;;  %5976 = vmatprep.subr.bf16.mxu1 %v8663_v14 }
 0x462   : > { %v8843_v7 = vpop.eup %8842  ;;  %v11341_v50 = vmul.f32 0.5, %v7762_v60  ;;  %v11348_v32 = vmul.f32 0.5, %v7812_v51  ;;  %8858 = verf.f32 %v4141_v27  ;;  %v7814_v47 = vadd.f32 %v11218_v42, %v11087_v59 }
 0x463   : > { %v11331_v54 = vpop.f32.mrb[24].mxu0  ;;  %13172 = vst [vmem:[#allocation88_spill] sm:$0xff] %v11334_v39  ;;  %v8845_v9 = vpop.eup %8844  ;;  %v11357_v5 = vmul.f32 %v4423_v35, %v11230_v21  ;;  %v4427_v60 = vadd.f32 1.0, %v8841_v40  ;;  %v4145_v62 = vmul.f32 0.70710677, %v7764_v56  ;;  %v11361_v6 = vpack.c.bf16 %v11275_v52, %v11221_v58 }
 0x464   : > { %13171 = vst [vmem:[#allocation87_spill] sm:$0xff] %v11331_v54  ;;  %v11343_v46 = vpop.f32.mrb[24].mxu1  ;;  %v11345_v48 = vpop.f32.mrb[25].mxu0  ;;  %v4146_v54 = vmul.f32 0.70710677, %v7813_v63  ;;  %v11368_v14 = vmul.f32 %v4426_v61, %v11257_v12  ;;  %v11371_v39 = vmul.f32 %v4428_v17, %v11261_v18  ;;  %8860 = verf.f32 %v4144_v3  ;;  %5977 = vmatpush1.bf16.msra.mxu1 %v8661_v33 }
 0x465   : > { %v11352_v8 = vpop.f32.mrb[25].mxu1  ;;  %v11354_v22 = vpop.f32.mrb[26].mxu0  ;;  %13173 = vst [vmem:[#allocation89_spill] sm:$0xff] %v11357_v5  ;;  %13174 = vst [vmem:[#allocation90_spill] sm:$0xff] %v11361_v6  ;;  %v4147_v21 = vmul.f32 0.70710677, %v7814_v47  ;;  %5851 = vmatprep.mubr.bf16.mxu1 %v11361_v6  ;;  %v11378_v5 = vadd.f32 %v11223_v44, %v11079_v53  ;;  %v11382_v12 = vadd.f32 %v11225_v25, %v11081_v43  ;;  %5978 = vmatprep.subr.bf16.mxu1 %v8666_v26 }
 0x466   : > { %v11363_v27 = vpop.f32.mrb[26].mxu1  ;;  %v11365_v51 = vpop.f32.mrb[27].mxu0  ;;  %13175 = vst [vmem:[#allocation91_spill] sm:$0xff] %v11371_v39  ;;  %v4429_v58 = vadd.f32 1.0, %v8843_v7  ;;  %v4432_v52 = vadd.f32 1.0, %v8845_v9  ;;  %v11385_v17 = vmul.f32 0.5, %v7763_v57  ;;  %8862 = verf.f32 %v4146_v54 }
 0x467   : > { %v8847_v42 = vpop.eup %8846  ;;  %v11373_v35 = vpop.f32.mrb[27].mxu1  ;;  %v8664_v18 = vld [vmem:[%s9815_s20 + $0x1e0] ss:$12 sps:$4 sm:$0xff]   ;;  %v11387_v3 = vmul.f32 0.5, %v7813_v63  ;;  %v11391_v9 = vpack.c.bf16 %v11255_v45, %v11198_v24  ;;  %v8669_v7 = vld [vmem:[%s9815_s20 + $0x1fc] ss:$12 sps:$4 sm:$0xff]   ;;  %v11396_v25 = vmul.f32 %v4427_v60, %v11277_v10  ;;  %8864 = verf.f32 %v4145_v62 }
 0x468   : > { %v8849_v40 = vpop.eup %8848  ;;  %3888 = vmatmul.mubr.bf16.gmra.mrb[80].mxu0 %v11002_v4  ;;  %v11398_v33 = vmul.f32 0.5, %v7764_v56  ;;  %v4150_v57 = vmul.f32 0.70710677, %v11378_v5  ;;  %v4434_v54 = vadd.f32 1.0, %v8847_v42  ;;  %8866 = verf.f32 %v4147_v21  ;;  %5979 = vmatpush1.bf16.msra.mxu1 %v8664_v18  ;;  %v8667_v39 = vld [vmem:[%s9815_s20 + $0x1f8] ss:$12 sps:$4 sm:$0xff]  }
 0x469   : > { %v8851_v61 = vpop.eup %8850  ;;  %13176 = vst [vmem:[#allocation92_spill] sm:$0xff] %v11391_v9  ;;  %3897 = vmatprep.mubr.bf16.mxu0 %v13170_v1  ;;  %v4152_v24 = vmul.f32 0.70710677, %v11382_v12  ;;  %5852 = vmatmul.mubr.bf16.gmra.mrb[56].mxu1 %v11391_v9  ;;  %v7766_v4 = vadd.f32 %v11232_v13, %v11083_v23  ;;  %v11411_v26 = vmul.f32 %v4429_v58, %v11286_v19  ;;  %v8672_v9 = vld [vmem:[%s9815_s20 + $0x214] ss:$12 sps:$4 sm:$0xff]   ;;  %v4433_v19 = vadd.f32 1.0, %v8849_v40 }
 0x46a   : > { %v8853_v44 = vpop.eup %8852  ;;  %v11414_v60 = vmul.f32 %v4432_v52, %v11301_v49  ;;  %v11418_v62 = vadd.f32 %v11239_v15, %v11087_v59  ;;  %v11422_v42 = vadd.f32 %v11270_v28, %v11079_v53  ;;  %v4435_v58 = vadd.f32 1.0, %v8851_v61  ;;  %5980 = vmatprep.subr.bf16.mxu1 %v8669_v7 }
 0x46b   : > { %v8855_v63 = vpop.eup %8854  ;;  %v11406_v45 = vpop.f32.mrb[28].mxu0  ;;  %13177 = vst [vmem:[#allocation93_spill] sm:$0xff] %v11411_v26  ;;  %v11430_v26 = vmul.f32 0.5, %v7814_v47  ;;  %8868 = verf.f32 %v4150_v57  ;;  %v4438_v52 = vadd.f32 1.0, %v8853_v44  ;;  %v4151_v18 = vmul.f32 0.70710677, %v7766_v4 }
 0x46c   : > { %v11408_v10 = vpop.f32.mrb[28].mxu1  ;;  %v8857_v56 = vpop.eup %8856  ;;  %v4440_v28 = vadd.f32 1.0, %v8855_v63  ;;  %8870 = verf.f32 %v4152_v24  ;;  %v4153_v47 = vmul.f32 0.70710677, %v11418_v62  ;;  %v11444_v61 = vadd.f32 %v11272_v38, %v11081_v43  ;;  %5981 = vmatpush1.bf16.msra.mxu1 %v8667_v39  ;;  %v8670_v63 = vld [vmem:[%s9815_s20 + $0x210] ss:$12 sps:$4 sm:$0xff]  }
 0x46d   : > { %v11424_v13 = vpop.f32.mrb[29].mxu0  ;;  %v11426_v21 = vpop.f32.mrb[29].mxu1  ;;  %v4439_v40 = vadd.f32 1.0, %v8857_v56  ;;  %8872 = verf.f32 %v4151_v18  ;;  %v4156_v44 = vmul.f32 0.70710677, %v11422_v42  ;;  %v11451_v57 = vadd.f32 %v11282_v34, %v11083_v23  ;;  %5982 = vmatprep.subr.bf16.mxu1 %v8672_v9 }
 0x46e   : > { %13178 = vst [vmem:[#allocation94_spill] sm:$0xff] %v11424_v13  ;;  %13179 = vst [vmem:[#allocation95_spill] sm:$0xff] %v11426_v21  ;;  %v11432_v49 = vpop.f32.mrb[30].mxu0  ;;  %v11434_v15 = vpop.f32.mrb[30].mxu1  ;;  %v11439_v13 = vmul.f32 %v4434_v54, %v11310_v0  ;;  %v11455_v0 = vadd.f32 %v11284_v29, %v11087_v59  ;;  %v11459_v38 = vmul.f32 %v4433_v19, %v11312_v16  ;;  %v11465_v56 = vmul.f32 0.5, %v11378_v5 }
 0x46f   : > { %v11436_v6 = vpop.f32.mrb[31].mxu0  ;;  %v8859_v21 = vpop.eup %8858  ;;  %v11462_v24 = vmul.f32 %v4435_v58, %v11323_v2  ;;  %v4158_v34 = vmul.f32 0.70710677, %v11444_v61  ;;  %v9108_v18 = vld [vmem:[#allocation2 + $0xc8] ss:$12 sps:$4 sm:$0xff]   ;;  %v11470_v39 = vmul.f32 %v4438_v52, %v11329_v55  ;;  %v11476_v19 = vmul.f32 0.5, %v11382_v12 }
 0x470   : > { %13180 = vst [vmem:[#allocation96_spill] sm:$0xff] %v11439_v13  ;;  %v11446_v7 = vpop.f32.mrb[31].mxu1  ;;  %v8861_v54 = vpop.eup %8860  ;;  %3898 = vmatmul.mubr.bf16.gmra.mrb[84].mxu0 %v9108_v18  ;;  %v8677_v29 = vld [vmem:[%s9815_s20 + $0x22c] ss:$12 sps:$4 sm:$0xff]   ;;  %v11473_v13 = vmul.f32 %v4440_v28, %v11339_v20  ;;  %v4441_v16 = vadd.f32 1.0, %v8859_v21  ;;  %v11481_v58 = vmul.f32 %v4439_v40, %v11341_v50  ;;  %v11483_v18 = vmul.f32 0.5, %v7766_v4  ;;  %5983 = vmatpush1.bf16.msra.mxu1 %v8670_v63 }
 0x471   : > { %13181 = vst [vmem:[#allocation97_spill] sm:$0xff] %v11462_v24  ;;  %3907 = vmatprep.mubr.bf16.mxu0 %v13170_v1  ;;  %v8675_v2 = vld [vmem:[%s9815_s20 + $0x228] ss:$12 sps:$4 sm:$0xff]   ;;  %v8863_v5 = vpop.eup %8862  ;;  %8874 = verf.f32 %v4153_v47  ;;  %v4157_v55 = vmul.f32 0.70710677, %v11451_v57  ;;  %v4444_v12 = vadd.f32 1.0, %v8861_v54  ;;  %v11493_v28 = vpack.c.bf16 %v11396_v25, %v11337_v41  ;;  %5984 = vmatprep.subr.bf16.mxu1 %v8677_v29 }
 0x472   : > { %13182 = vst [vmem:[#allocation98_spill] sm:$0xff] %v11473_v13  ;;  %v8865_v21 = vpop.eup %8864  ;;  %8876 = verf.f32 %v4156_v44  ;;  %v4159_v52 = vmul.f32 0.70710677, %v11455_v0  ;;  %v7769_v47 = vadd.f32 %v11293_v37, %v11079_v53  ;;  %v11503_v54 = vadd.f32 %v11295_v31, %v11081_v43  ;;  %v8683_v63 = vld [vmem:[%s9815_s20 + $0x244] ss:$12 sps:$4 sm:$0xff]  }
 0x473   : > { %v11486_v9 = vpop.f32.mrb[32].mxu0  ;;  %13183 = vst [vmem:[#allocation99_spill] sm:$0xff] %v11493_v28  ;;  %v8867_v40 = vpop.eup %8866  ;;  %8878 = verf.f32 %v4158_v34  ;;  %v11507_v44 = vpack.c.bf16 %v11368_v14, %v11308_v36  ;;  %v4446_v13 = vadd.f32 1.0, %v8863_v5  ;;  %v11515_v34 = vmul.f32 0.5, %v11418_v62  ;;  %5861 = vmatprep.mubr.bf16.mxu1 %v11493_v28  ;;  %v8681_v5 = vld [vmem:[%s9815_s20 + $0x240] ss:$12 sps:$4 sm:$0xff]  }
 0x474   : > { %v11488_v20 = vpop.f32.mrb[32].mxu1  ;;  %v11495_v50 = vpop.f32.mrb[33].mxu0  ;;  %8880 = verf.f32 %v4157_v55  ;;  %v7770_v37 = vadd.f32 %v11303_v30, %v11083_v23  ;;  %v11525_v24 = vmul.f32 %v4441_v16, %v11348_v32  ;;  %v4162_v29 = vmul.f32 0.70710677, %v7769_v47  ;;  %5985 = vmatpush1.bf16.msra.mxu1 %v8675_v2 }
 0x475   : > { %v11497_v4 = vpop.f32.mrb[33].mxu1  ;;  %13184 = vst [vmem:[#allocation100_spill] sm:$0xff] %v11507_v44  ;;  %v11509_v41 = vpop.f32.mrb[34].mxu0  ;;  %8882 = verf.f32 %v4159_v52  ;;  %5862 = vmatmul.mubr.bf16.gmra.mrb[60].mxu1 %v11507_v44  ;;  %v7820_v62 = vadd.f32 %v11305_v11, %v11087_v59  ;;  %v4445_v28 = vadd.f32 1.0, %v8865_v21  ;;  %v4447_v30 = vadd.f32 1.0, %v8867_v40  ;;  %5986 = vmatprep.subr.bf16.mxu1 %v8683_v63 }
 0x476   : > { %v11511_v25 = vpop.f32.mrb[34].mxu1  ;;  %v11520_v31 = vpop.f32.mrb[35].mxu0  ;;  %13187 = vst [vmem:[#allocation103_spill] sm:$0xff] %v11525_v24  ;;  %v11536_v32 = vmul.f32 %v4444_v12, %v11385_v17  ;;  %v11539_v16 = vmul.f32 0.5, %v11444_v61  ;;  %v11542_v52 = vmul.f32 0.5, %v11451_v57  ;;  %8884 = verf.f32 %v4162_v29  ;;  %v13189_v17 = vld [vmem:[#allocation87_spill] sm:$0xff] }
 0x477   : > { %13185 = vst [vmem:[#allocation101_spill] sm:$0xff] %v11520_v31  ;;  %v11522_v36 = vpop.f32.mrb[35].mxu1  ;;  %v8869_v14 = vpop.eup %8868  ;;  %v11532_v31 = vmul.f32 0.5, %v11422_v42  ;;  %v4163_v11 = vmul.f32 0.70710677, %v7770_v37  ;;  %v11546_v42 = vmul.f32 %v4446_v13, %v11387_v3  ;;  %v7771_v2 = vadd.f32 %v13189_v17, %v11079_v53 }
 0x478   : > { %13186 = vst [vmem:[#allocation102_spill] sm:$0xff] %v11522_v36  ;;  %v8871_v55 = vpop.eup %8870  ;;  %v4164_v36 = vmul.f32 0.70710677, %v11503_v54  ;;  %v9109_v24 = vld [vmem:[#allocation2 + $0xe0] ss:$12 sps:$4 sm:$0xff]   ;;  %v4450_v44 = vadd.f32 1.0, %v8869_v14  ;;  %v11558_v3 = vmul.f32 %v4445_v28, %v11398_v33  ;;  %v11561_v13 = vmul.f32 %v4447_v30, %v11430_v26  ;;  %5987 = vmatpush1.bf16.msra.mxu1 %v8681_v5 }
 0x479   : > { %3908 = vmatmul.mubr.bf16.gmra.mrb[88].mxu0 %v9109_v24  ;;  %v8689_v21 = vld [vmem:[%s9815_s20 + $0x25c] ss:$12 sps:$4 sm:$0xff]   ;;  %v8873_v40 = vpop.eup %8872  ;;  %13188 = vst [vmem:[#allocation104_spill] sm:$0xff] %v11546_v42  ;;  %v4452_v61 = vadd.f32 1.0, %v8871_v55  ;;  %v4165_v57 = vmul.f32 0.70710677, %v7820_v62  ;;  %v7821_v24 = vadd.f32 %v11343_v46, %v11081_v43  ;;  %v11579_v26 = vadd.f32 %v11352_v8, %v11087_v59 }
 0x47a   : > { %3917 = vmatprep.mubr.bf16.mxu0 %v13170_v1  ;;  %8886 = verf.f32 %v4164_v36  ;;  %13190 = vst [vmem:[#allocation87_spill] sm:$0xff] %v11561_v13  ;;  %v11564_v14 = vmul.f32 0.5, %v11455_v0  ;;  %v11568_v36 = vadd.f32 %v11345_v48, %v11083_v23  ;;  %v8687_v55 = vld [vmem:[%s9815_s20 + $0x258] ss:$12 sps:$4 sm:$0xff]   ;;  %v4451_v33 = vadd.f32 1.0, %v8873_v40  ;;  %5988 = vmatprep.subr.bf16.mxu1 %v8689_v21 }
 0x47b   : > { %v11553_v12 = vpop.f32.mrb[36].mxu0  ;;  %v8875_v17 = vpop.eup %8874  ;;  %v11575_v28 = vmul.f32 0.5, %v7769_v47  ;;  %8888 = verf.f32 %v4163_v11  ;;  %v8696_v48 = vld [vmem:[%s9815_s20 + $0x274] ss:$12 sps:$4 sm:$0xff]   ;;  %v11587_v13 = vmul.f32 %v4450_v44, %v11465_v56  ;;  %v11590_v5 = vmul.f32 0.5, %v11503_v54 }
 0x47c   : > { %v11555_v63 = vpop.f32.mrb[36].mxu1  ;;  %v11570_v29 = vpop.f32.mrb[37].mxu0  ;;  %v11592_v47 = vmul.f32 0.5, %v7770_v37  ;;  %v4168_v11 = vmul.f32 0.70710677, %v7771_v2  ;;  %v11601_v21 = vmul.f32 0.5, %v7820_v62  ;;  %8890 = verf.f32 %v4165_v57  ;;  %5989 = vmatpush1.bf16.msra.mxu1 %v8687_v55 }
 0x47d   : > { %v11572_v46 = vpop.f32.mrb[37].mxu1  ;;  %v11581_v0 = vpop.f32.mrb[38].mxu0  ;;  %v4170_v56 = vmul.f32 0.70710677, %v7821_v24  ;;  %v11603_v54 = vmul.f32 0.5, %v7771_v2  ;;  %v11618_v2 = vadd.f32 %v11363_v27, %v11081_v43  ;;  %5990 = vmatprep.subr.bf16.mxu1 %v8696_v48 }
 0x47e   : > { %13191 = vst [vmem:[#allocation105_spill] sm:$0xff] %v11572_v46  ;;  %13192 = vst [vmem:[#allocation106_spill] sm:$0xff] %v11581_v0  ;;  %v11583_v30 = vpop.f32.mrb[38].mxu1  ;;  %v8877_v42 = vpop.eup %8876  ;;  %v11599_v0 = vmul.f32 %v4452_v61, %v11476_v19  ;;  %v4169_v37 = vmul.f32 0.70710677, %v11568_v36  ;;  %v11611_v19 = vmul.f32 %v4451_v33, %v11483_v18  ;;  %v7773_v61 = vadd.f32 %v11354_v22, %v11079_v53 }
 0x47f   : > { %13193 = vst [vmem:[#allocation107_spill] sm:$0xff] %v11583_v30  ;;  %v11594_v40 = vpop.f32.mrb[39].mxu0  ;;  %v11596_v8 = vpop.f32.mrb[39].mxu1  ;;  %v4453_v30 = vadd.f32 1.0, %v8875_v17  ;;  %v4171_v62 = vmul.f32 0.70710677, %v11579_v26  ;;  %8892 = verf.f32 %v4168_v11  ;;  %v7774_v18 = vadd.f32 %v11365_v51, %v11083_v23 }
 0x480   : > { %13194 = vst [vmem:[#allocation108_spill] sm:$0xff] %v11594_v40  ;;  %13195 = vst [vmem:[#allocation109_spill] sm:$0xff] %v11596_v8  ;;  %v8879_v46 = vpop.eup %8878  ;;  %v11608_v40 = vpack.c.bf16 %v11481_v58, %v11459_v38  ;;  %v9110_v57 = vld [vmem:[#allocation2 + $0xf8] ss:$12 sps:$4 sm:$0xff]   ;;  %v8694_v17 = vld [vmem:[%s9815_s20 + $0x270] ss:$12 sps:$4 sm:$0xff]   ;;  %v11624_v58 = vpack.c.bf16 %v11470_v39, %v11414_v60  ;;  %8894 = verf.f32 %v4170_v56  ;;  %v11642_v56 = vadd.f32 %v11406_v45, %v11079_v53 }
 0x481   : > { %13196 = vst [vmem:[#allocation110_spill] sm:$0xff] %v11599_v0  ;;  %v8881_v44 = vpop.eup %8880  ;;  %3918 = vmatmul.mubr.bf16.gmra.mrb[92].mxu0 %v9110_v57  ;;  %v4456_v38 = vadd.f32 1.0, %v8877_v42  ;;  %v8702_v22 = vld [vmem:[%s9815_s20 + $0x28c] ss:$12 sps:$4 sm:$0xff]   ;;  %v4458_v27 = vadd.f32 1.0, %v8879_v46  ;;  %v11634_v0 = vmul.f32 0.5, %v7821_v24  ;;  %8896 = verf.f32 %v4169_v37  ;;  %5991 = vmatpush1.bf16.msra.mxu1 %v8694_v17 }
 0x482   : > { %v8883_v8 = vpop.eup %8882  ;;  %5871 = vmatprep.mubr.bf16.mxu1 %v11608_v40  ;;  %13197 = vst [vmem:[#allocation111_spill] sm:$0xff] %v11624_v58  ;;  %3927 = vmatprep.mubr.bf16.mxu0 %v13170_v1  ;;  %v4457_v55 = vadd.f32 1.0, %v8881_v44  ;;  %v4174_v33 = vmul.f32 0.70710677, %v7773_v61  ;;  %v4176_v60 = vmul.f32 0.70710677, %v11618_v2  ;;  %8898 = verf.f32 %v4171_v62 }
 0x483   : > { %v11630_v57 = vpop.f32.mrb[40].mxu0  ;;  %v8885_v48 = vpop.eup %8884  ;;  %v4459_v11 = vadd.f32 1.0, %v8883_v8  ;;  %5872 = vmatmul.mubr.bf16.gmra.mrb[64].mxu1 %v11624_v58  ;;  %v4175_v39 = vmul.f32 0.70710677, %v7774_v18  ;;  %v7824_v46 = vadd.f32 %v11373_v35, %v11087_v59  ;;  %v8700_v8 = vld [vmem:[%s9815_s20 + $0x288] ss:$12 sps:$4 sm:$0xff]   ;;  %v11650_v37 = vmul.f32 %v4453_v30, %v11515_v34  ;;  %5992 = vmatprep.subr.bf16.mxu1 %v8702_v22 }
 0x484   : > { %v11632_v42 = vpop.f32.mrb[40].mxu1  ;;  %v8887_v51 = vpop.eup %8886  ;;  %v11653_v58 = vmul.f32 0.5, %v11568_v36  ;;  %8900 = verf.f32 %v4174_v33  ;;  %v11657_v35 = vadd.f32 %v11408_v10, %v11081_v43  ;;  %v11665_v17 = vmul.f32 %v4456_v38, %v11532_v31 }
 0x485   : > { %v11644_v44 = vpop.f32.mrb[41].mxu0  ;;  %v11646_v24 = vpop.f32.mrb[41].mxu1  ;;  %13200 = vst [vmem:[#allocation114_spill] sm:$0xff] %v11650_v37  ;;  %v11668_v34 = vmul.f32 %v4458_v27, %v11539_v16  ;;  %v11671_v36 = vmul.f32 %v4457_v55, %v11542_v52  ;;  %v11674_v10 = vmul.f32 0.5, %v11579_v26  ;;  %v4462_v22 = vadd.f32 1.0, %v8885_v48  ;;  %5993 = vmatpush1.bf16.msra.mxu1 %v8700_v8 }
 0x486   : > { %13198 = vst [vmem:[#allocation112_spill] sm:$0xff] %v11644_v44  ;;  %13199 = vst [vmem:[#allocation113_spill] sm:$0xff] %v11646_v24  ;;  %v11659_v62 = vpop.f32.mrb[42].mxu0  ;;  %v11661_v45 = vpop.f32.mrb[42].mxu1  ;;  %v8706_v44 = vld [vmem:[%s9815_s20 + $0x2a4] ss:$12 sps:$4 sm:$0xff]   ;;  %8902 = verf.f32 %v4176_v60  ;;  %v11681_v16 = vmul.f32 %v4459_v11, %v11564_v14  ;;  %v11709_v8 = vadd.f32 %v11432_v49, %v11079_v53 }
 0x487   : > { %13201 = vst [vmem:[#allocation115_spill] sm:$0xff] %v11661_v45  ;;  %v8889_v24 = vpop.eup %8888  ;;  %13202 = vst [vmem:[#allocation116_spill] sm:$0xff] %v11668_v34  ;;  %v11676_v30 = vpop.f32.mrb[43].mxu0  ;;  %v4464_v37 = vadd.f32 1.0, %v8887_v51  ;;  %v4177_v45 = vmul.f32 0.70710677, %v7824_v46  ;;  %8904 = verf.f32 %v4175_v39  ;;  %5994 = vmatprep.subr.bf16.mxu1 %v8706_v44  ;;  %v11716_v44 = vmul.f32 %v4462_v22, %v11575_v28 }
 0x488   : > { %v11678_v33 = vpop.f32.mrb[43].mxu1  ;;  %v8891_v31 = vpop.eup %8890  ;;  %13203 = vst [vmem:[#allocation117_spill] sm:$0xff] %v11681_v16  ;;  %v11683_v38 = vmul.f32 0.5, %v7773_v61  ;;  %v4180_v52 = vmul.f32 0.70710677, %v11642_v56  ;;  %v4463_v55 = vadd.f32 1.0, %v8889_v24  ;;  %v11705_v24 = vpack.c.bf16 %v11611_v19, %v11558_v3 }
 0x489   : > { %v9111_v26 = vld [vmem:[#allocation2 + $0x110] ss:$12 sps:$4 sm:$0xff]   ;;  %v4182_v48 = vmul.f32 0.70710677, %v11657_v35  ;;  %v13204_v60 = vld [vmem:[#allocation94_spill] sm:$0xff]  ;;  %v11699_v11 = vmul.f32 0.5, %v11618_v2  ;;  %v11719_v2 = vmul.f32 %v4464_v37, %v11590_v5  ;;  %8906 = verf.f32 %v4177_v45 }
 0x48a   : > { %3928 = vmatmul.mubr.bf16.gmra.mrb[96].mxu0 %v9111_v26  ;;  %v8704_v27 = vld [vmem:[%s9815_s20 + $0x2a0] ss:$12 sps:$4 sm:$0xff]   ;;  %v11690_v51 = vadd.f32 %v13204_v60, %v11083_v23  ;;  %v8709_v61 = vld [vmem:[%s9815_s20 + $0x2bc] ss:$12 sps:$4 sm:$0xff]   ;;  %v11701_v39 = vmul.f32 0.5, %v7774_v18  ;;  %v4465_v18 = vadd.f32 1.0, %v8891_v31  ;;  %8908 = verf.f32 %v4180_v52  ;;  %5881 = vmatprep.mubr.bf16.mxu1 %v11705_v24 }
 0x48b   : > { %v13205_v34 = vld [vmem:[#allocation95_spill] sm:$0xff]  ;;  %3937 = vmatprep.mubr.bf16.mxu0 %v13170_v1  ;;  %v11711_v26 = vpop.f32.mrb[44].mxu0  ;;  %v8893_v1 = vpop.eup %8892  ;;  %v11725_v19 = vmul.f32 0.5, %v7824_v46  ;;  %5995 = vmatpush1.bf16.msra.mxu1 %v8704_v27  ;;  %v11731_v5 = vmul.f32 %v4463_v55, %v11592_v47  ;;  %8910 = verf.f32 %v4182_v48  ;;  %v4186_v37 = vmul.f32 0.70710677, %v11709_v8 }
 0x48c   : > { %v11694_v14 = vadd.f32 %v13205_v34, %v11087_v59  ;;  %v11713_v34 = vpop.f32.mrb[44].mxu1  ;;  %13207 = vst [vmem:[#allocation95_spill] sm:$0xff] %v11719_v2  ;;  %v11721_v60 = vpop.f32.mrb[45].mxu0  ;;  %v4181_v16 = vmul.f32 0.70710677, %v11690_v51  ;;  %v11736_v46 = vadd.f32 %v11434_v15, %v11081_v43  ;;  %5996 = vmatprep.subr.bf16.mxu1 %v8709_v61  ;;  %v4468_v27 = vadd.f32 1.0, %v8893_v1 }
 0x48d   : > { %13206 = vst [vmem:[#allocation94_spill] sm:$0xff] %v11713_v34  ;;  %v11723_v3 = vpop.f32.mrb[45].mxu1  ;;  %v8895_v49 = vpop.eup %8894  ;;  %v8707_v31 = vld [vmem:[%s9815_s20 + $0x2b8] ss:$12 sps:$4 sm:$0xff]   ;;  %v11745_v47 = vpack.c.bf16 %v11587_v13, %v11536_v32  ;;  %v11749_v55 = vadd.f32 %v11436_v6, %v11083_v23  ;;  %v8712_v2 = vld [vmem:[%s9815_s20 + $0x2d4] ss:$12 sps:$4 sm:$0xff]   ;;  %v11761_v32 = vmul.f32 %v4465_v18, %v11601_v21 }
 0x48e   : > { %v4183_v34 = vmul.f32 0.70710677, %v11694_v14  ;;  %v8897_v28 = vpop.eup %8896  ;;  %v11738_v45 = vpop.f32.mrb[46].mxu0  ;;  %8912 = verf.f32 %v4181_v16  ;;  %v11757_v61 = vmul.f32 0.5, %v11642_v56  ;;  %v4188_v16 = vmul.f32 0.70710677, %v11736_v46 }
 0x48f   : > { %13208 = vst [vmem:[#allocation118_spill] sm:$0xff] %v11738_v45  ;;  %v11740_v22 = vpop.f32.mrb[46].mxu1  ;;  %v8899_v52 = vpop.eup %8898  ;;  %13211 = vst [vmem:[#allocation121_spill] sm:$0xff] %v11761_v32  ;;  %v11764_v6 = vmul.f32 0.5, %v11657_v35  ;;  %5882 = vmatmul.mubr.bf16.gmra.mrb[68].mxu1 %v11745_v47  ;;  %v4187_v13 = vmul.f32 0.70710677, %v11749_v55 }
 0x490   : > { %13209 = vst [vmem:[#allocation119_spill] sm:$0xff] %v11740_v22  ;;  %v11751_v48 = vpop.f32.mrb[47].mxu0  ;;  %v11753_v15 = vpop.f32.mrb[47].mxu1  ;;  %v4470_v22 = vadd.f32 1.0, %v8895_v49  ;;  %8914 = verf.f32 %v4183_v34  ;;  %v4469_v56 = vadd.f32 1.0, %v8897_v28  ;;  %v4471_v34 = vadd.f32 1.0, %v8899_v52  ;;  %5997 = vmatpush1.bf16.msra.mxu1 %v8707_v31 }
 0x491   : > { %13210 = vst [vmem:[#allocation120_spill] sm:$0xff] %v11753_v15  ;;  %v8901_v45 = vpop.eup %8900  ;;  %8916 = verf.f32 %v4186_v37  ;;  %v9112_v1 = vld [vmem:[#allocation2 + $0x128] ss:$0 sps:$4 sm:$0x33]   ;;  %v7828_v15 = vadd.f32 %v11446_v7, %v11087_v59  ;;  %v8710_v35 = vld [vmem:[%s9815_s20 + $0x2d0] ss:$12 sps:$4 sm:$0xff]   ;;  %v11773_v37 = vmul.f32 %v4468_v27, %v11603_v54  ;;  %v11779_v28 = vadd.f32 %v11488_v20, %v11081_v43  ;;  %5998 = vmatprep.subr.bf16.mxu1 %v8712_v2 }
 0x492   : > { %3938 = vmatmul.mubr.bf16.gmra.mrb[100].mxu0 %v9112_v1  ;;  %v8903_v49 = vpop.eup %8902  ;;  %8918 = verf.f32 %v4188_v16  ;;  %v13212_v21 = vld [vmem:[#allocation84_spill] sm:$0xff]  ;;  %v4474_v32 = vadd.f32 1.0, %v8901_v45  ;;  %v7779_v1 = vadd.f32 %v11486_v9, %v11079_v53  ;;  %v11787_v31 = vmul.f32 %v4470_v22, %v11634_v0 }
 0x493   : > { %6324 = vmatprep.mubr.bf16.mxu0 %v13212_v21  ;;  %v8905_v18 = vpop.eup %8904  ;;  %v11781_v52 = vpop.f32.mrb[48].mxu0  ;;  %v8715_v7 = vld [vmem:[%s9815_s20 + $0x2ec] ss:$12 sps:$4 sm:$0xff]   ;;  %v11790_v54 = vmul.f32 0.5, %v11690_v51  ;;  %v4189_v45 = vmul.f32 0.70710677, %v7828_v15  ;;  %v7780_v9 = vadd.f32 %v11495_v50, %v11083_v23  ;;  %8920 = verf.f32 %v4187_v13 }
 0x494   : > { %v11783_v16 = vpop.f32.mrb[48].mxu1  ;;  %13214 = vst [vmem:[#allocation122_spill] sm:$0xff] %v11787_v31  ;;  %v11794_v27 = vpop.f32.mrb[49].mxu0  ;;  %v4476_v21 = vadd.f32 1.0, %v8903_v49  ;;  %v4192_v2 = vmul.f32 0.70710677, %v7779_v1  ;;  %v11802_v51 = vmul.f32 %v4469_v56, %v11653_v58  ;;  %v11805_v31 = vmul.f32 %v4471_v34, %v11674_v10  ;;  %5999 = vmatpush1.bf16.msra.mxu1 %v8710_v35 }
 0x495   : > { %13213 = vst [vmem:[#allocation84_spill] sm:$0xff] %v11783_v16  ;;  %13215 = vst [vmem:[#allocation123_spill] sm:$0xff] %v11794_v27  ;;  %v11796_v20 = vpop.f32.mrb[49].mxu1  ;;  %v11799_v16 = vmul.f32 0.5, %v11694_v14  ;;  %v3299_v0 = vpop.f32.mrb[50].mxu0  ;;  %v4475_v50 = vadd.f32 1.0, %v8905_v18  ;;  %8922 = verf.f32 %v4189_v45  ;;  %6000 = vmatprep.subr.bf16.mxu1 %v8715_v7  ;;  %v7830_v35 = vadd.f32 %v11497_v4, %v11087_v59 }
 0x496   : > { %13216 = vst [vmem:[#allocation124_spill] sm:$0xff] %v11796_v20  ;;  %v8907_v22 = vpop.eup %8906  ;;  %13217 = vst [vmem:[#allocation125_spill] sm:$0xff] %v11805_v31  ;;  %v11808_v27 = vmul.f32 0.5, %v11709_v8  ;;  %v3621_v20 = vpop.f32.mrb[50].mxu1  ;;  %v8713_v14 = vld [vmem:[%s9815_s20 + $0x2e8] ss:$12 sps:$4 sm:$0xff]   ;;  %v11812_v0 = vmul.f32 %v4474_v32, %v11683_v38  ;;  %8924 = verf.f32 %v4192_v2  ;;  %v11823_v38 = vpack.c.bf16 %v11731_v5, %v11671_v36 }
 0x497   : > { %v3300_v49 = vpop.f32.mrb[51].mxu0  ;;  %v8909_v13 = vpop.eup %8908  ;;  %v11815_v58 = vmul.f32 0.5, %v11736_v46  ;;  %v4194_v10 = vmul.f32 0.70710677, %v11779_v28  ;;  %v8737_v8 = vld [vmem:[%s9815_s20 + $0x248] ss:$12 sps:$4 sm:$0xff]   ;;  %v11828_v45 = vmul.f32 %v4476_v21, %v11699_v11  ;;  %v7781_v2 = vadd.f32 %v11509_v41, %v11079_v53 }
 0x498   : > { %v3622_v56 = vpop.f32.mrb[51].mxu1  ;;  %v8911_v34 = vpop.eup %8910  ;;  %v4193_v18 = vmul.f32 0.70710677, %v7780_v9  ;;  %v8718_v32 = vld [vmem:[%s9815_s20 + $0x304] ss:$12 sps:$4 sm:$0xff]   ;;  %v11831_v7 = vmul.f32 0.5, %v11749_v55  ;;  %v7831_v49 = vadd.f32 %v11511_v25, %v11081_v43  ;;  %7559 = vmatprep.subr.bf16.mxu0 %v8737_v8  ;;  %5891 = vmatprep.mubr.bf16.mxu1 %v11823_v38  ;;  %v11847_v55 = vpack.c.bf16 %v11716_v44, %v11665_v17 }
 0x499   : > { %v8738_v46 = vld [vmem:[%s9815_s20 + $0x188] ss:$12 sps:$4 sm:$0xff]   ;;  %v8913_v20 = vpop.eup %8912  ;;  %13218 = vst [vmem:[#allocation126_spill] sm:$0xff] %v11828_v45  ;;  %v8742_v36 = vld [vmem:[%s9815_s20 + $0x260] ss:$12 sps:$4 sm:$0xff]   ;;  %v11840_v56 = vmul.f32 %v4475_v50, %v11701_v39  ;;  %v11842_v31 = vmul.f32 0.5, %v7828_v15  ;;  %8926 = verf.f32 %v4194_v10  ;;  %6001 = vmatpush1.bf16.msra.mxu1 %v8713_v14 }
 0x49a   : > { %v13219_v4 = vld [vmem:[#allocation78_spill] sm:$0xff]  ;;  %v8915_v5 = vpop.eup %8914  ;;  %v4195_v11 = vmul.f32 0.70710677, %v7830_v35  ;;  %v4477_v21 = vadd.f32 1.0, %v8907_v22  ;;  %v4198_v8 = vmul.f32 0.70710677, %v7781_v2  ;;  %8928 = verf.f32 %v4193_v18  ;;  %5892 = vmatmul.mubr.bf16.gmra.mrb[72].mxu1 %v11847_v55  ;;  %6131 = vmatprep.subr.bf16.mxu1 %v8718_v32 }
 0x49b   : > { %6325 = vmatmul.mubr.bf16.vlgmr.msra.gmra.mrb[104].mxu0 %v13219_v4  ;;  %v13220_v41 = vld [vmem:[#allocation90_spill] sm:$0xff]  ;;  %v8917_v25 = vpop.eup %8916  ;;  %v11850_v4 = vmul.f32 0.5, %v7779_v1  ;;  %v4480_v15 = vadd.f32 1.0, %v8909_v13  ;;  %v4482_v50 = vadd.f32 1.0, %v8911_v34  ;;  %v4200_v45 = vmul.f32 0.70710677, %v7831_v49 }
 0x49c   : > { %6332 = vmatprep.mubr.bf16.mxu0 %v13220_v41  ;;  %7560 = vmatpush3.bf16.msra.mxu0 %v8738_v46  ;;  %v8919_v39 = vpop.eup %8918  ;;  %v11854_v17 = vmul.f32 0.5, %v11779_v28  ;;  %v11856_v44 = vmul.f32 0.5, %v7780_v9  ;;  %8930 = verf.f32 %v4195_v11  ;;  %v13221_v1 = vld [vmem:[#allocation101_spill] sm:$0xff]  ;;  %v4481_v10 = vadd.f32 1.0, %v8913_v20  ;;  %v13222_v34 = vld [vmem:[#allocation102_spill] sm:$0xff] }
 0x49d   : > { %v7782_v22 = vadd.f32 %v13221_v1, %v11083_v23  ;;  %7561 = vmatprep.subr.bf16.mxu0 %v8742_v36  ;;  %v8743_v14 = vld [vmem:[%s9815_s20 + $0x1a0] ss:$12 sps:$4 sm:$0xff]   ;;  %v4483_v13 = vadd.f32 1.0, %v8915_v5  ;;  %8932 = verf.f32 %v4198_v8  ;;  %v7832_v18 = vadd.f32 %v13222_v34, %v11087_v59  ;;  %v8744_v46 = vld [vmem:[%s9815_s20 + $0x278] ss:$12 sps:$4 sm:$0xff]   ;;  %v8921_v32 = vpop.eup %8920 }
 0x49e   : > { %v4486_v41 = vadd.f32 1.0, %v8917_v25  ;;  %v4488_v28 = vadd.f32 1.0, %v8919_v39  ;;  %8934 = verf.f32 %v4200_v45  ;;  %v11865_v11 = vmul.f32 %v4477_v21, %v11725_v19  ;;  %v8748_v8 = vld [vmem:[%s9815_s20 + $0x1b8] ss:$12 sps:$4 sm:$0xff]  }
 0x49f   : > { %v4199_v9 = vmul.f32 0.70710677, %v7782_v22  ;;  %v11868_v36 = vmul.f32 %v4480_v15, %v11757_v61  ;;  %v11871_v20 = vmul.f32 %v4482_v50, %v11764_v6  ;;  %v7783_v5 = vadd.f32 %v11553_v12, %v11079_v53  ;;  %v8923_v25 = vpop.eup %8922  ;;  %v13224_v21 = vld [vmem:[#allocation92_spill] sm:$0xff]  ;;  %v8749_v61 = vld [vmem:[%s9815_s20 + $0x290] ss:$12 sps:$4 sm:$0xff]  }
 0x4a0   : > { %7562 = vmatpush3.bf16.msra.mxu0 %v8743_v14  ;;  %v11876_v39 = vmul.f32 0.5, %v7830_v35  ;;  %v11878_v45 = vmul.f32 0.5, %v7781_v2  ;;  %v4201_v1 = vmul.f32 0.70710677, %v7832_v18  ;;  %v7833_v19 = vadd.f32 %v11555_v63, %v11081_v43  ;;  %v8925_v15 = vpop.eup %8924  ;;  %v13225_v14 = vld [vmem:[#allocation99_spill] sm:$0xff] }
 0x4a1   : > { %13223 = vst [vmem:[#allocation78_spill] sm:$0xff] %v11871_v20  ;;  %7563 = vmatprep.subr.bf16.mxu0 %v8744_v46  ;;  %v11885_v6 = vmul.f32 %v4481_v10, %v11790_v54  ;;  %v4487_v50 = vadd.f32 1.0, %v8921_v32  ;;  %v11887_v12 = vmul.f32 0.5, %v7831_v49  ;;  %8936 = verf.f32 %v4199_v9  ;;  %v13228_v46 = vld [vmem:[#allocation105_spill] sm:$0xff] }
 0x4a2   : > { %v11891_v35 = vmul.f32 %v4483_v13, %v11799_v16  ;;  %v11894_v2 = vmul.f32 %v4486_v41, %v11808_v27  ;;  %v11897_v63 = vmul.f32 %v4488_v28, %v11815_v58  ;;  %v7784_v54 = vadd.f32 %v11570_v29, %v11083_v23  ;;  %v8750_v41 = vld [vmem:[%s9815_s20 + $0x1d0] ss:$12 sps:$4 sm:$0xff]  }
 0x4a3   : > { %6333 = vmatmul.mubr.bf16.gmra.mrb[108].mxu0 %v13224_v21  ;;  %v4489_v10 = vadd.f32 1.0, %v8923_v25  ;;  %v11901_v49 = vmul.f32 0.5, %v7782_v22  ;;  %v4204_v34 = vmul.f32 0.70710677, %v7783_v5  ;;  %v7834_v32 = vadd.f32 %v13228_v46, %v11087_v59  ;;  %v8927_v16 = vpop.eup %8926  ;;  %v8755_v46 = vld [vmem:[%s9815_s20 + $0x1e8] ss:$12 sps:$4 sm:$0xff]  }
 0x4a4   : > { %6340 = vmatprep.mubr.bf16.mxu0 %v13225_v14  ;;  %13226 = vst [vmem:[#allocation90_spill] sm:$0xff] %v11891_v35  ;;  %13227 = vst [vmem:[#allocation101_spill] sm:$0xff] %v11897_v63  ;;  %7564 = vmatpush3.bf16.msra.mxu0 %v8748_v8  ;;  %v4492_v13 = vadd.f32 1.0, %v8925_v15  ;;  %8938 = verf.f32 %v4201_v1  ;;  %v4206_v27 = vmul.f32 0.70710677, %v7833_v19  ;;  %v11907_v58 = vpack.c.bf16 %v11840_v56, %v11802_v51  ;;  %v8929_v29 = vpop.eup %8928  ;;  %v13229_v8 = vld [vmem:[#allocation106_spill] sm:$0xff] }
 0x4a5   : > { %7565 = vmatprep.subr.bf16.mxu0 %v8749_v61  ;;  %v11911_v28 = vmul.f32 %v4487_v50, %v11831_v7  ;;  %v11913_v22 = vmul.f32 0.5, %v7832_v18  ;;  %v4205_v9 = vmul.f32 0.70710677, %v7784_v54  ;;  %v7785_v25 = vadd.f32 %v13229_v8, %v11079_v53  ;;  %v13230_v51 = vld [vmem:[#allocation107_spill] sm:$0xff]  ;;  %v8754_v18 = vld [vmem:[%s9815_s20 + $0x2a8] ss:$12 sps:$4 sm:$0xff]  }
 0x4a6   : > { %v8931_v21 = vpop.eup %8930  ;;  %v11917_v1 = vmul.f32 0.5, %v7783_v5  ;;  %v4207_v61 = vmul.f32 0.70710677, %v7834_v32  ;;  %5901 = vmatprep.mubr.bf16.mxu1 %v11907_v58  ;;  %v7835_v56 = vadd.f32 %v13230_v51, %v11081_v43  ;;  %v11924_v7 = vpack.c.bf16 %v11812_v0, %v11773_v37  ;;  %v13231_v37 = vld [vmem:[#allocation100_spill] sm:$0xff]  ;;  %v8756_v0 = vld [vmem:[%s9815_s20 + $0x2c0] ss:$12 sps:$4 sm:$0xff]  }
 0x4a7   : > { %v8933_v15 = vpop.eup %8932  ;;  %v4494_v50 = vadd.f32 1.0, %v8927_v16  ;;  %8940 = verf.f32 %v4204_v34  ;;  %v11927_v14 = vmul.f32 0.5, %v7833_v19  ;;  %v4210_v5 = vmul.f32 0.70710677, %v7785_v25  ;;  %v13232_v19 = vld [vmem:[#allocation108_spill] sm:$0xff] }
 0x4a8   : > { %7566 = vmatpush3.bf16.msra.mxu0 %v8750_v41  ;;  %v8935_v8 = vpop.eup %8934  ;;  %v11931_v63 = vmul.f32 %v4489_v10, %v11842_v31  ;;  %v11934_v51 = vmul.f32 %v4492_v13, %v11850_v4  ;;  %v4493_v20 = vadd.f32 1.0, %v8929_v29  ;;  %8942 = verf.f32 %v4206_v27  ;;  %5902 = vmatmul.mubr.bf16.gmra.mrb[76].mxu1 %v11924_v7  ;;  %v13233_v41 = vld [vmem:[#allocation109_spill] sm:$0xff] }
 0x4a9   : > { %v4495_v16 = vadd.f32 1.0, %v8931_v21  ;;  %8944 = verf.f32 %v4205_v9  ;;  %v7786_v34 = vadd.f32 %v13232_v19, %v11083_v23  ;;  %v7836_v35 = vadd.f32 %v13233_v41, %v11087_v59  ;;  %7567 = vmatprep.subr.bf16.mxu0 %v8754_v18  ;;  %v13236_v19 = vld [vmem:[#allocation111_spill] sm:$0xff] }
 0x4aa   : > { %v4498_v31 = vadd.f32 1.0, %v8933_v15  ;;  %8946 = verf.f32 %v4207_v61  ;;  %v4212_v4 = vmul.f32 0.70710677, %v7835_v56  ;;  %v7787_v10 = vadd.f32 %v11630_v57, %v11079_v53  ;;  %v8763_v41 = vld [vmem:[%s9815_s20 + $0x2f0] ss:$12 sps:$4 sm:$0xff]  }
 0x4ab   : > { %6341 = vmatmul.mubr.bf16.gmra.mrb[112].mxu0 %v13231_v37  ;;  %v8937_v13 = vpop.eup %8936  ;;  %v11947_v27 = vmul.f32 %v4494_v50, %v11854_v17  ;;  %v4500_v29 = vadd.f32 1.0, %v8935_v8  ;;  %8948 = verf.f32 %v4210_v5  ;;  %v7837_v9 = vadd.f32 %v11632_v42, %v11081_v43  ;;  %v8757_v42 = vld [vmem:[%s9815_s20 + $0x200] ss:$12 sps:$4 sm:$0xff]   ;;  %v8761_v37 = vld [vmem:[%s9815_s20 + $0x2d8] ss:$12 sps:$4 sm:$0xff]  }
 0x4ac   : > { %6348 = vmatprep.mubr.bf16.mxu0 %v11608_v40  ;;  %7568 = vmatpush3.bf16.msra.mxu0 %v8755_v46  ;;  %v11952_v40 = vmul.f32 %v4493_v20, %v11856_v44  ;;  %v11954_v21 = vmul.f32 0.5, %v7784_v54  ;;  %v11956_v61 = vmul.f32 0.5, %v7834_v32  ;;  %v4211_v57 = vmul.f32 0.70710677, %v7786_v34  ;;  %v13234_v46 = vld [vmem:[#allocation112_spill] sm:$0xff] }
 0x4ad   : > { %7569 = vmatprep.subr.bf16.mxu0 %v8756_v0  ;;  %v11959_v18 = vmul.f32 %v4495_v16, %v11876_v39  ;;  %v11961_v17 = vmul.f32 0.5, %v7785_v25  ;;  %v11963_v15 = vmul.f32 0.5, %v7835_v56  ;;  %v4213_v50 = vmul.f32 0.70710677, %v7836_v35  ;;  %v13235_v56 = vld [vmem:[#allocation113_spill] sm:$0xff] }
 0x4ae   : > { %v8939_v5 = vpop.eup %8938  ;;  %v11967_v44 = vmul.f32 %v4498_v31, %v11878_v45  ;;  %v4499_v20 = vadd.f32 1.0, %v8937_v13  ;;  %8950 = verf.f32 %v4212_v4  ;;  %v4216_v54 = vmul.f32 0.70710677, %v7787_v10  ;;  %v8762_v0 = vld [vmem:[%s9815_s20 + $0x218] ss:$12 sps:$4 sm:$0xff]  }
 0x4af   : > { %v11970_v32 = vmul.f32 %v4500_v29, %v11887_v12  ;;  %v4218_v39 = vmul.f32 0.70710677, %v7837_v9  ;;  %v7788_v25 = vadd.f32 %v13234_v46, %v11083_v23  ;;  %v7838_v8 = vadd.f32 %v13235_v56, %v11087_v59 }
 0x4b0   : > { %7570 = vmatpush3.bf16.msra.mxu0 %v8757_v42  ;;  %v11978_v16 = vmul.f32 0.5, %v7786_v34  ;;  %8952 = verf.f32 %v4211_v57  ;;  %v11982_v45 = vpack.c.bf16 %v11911_v28, %v11885_v6  ;;  %v7789_v12 = vadd.f32 %v11659_v62, %v11079_v53 }
 0x4b1   : > { %v8941_v31 = vpop.eup %8940  ;;  %v4501_v4 = vadd.f32 1.0, %v8939_v5  ;;  %v11988_v13 = vmul.f32 0.5, %v7836_v35  ;;  %8954 = verf.f32 %v4213_v50  ;;  %v4217_v29 = vmul.f32 0.70710677, %v7788_v25  ;;  %7571 = vmatprep.subr.bf16.mxu0 %v8761_v37  ;;  %v13237_v35 = vld [vmem:[#allocation115_spill] sm:$0xff] }
 0x4b2   : > { %v8943_v34 = vpop.eup %8942  ;;  %v11991_v57 = vmul.f32 0.5, %v7787_v10  ;;  %8956 = verf.f32 %v4216_v54  ;;  %v4219_v6 = vmul.f32 0.70710677, %v7838_v8  ;;  %5911 = vmatprep.mubr.bf16.mxu1 %v11982_v45  ;;  %v4222_v62 = vmul.f32 0.70710677, %v7789_v12 }
 0x4b3   : > { %6349 = vmatmul.mubr.bf16.gmra.mrb[116].mxu0 %v13236_v19  ;;  %v8945_v28 = vpop.eup %8944  ;;  %v4649_v42 = vmul.f32 %v4499_v20, %v11901_v49  ;;  %8958 = verf.f32 %v4218_v39  ;;  %v7839_v50 = vadd.f32 %v13237_v35, %v11081_v43  ;;  %v4504_v5 = vadd.f32 1.0, %v8941_v31 }
 0x4b4   : > { %6356 = vmatprep.mubr.bf16.mxu0 %v11705_v24  ;;  %v11999_v24 = vpack.c.bf16 %v11894_v2, %v11868_v36  ;;  %7572 = vmatpush3.bf16.msra.mxu0 %v8762_v0  ;;  %v8947_v10 = vpop.eup %8946  ;;  %v12001_v54 = vmul.f32 0.5, %v7837_v9  ;;  %8960 = verf.f32 %v4217_v29  ;;  %v7790_v46 = vadd.f32 %v11676_v30, %v11083_v23  ;;  %v8767_v36 = vld [vmem:[%s9815_s20 + $0x230] ss:$12 sps:$4 sm:$0xff]  }
 0x4b5   : > { %7573 = vmatprep.subr.bf16.mxu0 %v8763_v41  ;;  %v8949_v49 = vpop.eup %8948  ;;  %v12006_v20 = vmul.f32 %v4501_v4, %v11913_v22  ;;  %v4506_v39 = vadd.f32 1.0, %v8943_v34  ;;  %8962 = verf.f32 %v4219_v6  ;;  %v4224_v56 = vmul.f32 0.70710677, %v7839_v50  ;;  %v13238_v22 = vld [vmem:[#allocation94_spill] sm:$0xff] }
 0x4b6   : > { %5912 = vmatmul.mubr.bf16.gmra.mrb[80].mxu1 %v11999_v24  ;;  %v4505_v2 = vadd.f32 1.0, %v8945_v28  ;;  %8964 = verf.f32 %v4222_v62  ;;  %v4223_v37 = vmul.f32 0.70710677, %v7790_v46  ;;  %v7840_v9 = vadd.f32 %v11678_v33, %v11087_v59 }
 0x4b7   : > { %v4507_v0 = vadd.f32 1.0, %v8947_v10  ;;  %8966 = verf.f32 %v4224_v56  ;;  %v7791_v30 = vadd.f32 %v11711_v26, %v11079_v53  ;;  %v7841_v19 = vadd.f32 %v13238_v22, %v11081_v43 }
 0x4b8   : > { %7574 = vmatpush3.bf16.msra.mxu0 %v8767_v36  ;;  %v8951_v41 = vpop.eup %8950  ;;  %v12017_v31 = vmul.f32 %v4504_v5, %v11917_v1  ;;  %v4510_v4 = vadd.f32 1.0, %v8949_v49  ;;  %8968 = verf.f32 %v4223_v37  ;;  %v4225_v29 = vmul.f32 0.70710677, %v7840_v9  ;;  %v13239_v36 = vld [vmem:[#allocation118_spill] sm:$0xff] }
 0x4b9   : > { %v12021_v33 = vmul.f32 %v4506_v39, %v11927_v14  ;;  %v12023_v34 = vmul.f32 0.5, %v7788_v25  ;;  %v12025_v6 = vmul.f32 0.5, %v7838_v8  ;;  %v4228_v26 = vmul.f32 0.70710677, %v7791_v30 }
 0x4ba   : > { %v8953_v62 = vpop.eup %8952  ;;  %v12029_v28 = vmul.f32 %v4505_v2, %v11954_v21  ;;  %v12031_v1 = vmul.f32 0.5, %v7789_v12  ;;  %8970 = verf.f32 %v4225_v29  ;;  %v4230_v35 = vmul.f32 0.70710677, %v7841_v19 }
 0x4bb   : > { %6357 = vmatmul.mubr.bf16.gmra.mrb[120].mxu0 %v11745_v47  ;;  %v8955_v10 = vpop.eup %8954  ;;  %v12034_v47 = vmul.f32 %v4507_v0, %v11956_v61  ;;  %v4512_v14 = vadd.f32 1.0, %v8951_v41  ;;  %8972 = verf.f32 %v4228_v26  ;;  %v7792_v25 = vadd.f32 %v11721_v60, %v11083_v23 }
 0x4bc   : > { %6364 = vmatprep.mubr.bf16.mxu0 %v11823_v38  ;;  %v8957_v8 = vpop.eup %8956  ;;  %v12039_v38 = vmul.f32 %v4510_v4, %v11961_v17  ;;  %v12041_v5 = vmul.f32 0.5, %v7839_v50  ;;  %v7842_v21 = vadd.f32 %v11723_v3, %v11087_v59  ;;  %v12046_v12 = vpack.c.bf16 %v4649_v42, %v11952_v40  ;;  %v13240_v50 = vld [vmem:[#allocation119_spill] sm:$0xff] }
 0x4bd   : > { %v8959_v49 = vpop.eup %8958  ;;  %v4511_v61 = vadd.f32 1.0, %v8953_v62  ;;  %v4073_v39 = vmul.f32 0.5, %v7790_v46  ;;  %v4229_v56 = vmul.f32 0.70710677, %v7792_v25  ;;  %v7793_v2 = vadd.f32 %v13239_v36, %v11079_v53 }
 0x4be   : > { %v8961_v60 = vpop.eup %8960  ;;  %v4513_v37 = vadd.f32 1.0, %v8955_v10  ;;  %8974 = verf.f32 %v4230_v35  ;;  %v4231_v17 = vmul.f32 0.70710677, %v7842_v21  ;;  %5921 = vmatprep.mubr.bf16.mxu1 %v12046_v12  ;;  %v7843_v0 = vadd.f32 %v13240_v50, %v11081_v43 }
 0x4bf   : > { %v8963_v3 = vpop.eup %8962  ;;  %v12054_v40 = vmul.f32 %v4512_v14, %v11963_v15  ;;  %v4075_v42 = vmul.f32 0.5, %v7840_v9  ;;  %8976 = verf.f32 %v4229_v56  ;;  %v4234_v46 = vmul.f32 0.70710677, %v7793_v2 }
 0x4c0   : > { %v8965_v22 = vpop.eup %8964  ;;  %v4516_v41 = vadd.f32 1.0, %v8957_v8  ;;  %v4518_v4 = vadd.f32 1.0, %v8959_v49  ;;  %v4078_v29 = vmul.f32 0.5, %v7791_v30  ;;  %8978 = verf.f32 %v4231_v17  ;;  %v13241_v30 = vld [vmem:[#allocation120_spill] sm:$0xff] }
 0x4c1   : > { %v8967_v26 = vpop.eup %8966  ;;  %v12057_v62 = vmul.f32 0.5, %v7841_v19  ;;  %8980 = verf.f32 %v4234_v46  ;;  %v4236_v35 = vmul.f32 0.70710677, %v7843_v0  ;;  %v12061_v10 = vpack.c.bf16 %v11967_v44, %v11934_v51 }
 0x4c2   : > { %v8969_v15 = vpop.eup %8968  ;;  %v4661_v9 = vmul.f32 %v4511_v61, %v11978_v16  ;;  %v12066_v14 = vmul.f32 %v4513_v37, %v11988_v13  ;;  %v7844_v19 = vadd.f32 %v13241_v30, %v11087_v59  ;;  %v4522_v8 = vadd.f32 1.0, %v8965_v22 }
 0x4c3   : > { %6365 = vmatmul.mubr.bf16.gmra.mrb[124].mxu0 %v11847_v55  ;;  %v7794_v55 = vadd.f32 %v11751_v48, %v11083_v23  ;;  %v4523_v49 = vadd.f32 1.0, %v8969_v15  ;;  %8982 = verf.f32 %v4236_v35  ;;  %5922 = vmatmul.mubr.bf16.gmra.mrb[84].mxu1 %v12061_v10  ;;  %v4666_v44 = vmul.f32 %v4516_v41, %v11991_v57 }
 0x4c4   : > { %6372 = vmatprep.mubr.bf16.mxu0 %v11907_v58  ;;  %v12075_v58 = vadd.f32 %v11781_v52, %v11079_v53  ;;  %v8971_v51 = vpop.eup %8970  ;;  %v12079_v16 = vmul.f32 %v4518_v4, %v12001_v54  ;;  %v4517_v13 = vadd.f32 1.0, %v8961_v60  ;;  %v4519_v56 = vadd.f32 1.0, %v8963_v3 }
 0x4c5   : > { %v4235_v48 = vmul.f32 0.70710677, %v7794_v55  ;;  %v8973_v61 = vpop.eup %8972  ;;  %v4524_v36 = vadd.f32 1.0, %v8967_v26  ;;  %v12081_v37 = vmul.f32 0.5, %v7792_v25  ;;  %v4237_v17 = vmul.f32 0.70710677, %v7844_v19 }
 0x4c6   : > { %v4525_v50 = vadd.f32 1.0, %v8971_v51  ;;  %v12083_v46 = vmul.f32 0.5, %v7842_v21  ;;  %v4084_v22 = vmul.f32 0.5, %v7793_v2  ;;  %v4672_v53 = vmul.f32 %v4522_v8, %v12031_v1  ;;  %v13242_v25 = vld [vmem:[#allocation123_spill] sm:$0xff] }
 0x4c7   : > { %8984 = verf.f32 %v4235_v48  ;;  %v4673_v52 = vmul.f32 %v4523_v49, %v4073_v39  ;;  %v4240_v57 = vmul.f32 0.70710677, %v12075_v58  ;;  %v4667_v60 = vmul.f32 %v4517_v13, %v12023_v34  ;;  %v13245_v8 = vld [vmem:[#allocation83_spill] sm:$0xff]  ;;  %v13246_v49 = vld [vmem:[#allocation86_spill] sm:$0xff]  ;;  %v13248_v13 = vld [vmem:[#allocation85_spill] sm:$0xff] }
 0x4c8   : > { %8986 = verf.f32 %v4237_v17  ;;  %v8975_v54 = vpop.eup %8974  ;;  %v4528_v41 = vadd.f32 1.0, %v8973_v61  ;;  %v4086_v3 = vmul.f32 0.5, %v7843_v0  ;;  %v12090_v4 = vadd.f32 %v13242_v25, %v11083_v23  ;;  %v13256_v25 = vld [vmem:[#allocation98_spill] sm:$0xff] }
 0x4c9   : > { %v8977_v21 = vpop.eup %8976  ;;  %v4669_v2 = vmul.f32 %v4519_v56, %v12025_v6  ;;  %v4674_v1 = vmul.f32 %v4524_v36, %v12041_v5  ;;  %v12096_v39 = vpack.c.bf16 %v4661_v9, %v12029_v28  ;;  %v12100_v26 = vpack.c.bf16 %v12039_v38, %v12017_v31  ;;  %v13244_v38 = vld [vmem:[#allocation81_spill] sm:$0xff] }
 0x4ca   : > { %v8979_v34 = vpop.eup %8978  ;;  %v4675_v0 = vmul.f32 %v4525_v50, %v4075_v42  ;;  %v4085_v23 = vmul.f32 0.5, %v7794_v55  ;;  %v4087_v35 = vmul.f32 0.5, %v7844_v19  ;;  %v4530_v30 = vadd.f32 1.0, %v8975_v54  ;;  %v13249_v56 = vld [vmem:[#allocation89_spill] sm:$0xff]  ;;  %v13251_v50 = vld [vmem:[#allocation88_spill] sm:$0xff]  ;;  %v13254_v54 = vld [vmem:[#allocation103_spill] sm:$0xff] }
 0x4cb   : > { %6373 = vmatmul.mubr.bf16.gmra.mrb[128].mxu0 %v11924_v7  ;;  %v4241_v7 = vmul.f32 0.70710677, %v12090_v4  ;;  %v8981_v15 = vpop.eup %8980  ;;  %8988 = verf.f32 %v4240_v57  ;;  %5931 = vmatprep.mubr.bf16.mxu1 %v12096_v39  ;;  %v12105_v6 = vpack.c.bf16 %v4673_v52, %v4667_v60  ;;  %v12107_v28 = vpack.c.bf16 %v4672_v53, %v4666_v44  ;;  %v13247_v44 = vld [vmem:[#allocation82_spill] sm:$0xff]  ;;  %v13250_v36 = vld [vmem:[#allocation93_spill] sm:$0xff]  ;;  %v13252_v53 = vld [vmem:[#allocation91_spill] sm:$0xff] }
 0x4cc   : > { %6380 = vmatprep.mubr.bf16.mxu0 %v11982_v45  ;;  %v4678_v5 = vmul.f32 %v4528_v41, %v4078_v29  ;;  %v4534_v31 = vadd.f32 1.0, %v8981_v15  ;;  %5932 = vmatmul.mubr.bf16.gmra.mrb[88].mxu1 %v12100_v26  ;;  %v13243_v45 = vld [vmem:[#allocation80_spill] sm:$0xff]  ;;  %v4529_v55 = vadd.f32 1.0, %v8977_v21  ;;  %v4531_v19 = vadd.f32 1.0, %v8979_v34  ;;  %v13253_v57 = vld [vmem:[#allocation97_spill] sm:$0xff]  ;;  %v13257_v34 = vld [vmem:[#allocation87_spill] sm:$0xff] }
 0x4cd   : > { %8990 = verf.f32 %v4241_v7  ;;  %v12112_v42 = vpack.c.bf16 %v13244_v38, %v13243_v45  ;;  %v8983_v9 = vpop.eup %8982  ;;  %5941 = vmatprep.mubr.bf16.mxu1 %v12105_v6  ;;  %v12117_v51 = vpack.c.bf16 %v13246_v49, %v13245_v8  ;;  %v12121_v29 = vpack.c.bf16 %v13248_v13, %v13247_v44  ;;  %v13255_v41 = vld [vmem:[#allocation96_spill] sm:$0xff]  ;;  %v13258_v7 = vld [vmem:[#allocation114_spill] sm:$0xff]  ;;  %v13261_v49 = vld [vmem:[#allocation117_spill] sm:$0xff] }
 0x4ce   : > { %v4684_v48 = vmul.f32 %v4534_v31, %v4084_v22  ;;  %v4536_v61 = vadd.f32 1.0, %v8983_v9  ;;  %v12125_v17 = vpack.c.bf16 %v13250_v36, %v13249_v56  ;;  %v12129_v52 = vpack.c.bf16 %v13252_v53, %v13251_v50  ;;  %v13259_v15 = vld [vmem:[#allocation104_spill] sm:$0xff]  ;;  %v13260_v31 = vld [vmem:[#allocation110_spill] sm:$0xff]  ;;  %v13262_v44 = vld [vmem:[#allocation121_spill] sm:$0xff] }
 0x4cf   : > { %v12133_v60 = vpack.c.bf16 %v13254_v54, %v13253_v57  ;;  %v12137_v21 = vpack.c.bf16 %v13256_v25, %v13255_v41  ;;  %v12141_v22 = vpack.c.bf16 %v13258_v7, %v13257_v34  ;;  %v12145_v45 = vpack.c.bf16 %v13260_v31, %v13259_v15  ;;  %v13263_v56 = vld [vmem:[#allocation116_spill] sm:$0xff]  ;;  %v13264_v36 = vld [vmem:[#allocation95_spill] sm:$0xff]  ;;  %v13265_v54 = vld [vmem:[#allocation125_spill] sm:$0xff] }
 0x4d0   : > { %v4686_v9 = vmul.f32 %v4536_v61, %v4086_v3  ;;  %v4837_v8 = vpack.c.bf16 %v4684_v48, %v4678_v5  ;;  %v12150_v13 = vpack.c.bf16 %v13262_v44, %v13261_v49  ;;  %v12154_v50 = vpack.c.bf16 %v13264_v36, %v13263_v56  ;;  %v13266_v3 = vld [vmem:[#allocation122_spill] sm:$0xff]  ;;  %v13270_v7 = vld [vmem:[#allocation101_spill] sm:$0xff] }
 0x4d1   : > { %v8985_v38 = vpop.eup %8984  ;;  %v12159_v41 = vpack.c.bf16 %v11865_v11, %v13265_v54  ;;  %v13267_v5 = vld [vmem:[#allocation126_spill] sm:$0xff]  ;;  %v12179_v11 = vpack.c.bf16 %v11970_v32, %v11947_v27  ;;  %v4679_v31 = vmul.f32 %v4529_v55, %v12081_v37  ;;  %v12188_v49 = vpack.c.bf16 %v12054_v40, %v12021_v33  ;;  %v9113_v54 = vld [vmem:[%s433_s22] sm:$0x3f] }
 0x4d2   : > { %v8987_v53 = vpop.eup %8986  ;;  %v4535_v57 = vadd.f32 1.0, %v8985_v38  ;;  %v12163_v48 = vpack.c.bf16 %v13267_v5, %v13266_v3  ;;  %v13269_v34 = vld [vmem:[#allocation78_spill] sm:$0xff]  ;;  %v4680_v44 = vmul.f32 %v4530_v30, %v12057_v62  ;;  %v12193_v27 = vpack.c.bf16 %v4675_v0, %v4669_v2  ;;  %v8724_v0 = vld [vmem:[%s9815_s20 + $0x334] ss:$12 sps:$4 sm:$0xff]   ;;  %v8727_v30 = vld [vmem:[%s9815_s20 + $0x34c] ss:$12 sps:$4 sm:$0xff]  }
 0x4d3   : > { %6381 = vmatmul.mubr.bf16.gmra.mrb[132].mxu0 %v11999_v24  ;;  %v13268_v24 = vld [vmem:[#allocation90_spill] sm:$0xff]  ;;  %v4537_v25 = vadd.f32 1.0, %v8987_v53  ;;  %v12171_v15 = vpack.c.bf16 %v13270_v7, %v13269_v34  ;;  %v4091_v33 = vmul.f32 0.5, %v12090_v4  ;;  %v8734_v5 = vld [vmem:[%s9815_s20 + $0x390] ss:$12 sps:$4 sm:$0xff]  }
 0x4d4   : > { %6388 = vmatprep.mubr.bf16.mxu0 %v12046_v12  ;;  %v12167_v61 = vpack.c.bf16 %v11931_v63, %v13268_v24  ;;  %v12175_v12 = vpack.c.bf16 %v12006_v20, %v11959_v18  ;;  %v4685_v38 = vmul.f32 %v4535_v57, %v4085_v23  ;;  %v12184_v63 = vpack.c.bf16 %v12066_v14, %v12034_v47  ;;  %v8731_v53 = vld [vmem:[%s9815_s20 + $0x378] ss:$12 sps:$4 sm:$0xff]   ;;  %v8736_v57 = vld [vmem:[%s9815_s20 + $0x394] ss:$12 sps:$4 sm:$0xff]  }
 0x4d5   : > { %v4681_v18 = vmul.f32 %v4531_v19, %v12083_v46  ;;  %v4687_v20 = vmul.f32 %v4537_v25, %v4087_v35  ;;  %5942 = vmatmul.mubr.bf16.gmra.mrb[92].mxu1 %v12107_v28  ;;  %v8989_v32 = vpop.eup %8988  ;;  %v12196_v23 = vpack.c.bf16 %v4674_v1, %v12079_v16  ;;  %v12200_v55 = vpack.c.bf16 %v4686_v9, %v4680_v44  ;;  %v8722_v35 = vld [vmem:[%s9815_s20 + $0x330] ss:$12 sps:$4 sm:$0xff]   ;;  %v8728_v19 = vld [vmem:[%s9815_s20 + $0x360] ss:$12 sps:$4 sm:$0xff]   ;;  %v8739_v44 = vld [vmem:[%s9815_s20 + $0x3a8] ss:$12 sps:$4 sm:$0xff]  }
 0x4d6   : > { %v4838_v37 = vpack.c.bf16 %v4685_v38, %v4679_v31  ;;  %v4540_v46 = vadd.f32 1.0, %v8989_v32  ;;  %v4090_v16 = vmul.f32 0.5, %v12075_v58  ;;  %v8721_v58 = vld [vmem:[%s9815_s20 + $0x31c] ss:$12 sps:$4 sm:$0xff]   ;;  %v8741_v24 = vld [vmem:[%s9815_s20 + $0x3ac] ss:$12 sps:$4 sm:$0xff]  }
 0x4d7   : > { %v8991_v47 = vpop.eup %8990  ;;  %v12198_v14 = vpack.c.bf16 %v4687_v20, %v4681_v18  ;;  %v8733_v9 = vld [vmem:[%s9815_s20 + $0x37c] ss:$12 sps:$4 sm:$0xff]   ;;  %v8747_v32 = vld [vmem:[%s9815_s20 + $0x3c4] ss:$12 sps:$4 sm:$0xff]  }
 0x4d8   : > { %v4541_v40 = vadd.f32 1.0, %v8991_v47  ;;  %5951 = vmatprep.mubr.bf16.mxu1 %v4838_v37  ;;  %v4690_v1 = vmul.f32 %v4540_v46, %v4090_v16  ;;  %v8753_v46 = vld [vmem:[%s9815_s20 + $0x3dc] ss:$12 sps:$4 sm:$0xff]  }
 0x4da   : > { %v4691_v62 = vmul.f32 %v4541_v40, %v4091_v33  ;;  %v4843_v4 = vpack.c.bf16 %v4690_v1, %v4690_v1 }
 0x4db   : > { %6389 = vmatmul.mubr.bf16.gmra.mrb[136].mxu0 %v12061_v10  ;;  %v8716_v10 = vld [vmem:[%s9815_s20 + $0x300] ss:$12 sps:$4 sm:$0xff]  }
 0x4dc   : > { %6396 = vmatprep.mubr.bf16.mxu0 %v12096_v39  ;;  %v4844_v2 = vpack.c.bf16 %v4691_v62, %v4691_v62  ;;  %v13271_v39 = vld [vmem:[#allocation79_spill] sm:$0xff] }
 0x4dd   : > { %5952 = vmatmul.mubr.bf16.gmra.mrb[96].mxu1 %v4837_v8  ;;  %v8745_v62 = vld [vmem:[%s9815_s20 + $0x3c0] ss:$12 sps:$4 sm:$0xff]  }
 0x4de   : > { %5961 = vmatprep.mubr.bf16.mxu1 %v4844_v2 }
 0x4e3   : > { %6397 = vmatmul.mubr.bf16.gmra.mrb[140].mxu0 %v12100_v26  ;;  %v8719_v26 = vld [vmem:[%s9815_s20 + $0x318] ss:$12 sps:$4 sm:$0xff]  }
 0x4e4   : > { %6404 = vmatprep.mubr.bf16.mxu0 %v12105_v6  ;;  %v8725_v6 = vld [vmem:[%s9815_s20 + $0x348] ss:$12 sps:$4 sm:$0xff]  }
 0x4e5   : > { %5962 = vmatmul.mubr.bf16.gmra.mrb[100].mxu1 %v4843_v4 }
 0x4e6   : > { %6002 = vmatprep.mubr.bf16.mxu1 %v12112_v42 }
 0x4eb   : > { %6405 = vmatmul.mubr.bf16.gmra.mrb[144].mxu0 %v12107_v28  ;;  %v8730_v28 = vld [vmem:[%s9815_s20 + $0x364] ss:$12 sps:$4 sm:$0xff]  }
 0x4ec   : > { %6412 = vmatprep.mubr.bf16.mxu0 %v4838_v37 }
 0x4ed   : > { %6003 = vmatmul.mubr.bf16.vlgmr.msra.gmra.mrb[52].mxu1 %v13271_v39 }
 0x4ee   : > { %6012 = vmatprep.mubr.bf16.mxu1 %v12117_v51  ;;  %6132 = vmatpush1.bf16.msra.mxu1 %v8716_v10 }
 0x4ef   : > { %6133 = vmatprep.subr.bf16.mxu1 %v8721_v58 }
 0x4f2   : > { %6134 = vmatpush1.bf16.msra.mxu1 %v8719_v26  ;;  %v8760_v26 = vld [vmem:[%s9815_s20 + $0x3f4] ss:$12 sps:$4 sm:$0xff]  }
 0x4f3   : > { %6413 = vmatmul.mubr.bf16.gmra.mrb[148].mxu0 %v4837_v8  ;;  %6135 = vmatprep.subr.bf16.mxu1 %v8724_v0  ;;  %v13272_v8 = vld [vmem:[#allocation77_spill] sm:$0xff] }
 0x4f4   : > { %6420 = vmatprep.mubr.bf16.mxu0 %v4844_v2  ;;  %v2045_v56 = vsub.s32 4, %v13272_v8  ;;  %v2049_v36 = vsub.s32 5, %v13272_v8  ;;  %v8766_v8 = vld [vmem:[%s9815_s20 + $0x40c] ss:$12 sps:$4 sm:$0xff]  }
 0x4f5   : > { %6013 = vmatmul.mubr.bf16.gmra.mrb[56].mxu1 %v12121_v29 }
 0x4f6   : > { %6022 = vmatprep.mubr.bf16.mxu1 %v12125_v17  ;;  %6136 = vmatpush1.bf16.msra.mxu1 %v8722_v35  ;;  %v12233_v3 = vrot.slane %v9113_v54, %v2045_v56 }
 0x4f7   : > { %6137 = vmatprep.subr.bf16.mxu1 %v8727_v30 }
 0x4fa   : > { %6138 = vmatpush1.bf16.msra.mxu1 %v8725_v6 }
 0x4fb   : > { %6421 = vmatmul.mubr.bf16.gmra.mrb[152].mxu0 %v4843_v4  ;;  %6139 = vmatprep.subr.bf16.mxu1 %v8730_v28 }
 0x4fc   : > { %6460 = vmatprep.mubr.bf16.mxu0 %v12112_v42  ;;  %v12236_v42 = vrot.slane %v9113_v54, %v2049_v36 }
 0x4fd   : > { %6023 = vmatmul.mubr.bf16.gmra.mrb[60].mxu1 %v12129_v52 }
 0x4fe   : > { %6032 = vmatprep.mubr.bf16.mxu1 %v12133_v60  ;;  %6140 = vmatpush1.bf16.msra.mxu1 %v8728_v19  ;;  %v8758_v19 = vld [vmem:[%s9815_s20 + $0x3f0] ss:$12 sps:$4 sm:$0xff]  }
 0x4ff   : > { %6141 = vmatprep.subr.bf16.mxu1 %v8733_v9 }
 0x502   : > { %6142 = vmatpush1.bf16.msra.mxu1 %v8731_v53 }
 0x503   : > { %6461 = vmatmul.mubr.bf16.vlgmr.msra.gmra.mrb[156].mxu0 %v13271_v39  ;;  %6143 = vmatprep.subr.bf16.mxu1 %v8736_v57  ;;  %v3819_v25 = vpop.f32.mrb[52].mxu0 }
 0x504   : > { %6468 = vmatprep.mubr.bf16.mxu0 %v12117_v51  ;;  %v12242_v34 = vadd.f32 %v3819_v25, %v12233_v3  ;;  %v3821_v7 = vpop.f32.mrb[53].mxu0 }
 0x505   : > { %6033 = vmatmul.mubr.bf16.gmra.mrb[64].mxu1 %v12137_v21  ;;  %v12246_v31 = vadd.f32 %v3821_v7, %v12236_v42  ;;  %v3823_v38 = vpop.f32.mrb[54].mxu0 }
 0x506   : > { %6042 = vmatprep.mubr.bf16.mxu1 %v12141_v22  ;;  %6144 = vmatpush1.bf16.msra.mxu1 %v8734_v5  ;;  %v4100_v51 = vmul.f32 0.70710677, %v12242_v34  ;;  %v7849_v18 = vadd.f32 %v3823_v38, %v12233_v3  ;;  %v3825_v20 = vpop.f32.mrb[55].mxu0  ;;  %v3950_v25 = vmul.f32 0.5, %v12242_v34  ;;  %v8770_v34 = vld [vmem:[%s9815_s20 + $0x424] ss:$12 sps:$4 sm:$0xff]  }
 0x507   : > { %6145 = vmatprep.subr.bf16.mxu1 %v8741_v24  ;;  %v4101_v37 = vmul.f32 0.70710677, %v12246_v31  ;;  %v7850_v47 = vadd.f32 %v3825_v20, %v12236_v42  ;;  %v8764_v24 = vld [vmem:[%s9815_s20 + $0x408] ss:$12 sps:$4 sm:$0xff]  }
 0x508   : > { %8992 = verf.f32 %v4100_v51  ;;  %v4106_v33 = vmul.f32 0.70710677, %v7849_v18  ;;  %v3951_v51 = vmul.f32 0.5, %v12246_v31 }
 0x509   : > { %8994 = verf.f32 %v4101_v37  ;;  %v4107_v40 = vmul.f32 0.70710677, %v7850_v47  ;;  %v3957_v20 = vmul.f32 0.5, %v7850_v47 }
 0x50a   : > { %6146 = vmatpush1.bf16.msra.mxu1 %v8739_v44  ;;  %8996 = verf.f32 %v4106_v33 }
 0x50b   : > { %6469 = vmatmul.mubr.bf16.gmra.mrb[160].mxu0 %v12121_v29  ;;  %6147 = vmatprep.subr.bf16.mxu1 %v8747_v32  ;;  %8998 = verf.f32 %v4107_v40  ;;  %v3829_v2 = vpop.f32.mrb[56].mxu0 }
 0x50c   : > { %6476 = vmatprep.mubr.bf16.mxu0 %v12125_v17  ;;  %v12260_v16 = vadd.f32 %v3829_v2, %v12233_v3  ;;  %v3831_v1 = vpop.f32.mrb[57].mxu0  ;;  %v8751_v17 = vld [vmem:[%s9815_s20 + $0x3d8] ss:$12 sps:$4 sm:$0xff]  }
 0x50d   : > { %6043 = vmatmul.mubr.bf16.gmra.mrb[68].mxu1 %v12145_v45  ;;  %v12264_v4 = vadd.f32 %v3831_v1, %v12236_v42  ;;  %v3833_v29 = vpop.f32.mrb[58].mxu0 }
 0x50e   : > { %6052 = vmatprep.mubr.bf16.mxu1 %v12150_v13  ;;  %6148 = vmatpush1.bf16.msra.mxu1 %v8745_v62  ;;  %v4112_v10 = vmul.f32 0.70710677, %v12260_v16  ;;  %v12270_v58 = vadd.f32 %v3833_v29, %v12233_v3  ;;  %v3835_v39 = vpop.f32.mrb[59].mxu0 }
 0x50f   : > { %6149 = vmatprep.subr.bf16.mxu1 %v8753_v46  ;;  %v4113_v0 = vmul.f32 0.70710677, %v12264_v4  ;;  %v12275_v35 = vadd.f32 %v3835_v39, %v12236_v42 }
 0x510   : > { %9000 = verf.f32 %v4112_v10  ;;  %v4118_v30 = vmul.f32 0.70710677, %v12270_v58  ;;  %v8768_v10 = vld [vmem:[%s9815_s20 + $0x420] ss:$12 sps:$4 sm:$0xff]  }
 0x511   : > { %9002 = verf.f32 %v4113_v0  ;;  %v4119_v6 = vmul.f32 0.70710677, %v12275_v35 }
 0x512   : > { %v8993_v28 = vpop.eup %8992  ;;  %6150 = vmatpush1.bf16.msra.mxu1 %v8751_v17  ;;  %9004 = verf.f32 %v4118_v30  ;;  %v13273_v30 = vld [vmem:[#allocation84_spill] sm:$0xff] }
 0x513   : > { %6477 = vmatmul.mubr.bf16.gmra.mrb[164].mxu0 %v12129_v52  ;;  %v8995_v9 = vpop.eup %8994  ;;  %6151 = vmatprep.subr.bf16.mxu1 %v8760_v26  ;;  %v4400_v56 = vadd.f32 1.0, %v8993_v28  ;;  %9006 = verf.f32 %v4119_v6  ;;  %v3839_v36 = vpop.f32.mrb[60].mxu0  ;;  %v12314_v6 = vadd.f32 %v13273_v30, %v11081_v43  ;;  %v8773_v28 = vld [vmem:[%s9815_s20 + $0x43c] ss:$12 sps:$4 sm:$0xff]   ;;  %v8771_v43 = vld [vmem:[%s9815_s20 + $0x438] ss:$12 sps:$4 sm:$0xff]  }
 0x514   : > { %6484 = vmatprep.mubr.bf16.mxu0 %v12133_v60  ;;  %v8997_v53 = vpop.eup %8996  ;;  %v4401_v57 = vadd.f32 1.0, %v8995_v9  ;;  %v12284_v54 = vadd.f32 %v3839_v36, %v12233_v3  ;;  %v3841_v5 = vpop.f32.mrb[61].mxu0  ;;  %v3956_v60 = vmul.f32 0.5, %v7849_v18 }
 0x515   : > { %v8999_v52 = vpop.eup %8998  ;;  %6053 = vmatmul.mubr.bf16.gmra.mrb[72].mxu1 %v12154_v50  ;;  %v4406_v7 = vadd.f32 1.0, %v8997_v53  ;;  %v12290_v38 = vadd.f32 %v3841_v5, %v12236_v42  ;;  %v3843_v44 = vpop.f32.mrb[62].mxu0  ;;  %v4550_v40 = vmul.f32 %v4400_v56, %v3950_v25  ;;  %v3962_v5 = vmul.f32 0.5, %v12260_v16 }
 0x516   : > { %6062 = vmatprep.mubr.bf16.mxu1 %v12159_v41  ;;  %6152 = vmatpush1.bf16.msra.mxu1 %v8758_v19  ;;  %v4407_v32 = vadd.f32 1.0, %v8999_v52  ;;  %v4124_v37 = vmul.f32 0.70710677, %v12284_v54  ;;  %v3845_v33 = vpop.f32.mrb[63].mxu0  ;;  %v12298_v46 = vadd.f32 %v3843_v44, %v12233_v3  ;;  %v4551_v2 = vmul.f32 %v4401_v57, %v3951_v51 }
 0x517   : > { %6153 = vmatprep.subr.bf16.mxu1 %v8766_v8  ;;  %v4556_v18 = vmul.f32 %v4406_v7, %v3956_v60  ;;  %v4125_v62 = vmul.f32 0.70710677, %v12290_v38  ;;  %v12301_v31 = vadd.f32 %v3845_v33, %v12236_v42  ;;  %v13274_v8 = vld [vmem:[#allocation124_spill] sm:$0xff]  ;;  %v3968_v52 = vmul.f32 0.5, %v12270_v58 }
 0x518   : > { %v4557_v1 = vmul.f32 %v4407_v32, %v3957_v20  ;;  %9008 = verf.f32 %v4124_v37  ;;  %v4130_v29 = vmul.f32 0.70710677, %v12298_v46  ;;  %v12319_v56 = vadd.f32 %v13274_v8, %v11087_v59  ;;  %v8776_v32 = vld [vmem:[%s9815_s20 + $0x454] ss:$12 sps:$4 sm:$0xff]  }
 0x519   : > { %v12303_v47 = vpack.c.bf16 %v4556_v18, %v4550_v40  ;;  %9010 = verf.f32 %v4125_v62  ;;  %v4131_v39 = vmul.f32 0.70710677, %v12301_v31  ;;  %v3963_v60 = vmul.f32 0.5, %v12264_v4  ;;  %v8777_v8 = vld [vmem:[%s9815_s20 + $0x468] ss:$12 sps:$4 sm:$0xff]  }
 0x51a   : > { %v9001_v17 = vpop.eup %9000  ;;  %6154 = vmatpush1.bf16.msra.mxu1 %v8764_v24  ;;  %v12310_v26 = vpack.c.bf16 %v4557_v1, %v4551_v2  ;;  %9012 = verf.f32 %v4130_v29  ;;  %v3969_v7 = vmul.f32 0.5, %v12275_v35  ;;  %v4243_v35 = vmul.f32 0.70710677, %v12319_v56  ;;  %v8774_v1 = vld [vmem:[%s9815_s20 + $0x450] ss:$12 sps:$4 sm:$0xff]  }
 0x51b   : > { %6485 = vmatmul.mubr.bf16.gmra.mrb[168].mxu0 %v12137_v21  ;;  %v9003_v0 = vpop.eup %9002  ;;  %6155 = vmatprep.subr.bf16.mxu1 %v8770_v34  ;;  %v4412_v19 = vadd.f32 1.0, %v9001_v17  ;;  %v3849_v21 = vpop.f32.mrb[64].mxu0  ;;  %9014 = verf.f32 %v4131_v39  ;;  %v8779_v39 = vld [vmem:[%s9815_s20 + $0x46c] ss:$12 sps:$4 sm:$0xff]   ;;  %v4242_v30 = vmul.f32 0.70710677, %v12314_v6 }
 0x51c   : > { %6492 = vmatprep.mubr.bf16.mxu0 %v12141_v22  ;;  %v9005_v9 = vpop.eup %9004  ;;  %v4413_v36 = vadd.f32 1.0, %v9003_v0  ;;  %v12322_v22 = vadd.f32 %v3849_v21, %v12233_v3  ;;  %v3851_v53 = vpop.f32.mrb[65].mxu0 }
 0x51d   : > { %v9007_v57 = vpop.eup %9006  ;;  %6063 = vmatmul.mubr.bf16.gmra.mrb[76].mxu1 %v12163_v48  ;;  %v4418_v24 = vadd.f32 1.0, %v9005_v9  ;;  %v12329_v25 = vadd.f32 %v3851_v53, %v12236_v42  ;;  %v3853_v59 = vpop.f32.mrb[66].mxu0  ;;  %v4562_v16 = vmul.f32 %v4412_v19, %v3962_v5  ;;  %v3980_v5 = vmul.f32 0.5, %v12298_v46 }
 0x51e   : > { %6072 = vmatprep.mubr.bf16.mxu1 %v12167_v61  ;;  %6156 = vmatpush1.bf16.msra.mxu1 %v8768_v10  ;;  %v4419_v44 = vadd.f32 1.0, %v9007_v57  ;;  %v4136_v51 = vmul.f32 0.70710677, %v12322_v22  ;;  %v3855_v20 = vpop.f32.mrb[67].mxu0  ;;  %v12338_v33 = vadd.f32 %v3853_v59, %v12233_v3  ;;  %v4563_v40 = vmul.f32 %v4413_v36, %v3963_v60 }
 0x51f   : > { %6157 = vmatprep.subr.bf16.mxu1 %v8773_v28  ;;  %v4568_v58 = vmul.f32 %v4418_v24, %v3968_v52  ;;  %v4137_v37 = vmul.f32 0.70710677, %v12329_v25  ;;  %v12341_v4 = vadd.f32 %v3855_v20, %v12236_v42 }
 0x520   : > { %v4569_v34 = vmul.f32 %v4419_v44, %v3969_v7  ;;  %9016 = verf.f32 %v4136_v51  ;;  %v4142_v18 = vmul.f32 0.70710677, %v12338_v33  ;;  %v8780_v7 = vld [vmem:[%s9815_s20 + $0x3c8] ss:$12 sps:$4 sm:$0xff]  }
 0x521   : > { %9018 = verf.f32 %v4137_v37  ;;  %v12346_v62 = vpack.c.bf16 %v4568_v58, %v4562_v16  ;;  %v4143_v29 = vmul.f32 0.70710677, %v12341_v4 }
 0x522   : > { %v9009_v2 = vpop.eup %9008  ;;  %6158 = vmatpush1.bf16.msra.mxu1 %v8771_v43  ;;  %v12351_v17 = vpack.c.bf16 %v4569_v34, %v4563_v40  ;;  %9020 = verf.f32 %v4142_v18  ;;  %v3975_v43 = vmul.f32 0.5, %v12290_v38 }
 0x523   : > { %6493 = vmatmul.mubr.bf16.gmra.mrb[172].mxu0 %v12145_v45  ;;  %v9011_v10 = vpop.eup %9010  ;;  %6159 = vmatprep.subr.bf16.mxu1 %v8776_v32  ;;  %v3859_v0 = vpop.f32.mrb[68].mxu0  ;;  %v4424_v45 = vadd.f32 1.0, %v9009_v2  ;;  %9022 = verf.f32 %v4143_v29 }
 0x524   : > { %6500 = vmatprep.mubr.bf16.mxu0 %v12150_v13  ;;  %v12356_v28 = vadd.f32 %v3859_v0, %v12233_v3  ;;  %v3861_v19 = vpop.f32.mrb[69].mxu0  ;;  %v9013_v21 = vpop.eup %9012  ;;  %9024 = verf.f32 %v4243_v35  ;;  %v3974_v13 = vmul.f32 0.5, %v12284_v54  ;;  %v4425_v9 = vadd.f32 1.0, %v9011_v10 }
 0x525   : > { %6073 = vmatmul.mubr.bf16.gmra.mrb[80].mxu1 %v12171_v15  ;;  %v12362_v36 = vadd.f32 %v3861_v19, %v12236_v42  ;;  %v3863_v53 = vpop.f32.mrb[70].mxu0  ;;  %v9015_v57 = vpop.eup %9014  ;;  %v4430_v52 = vadd.f32 1.0, %v9013_v21  ;;  %v3981_v54 = vmul.f32 0.5, %v12301_v31  ;;  %v3987_v19 = vmul.f32 0.5, %v12329_v25 }
 0x526   : > { %6082 = vmatprep.mubr.bf16.mxu1 %v12175_v12  ;;  %6160 = vmatpush1.bf16.msra.mxu1 %v8774_v1  ;;  %v4148_v24 = vmul.f32 0.70710677, %v12356_v28  ;;  %v3865_v59 = vpop.f32.mrb[71].mxu0  ;;  %v4431_v60 = vadd.f32 1.0, %v9015_v57  ;;  %v12372_v51 = vadd.f32 %v3863_v53, %v12233_v3  ;;  %v4574_v20 = vmul.f32 %v4424_v45, %v3974_v13 }
 0x527   : > { %6161 = vmatprep.subr.bf16.mxu1 %v8779_v39  ;;  %v4149_v44 = vmul.f32 0.70710677, %v12362_v36  ;;  %v4580_v16 = vmul.f32 %v4430_v52, %v3980_v5  ;;  %v12375_v38 = vadd.f32 %v3865_v59, %v12236_v42  ;;  %v4575_v46 = vmul.f32 %v4425_v9, %v3975_v43 }
 0x528   : > { %9026 = verf.f32 %v4148_v24  ;;  %v4581_v58 = vmul.f32 %v4431_v60, %v3981_v54  ;;  %v4154_v32 = vmul.f32 0.70710677, %v12372_v51  ;;  %v3992_v21 = vmul.f32 0.5, %v12338_v33 }
 0x529   : > { %9028 = verf.f32 %v4149_v44  ;;  %v4155_v37 = vmul.f32 0.70710677, %v12375_v38  ;;  %v12381_v40 = vpack.c.bf16 %v4580_v16, %v4574_v20  ;;  %v3993_v53 = vmul.f32 0.5, %v12341_v4 }
 0x52a   : > { %v9017_v31 = vpop.eup %9016  ;;  %6162 = vmatpush1.bf16.msra.mxu1 %v8777_v8  ;;  %9030 = verf.f32 %v4154_v32  ;;  %v12383_v18 = vpack.c.bf16 %v4581_v58, %v4575_v46 }
 0x52b   : > { %6501 = vmatmul.mubr.bf16.gmra.mrb[176].mxu0 %v12154_v50  ;;  %v9019_v34 = vpop.eup %9018  ;;  %7653 = vmatprep.subr.bf16.mxu1 %v8780_v7  ;;  %v3869_v35 = vpop.f32.mrb[72].mxu0  ;;  %v4436_v2 = vadd.f32 1.0, %v9017_v31  ;;  %9032 = verf.f32 %v4155_v37  ;;  %v3998_v31 = vmul.f32 0.5, %v12356_v28 }
 0x52c   : > { %6508 = vmatprep.mubr.bf16.mxu0 %v12159_v41  ;;  %v12386_v1 = vadd.f32 %v3869_v35, %v12233_v3  ;;  %v3871_v50 = vpop.f32.mrb[73].mxu0  ;;  %v9021_v29 = vpop.eup %9020  ;;  %9034 = verf.f32 %v4242_v30  ;;  %v3986_v41 = vmul.f32 0.5, %v12322_v22  ;;  %v4437_v10 = vadd.f32 1.0, %v9019_v34 }
 0x52d   : > { %6083 = vmatmul.mubr.bf16.gmra.mrb[84].mxu1 %v12179_v11  ;;  %v12391_v39 = vadd.f32 %v3871_v50, %v12236_v42  ;;  %v3873_v0 = vpop.f32.mrb[74].mxu0  ;;  %v9023_v45 = vpop.eup %9022  ;;  %v4442_v13 = vadd.f32 1.0, %v9021_v29  ;;  %v4004_v50 = vmul.f32 0.5, %v12372_v51 }
 0x52e   : > { %6092 = vmatprep.mubr.bf16.mxu1 %v12184_v63  ;;  %v4160_v9 = vmul.f32 0.70710677, %v12386_v1  ;;  %v3875_v30 = vpop.f32.mrb[75].mxu0  ;;  %v9025_v8 = vpop.eup %9024  ;;  %v4443_v22 = vadd.f32 1.0, %v9023_v45  ;;  %v12400_v43 = vadd.f32 %v3873_v0, %v12233_v3  ;;  %v4586_v5 = vmul.f32 %v4436_v2, %v3986_v41 }
 0x52f   : > { %v4161_v57 = vmul.f32 0.70710677, %v12391_v39  ;;  %v4592_v52 = vmul.f32 %v4442_v13, %v3992_v21  ;;  %v12403_v25 = vadd.f32 %v3875_v30, %v12236_v42  ;;  %v4587_v33 = vmul.f32 %v4437_v10, %v3987_v19 }
 0x530   : > { %9036 = verf.f32 %v4160_v9  ;;  %v4593_v24 = vmul.f32 %v4443_v22, %v3993_v53  ;;  %v4166_v59 = vmul.f32 0.70710677, %v12400_v43  ;;  %v3999_v2 = vmul.f32 0.5, %v12362_v36 }
 0x531   : > { %9038 = verf.f32 %v4161_v57  ;;  %v4167_v54 = vmul.f32 0.70710677, %v12403_v25  ;;  %v12409_v60 = vpack.c.bf16 %v4592_v52, %v4586_v5  ;;  %v4005_v45 = vmul.f32 0.5, %v12375_v38 }
 0x532   : > { %v9027_v4 = vpop.eup %9026  ;;  %9040 = verf.f32 %v4166_v59  ;;  %v12411_v20 = vpack.c.bf16 %v4593_v24, %v4587_v33  ;;  %v4093_v5 = vmul.f32 0.5, %v12319_v56  ;;  %v4011_v56 = vmul.f32 0.5, %v12391_v39 }
 0x533   : > { %6509 = vmatmul.mubr.bf16.gmra.mrb[180].mxu0 %v12163_v48  ;;  %v9029_v7 = vpop.eup %9028  ;;  %v3879_v44 = vpop.f32.mrb[76].mxu0  ;;  %v4448_v16 = vadd.f32 1.0, %v9027_v4  ;;  %9042 = verf.f32 %v4167_v54  ;;  %v4543_v48 = vadd.f32 1.0, %v9025_v8  ;;  %v4010_v54 = vmul.f32 0.5, %v12386_v1 }
 0x534   : > { %6516 = vmatprep.mubr.bf16.mxu0 %v12167_v61  ;;  %v12414_v46 = vadd.f32 %v3879_v44, %v12233_v3  ;;  %v3881_v58 = vpop.f32.mrb[77].mxu0  ;;  %v9031_v32 = vpop.eup %9030  ;;  %v4449_v61 = vadd.f32 1.0, %v9029_v7 }
 0x535   : > { %6093 = vmatmul.mubr.bf16.gmra.mrb[88].mxu1 %v12188_v49  ;;  %v12419_v37 = vadd.f32 %v3881_v58, %v12236_v42  ;;  %v3883_v34 = vpop.f32.mrb[78].mxu0  ;;  %v9033_v35 = vpop.eup %9032  ;;  %v4454_v29 = vadd.f32 1.0, %v9031_v32  ;;  %v4598_v13 = vmul.f32 %v4448_v16, %v3998_v31  ;;  %v4016_v58 = vmul.f32 0.5, %v12400_v43 }
 0x536   : > { %6102 = vmatprep.mubr.bf16.mxu1 %v12193_v27  ;;  %v4172_v41 = vmul.f32 0.70710677, %v12414_v46  ;;  %v3885_v10 = vpop.f32.mrb[79].mxu0  ;;  %v9035_v0 = vpop.eup %9034  ;;  %v4455_v28 = vadd.f32 1.0, %v9033_v35  ;;  %v12428_v21 = vadd.f32 %v3883_v34, %v12233_v3  ;;  %v4599_v51 = vmul.f32 %v4449_v61, %v3999_v2 }
 0x537   : > { %v4173_v19 = vmul.f32 0.70710677, %v12419_v37  ;;  %v4604_v9 = vmul.f32 %v4454_v29, %v4004_v50  ;;  %v12431_v36 = vadd.f32 %v3885_v10, %v12236_v42  ;;  %v4542_v33 = vadd.f32 1.0, %v9035_v0 }
 0x538   : > { %9044 = verf.f32 %v4172_v41  ;;  %v4605_v30 = vmul.f32 %v4455_v28, %v4005_v45  ;;  %v4178_v8 = vmul.f32 0.70710677, %v12428_v21 }
 0x539   : > { %9046 = verf.f32 %v4173_v19  ;;  %v4179_v53 = vmul.f32 0.70710677, %v12431_v36  ;;  %v12437_v22 = vpack.c.bf16 %v4604_v9, %v4598_v13  ;;  %v4092_v13 = vmul.f32 0.5, %v12314_v6 }
 0x53a   : > { %v9037_v38 = vpop.eup %9036  ;;  %9048 = verf.f32 %v4178_v8  ;;  %v12440_v52 = vpack.c.bf16 %v4605_v30, %v4599_v51 }
 0x53b   : > { %6517 = vmatmul.mubr.bf16.gmra.mrb[184].mxu0 %v12171_v15  ;;  %v9039_v57 = vpop.eup %9038  ;;  %v4460_v24 = vadd.f32 1.0, %v9037_v38  ;;  %9050 = verf.f32 %v4179_v53  ;;  %v3889_v59 = vpop.f32.mrb[80].mxu0  ;;  %v4693_v15 = vmul.f32 %v4543_v48, %v4093_v5  ;;  %v4017_v48 = vmul.f32 0.5, %v12403_v25 }
 0x53c   : > { %6524 = vmatprep.mubr.bf16.mxu0 %v12175_v12  ;;  %v9041_v4 = vpop.eup %9040  ;;  %v4461_v7 = vadd.f32 1.0, %v9039_v57  ;;  %v12445_v12 = vadd.f32 %v3889_v59, %v12233_v3  ;;  %v3891_v44 = vpop.f32.mrb[81].mxu0  ;;  %v4692_v38 = vmul.f32 %v4542_v33, %v4092_v13  ;;  %v4022_v53 = vmul.f32 0.5, %v12414_v46 }
 0x53d   : > { %6103 = vmatmul.mubr.bf16.gmra.mrb[92].mxu1 %v12196_v23  ;;  %v9043_v16 = vpop.eup %9042  ;;  %v4466_v32 = vadd.f32 1.0, %v9041_v4  ;;  %v12451_v31 = vadd.f32 %v3891_v44, %v12236_v42  ;;  %v3893_v61 = vpop.f32.mrb[82].mxu0  ;;  %v4610_v50 = vmul.f32 %v4460_v24, %v4010_v54  ;;  %v12471_v51 = vpack.c.bf16 %v4693_v15, %v4693_v15 }
 0x53e   : > { %6112 = vmatprep.mubr.bf16.mxu1 %v12198_v14  ;;  %v4467_v1 = vadd.f32 1.0, %v9043_v16  ;;  %v4184_v34 = vmul.f32 0.70710677, %v12445_v12  ;;  %v12456_v35 = vadd.f32 %v3893_v61, %v12233_v3  ;;  %v3895_v2 = vpop.f32.mrb[83].mxu0  ;;  %v4611_v41 = vmul.f32 %v4461_v7, %v4011_v56 }
 0x53f   : > { %v4616_v29 = vmul.f32 %v4466_v32, %v4016_v58  ;;  %v4185_v39 = vmul.f32 0.70710677, %v12451_v31  ;;  %v12460_v43 = vadd.f32 %v3895_v2, %v12236_v42  ;;  %v4023_v24 = vmul.f32 0.5, %v12419_v37 }
 0x540   : > { %v4617_v10 = vmul.f32 %v4467_v1, %v4017_v48  ;;  %9052 = verf.f32 %v4184_v34  ;;  %v4190_v0 = vmul.f32 0.70710677, %v12456_v35  ;;  %v4028_v59 = vmul.f32 0.5, %v12428_v21 }
 0x541   : > { %9054 = verf.f32 %v4185_v39  ;;  %v4191_v45 = vmul.f32 0.70710677, %v12460_v43  ;;  %v12466_v28 = vpack.c.bf16 %v4616_v29, %v4610_v50  ;;  %v4029_v33 = vmul.f32 0.5, %v12431_v36 }
 0x542   : > { %v9045_v25 = vpop.eup %9044  ;;  %9056 = verf.f32 %v4190_v0  ;;  %v12469_v9 = vpack.c.bf16 %v4617_v10, %v4611_v41  ;;  %v12499_v2 = vpack.c.bf16 %v4692_v38, %v4692_v38  ;;  %v4041_v38 = vmul.f32 0.5, %v12460_v43 }
 0x543   : > { %6525 = vmatmul.mubr.bf16.gmra.mrb[188].mxu0 %v12179_v11  ;;  %v9047_v19 = vpop.eup %9046  ;;  %v4472_v30 = vadd.f32 1.0, %v9045_v25  ;;  %9058 = verf.f32 %v4191_v45  ;;  %v3899_v8 = vpop.f32.mrb[84].mxu0  ;;  %v4034_v45 = vmul.f32 0.5, %v12445_v12 }
 0x544   : > { %6532 = vmatprep.mubr.bf16.mxu0 %v12184_v63  ;;  %v9049_v11 = vpop.eup %9048  ;;  %v4473_v63 = vadd.f32 1.0, %v9047_v19  ;;  %v12476_v57 = vadd.f32 %v3899_v8, %v12233_v3  ;;  %v3901_v5 = vpop.f32.mrb[85].mxu0  ;;  %v4040_v19 = vmul.f32 0.5, %v12456_v35 }
 0x545   : > { %6113 = vmatmul.mubr.bf16.gmra.mrb[96].mxu1 %v12200_v55  ;;  %v9051_v6 = vpop.eup %9050  ;;  %v4478_v4 = vadd.f32 1.0, %v9049_v11  ;;  %v12482_v15 = vadd.f32 %v3901_v5, %v12236_v42  ;;  %v3903_v54 = vpop.f32.mrb[86].mxu0  ;;  %v4622_v56 = vmul.f32 %v4472_v30, %v4022_v53  ;;  %v4035_v11 = vmul.f32 0.5, %v12451_v31  ;;  %v8781_v31 = vld [vmem:[%s9815_s20 + $0x308] ss:$12 sps:$4 sm:$0xff]  }
 0x546   : > { %6122 = vmatprep.mubr.bf16.mxu1 %v12471_v51  ;;  %v4479_v46 = vadd.f32 1.0, %v9051_v6  ;;  %v4196_v7 = vmul.f32 0.70710677, %v12476_v57  ;;  %v12487_v44 = vadd.f32 %v3903_v54, %v12233_v3  ;;  %v3905_v16 = vpop.f32.mrb[87].mxu0  ;;  %v4623_v32 = vmul.f32 %v4473_v63, %v4023_v24 }
 0x547   : > { %v4628_v58 = vmul.f32 %v4478_v4, %v4028_v59  ;;  %v4197_v37 = vmul.f32 0.70710677, %v12482_v15  ;;  %v12491_v21 = vadd.f32 %v3905_v16, %v12236_v42 }
 0x548   : > { %v4629_v61 = vmul.f32 %v4479_v46, %v4029_v33  ;;  %9060 = verf.f32 %v4196_v7  ;;  %v4202_v48 = vmul.f32 0.70710677, %v12487_v44  ;;  %v8782_v7 = vld [vmem:[%s9815_s20 + $0x3e0] ss:$12 sps:$4 sm:$0xff]  }
 0x549   : > { %9062 = verf.f32 %v4197_v37  ;;  %v4203_v36 = vmul.f32 0.70710677, %v12491_v21  ;;  %v12497_v1 = vpack.c.bf16 %v4628_v58, %v4622_v56 }
 0x54a   : > { %v9053_v34 = vpop.eup %9052  ;;  %9064 = verf.f32 %v4202_v48  ;;  %v12501_v50 = vpack.c.bf16 %v4629_v61, %v4623_v32  ;;  %v8783_v61 = vld [vmem:[%s9815_s20 + $0x320] ss:$12 sps:$4 sm:$0xff]  }
 0x54b   : > { %6533 = vmatmul.mubr.bf16.gmra.mrb[192].mxu0 %v12188_v49  ;;  %v9055_v29 = vpop.eup %9054  ;;  %v4484_v39 = vadd.f32 1.0, %v9053_v34  ;;  %9066 = verf.f32 %v4203_v36 }
 0x54c   : > { %6540 = vmatprep.mubr.bf16.mxu0 %v12193_v27  ;;  %v3909_v41 = vpop.f32.mrb[88].mxu0  ;;  %v9057_v10 = vpop.eup %9056  ;;  %v4485_v49 = vadd.f32 1.0, %v9055_v29  ;;  %v8784_v29 = vld [vmem:[%s9815_s20 + $0x3f8] ss:$12 sps:$4 sm:$0xff]  }
 0x54d   : > { %6123 = vmatmul.mubr.bf16.gmra.mrb[104].mxu1 %v12499_v2  ;;  %v12505_v0 = vadd.f32 %v3909_v41, %v12233_v3  ;;  %v3911_v27 = vpop.f32.mrb[89].mxu0  ;;  %v9059_v25 = vpop.eup %9058  ;;  %v4490_v13 = vadd.f32 1.0, %v9057_v10  ;;  %v4634_v6 = vmul.f32 %v4484_v39, %v4034_v45  ;;  %v4046_v39 = vmul.f32 0.5, %v12476_v57 }
 0x54e   : > { %6163 = vmatprep.mubr.bf16.mxu1 %v12310_v26  ;;  %v12511_v30 = vadd.f32 %v3911_v27, %v12236_v42  ;;  %v3913_v8 = vpop.f32.mrb[90].mxu0  ;;  %v4491_v53 = vadd.f32 1.0, %v9059_v25  ;;  %v4635_v59 = vmul.f32 %v4485_v49, %v4035_v11  ;;  %v4052_v41 = vmul.f32 0.5, %v12487_v44 }
 0x54f   : > { %v4208_v63 = vmul.f32 0.70710677, %v12505_v0  ;;  %v3915_v5 = vpop.f32.mrb[91].mxu0  ;;  %v4640_v24 = vmul.f32 %v4490_v13, %v4040_v19  ;;  %v12518_v35 = vadd.f32 %v3913_v8, %v12233_v3  ;;  %v4047_v25 = vmul.f32 0.5, %v12482_v15  ;;  %v8785_v15 = vld [vmem:[%s9815_s20 + $0x338] ss:$12 sps:$4 sm:$0xff]  }
 0x550   : > { %v4209_v12 = vmul.f32 0.70710677, %v12511_v30  ;;  %v4641_v4 = vmul.f32 %v4491_v53, %v4041_v38  ;;  %v12521_v54 = vadd.f32 %v3915_v5, %v12236_v42  ;;  %v4053_v45 = vmul.f32 0.5, %v12491_v21 }
 0x551   : > { %9068 = verf.f32 %v4208_v63  ;;  %v4214_v43 = vmul.f32 0.70710677, %v12518_v35  ;;  %v12527_v33 = vpack.c.bf16 %v4640_v24, %v4634_v6 }
 0x552   : > { %9070 = verf.f32 %v4209_v12  ;;  %v9061_v46 = vpop.eup %9060  ;;  %v4215_v16 = vmul.f32 0.70710677, %v12521_v54  ;;  %v12531_v56 = vpack.c.bf16 %v4641_v4, %v4635_v59  ;;  %v8786_v12 = vld [vmem:[%s9815_s20 + $0x410] ss:$12 sps:$4 sm:$0xff]  }
 0x553   : > { %6541 = vmatmul.mubr.bf16.gmra.mrb[196].mxu0 %v12196_v23  ;;  %v9063_v58 = vpop.eup %9062  ;;  %v4496_v37 = vadd.f32 1.0, %v9061_v46  ;;  %9072 = verf.f32 %v4214_v43  ;;  %v8787_v43 = vld [vmem:[%s9815_s20 + $0x350] ss:$12 sps:$4 sm:$0xff]  }
 0x554   : > { %6548 = vmatprep.mubr.bf16.mxu0 %v12198_v14  ;;  %v3919_v23 = vpop.f32.mrb[92].mxu0  ;;  %v9065_v32 = vpop.eup %9064  ;;  %v4497_v48 = vadd.f32 1.0, %v9063_v58  ;;  %9074 = verf.f32 %v4215_v16  ;;  %v4058_v58 = vmul.f32 0.5, %v12505_v0 }
 0x555   : > { %6164 = vmatmul.mubr.bf16.vlgmr.msra.gmra.mrb[52].mxu1 %v12303_v47  ;;  %v12536_v14 = vadd.f32 %v3919_v23, %v12233_v3  ;;  %v3921_v36 = vpop.f32.mrb[93].mxu0  ;;  %v9067_v34 = vpop.eup %9066  ;;  %v4502_v10 = vadd.f32 1.0, %v9065_v32  ;;  %v4646_v11 = vmul.f32 %v4496_v37, %v4046_v39  ;;  %v8788_v23 = vld [vmem:[%s9815_s20 + $0x428] ss:$12 sps:$4 sm:$0xff]  }
 0x556   : > { %7654 = vmatpush3.bf16.msra.mxu1 %v8781_v31  ;;  %6173 = vmatprep.mubr.bf16.mxu1 %v12351_v17  ;;  %v12543_v49 = vadd.f32 %v3921_v36, %v12236_v42  ;;  %v3923_v27 = vpop.f32.mrb[94].mxu0  ;;  %v4503_v19 = vadd.f32 1.0, %v9067_v34  ;;  %v4647_v53 = vmul.f32 %v4497_v48, %v4047_v25  ;;  %v4059_v36 = vmul.f32 0.5, %v12511_v30 }
 0x557   : > { %7655 = vmatprep.subr.bf16.mxu1 %v8782_v7  ;;  %v4220_v13 = vmul.f32 0.70710677, %v12536_v14  ;;  %v3925_v8 = vpop.f32.mrb[95].mxu0  ;;  %v4652_v38 = vmul.f32 %v4502_v10, %v4052_v41  ;;  %v12550_v44 = vadd.f32 %v3923_v27, %v12233_v3  ;;  %v4064_v34 = vmul.f32 0.5, %v12518_v35 }
 0x558   : > { %v4221_v57 = vmul.f32 0.70710677, %v12543_v49  ;;  %v4653_v63 = vmul.f32 %v4503_v19, %v4053_v45  ;;  %v12553_v5 = vadd.f32 %v3925_v8, %v12236_v42  ;;  %v4065_v10 = vmul.f32 0.5, %v12521_v54  ;;  %v8789_v8 = vld [vmem:[%s9815_s20 + $0x368] ss:$12 sps:$4 sm:$0xff]  }
 0x559   : > { %9076 = verf.f32 %v4220_v13  ;;  %v4226_v21 = vmul.f32 0.70710677, %v12550_v44  ;;  %v12559_v6 = vpack.c.bf16 %v4652_v38, %v4646_v11 }
 0x55a   : > { %7656 = vmatpush3.bf16.msra.mxu1 %v8783_v61  ;;  %9078 = verf.f32 %v4221_v57  ;;  %v4227_v59 = vmul.f32 0.70710677, %v12553_v5  ;;  %v12563_v4 = vpack.c.bf16 %v4653_v63, %v4647_v53  ;;  %v8790_v57 = vld [vmem:[%s9815_s20 + $0x440] ss:$12 sps:$4 sm:$0xff]  }
 0x55b   : > { %6549 = vmatmul.mubr.bf16.gmra.mrb[200].mxu0 %v12200_v55  ;;  %v9069_v24 = vpop.eup %9068  ;;  %7657 = vmatprep.subr.bf16.mxu1 %v8784_v29  ;;  %9080 = verf.f32 %v4226_v21 }
 0x55c   : > { %6556 = vmatprep.mubr.bf16.mxu0 %v12471_v51  ;;  %v9071_v31 = vpop.eup %9070  ;;  %v4508_v46 = vadd.f32 1.0, %v9069_v24  ;;  %9082 = verf.f32 %v4227_v59 }
 0x55d   : > { %v3929_v55 = vpop.f32.mrb[96].mxu0  ;;  %6174 = vmatmul.mubr.bf16.gmra.mrb[56].mxu1 %v12346_v62  ;;  %v9073_v16 = vpop.eup %9072  ;;  %v4509_v37 = vadd.f32 1.0, %v9071_v31  ;;  %v8791_v31 = vld [vmem:[%s9815_s20 + $0x380] ss:$12 sps:$4 sm:$0xff]  }
 0x55e   : > { %v12568_v51 = vadd.f32 %v3929_v55, %v12233_v3  ;;  %v3931_v7 = vpop.f32.mrb[97].mxu0  ;;  %6183 = vmatprep.mubr.bf16.mxu1 %v12383_v18  ;;  %7658 = vmatpush3.bf16.msra.mxu1 %v8785_v15  ;;  %v9075_v48 = vpop.eup %9074  ;;  %v4514_v29 = vadd.f32 1.0, %v9073_v16  ;;  %v4658_v45 = vmul.f32 %v4508_v46, %v4058_v58  ;;  %v4070_v46 = vmul.f32 0.5, %v12536_v14 }
 0x55f   : > { %v12574_v32 = vadd.f32 %v3931_v7, %v12236_v42  ;;  %v3933_v61 = vpop.f32.mrb[98].mxu0  ;;  %7659 = vmatprep.subr.bf16.mxu1 %v8786_v12  ;;  %v4515_v0 = vadd.f32 1.0, %v9075_v48  ;;  %v4659_v35 = vmul.f32 %v4509_v37, %v4059_v36  ;;  %v4076_v7 = vmul.f32 0.5, %v12550_v44  ;;  %v8792_v37 = vld [vmem:[%s9815_s20 + $0x458] ss:$12 sps:$4 sm:$0xff]  }
 0x560   : > { %v4232_v39 = vmul.f32 0.70710677, %v12568_v51  ;;  %v3935_v41 = vpop.f32.mrb[99].mxu0  ;;  %v12582_v25 = vadd.f32 %v3933_v61, %v12233_v3  ;;  %v4664_v19 = vmul.f32 %v4514_v29, %v4064_v34  ;;  %v4077_v61 = vmul.f32 0.5, %v12553_v5  ;;  %v8794_v44 = vld [vmem:[%s9815_s20 + $0x470] ss:$12 sps:$4 sm:$0xff]  }
 0x561   : > { %v4233_v27 = vmul.f32 0.70710677, %v12574_v32  ;;  %v12585_v30 = vadd.f32 %v3935_v41, %v12236_v42  ;;  %v4665_v13 = vmul.f32 %v4515_v0, %v4065_v10  ;;  %v8793_v41 = vld [vmem:[%s9815_s20 + $0x398] ss:$12 sps:$4 sm:$0xff]  }
 0x562   : > { %9084 = verf.f32 %v4232_v39  ;;  %7660 = vmatpush3.bf16.msra.mxu1 %v8787_v43  ;;  %v4238_v54 = vmul.f32 0.70710677, %v12582_v25  ;;  %v12592_v53 = vpack.c.bf16 %v4664_v19, %v4658_v45 }
 0x563   : > { %6557 = vmatmul.mubr.bf16.gmra.mrb[204].mxu0 %v12499_v2  ;;  %9086 = verf.f32 %v4233_v27  ;;  %v9077_v11 = vpop.eup %9076  ;;  %7661 = vmatprep.subr.bf16.mxu1 %v8788_v23  ;;  %v4239_v38 = vmul.f32 0.70710677, %v12585_v30  ;;  %v12596_v2 = vpack.c.bf16 %v4665_v13, %v4659_v35  ;;  %v4071_v23 = vmul.f32 0.5, %v12543_v49 }
 0x564   : > { %v9079_v63 = vpop.eup %9078  ;;  %9088 = verf.f32 %v4238_v54  ;;  %v4520_v21 = vadd.f32 1.0, %v9077_v11  ;;  %v8795_v54 = vld [vmem:[%s9815_s20 + $0x3b0] ss:$12 sps:$4 sm:$0xff]  }
 0x565   : > { %v12594_v15 = vpop.f32.mrb[100].mxu0  ;;  %6184 = vmatmul.mubr.bf16.gmra.mrb[60].mxu1 %v12381_v40  ;;  %9090 = verf.f32 %v4239_v38  ;;  %v9081_v12 = vpop.eup %9080  ;;  %v4521_v59 = vadd.f32 1.0, %v9079_v63  ;;  %v4082_v38 = vmul.f32 0.5, %v12568_v51 }
 0x566   : > { %v12599_v24 = vpop.f32.mrb[101].mxu0  ;;  %6193 = vmatprep.mubr.bf16.mxu1 %v12411_v20  ;;  %7662 = vmatpush3.bf16.msra.mxu1 %v8789_v8  ;;  %v9083_v43 = vpop.eup %9082  ;;  %v4526_v16 = vadd.f32 1.0, %v9081_v12  ;;  %v4670_v36 = vmul.f32 %v4520_v21, %v4070_v46  ;;  %v4083_v12 = vmul.f32 0.5, %v12574_v32 }
 0x567   : > { %v3943_v55 = vpop.f32.mrb[102].mxu0  ;;  %7663 = vmatprep.subr.bf16.mxu1 %v8790_v57  ;;  %v4527_v48 = vadd.f32 1.0, %v9083_v43  ;;  %v4671_v29 = vmul.f32 %v4521_v59, %v4071_v23  ;;  %v4088_v57 = vmul.f32 0.5, %v12582_v25  ;;  %v4089_v59 = vmul.f32 0.5, %v12585_v30 }
 0x568   : > { %v3944_v58 = vpop.f32.mrb[103].mxu0  ;;  %v4676_v34 = vmul.f32 %v4526_v16, %v4076_v7 }
 0x569   : > { %v4677_v39 = vmul.f32 %v4527_v48, %v4077_v61 }
 0x56a   : > { %7664 = vmatpush3.bf16.msra.mxu1 %v8791_v31  ;;  %v12609_v14 = vpack.c.bf16 %v4676_v34, %v4670_v36 }
 0x56b   : > { %7665 = vmatprep.subr.bf16.mxu1 %v8792_v37  ;;  %v12612_v45 = vpack.c.bf16 %v4677_v39, %v4671_v29 }
 0x56c   : > { %v9085_v10 = vpop.eup %9084 }
 0x56d   : > { %v9087_v0 = vpop.eup %9086  ;;  %6194 = vmatmul.mubr.bf16.gmra.mrb[64].mxu1 %v12409_v60  ;;  %v4532_v49 = vadd.f32 1.0, %v9085_v10 }
 0x56e   : > { %v7481_v27 = vpop.f32.mrb[104].mxu0  ;;  %v9089_v19 = vpop.eup %9088  ;;  %6203 = vmatprep.mubr.bf16.mxu1 %v12440_v52  ;;  %v4533_v35 = vadd.f32 1.0, %v9087_v0  ;;  %7666 = vmatpush3.bf16.msra.mxu1 %v8793_v41 }
 0x56f   : > { %v7482_v5 = vpop.f32.mrb[105].mxu0  ;;  %v9091_v11 = vpop.eup %9090  ;;  %v4538_v63 = vadd.f32 1.0, %v9089_v19  ;;  %7667 = vmatprep.subr.bf16.mxu1 %v8794_v44  ;;  %v4682_v43 = vmul.f32 %v4532_v49, %v4082_v38 }
 0x570   : > { %v12616_v13 = vadd.f32 %v7482_v5, %v7481_v27  ;;  %v7484_v8 = vpop.f32.mrb[106].mxu0  ;;  %v4539_v31 = vadd.f32 1.0, %v9091_v11  ;;  %v4683_v7 = vmul.f32 %v4533_v35, %v4083_v12  ;;  %v7896_v35 = vadd.f32 %v12599_v24, %v12236_v42 }
 0x571   : > { %v7485_v21 = vpop.f32.mrb[107].mxu0  ;;  %v4688_v46 = vmul.f32 %v4538_v63, %v4088_v57 }
 0x572   : > { %v12623_v55 = vadd.f32 %v7485_v21, %v7484_v8  ;;  %v4689_v16 = vmul.f32 %v4539_v31, %v4089_v59  ;;  %7668 = vmatpush3.bf16.msra.mxu1 %v8795_v54  ;;  %v4245_v63 = vmul.f32 0.70710677, %v7896_v35  ;;  %v7895_v59 = vadd.f32 %v12594_v15, %v12233_v3 }
 0x573   : > { %v12625_v58 = vpack.c.bf16 %v4688_v46, %v4682_v43 }
 0x574   : > { %v12627_v37 = vpack.c.bf16 %v4689_v16, %v4683_v7  ;;  %9092 = verf.f32 %v4245_v63  ;;  %v4244_v46 = vmul.f32 0.70710677, %v7895_v59  ;;  %v4094_v63 = vmul.f32 0.5, %v7895_v59 }
 0x575   : > { %6204 = vmatmul.mubr.bf16.gmra.mrb[68].mxu1 %v12437_v22 }
 0x576   : > { %v7487_v51 = vpop.f32.mrb[108].mxu0  ;;  %6213 = vmatprep.mubr.bf16.mxu1 %v12469_v9  ;;  %9094 = verf.f32 %v4244_v46 }
 0x577   : > { %v7488_v25 = vpop.f32.mrb[109].mxu0 }
 0x578   : > { %v12631_v32 = vadd.f32 %v7488_v25, %v7487_v51  ;;  %v7490_v30 = vpop.f32.mrb[110].mxu0 }
 0x579   : > { %v7491_v23 = vpop.f32.mrb[111].mxu0 }
 0x57a   : > { %v12633_v61 = vadd.f32 %v7491_v23, %v7490_v30 }
 0x57d   : > { %6214 = vmatmul.mubr.bf16.gmra.mrb[72].mxu1 %v12466_v28 }
 0x57e   : > { %v7493_v48 = vpop.f32.mrb[112].mxu0  ;;  %6223 = vmatprep.mubr.bf16.mxu1 %v12501_v50  ;;  %v9093_v3 = vpop.eup %9092 }
 0x57f   : > { %v7494_v36 = vpop.f32.mrb[113].mxu0  ;;  %v4545_v23 = vadd.f32 1.0, %v9093_v3 }
 0x580   : > { %v12637_v34 = vadd.f32 %v7494_v36, %v7493_v48  ;;  %v7496_v29 = vpop.f32.mrb[114].mxu0  ;;  %v4095_v48 = vmul.f32 0.5, %v7896_v35 }
 0x581   : > { %v7497_v39 = vpop.f32.mrb[115].mxu0 }
 0x582   : > { %v12639_v41 = vadd.f32 %v7497_v39, %v7496_v29  ;;  %v4695_v39 = vmul.f32 %v4545_v23, %v4095_v48 }
 0x585   : > { %6224 = vmatmul.mubr.bf16.gmra.mrb[76].mxu1 %v12497_v1 }
 0x586   : > { %v7499_v10 = vpop.f32.mrb[116].mxu0  ;;  %6233 = vmatprep.mubr.bf16.mxu1 %v12531_v56 }
 0x587   : > { %v7500_v44 = vpop.f32.mrb[117].mxu0 }
 0x588   : > { %v12643_v0 = vadd.f32 %v7500_v44, %v7499_v10  ;;  %v7502_v27 = vpop.f32.mrb[118].mxu0 }
 0x589   : > { %v7503_v49 = vpop.f32.mrb[119].mxu0 }
 0x58a   : > { %v12645_v5 = vadd.f32 %v7503_v49, %v7502_v27  ;;  %v9095_v49 = vpop.eup %9094 }
 0x58d   : > { %6234 = vmatmul.mubr.bf16.gmra.mrb[80].mxu1 %v12527_v33 }
 0x58e   : > { %v7505_v19 = vpop.f32.mrb[120].mxu0  ;;  %6243 = vmatprep.mubr.bf16.mxu1 %v12563_v4 }
 0x58f   : > { %v7506_v8 = vpop.f32.mrb[121].mxu0 }
 0x590   : > { %v12651_v54 = vadd.f32 %v7506_v8, %v7505_v19  ;;  %v7508_v11 = vpop.f32.mrb[122].mxu0  ;;  %v12675_v8 = vpack.c.bf16 %v4695_v39, %v4695_v39 }
 0x591   : > { %v7509_v38 = vpop.f32.mrb[123].mxu0 }
 0x592   : > { %v12653_v57 = vadd.f32 %v7509_v38, %v7508_v11  ;;  %v4544_v11 = vadd.f32 1.0, %v9095_v49 }
 0x595   : > { %6244 = vmatmul.mubr.bf16.gmra.mrb[84].mxu1 %v12559_v6 }
 0x596   : > { %v7511_v21 = vpop.f32.mrb[124].mxu0  ;;  %6253 = vmatprep.mubr.bf16.mxu1 %v12596_v2 }
 0x597   : > { %v7512_v12 = vpop.f32.mrb[125].mxu0 }
 0x598   : > { %v12659_v42 = vadd.f32 %v7512_v12, %v7511_v21  ;;  %v7514_v24 = vpop.f32.mrb[126].mxu0 }
 0x599   : > { %v7515_v31 = vpop.f32.mrb[127].mxu0 }
 0x59a   : > { %v12661_v43 = vadd.f32 %v7515_v31, %v7514_v24  ;;  %v4694_v24 = vmul.f32 %v4544_v11, %v4094_v63 }
 0x59d   : > { %6254 = vmatmul.mubr.bf16.gmra.mrb[88].mxu1 %v12592_v53 }
 0x59e   : > { %v7517_v7 = vpop.f32.mrb[128].mxu0  ;;  %6263 = vmatprep.mubr.bf16.mxu1 %v12612_v45 }
 0x59f   : > { %v7518_v16 = vpop.f32.mrb[129].mxu0 }
 0x5a0   : > { %v12665_v51 = vadd.f32 %v7518_v16, %v7517_v7  ;;  %v7520_v25 = vpop.f32.mrb[130].mxu0  ;;  %v12683_v7 = vpack.c.bf16 %v4694_v24, %v4694_v24 }
 0x5a1   : > { %v7521_v15 = vpop.f32.mrb[131].mxu0 }
 0x5a2   : > { %v12667_v30 = vadd.f32 %v7521_v15, %v7520_v25 }
 0x5a5   : > { %6264 = vmatmul.mubr.bf16.gmra.mrb[92].mxu1 %v12609_v14 }
 0x5a6   : > { %v7523_v36 = vpop.f32.mrb[132].mxu0  ;;  %6273 = vmatprep.mubr.bf16.mxu1 %v12627_v37 }
 0x5a7   : > { %v7524_v29 = vpop.f32.mrb[133].mxu0 }
 0x5a8   : > { %v12671_v10 = vadd.f32 %v7524_v29, %v7523_v36  ;;  %v7526_v44 = vpop.f32.mrb[134].mxu0 }
 0x5a9   : > { %v7527_v27 = vpop.f32.mrb[135].mxu0 }
 0x5aa   : > { %v12673_v19 = vadd.f32 %v7527_v27, %v7526_v44 }
 0x5ad   : > { %6274 = vmatmul.mubr.bf16.gmra.mrb[96].mxu1 %v12625_v58 }
 0x5ae   : > { %v7529_v38 = vpop.f32.mrb[136].mxu0  ;;  %6283 = vmatprep.mubr.bf16.mxu1 %v12675_v8 }
 0x5af   : > { %v7530_v35 = vpop.f32.mrb[137].mxu0 }
 0x5b0   : > { %v12679_v21 = vadd.f32 %v7530_v35, %v7529_v38  ;;  %v7532_v12 = vpop.f32.mrb[138].mxu0 }
 0x5b1   : > { %v7533_v31 = vpop.f32.mrb[139].mxu0 }
 0x5b2   : > { %v12681_v46 = vadd.f32 %v7533_v31, %v7532_v12 }
 0x5b5   : > { %6284 = vmatmul.mubr.bf16.gmra.mrb[108].mxu1 %v12683_v7 }
 0x5b6   : > { %v7535_v16 = vpop.f32.mrb[140].mxu0  ;;  %6596 = vmatprep.mubr.bf16.mxu1 %v12310_v26 }
 0x5b7   : > { %v7536_v25 = vpop.f32.mrb[141].mxu0 }
 0x5b8   : > { %v12687_v59 = vadd.f32 %v7536_v25, %v7535_v16  ;;  %v7538_v3 = vpop.f32.mrb[142].mxu0  ;;  %v12689_v23 = vpop.f32.mrb[100].mxu1 }
 0x5b9   : > { %v7539_v15 = vpop.f32.mrb[143].mxu0  ;;  %v12693_v36 = vpop.f32.mrb[101].mxu1 }
 0x5ba   : > { %v12691_v48 = vadd.f32 %v7539_v15, %v7538_v3  ;;  %v5967_v29 = vpop.f32.mrb[102].mxu1 }
 0x5bb   : > { %v5968_v39 = vpop.f32.mrb[103].mxu1 }
 0x5bd   : > { %6597 = vmatmul.mubr.bf16.vlgmr.msra.gmra.mrb[112].mxu1 %v12303_v47 }
 0x5be   : > { %v7541_v44 = vpop.f32.mrb[144].mxu0  ;;  %6604 = vmatprep.mubr.bf16.mxu1 %v12351_v17 }
 0x5bf   : > { %v7542_v27 = vpop.f32.mrb[145].mxu0 }
 0x5c0   : > { %v12697_v49 = vadd.f32 %v7542_v27, %v7541_v44  ;;  %v7544_v26 = vpop.f32.mrb[146].mxu0 }
 0x5c1   : > { %v7545_v11 = vpop.f32.mrb[147].mxu0 }
 0x5c2   : > { %v12699_v38 = vadd.f32 %v7545_v11, %v7544_v26 }
 0x5c5   : > { %6605 = vmatmul.mubr.bf16.gmra.mrb[116].mxu1 %v12346_v62 }
 0x5c6   : > { %v7547_v63 = vpop.f32.mrb[148].mxu0  ;;  %6612 = vmatprep.mubr.bf16.mxu1 %v12383_v18 }
 0x5c7   : > { %v7548_v35 = vpop.f32.mrb[149].mxu0 }
 0x5c8   : > { %v12703_v12 = vadd.f32 %v7548_v35, %v7547_v63  ;;  %v7550_v24 = vpop.f32.mrb[150].mxu0 }
 0x5c9   : > { %v7551_v31 = vpop.f32.mrb[151].mxu0 }
 0x5ca   : > { %v12705_v47 = vadd.f32 %v7551_v31, %v7550_v24 }
 0x5cd   : > { %6613 = vmatmul.mubr.bf16.gmra.mrb[120].mxu1 %v12381_v40 }
 0x5ce   : > { %v7553_v16 = vpop.f32.mrb[152].mxu0  ;;  %6620 = vmatprep.mubr.bf16.mxu1 %v12411_v20 }
 0x5cf   : > { %v7554_v17 = vpop.f32.mrb[153].mxu0 }
 0x5d0   : > { %v12709_v25 = vadd.f32 %v7554_v17, %v7553_v16  ;;  %v7556_v3 = vpop.f32.mrb[154].mxu0 }
 0x5d1   : > { %v7557_v15 = vpop.f32.mrb[155].mxu0 }
 0x5d5   : > { %6621 = vmatmul.mubr.bf16.gmra.mrb[124].mxu1 %v12409_v60 }
 0x5d6   : > { %v7575_v62 = vpop.f32.mrb[156].mxu0  ;;  %6628 = vmatprep.mubr.bf16.mxu1 %v12440_v52 }
 0x5d7   : > { %v7576_v18 = vpop.f32.mrb[157].mxu0 }
 0x5d8   : > { %v7577_v29 = vadd.f32 %v7576_v18, %v7575_v62  ;;  %v7578_v39 = vpop.f32.mrb[158].mxu0 }
 0x5d9   : > { %v7579_v44 = vpop.f32.mrb[159].mxu0 }
 0x5da   : > { %v12714_v27 = vadd.f32 %v7577_v29, %v12616_v13  ;;  %v7580_v40 = vadd.f32 %v7579_v44, %v7578_v39 }
 0x5dc   : > { %v12717_v26 = vadd.f32 %v7580_v40, %v12623_v55 }
 0x5dd   : > { %6629 = vmatmul.mubr.bf16.gmra.mrb[128].mxu1 %v12437_v22 }
 0x5de   : > { %v7581_v20 = vpop.f32.mrb[160].mxu0  ;;  %6636 = vmatprep.mubr.bf16.mxu1 %v12469_v9 }
 0x5df   : > { %v7582_v11 = vpop.f32.mrb[161].mxu0 }
 0x5e0   : > { %v7583_v60 = vadd.f32 %v7582_v11, %v7581_v20  ;;  %v7584_v63 = vpop.f32.mrb[162].mxu0 }
 0x5e1   : > { %v7585_v35 = vpop.f32.mrb[163].mxu0 }
 0x5e2   : > { %v12722_v52 = vadd.f32 %v7583_v60, %v12631_v32  ;;  %v7586_v24 = vadd.f32 %v7585_v35, %v7584_v63 }
 0x5e4   : > { %v12725_v13 = vadd.f32 %v7586_v24, %v12633_v61 }
 0x5e5   : > { %6637 = vmatmul.mubr.bf16.gmra.mrb[132].mxu1 %v12466_v28 }
 0x5e6   : > { %v7587_v31 = vpop.f32.mrb[164].mxu0  ;;  %6644 = vmatprep.mubr.bf16.mxu1 %v12501_v50 }
 0x5e7   : > { %v7588_v55 = vpop.f32.mrb[165].mxu0 }
 0x5e8   : > { %v7589_v22 = vadd.f32 %v7588_v55, %v7587_v31  ;;  %v7590_v16 = vpop.f32.mrb[166].mxu0 }
 0x5e9   : > { %v7591_v17 = vpop.f32.mrb[167].mxu0 }
 0x5ea   : > { %v12730_v9 = vadd.f32 %v7589_v22, %v12637_v34  ;;  %v7592_v3 = vadd.f32 %v7591_v17, %v7590_v16 }
 0x5ec   : > { %v12733_v32 = vadd.f32 %v7592_v3, %v12639_v41 }
 0x5ed   : > { %6645 = vmatmul.mubr.bf16.gmra.mrb[136].mxu1 %v12497_v1 }
 0x5ee   : > { %v7593_v15 = vpop.f32.mrb[168].mxu0  ;;  %6652 = vmatprep.mubr.bf16.mxu1 %v12531_v56 }
 0x5ef   : > { %v7594_v61 = vpop.f32.mrb[169].mxu0 }
 0x5f0   : > { %v7595_v28 = vadd.f32 %v7594_v61, %v7593_v15  ;;  %v7596_v62 = vpop.f32.mrb[170].mxu0 }
 0x5f1   : > { %v7597_v18 = vpop.f32.mrb[171].mxu0 }
 0x5f2   : > { %v12738_v50 = vadd.f32 %v7595_v28, %v12643_v0  ;;  %v7598_v29 = vadd.f32 %v7597_v18, %v7596_v62 }
 0x5f4   : > { %v12741_v34 = vadd.f32 %v7598_v29, %v12645_v5 }
 0x5f5   : > { %6653 = vmatmul.mubr.bf16.gmra.mrb[140].mxu1 %v12527_v33 }
 0x5f6   : > { %v7599_v39 = vpop.f32.mrb[172].mxu0  ;;  %6660 = vmatprep.mubr.bf16.mxu1 %v12563_v4 }
 0x5f7   : > { %v7600_v41 = vpop.f32.mrb[173].mxu0 }
 0x5f8   : > { %v7601_v1 = vadd.f32 %v7600_v41, %v7599_v39  ;;  %v7602_v44 = vpop.f32.mrb[174].mxu0 }
 0x5f9   : > { %v7603_v40 = vpop.f32.mrb[175].mxu0 }
 0x5fa   : > { %v12746_v56 = vadd.f32 %v7601_v1, %v12651_v54  ;;  %v7604_v20 = vadd.f32 %v7603_v40, %v7602_v44 }
 0x5fc   : > { %v12749_v0 = vadd.f32 %v7604_v20, %v12653_v57 }
 0x5fd   : > { %6661 = vmatmul.mubr.bf16.gmra.mrb[144].mxu1 %v12559_v6 }
 0x5fe   : > { %v7605_v11 = vpop.f32.mrb[176].mxu0  ;;  %6668 = vmatprep.mubr.bf16.mxu1 %v12596_v2 }
 0x5ff   : > { %v7606_v5 = vpop.f32.mrb[177].mxu0 }
 0x600   : > { %v7607_v33 = vadd.f32 %v7606_v5, %v7605_v11  ;;  %v7608_v60 = vpop.f32.mrb[178].mxu0 }
 0x601   : > { %v7609_v63 = vpop.f32.mrb[179].mxu0 }
 0x602   : > { %v12754_v4 = vadd.f32 %v7607_v33, %v12659_v42  ;;  %v7610_v35 = vadd.f32 %v7609_v63, %v7608_v60  ;;  %v4696_v60 = vld [vmem:[#allocation15] sm:$0xff] }
 0x604   : > { %v12757_v54 = vadd.f32 %v7610_v35, %v12661_v43 }
 0x605   : > { %6669 = vmatmul.mubr.bf16.gmra.mrb[148].mxu1 %v12592_v53 }
 0x606   : > { %v7611_v24 = vpop.f32.mrb[180].mxu0  ;;  %6676 = vmatprep.mubr.bf16.mxu1 %v12612_v45 }
 0x607   : > { %v7612_v57 = vpop.f32.mrb[181].mxu0 }
 0x608   : > { %v7613_v6 = vadd.f32 %v7612_v57, %v7611_v24  ;;  %v7614_v31 = vpop.f32.mrb[182].mxu0 }
 0x609   : > { %v7615_v55 = vpop.f32.mrb[183].mxu0 }
 0x60a   : > { %v12762_v2 = vadd.f32 %v7613_v6, %v12665_v51  ;;  %v7616_v22 = vadd.f32 %v7615_v55, %v7614_v31  ;;  %v4699_v6 = vld [vmem:[#allocation15 + $0x18] sm:$0xff] }
 0x60c   : > { %v12765_v42 = vadd.f32 %v7616_v22, %v12667_v30  ;;  %v4700_v22 = vld [vmem:[#allocation15 + $0x20] sm:$0xff] }
 0x60d   : > { %6677 = vmatmul.mubr.bf16.gmra.mrb[152].mxu1 %v12609_v14 }
 0x60e   : > { %v7617_v16 = vpop.f32.mrb[184].mxu0  ;;  %6684 = vmatprep.mubr.bf16.mxu1 %v12627_v37 }
 0x60f   : > { %v7618_v43 = vpop.f32.mrb[185].mxu0 }
 0x610   : > { %v7619_v53 = vadd.f32 %v7618_v43, %v7617_v16  ;;  %v7620_v17 = vpop.f32.mrb[186].mxu0 }
 0x611   : > { %v7621_v3 = vpop.f32.mrb[187].mxu0 }
 0x612   : > { %v12770_v45 = vadd.f32 %v7619_v53, %v12671_v10  ;;  %v7622_v15 = vadd.f32 %v7621_v3, %v7620_v17 }
 0x614   : > { %v12773_v51 = vadd.f32 %v7622_v15, %v12673_v19 }
 0x615   : > { %6685 = vmatmul.mubr.bf16.gmra.mrb[156].mxu1 %v12625_v58 }
 0x616   : > { %v7623_v61 = vpop.f32.mrb[188].mxu0  ;;  %6692 = vmatprep.mubr.bf16.mxu1 %v12675_v8 }
 0x617   : > { %v7624_v30 = vpop.f32.mrb[189].mxu0 }
 0x618   : > { %v7625_v14 = vadd.f32 %v7624_v30, %v7623_v61  ;;  %v7626_v28 = vpop.f32.mrb[190].mxu0 }
 0x619   : > { %v7627_v62 = vpop.f32.mrb[191].mxu0 }
 0x61a   : > { %v12778_v37 = vadd.f32 %v7625_v14, %v12679_v21  ;;  %v7628_v18 = vadd.f32 %v7627_v62, %v7626_v28  ;;  %v4703_v28 = vld [vmem:[#allocation15 + $0x38] sm:$0xff] }
 0x61c   : > { %v12781_v10 = vadd.f32 %v7628_v18, %v12681_v46 }
 0x61d   : > { %6693 = vmatmul.mubr.bf16.gmra.mrb[160].mxu1 %v12683_v7 }
 0x61e   : > { %v7629_v29 = vpop.f32.mrb[192].mxu0 }
 0x61f   : > { %v7630_v19 = vpop.f32.mrb[193].mxu0 }
 0x620   : > { %v7631_v39 = vadd.f32 %v7630_v19, %v7629_v29  ;;  %v7632_v41 = vpop.f32.mrb[194].mxu0  ;;  %v6124_v1 = vpop.f32.mrb[104].mxu1  ;;  %v4705_v29 = vld [vmem:[#allocation15 + $0x48] sm:$0xff] }
 0x621   : > { %v7633_v58 = vpop.f32.mrb[195].mxu0  ;;  %v12788_v40 = vadd.f32 %v6124_v1, %v12689_v23  ;;  %v6126_v21 = vpop.f32.mrb[105].mxu1 }
 0x622   : > { %v12785_v8 = vadd.f32 %v7631_v39, %v12687_v59  ;;  %v7634_v44 = vadd.f32 %v7633_v58, %v7632_v41  ;;  %v12791_v20 = vadd.f32 %v6126_v21, %v12693_v36  ;;  %v6128_v46 = vpop.f32.mrb[106].mxu1  ;;  %v4697_v59 = vld [vmem:[#allocation15 + $0x8] sm:$0xff]  ;;  %v4706_v58 = vld [vmem:[#allocation15 + $0x50] sm:$0xff] }
 0x623   : > { %v6129_v7 = vpop.f32.mrb[107].mxu1 }
 0x624   : > { %v12794_v11 = vadd.f32 %v7634_v44, %v12691_v48 }
 0x626   : > { %v7635_v5 = vpop.f32.mrb[196].mxu0 }
 0x627   : > { %v7636_v33 = vpop.f32.mrb[197].mxu0 }
 0x628   : > { %v7637_v63 = vadd.f32 %v7636_v33, %v7635_v5  ;;  %v7638_v35 = vpop.f32.mrb[198].mxu0  ;;  %v6165_v57 = vpop.f32.mrb[52].mxu1 }
 0x629   : > { %v7639_v24 = vpop.f32.mrb[199].mxu0  ;;  %v6700_v36 = vadd.f32 %v6165_v57, %v4696_v60  ;;  %v6167_v55 = vpop.f32.mrb[53].mxu1 }
 0x62a   : > { %v12797_v23 = vadd.f32 %v7637_v63, %v12697_v49  ;;  %v7640_v31 = vadd.f32 %v7639_v24, %v7638_v35  ;;  %v6701_v16 = vadd.f32 %v6167_v55, %v4697_v59  ;;  %v6169_v48 = vpop.f32.mrb[54].mxu1  ;;  %v4702_v49 = vld [vmem:[#allocation15 + $0x30] sm:$0xff]  ;;  %v4709_v59 = vld [vmem:[#allocation15 + $0x68] sm:$0xff]  ;;  %v4712_v55 = vld [vmem:[#allocation15 + $0x80] sm:$0xff] }
 0x62b   : > { %6775 = vst [vmem:[#allocation15] sm:$0xff] %v6700_v36  ;;  %v6703_v53 = vadd.f32 %v6169_v48, %v4699_v6  ;;  %v6171_v17 = vpop.f32.mrb[55].mxu1  ;;  %v4711_v6 = vld [vmem:[#allocation15 + $0x78] sm:$0xff] }
 0x62c   : > { %v12800_v43 = vadd.f32 %v7640_v31, %v12699_v38  ;;  %6776 = vst [vmem:[#allocation15 + $0x8] sm:$0xff] %v6701_v16  ;;  %v6704_v3 = vadd.f32 %v6171_v17, %v4700_v22 }
 0x62d   : > { %6778 = vst [vmem:[#allocation15 + $0x18] sm:$0xff] %v6703_v53 }
 0x62e   : > { %v7641_v15 = vpop.f32.mrb[200].mxu0  ;;  %6779 = vst [vmem:[#allocation15 + $0x20] sm:$0xff] %v6704_v3  ;;  %v4714_v3 = vld [vmem:[#allocation15 + $0x90] sm:$0xff] }
 0x62f   : > { %v7642_v61 = vpop.f32.mrb[201].mxu0 }
 0x630   : > { %v7643_v30 = vadd.f32 %v7642_v61, %v7641_v15  ;;  %v7644_v14 = vpop.f32.mrb[202].mxu0  ;;  %v6175_v18 = vpop.f32.mrb[56].mxu1  ;;  %v4715_v15 = vld [vmem:[#allocation15 + $0x98] sm:$0xff] }
 0x631   : > { %v7645_v62 = vpop.f32.mrb[203].mxu0  ;;  %v6706_v39 = vadd.f32 %v6175_v18, %v4702_v49  ;;  %v6177_v41 = vpop.f32.mrb[57].mxu1  ;;  %v4717_v49 = vld [vmem:[#allocation15 + $0xa8] sm:$0xff] }
 0x632   : > { %v12803_v19 = vadd.f32 %v7643_v30, %v12703_v12  ;;  %v7646_v38 = vadd.f32 %v7645_v62, %v7644_v14  ;;  %v6707_v1 = vadd.f32 %v6177_v41, %v4703_v28  ;;  %v6179_v44 = vpop.f32.mrb[58].mxu1  ;;  %v4708_v12 = vld [vmem:[#allocation15 + $0x60] sm:$0xff]  ;;  %v4721_v41 = vld [vmem:[#allocation15 + $0xc8] sm:$0xff] }
 0x633   : > { %6781 = vst [vmem:[#allocation15 + $0x30] sm:$0xff] %v6706_v39  ;;  %v6709_v46 = vadd.f32 %v6179_v44, %v4705_v29  ;;  %v6181_v7 = vpop.f32.mrb[59].mxu1  ;;  %v4720_v39 = vld [vmem:[#allocation15 + $0xc0] sm:$0xff] }
 0x634   : > { %v12806_v21 = vadd.f32 %v7646_v38, %v12705_v47  ;;  %6782 = vst [vmem:[#allocation15 + $0x38] sm:$0xff] %v6707_v1  ;;  %v6710_v5 = vadd.f32 %v6181_v7, %v4706_v58  ;;  %v4723_v1 = vld [vmem:[#allocation15 + $0xd8] sm:$0xff]  ;;  %v4724_v7 = vld [vmem:[#allocation15 + $0xe0] sm:$0xff] }
 0x635   : > { %6784 = vst [vmem:[#allocation15 + $0x48] sm:$0xff] %v6709_v46 }
 0x636   : > { %v7647_v33 = vpop.f32.mrb[204].mxu0  ;;  %6785 = vst [vmem:[#allocation15 + $0x50] sm:$0xff] %v6710_v5 }
 0x637   : > { %v7648_v60 = vpop.f32.mrb[205].mxu0 }
 0x638   : > { %v7649_v63 = vadd.f32 %v7648_v60, %v7647_v33  ;;  %v7650_v35 = vpop.f32.mrb[206].mxu0  ;;  %v6185_v57 = vpop.f32.mrb[60].mxu1 }
 0x639   : > { %v7651_v24 = vpop.f32.mrb[207].mxu0  ;;  %v6712_v47 = vadd.f32 %v6185_v57, %v4708_v12  ;;  %v6187_v36 = vpop.f32.mrb[61].mxu1  ;;  %v4726_v35 = vld [vmem:[#allocation15 + $0xf0] sm:$0xff]  ;;  %v4729_v57 = vld [vmem:[#allocation15 + $0x108] sm:$0xff] }
 0x63a   : > { %v12809_v31 = vadd.f32 %v7649_v63, %v12709_v25  ;;  %v6713_v22 = vadd.f32 %v6187_v36, %v4709_v59  ;;  %v6189_v16 = vpop.f32.mrb[62].mxu1  ;;  %v4718_v25 = vld [vmem:[#allocation15 + $0xb0] sm:$0xff]  ;;  %v4727_v59 = vld [vmem:[#allocation15 + $0xf8] sm:$0xff] }
 0x63b   : > { %6787 = vst [vmem:[#allocation15 + $0x60] sm:$0xff] %v6712_v47  ;;  %v6715_v48 = vadd.f32 %v6189_v16, %v4711_v6  ;;  %v6191_v53 = vpop.f32.mrb[63].mxu1  ;;  %v4730_v36 = vld [vmem:[#allocation15 + $0x110] sm:$0xff] }
 0x63c   : > { %6788 = vst [vmem:[#allocation15 + $0x68] sm:$0xff] %v6713_v22  ;;  %v6716_v17 = vadd.f32 %v6191_v53, %v4712_v55 }
 0x63d   : > { %6790 = vst [vmem:[#allocation15 + $0x78] sm:$0xff] %v6715_v48 }
 0x63e   : > { %6791 = vst [vmem:[#allocation15 + $0x80] sm:$0xff] %v6716_v17  ;;  %v4732_v17 = vld [vmem:[#allocation15 + $0x120] sm:$0xff] }
 0x640   : > { %v6195_v61 = vpop.f32.mrb[64].mxu1 }
 0x641   : > { %v6718_v30 = vadd.f32 %v6195_v61, %v4714_v3  ;;  %v6197_v14 = vpop.f32.mrb[65].mxu1  ;;  %v4733_v3 = vld [vmem:[#allocation15 + $0x128] sm:$0xff]  ;;  %v4735_v61 = vld [vmem:[#allocation15 + $0x138] sm:$0xff] }
 0x642   : > { %v6719_v28 = vadd.f32 %v6197_v14, %v4715_v15  ;;  %v6199_v62 = vpop.f32.mrb[66].mxu1  ;;  %v4736_v14 = vld [vmem:[#allocation15 + $0x140] sm:$0xff] }
 0x643   : > { %6793 = vst [vmem:[#allocation15 + $0x90] sm:$0xff] %v6718_v30  ;;  %v6721_v18 = vadd.f32 %v6199_v62, %v4717_v49  ;;  %v6201_v29 = vpop.f32.mrb[67].mxu1 }
 0x644   : > { %6794 = vst [vmem:[#allocation15 + $0x98] sm:$0xff] %v6719_v28  ;;  %v6722_v38 = vadd.f32 %v6201_v29, %v4718_v25 }
 0x645   : > { %6796 = vst [vmem:[#allocation15 + $0xa8] sm:$0xff] %v6721_v18 }
 0x646   : > { %6797 = vst [vmem:[#allocation15 + $0xb0] sm:$0xff] %v6722_v38  ;;  %v4738_v38 = vld [vmem:[#allocation15 + $0x150] sm:$0xff] }
 0x648   : > { %v6205_v58 = vpop.f32.mrb[68].mxu1 }
 0x649   : > { %v6724_v44 = vadd.f32 %v6205_v58, %v4720_v39  ;;  %v6207_v46 = vpop.f32.mrb[69].mxu1  ;;  %v4739_v39 = vld [vmem:[#allocation15 + $0x158] sm:$0xff]  ;;  %v4741_v58 = vld [vmem:[#allocation15 + $0x168] sm:$0xff] }
 0x64a   : > { %v6725_v5 = vadd.f32 %v6207_v46, %v4721_v41  ;;  %v6209_v33 = vpop.f32.mrb[70].mxu1  ;;  %v4742_v46 = vld [vmem:[#allocation15 + $0x170] sm:$0xff] }
 0x64b   : > { %6799 = vst [vmem:[#allocation15 + $0xc0] sm:$0xff] %v6724_v44  ;;  %v6727_v60 = vadd.f32 %v6209_v33, %v4723_v1  ;;  %v6211_v12 = vpop.f32.mrb[71].mxu1 }
 0x64c   : > { %6800 = vst [vmem:[#allocation15 + $0xc8] sm:$0xff] %v6725_v5  ;;  %v6728_v63 = vadd.f32 %v6211_v12, %v4724_v7 }
 0x64d   : > { %6802 = vst [vmem:[#allocation15 + $0xd8] sm:$0xff] %v6727_v60 }
 0x64e   : > { %6803 = vst [vmem:[#allocation15 + $0xe0] sm:$0xff] %v6728_v63  ;;  %v4744_v63 = vld [vmem:[#allocation15 + $0x180] sm:$0xff] }
 0x650   : > { %v6215_v24 = vpop.f32.mrb[72].mxu1 }
 0x651   : > { %v6730_v6 = vadd.f32 %v6215_v24, %v4726_v35  ;;  %v6217_v47 = vpop.f32.mrb[73].mxu1  ;;  %v4745_v35 = vld [vmem:[#allocation15 + $0x188] sm:$0xff]  ;;  %v4747_v24 = vld [vmem:[#allocation15 + $0x198] sm:$0xff] }
 0x652   : > { %v6731_v55 = vadd.f32 %v6217_v47, %v4727_v59  ;;  %v6219_v22 = vpop.f32.mrb[74].mxu1  ;;  %v4748_v47 = vld [vmem:[#allocation15 + $0x1a0] sm:$0xff] }
 0x653   : > { %6805 = vst [vmem:[#allocation15 + $0xf0] sm:$0xff] %v6730_v6  ;;  %v6733_v16 = vadd.f32 %v6219_v22, %v4729_v57  ;;  %v6221_v48 = vpop.f32.mrb[75].mxu1 }
 0x654   : > { %6806 = vst [vmem:[#allocation15 + $0xf8] sm:$0xff] %v6731_v55  ;;  %v6734_v53 = vadd.f32 %v6221_v48, %v4730_v36 }
 0x655   : > { %6808 = vst [vmem:[#allocation15 + $0x108] sm:$0xff] %v6733_v16 }
 0x656   : > { %6809 = vst [vmem:[#allocation15 + $0x110] sm:$0xff] %v6734_v53  ;;  %v4750_v53 = vld [vmem:[#allocation15 + $0x1b0] sm:$0xff] }
 0x658   : > { %v6225_v15 = vpop.f32.mrb[76].mxu1 }
 0x659   : > { %v6736_v49 = vadd.f32 %v6225_v15, %v4732_v17  ;;  %v6227_v30 = vpop.f32.mrb[77].mxu1  ;;  %v4751_v17 = vld [vmem:[#allocation15 + $0x1b8] sm:$0xff]  ;;  %v4753_v15 = vld [vmem:[#allocation15 + $0x1c8] sm:$0xff] }
 0x65a   : > { %v6737_v25 = vadd.f32 %v6227_v30, %v4733_v3  ;;  %v6229_v28 = vpop.f32.mrb[78].mxu1  ;;  %v4754_v30 = vld [vmem:[#allocation15 + $0x1d0] sm:$0xff] }
 0x65b   : > { %6811 = vst [vmem:[#allocation15 + $0x120] sm:$0xff] %v6736_v49  ;;  %v6739_v62 = vadd.f32 %v6229_v28, %v4735_v61  ;;  %v6231_v18 = vpop.f32.mrb[79].mxu1 }
 0x65c   : > { %6812 = vst [vmem:[#allocation15 + $0x128] sm:$0xff] %v6737_v25  ;;  %v6740_v29 = vadd.f32 %v6231_v18, %v4736_v14 }
 0x65d   : > { %6814 = vst [vmem:[#allocation15 + $0x138] sm:$0xff] %v6739_v62 }
 0x65e   : > { %6815 = vst [vmem:[#allocation15 + $0x140] sm:$0xff] %v6740_v29  ;;  %v4756_v29 = vld [vmem:[#allocation15 + $0x1e0] sm:$0xff] }
 0x660   : > { %v6235_v41 = vpop.f32.mrb[80].mxu1 }
 0x661   : > { %v6742_v1 = vadd.f32 %v6235_v41, %v4738_v38  ;;  %v6237_v44 = vpop.f32.mrb[81].mxu1  ;;  %v4757_v38 = vld [vmem:[#allocation15 + $0x1e8] sm:$0xff]  ;;  %v4759_v41 = vld [vmem:[#allocation15 + $0x1f8] sm:$0xff] }
 0x662   : > { %v6743_v7 = vadd.f32 %v6237_v44, %v4739_v39  ;;  %v6239_v5 = vpop.f32.mrb[82].mxu1  ;;  %v4760_v44 = vld [vmem:[#allocation15 + $0x200] sm:$0xff] }
 0x663   : > { %6817 = vst [vmem:[#allocation15 + $0x150] sm:$0xff] %v6742_v1  ;;  %v6745_v33 = vadd.f32 %v6239_v5, %v4741_v58  ;;  %v6241_v60 = vpop.f32.mrb[83].mxu1 }
 0x664   : > { %6818 = vst [vmem:[#allocation15 + $0x158] sm:$0xff] %v6743_v7  ;;  %v6746_v12 = vadd.f32 %v6241_v60, %v4742_v46 }
 0x665   : > { %6820 = vst [vmem:[#allocation15 + $0x168] sm:$0xff] %v6745_v33 }
 0x666   : > { %6821 = vst [vmem:[#allocation15 + $0x170] sm:$0xff] %v6746_v12  ;;  %v4762_v12 = vld [vmem:[#allocation15 + $0x210] sm:$0xff] }
 0x668   : > { %v6245_v59 = vpop.f32.mrb[84].mxu1 }
 0x669   : > { %v6748_v57 = vadd.f32 %v6245_v59, %v4744_v63  ;;  %v6247_v6 = vpop.f32.mrb[85].mxu1  ;;  %v4763_v63 = vld [vmem:[#allocation15 + $0x218] sm:$0xff]  ;;  %v4765_v59 = vld [vmem:[#allocation15 + $0x228] sm:$0xff] }
 0x66a   : > { %v6749_v36 = vadd.f32 %v6247_v6, %v4745_v35  ;;  %v6249_v55 = vpop.f32.mrb[86].mxu1  ;;  %v4766_v6 = vld [vmem:[#allocation15 + $0x230] sm:$0xff] }
 0x66b   : > { %6823 = vst [vmem:[#allocation15 + $0x180] sm:$0xff] %v6748_v57  ;;  %v6751_v22 = vadd.f32 %v6249_v55, %v4747_v24  ;;  %v6251_v16 = vpop.f32.mrb[87].mxu1 }
 0x66c   : > { %6824 = vst [vmem:[#allocation15 + $0x188] sm:$0xff] %v6749_v36  ;;  %v6752_v48 = vadd.f32 %v6251_v16, %v4748_v47 }
 0x66d   : > { %6826 = vst [vmem:[#allocation15 + $0x198] sm:$0xff] %v6751_v22 }
 0x66e   : > { %6827 = vst [vmem:[#allocation15 + $0x1a0] sm:$0xff] %v6752_v48  ;;  %v4768_v48 = vld [vmem:[#allocation15 + $0x240] sm:$0xf] }
 0x670   : > { %v6255_v3 = vpop.f32.mrb[88].mxu1 }
 0x671   : > { %v6754_v61 = vadd.f32 %v6255_v3, %v4750_v53  ;;  %v6257_v49 = vpop.f32.mrb[89].mxu1  ;;  %v4769_v3 = vld [vmem:[#allocation15 + $0x248] sm:$0xf] }
 0x672   : > { %v6755_v14 = vadd.f32 %v6257_v49, %v4751_v17  ;;  %v6259_v25 = vpop.f32.mrb[90].mxu1 }
 0x673   : > { %6829 = vst [vmem:[#allocation15 + $0x1b0] sm:$0xff] %v6754_v61  ;;  %v6757_v28 = vadd.f32 %v6259_v25, %v4753_v15  ;;  %v6261_v62 = vpop.f32.mrb[91].mxu1 }
 0x674   : > { %6830 = vst [vmem:[#allocation15 + $0x1b8] sm:$0xff] %v6755_v14  ;;  %v6758_v18 = vadd.f32 %v6261_v62, %v4754_v30 }
 0x675   : > { %6832 = vst [vmem:[#allocation15 + $0x1c8] sm:$0xff] %v6757_v28 }
 0x676   : > { %6833 = vst [vmem:[#allocation15 + $0x1d0] sm:$0xff] %v6758_v18 }
 0x678   : > { %v6265_v39 = vpop.f32.mrb[92].mxu1 }
 0x679   : > { %v6760_v58 = vadd.f32 %v6265_v39, %v4756_v29  ;;  %v6267_v1 = vpop.f32.mrb[93].mxu1 }
 0x67a   : > { %v6761_v46 = vadd.f32 %v6267_v1, %v4757_v38  ;;  %v6269_v7 = vpop.f32.mrb[94].mxu1  ;;  %v4698_v38 = vld [vmem:[#allocation15 + $0x10] sm:$0xff] }
 0x67b   : > { %6835 = vst [vmem:[#allocation15 + $0x1e0] sm:$0xff] %v6760_v58  ;;  %v6763_v5 = vadd.f32 %v6269_v7, %v4759_v41  ;;  %v6271_v33 = vpop.f32.mrb[95].mxu1 }
 0x67c   : > { %6836 = vst [vmem:[#allocation15 + $0x1e8] sm:$0xff] %v6761_v46  ;;  %v6764_v60 = vadd.f32 %v6271_v33, %v4760_v44 }
 0x67d   : > { %6838 = vst [vmem:[#allocation15 + $0x1f8] sm:$0xff] %v6763_v5 }
 0x67e   : > { %6839 = vst [vmem:[#allocation15 + $0x200] sm:$0xff] %v6764_v60  ;;  %v4704_v60 = vld [vmem:[#allocation15 + $0x40] sm:$0xff] }
 0x680   : > { %v6275_v35 = vpop.f32.mrb[96].mxu1 }
 0x681   : > { %v6766_v24 = vadd.f32 %v6275_v35, %v4762_v12  ;;  %v6277_v57 = vpop.f32.mrb[97].mxu1 }
 0x682   : > { %v6767_v47 = vadd.f32 %v6277_v57, %v4763_v63  ;;  %v6279_v36 = vpop.f32.mrb[98].mxu1 }
 0x683   : > { %6841 = vst [vmem:[#allocation15 + $0x210] sm:$0xff] %v6766_v24  ;;  %v6769_v55 = vadd.f32 %v6279_v36, %v4765_v59  ;;  %v6281_v22 = vpop.f32.mrb[99].mxu1  ;;  %v4707_v59 = vld [vmem:[#allocation15 + $0x58] sm:$0xff] }
 0x684   : > { %6842 = vst [vmem:[#allocation15 + $0x218] sm:$0xff] %v6767_v47  ;;  %v6770_v16 = vadd.f32 %v6281_v22, %v4766_v6 }
 0x685   : > { %6844 = vst [vmem:[#allocation15 + $0x228] sm:$0xff] %v6769_v55  ;;  %v4710_v55 = vld [vmem:[#allocation15 + $0x70] sm:$0xff] }
 0x686   : > { %6845 = vst [vmem:[#allocation15 + $0x230] sm:$0xff] %v6770_v16 }
 0x688   : > { %v6285_v53 = vpop.f32.mrb[108].mxu1 }
 0x689   : > { %v6286_v17 = vadd.f32 %v6285_v53, %v12788_v40  ;;  %v6287_v15 = vpop.f32.mrb[109].mxu1  ;;  %v4701_v40 = vld [vmem:[#allocation15 + $0x28] sm:$0xff] }
 0x68a   : > { %v6288_v61 = vadd.f32 %v6287_v15, %v12791_v20  ;;  %v6289_v49 = vpop.f32.mrb[110].mxu1  ;;  %v4713_v53 = vld [vmem:[#allocation15 + $0x88] sm:$0xff] }
 0x68b   : > { %v6772_v30 = vadd.f32 %v6286_v17, %v4768_v48  ;;  %v6290_v14 = vpop.f32.mrb[111].mxu1 }
 0x68c   : > { %v6773_v25 = vadd.f32 %v6288_v61, %v4769_v3 }
 0x68d   : > { %6847 = vst [vmem:[#allocation15 + $0x240] sm:$0xf] %v6772_v30  ;;  %v4716_v30 = vld [vmem:[#allocation15 + $0xa0] sm:$0xff] }
 0x68e   : > { %6848 = vst [vmem:[#allocation15 + $0x248] sm:$0xf] %v6773_v25 }
 0x690   : > { %v7669_v28 = vpop.f32.mrb[112].mxu1 }
 0x691   : > { %v7670_v62 = vpop.f32.mrb[113].mxu1 }
 0x692   : > { %v7671_v18 = vadd.f32 %v7670_v62, %v7669_v28  ;;  %v7672_v29 = vpop.f32.mrb[114].mxu1  ;;  %v4719_v62 = vld [vmem:[#allocation15 + $0xb8] sm:$0xff] }
 0x693   : > { %v7673_v39 = vpop.f32.mrb[115].mxu1 }
 0x694   : > { %v6599_v41 = vadd.f32 %v7671_v18, %v12714_v27  ;;  %v7674_v58 = vadd.f32 %v7673_v39, %v7672_v29 }
 0x696   : > { %v6702_v1 = vadd.f32 %v6599_v41, %v4698_v38  ;;  %v6602_v44 = vadd.f32 %v7674_v58, %v12717_v26  ;;  %v4722_v58 = vld [vmem:[#allocation15 + $0xd0] sm:$0xff] }
 0x698   : > { %6777 = vst [vmem:[#allocation15 + $0x10] sm:$0xff] %v6702_v1  ;;  %v6705_v20 = vadd.f32 %v6602_v44, %v4701_v40  ;;  %v7675_v46 = vpop.f32.mrb[116].mxu1 }
 0x699   : > { %v7676_v7 = vpop.f32.mrb[117].mxu1 }
 0x69a   : > { %6780 = vst [vmem:[#allocation15 + $0x28] sm:$0xff] %v6705_v20  ;;  %v7677_v5 = vadd.f32 %v7676_v7, %v7675_v46  ;;  %v7678_v33 = vpop.f32.mrb[118].mxu1  ;;  %v4725_v20 = vld [vmem:[#allocation15 + $0xe8] sm:$0xff] }
 0x69b   : > { %v7679_v12 = vpop.f32.mrb[119].mxu1 }
 0x69c   : > { %v6607_v63 = vadd.f32 %v7677_v5, %v12722_v52  ;;  %v7680_v35 = vadd.f32 %v7679_v12, %v7678_v33  ;;  %v4728_v12 = vld [vmem:[#allocation15 + $0x100] sm:$0xff] }
 0x69e   : > { %v6708_v24 = vadd.f32 %v6607_v63, %v4704_v60  ;;  %v6610_v27 = vadd.f32 %v7680_v35, %v12725_v13 }
 0x6a0   : > { %6783 = vst [vmem:[#allocation15 + $0x40] sm:$0xff] %v6708_v24  ;;  %v6711_v57 = vadd.f32 %v6610_v27, %v4707_v59  ;;  %v7681_v6 = vpop.f32.mrb[120].mxu1  ;;  %v4731_v24 = vld [vmem:[#allocation15 + $0x118] sm:$0xff] }
 0x6a1   : > { %v7682_v26 = vpop.f32.mrb[121].mxu1 }
 0x6a2   : > { %6786 = vst [vmem:[#allocation15 + $0x58] sm:$0xff] %v6711_v57  ;;  %v7683_v47 = vadd.f32 %v7682_v26, %v7681_v6  ;;  %v7684_v36 = vpop.f32.mrb[122].mxu1 }
 0x6a3   : > { %v7685_v22 = vpop.f32.mrb[123].mxu1 }
 0x6a4   : > { %v6615_v16 = vadd.f32 %v7683_v47, %v12730_v9  ;;  %v7686_v48 = vadd.f32 %v7685_v22, %v7684_v36  ;;  %v4734_v36 = vld [vmem:[#allocation15 + $0x130] sm:$0xff] }
 0x6a6   : > { %v6714_v17 = vadd.f32 %v6615_v16, %v4710_v55  ;;  %v6618_v52 = vadd.f32 %v7686_v48, %v12733_v32  ;;  %v4737_v48 = vld [vmem:[#allocation15 + $0x148] sm:$0xff] }
 0x6a8   : > { %6789 = vst [vmem:[#allocation15 + $0x70] sm:$0xff] %v6714_v17  ;;  %v6717_v3 = vadd.f32 %v6618_v52, %v4713_v53  ;;  %v7687_v15 = vpop.f32.mrb[124].mxu1 }
 0x6a9   : > { %v7688_v13 = vpop.f32.mrb[125].mxu1 }
 0x6aa   : > { %6792 = vst [vmem:[#allocation15 + $0x88] sm:$0xff] %v6717_v3  ;;  %v7689_v61 = vadd.f32 %v7688_v13, %v7687_v15  ;;  %v7690_v49 = vpop.f32.mrb[126].mxu1  ;;  %v4740_v13 = vld [vmem:[#allocation15 + $0x160] sm:$0xff] }
 0x6ab   : > { %v7691_v14 = vpop.f32.mrb[127].mxu1 }
 0x6ac   : > { %v6623_v25 = vadd.f32 %v7689_v61, %v12738_v50  ;;  %v7692_v28 = vadd.f32 %v7691_v14, %v7690_v49  ;;  %v4743_v14 = vld [vmem:[#allocation15 + $0x178] sm:$0xff] }
 0x6ae   : > { %v6720_v18 = vadd.f32 %v6623_v25, %v4716_v30  ;;  %v6626_v9 = vadd.f32 %v7692_v28, %v12741_v34 }
 0x6b0   : > { %6795 = vst [vmem:[#allocation15 + $0xa0] sm:$0xff] %v6720_v18  ;;  %v6723_v29 = vadd.f32 %v6626_v9, %v4719_v62  ;;  %v7693_v38 = vpop.f32.mrb[128].mxu1 }
 0x6b1   : > { %v7694_v32 = vpop.f32.mrb[129].mxu1 }
 0x6b2   : > { %6798 = vst [vmem:[#allocation15 + $0xb8] sm:$0xff] %v6723_v29  ;;  %v7695_v39 = vadd.f32 %v7694_v32, %v7693_v38  ;;  %v7696_v41 = vpop.f32.mrb[130].mxu1  ;;  %v4746_v29 = vld [vmem:[#allocation15 + $0x190] sm:$0xff] }
 0x6b3   : > { %v7697_v40 = vpop.f32.mrb[131].mxu1 }
 0x6b4   : > { %v6631_v1 = vadd.f32 %v7695_v39, %v12746_v56  ;;  %v7698_v44 = vadd.f32 %v7697_v40, %v7696_v41  ;;  %v4749_v41 = vld [vmem:[#allocation15 + $0x1a8] sm:$0xff] }
 0x6b6   : > { %v6726_v46 = vadd.f32 %v6631_v1, %v4722_v58  ;;  %v6634_v50 = vadd.f32 %v7698_v44, %v12749_v0 }
 0x6b8   : > { %6801 = vst [vmem:[#allocation15 + $0xd0] sm:$0xff] %v6726_v46  ;;  %v6729_v7 = vadd.f32 %v6634_v50, %v4725_v20  ;;  %v7699_v5 = vpop.f32.mrb[132].mxu1  ;;  %v4752_v46 = vld [vmem:[#allocation15 + $0x1c0] sm:$0xff] }
 0x6b9   : > { %v7700_v34 = vpop.f32.mrb[133].mxu1 }
 0x6ba   : > { %6804 = vst [vmem:[#allocation15 + $0xe8] sm:$0xff] %v6729_v7  ;;  %v7701_v33 = vadd.f32 %v7700_v34, %v7699_v5  ;;  %v7702_v60 = vpop.f32.mrb[134].mxu1  ;;  %v4755_v34 = vld [vmem:[#allocation15 + $0x1d8] sm:$0xff] }
 0x6bb   : > { %v7703_v63 = vpop.f32.mrb[135].mxu1 }
 0x6bc   : > { %v6639_v35 = vadd.f32 %v7701_v33, %v12754_v4  ;;  %v7704_v59 = vadd.f32 %v7703_v63, %v7702_v60 }
 0x6be   : > { %v6732_v27 = vadd.f32 %v6639_v35, %v4728_v12  ;;  %v6642_v56 = vadd.f32 %v7704_v59, %v12757_v54  ;;  %v4758_v59 = vld [vmem:[#allocation15 + $0x1f0] sm:$0xff] }
 0x6c0   : > { %6807 = vst [vmem:[#allocation15 + $0x100] sm:$0xff] %v6732_v27  ;;  %v6735_v57 = vadd.f32 %v6642_v56, %v4731_v24  ;;  %v7705_v6 = vpop.f32.mrb[136].mxu1 }
 0x6c1   : > { %v7706_v0 = vpop.f32.mrb[137].mxu1 }
 0x6c2   : > { %6810 = vst [vmem:[#allocation15 + $0x118] sm:$0xff] %v6735_v57  ;;  %v7707_v26 = vadd.f32 %v7706_v0, %v7705_v6  ;;  %v7708_v47 = vpop.f32.mrb[138].mxu1  ;;  %v4761_v57 = vld [vmem:[#allocation15 + $0x208] sm:$0xff] }
 0x6c3   : > { %v7709_v55 = vpop.f32.mrb[139].mxu1 }
 0x6c4   : > { %v6647_v22 = vadd.f32 %v7707_v26, %v12762_v2  ;;  %v7710_v16 = vadd.f32 %v7709_v55, %v7708_v47  ;;  %v4764_v55 = vld [vmem:[#allocation15 + $0x220] sm:$0xff] }
 0x6c6   : > { %v6738_v53 = vadd.f32 %v6647_v22, %v4734_v36  ;;  %v6650_v4 = vadd.f32 %v7710_v16, %v12765_v42 }
 0x6c8   : > { %6813 = vst [vmem:[#allocation15 + $0x130] sm:$0xff] %v6738_v53  ;;  %v6741_v17 = vadd.f32 %v6650_v4, %v4737_v48  ;;  %v7711_v52 = vpop.f32.mrb[140].mxu1  ;;  %v4767_v53 = vld [vmem:[#allocation15 + $0x238] sm:$0xff] }
 0x6c9   : > { %v7712_v54 = vpop.f32.mrb[141].mxu1 }
 0x6ca   : > { %6816 = vst [vmem:[#allocation15 + $0x148] sm:$0xff] %v6741_v17  ;;  %v7713_v3 = vadd.f32 %v7712_v54, %v7711_v52  ;;  %v7714_v15 = vpop.f32.mrb[142].mxu1 }
 0x6cb   : > { %v7715_v61 = vpop.f32.mrb[143].mxu1 }
 0x6cc   : > { %v6655_v49 = vadd.f32 %v7713_v3, %v12770_v45  ;;  %v7716_v30 = vadd.f32 %v7715_v61, %v7714_v15  ;;  %v4770_v15 = vld [vmem:[#allocation15 + $0x250] sm:$0xf] }
 0x6ce   : > { %v6744_v25 = vadd.f32 %v6655_v49, %v4740_v13  ;;  %v6658_v2 = vadd.f32 %v7716_v30, %v12773_v51 }
 0x6d0   : > { %6819 = vst [vmem:[#allocation15 + $0x160] sm:$0xff] %v6744_v25  ;;  %v6747_v28 = vadd.f32 %v6658_v2, %v4743_v14  ;;  %v7717_v62 = vpop.f32.mrb[144].mxu1 }
 0x6d1   : > { %v7718_v42 = vpop.f32.mrb[145].mxu1 }
 0x6d2   : > { %6822 = vst [vmem:[#allocation15 + $0x178] sm:$0xff] %v6747_v28  ;;  %v7719_v18 = vadd.f32 %v7718_v42, %v7717_v62  ;;  %v7720_v9 = vpop.f32.mrb[146].mxu1 }
 0x6d3   : > { %v7721_v38 = vpop.f32.mrb[147].mxu1 }
 0x6d4   : > { %v6663_v32 = vadd.f32 %v7719_v18, %v12778_v37  ;;  %v7722_v39 = vadd.f32 %v7721_v38, %v7720_v9 }
 0x6d6   : > { %v6750_v58 = vadd.f32 %v6663_v32, %v4746_v29  ;;  %v6666_v45 = vadd.f32 %v7722_v39, %v12781_v10 }
 0x6d8   : > { %6825 = vst [vmem:[#allocation15 + $0x190] sm:$0xff] %v6750_v58  ;;  %v6753_v40 = vadd.f32 %v6666_v45, %v4749_v41  ;;  %v7723_v1 = vpop.f32.mrb[148].mxu1 }
 0x6d9   : > { %v7724_v51 = vpop.f32.mrb[149].mxu1 }
 0x6da   : > { %6828 = vst [vmem:[#allocation15 + $0x1a8] sm:$0xff] %v6753_v40  ;;  %v7725_v44 = vadd.f32 %v7724_v51, %v7723_v1  ;;  %v7726_v20 = vpop.f32.mrb[150].mxu1 }
 0x6db   : > { %v7727_v50 = vpop.f32.mrb[151].mxu1 }
 0x6dc   : > { %v6671_v7 = vadd.f32 %v7725_v44, %v12785_v8  ;;  %v7728_v5 = vadd.f32 %v7727_v50, %v7726_v20 }
 0x6de   : > { %v6756_v33 = vadd.f32 %v6671_v7, %v4752_v46  ;;  %v6674_v37 = vadd.f32 %v7728_v5, %v12794_v11 }
 0x6e0   : > { %6831 = vst [vmem:[#allocation15 + $0x1c0] sm:$0xff] %v6756_v33  ;;  %v6759_v60 = vadd.f32 %v6674_v37, %v4755_v34  ;;  %v7729_v12 = vpop.f32.mrb[152].mxu1 }
 0x6e1   : > { %v7730_v10 = vpop.f32.mrb[153].mxu1 }
 0x6e2   : > { %6834 = vst [vmem:[#allocation15 + $0x1d8] sm:$0xff] %v6759_v60  ;;  %v7731_v63 = vadd.f32 %v7730_v10, %v7729_v12  ;;  %v7732_v35 = vpop.f32.mrb[154].mxu1 }
 0x6e3   : > { %v7733_v24 = vpop.f32.mrb[155].mxu1 }
 0x6e4   : > { %v6679_v27 = vadd.f32 %v7731_v63, %v12797_v23  ;;  %v7734_v56 = vadd.f32 %v7733_v24, %v7732_v35 }
 0x6e6   : > { %v6762_v6 = vadd.f32 %v6679_v27, %v4758_v59  ;;  %v6682_v8 = vadd.f32 %v7734_v56, %v12800_v43 }
 0x6e8   : > { %6837 = vst [vmem:[#allocation15 + $0x1f0] sm:$0xff] %v6762_v6  ;;  %v6765_v0 = vadd.f32 %v6682_v8, %v4761_v57  ;;  %v7735_v26 = vpop.f32.mrb[156].mxu1 }
 0x6e9   : > { %v7736_v11 = vpop.f32.mrb[157].mxu1 }
 0x6ea   : > { %6840 = vst [vmem:[#allocation15 + $0x208] sm:$0xff] %v6765_v0  ;;  %v7737_v47 = vadd.f32 %v7736_v11, %v7735_v26  ;;  %v7738_v36 = vpop.f32.mrb[158].mxu1 }
 0x6eb   : > { %v7739_v22 = vpop.f32.mrb[159].mxu1 }
 0x6ec   : > { %v6687_v16 = vadd.f32 %v7737_v47, %v12803_v19  ;;  %v7740_v48 = vadd.f32 %v7739_v22, %v7738_v36 }
 0x6ee   : > { %v6768_v23 = vadd.f32 %v6687_v16, %v4764_v55  ;;  %v6690_v4 = vadd.f32 %v7740_v48, %v12806_v21 }
 0x6f0   : > { %6843 = vst [vmem:[#allocation15 + $0x220] sm:$0xff] %v6768_v23  ;;  %v6771_v17 = vadd.f32 %v6690_v4, %v4767_v53  ;;  %v7741_v43 = vpop.f32.mrb[160].mxu1 }
 0x6f1   : > { %v7742_v52 = vpop.f32.mrb[161].mxu1 }
 0x6f2   : > { %6846 = vst [vmem:[#allocation15 + $0x238] sm:$0xff] %v6771_v17  ;;  %v7743_v54 = vadd.f32 %v7742_v52, %v7741_v43  ;;  %v7744_v3 = vpop.f32.mrb[162].mxu1 }
 0x6f3   : > { %v7745_v13 = vpop.f32.mrb[163].mxu1 }
 0x6f4   : > { %v6695_v19 = vadd.f32 %v7743_v54, %v12809_v31 }
 0x6f6   : > { %v6774_v61 = vadd.f32 %v6695_v19, %v4770_v15 }
 0x6f8   : > { %6849 = vst [vmem:[#allocation15 + $0x250] sm:$0xf] %v6774_v61 }
 0x6f9   : > { %9357 = shalt.err (!%p9354_p2)
}
 0x6fa   : > { %s13275_s15 = sld [smem:[#allocation130_spill]] }
 0x700   : > { %s9358_s26 = scalar_lea.hbm %s13275_s15, 9600 }
 0x701   : > { %p9359_p6 = scmp.ne.s32.totalorder %s13275_s15, %s9358_s26  ;;  %p9364_p3 = scmp.lt.u32.totalorder %s9358_s26, %s13275_s15 }
 0x703   : > { %p9360_p1 = pnand %p9359_p6, %p8224_p4 }
 0x705   : > { %p9361_p12 = pneg %p9360_p1 }
 0x707   : > { %p9366_p5 = pnand %p9364_p3, %p9361_p12 }
 0x709   : > { %9369 = shalt.err (!%p9366_p5)
}
 0x70a   : > { %s9456_s4 = smov 384   ;;  %s9457_s13 = smov 24  }
 0x70b   : > { %8183 = dma.vmem_to_hbm [thread:$0]  (%p8224_p4), %s6861_s19, 9600, %s13275_s15, [#allocation5], %s9456_s4, %s9456_s4, %s9457_s13  }
 0x70c   : > { %9415 = dma.done.wait (%p8224_p4), [#allocation5], 9600  }
 0x70d   : > { %9417 = vsyncadd (%p8224_p4), [#allocation5], 4294957696 }
 0x70e PF: > { %s13276_s21 = sld [smem:[#allocation24_spill]]  ;;  %s13277_s27 = sld [smem:[#allocation22_spill]] }
 0x70f   : > { %s13278_s14 = sld [smem:[#allocation27_spill]]  ;;  %s13279_s23 = sld [smem:[#allocation26_spill]] }
 0x710   : > { %s13280_s28 = smov %s9428_s29  ;;  %s13282_s30 = smov %s9436_s9 }
 0x714   : > { %s22_s10 = sadd.s32 1, %s13276_s21  }
 0x715   : > { %p19_p0 = scmp.ge.s32.totalorder %s22_s10, 4   ;;  %s13281_s29 = smov %s13278_s14 }
 0x716   : > { %s13283_s9 = smov %s13279_s23 }
 0x717   :  { %21 = sbr.rel (!%p19_p0) target bundleno = 11 (0xb), region = 137 }
 0x71e   :  { %6876 = vsyncpa [#allocation4], 1 }
 0x71f   :  { %6878 = vsyncpa [#allocation4 + $0x1], 1 }
 0x720   :  { %6879 = vsyncpa [#allocation7], 1 }
 0x721   :  { %6880 = vsyncpa [#allocation10], 1 }
 0x722   :  { %6881 = vsyncpa [#allocation5], 1 }
 0x723   :  { %6883 = vsyncpa [#allocation5 + $0x1], 1 }

</bundles_post_ra>
